<compile_context>
chip_gen: v6e
topology: v6e:2x2x1
jax: 0.10.0
libtpu: 0.0.40
codegen_flags: <defaults>
</compile_context>

<pallas_src>
import numpy as np
import jax
import jax.numpy as jnp
from jax.experimental import pallas as pl
from jax.experimental.pallas import tpu as pltpu

ALPHA = 1e-5
LOG_2PI = float(np.log(2.0 * np.pi))
LOG_256 = float(np.log(256.0))

# Batch rows per kernel tile.  128 fills the MXU rows on v5e (4x128^2); bump to
# 256 on v6e/v7x when the production batch is large enough.
TB = 128


def get_mask(side=28):
    m = np.zeros((side, side), dtype=np.float32)
    for i in range(side):
        for j in range(side):
            if (i + j) % 2 == 0:
                m[i, j] = 1.0
    return m.reshape(1, side * side)


def flow_kernel(x_ref, w1_ref, b1_ref, w2_ref, b2_ref,
                ws_ref, bs_ref, wt_ref, bt_ref,
                out_ref, z_s, ldj_s):
    """Grid = (batch_tiles, layers).  One step == one Coupling layer applied to
    one batch tile; z / ldj are carried in VMEM scratch across the layer axis.

    Feature layout: the 784 pixels are pre-permuted (in the wrapper) into two
    checkerboard groups of 392 lanes each (group 0 = mask==1, group 1 = mask==0),
    so each layer only touches the weight rows / columns it actually uses."""
    l = pl.program_id(1)
    n_layers = pl.num_programs(1)
    half = x_ref.shape[2]                       # 392
    d_total = x_ref.shape[0] * half             # 784 (full feature count)

    # ---- logit_normalize (first layer step of every batch tile) ----
    @pl.when(l == 0)
    def _init():
        z0 = x_ref[...] / 256.0                 # (2, TB, half)
        z0 = z0 * (1.0 - ALPHA) + ALPHA * 0.5
        per_lane = -jnp.log(z0) - jnp.log(1.0 - z0)
        ldj_s[...] = (-LOG_256 * d_total
                      + jnp.sum(per_lane[0] + per_lane[1], axis=1, keepdims=True))
        z_s[...] = jnp.log(z0) - jnp.log(1.0 - z0)

    # ---- Coupling layer l (weights already reduced to active rows/cols) ----
    def couple(z_in_ref, z_out_ref):
        x_bf = z_in_ref[...].astype(jnp.bfloat16)                       # (TB, half)
        h1 = jnp.maximum(
            jnp.dot(x_bf, w1_ref[0], preferred_element_type=jnp.float32)
            + b1_ref[0], 0.0)
        h2 = jnp.maximum(
            jnp.dot(h1.astype(jnp.bfloat16), w2_ref[0],
                    preferred_element_type=jnp.float32) + b2_ref[0], 0.0)
        h2b = h2.astype(jnp.bfloat16)
        scale = jnp.dot(h2b, ws_ref[0], preferred_element_type=jnp.float32) + bs_ref[0]
        trans = jnp.dot(h2b, wt_ref[0], preferred_element_type=jnp.float32) + bt_ref[0]
        log_scale = jnp.tanh(scale)                                     # (TB, half)
        z_out_ref[...] = z_out_ref[...] * jnp.exp(log_scale) + trans
        ldj_s[...] = ldj_s[...] + jnp.sum(log_scale, axis=1, keepdims=True)

    @pl.when(l % 2 == 0)
    def _even_layer():                 # mask==1 group is the NN input
        couple(z_s.at[0], z_s.at[1])

    @pl.when(l % 2 == 1)
    def _odd_layer():                  # mask==0 group is the NN input
        couple(z_s.at[1], z_s.at[0])

    # ---- standard-Gaussian log-prior + final output (last layer step) ----
    @pl.when(l == n_layers - 1)
    def _final():
        zsq = (jnp.sum(z_s[0] * z_s[0], axis=1, keepdims=True)
               + jnp.sum(z_s[1] * z_s[1], axis=1, keepdims=True))
        out_ref[...] = -0.5 * (LOG_2PI * d_total + zsq) + ldj_s[...]


def flow_logpx(x_perm, w1r, b1, w2, b2, wsr, bsr, wtr, btr):
    """x_perm: (2, Bpad, half) f32, pixels permuted into checkerboard groups and
    batch padded to a multiple of TB.  w1r/w2/wsr/wtr are bf16 (checkerboard-
    reduced); biases are f32.  Returns log_px of shape (Bpad,)."""
    n_groups, bpad, half = x_perm.shape
    L, _, H = w1r.shape
    assert n_groups == 2 and bpad % TB == 0
    nb = bpad // TB

    grid_spec = pltpu.PrefetchScalarGridSpec(
        num_scalar_prefetch=0,
        grid=(nb, L),
        in_specs=[
            pl.BlockSpec((2, TB, half), lambda b, l: (0, b, 0)),   # permuted input tile
            pl.BlockSpec((1, half, H),  lambda b, l: (l, 0, 0)),   # W1 (active rows)
            pl.BlockSpec((1, 1, H),     lambda b, l: (l, 0, 0)),   # b1
            pl.BlockSpec((1, H, H),     lambda b, l: (l, 0, 0)),   # W2
            pl.BlockSpec((1, 1, H),     lambda b, l: (l, 0, 0)),   # b2
            pl.BlockSpec((1, H, half),  lambda b, l: (l, 0, 0)),   # W_scale (active cols)
            pl.BlockSpec((1, 1, half),  lambda b, l: (l, 0, 0)),   # b_scale
            pl.BlockSpec((1, H, half),  lambda b, l: (l, 0, 0)),   # W_translation (active cols)
            pl.BlockSpec((1, 1, half),  lambda b, l: (l, 0, 0)),   # b_translation
        ],
        out_specs=pl.BlockSpec((TB, 1), lambda b, l: (b, 0)),
        scratch_shapes=[pltpu.VMEM((2, TB, half), jnp.float32),    # carried z (two groups)
                        pltpu.VMEM((TB, 1), jnp.float32)],         # carried ldj
    )

    # Explicit VMEM budget: double-buffered bf16 weights + f32 activation tiles,
    # plus margin.  Clamped to 48 MiB so it fits v7x's 64 MiB physical VMEM and
    # still lifts v5e's 16 MiB default scoped limit at n_hidden=1024.
    per_layer_w = 2 * (half * H + H * H + 2 * H * half) + 4 * (2 * H + 2 * half)
    act_bytes = 4 * (2 * 2 * TB * half + 2 * TB * half + 2 * TB)
    vmem_limit = int(min(max(2 * per_layer_w + act_bytes + (8 << 20), 32 << 20),
                         48 << 20))

    out = pl.pallas_call(
        flow_kernel,
        out_shape=jax.ShapeDtypeStruct((bpad, 1), jnp.float32),
        grid_spec=grid_spec,
        compiler_params=pltpu.CompilerParams(
            dimension_semantics=("parallel", "arbitrary"),  # batch-parallel (2 TCs on v7x)
            vmem_limit_bytes=vmem_limit),
    )(x_perm, w1r, b1, w2, b2, wsr, bsr, wtr, btr)
    return out[:, 0]


def reference_logpx(x_deq, masks, w1, b1, w2, b2, ws, bs, wt, bt):
    """Pure-JAX reference of Model.forward (after dequantization), full weights."""
    B, D = x_deq.shape
    L = masks.shape[0]
    hi = jax.lax.Precision.HIGHEST

    z = x_deq / 256.0
    ldj = jnp.full((B,), -LOG_256 * D, jnp.float32)
    z = z * (1.0 - ALPHA) + ALPHA * 0.5
    ldj = ldj + jnp.sum(-jnp.log(z) - jnp.log(1.0 - z), axis=1)
    z = jnp.log(z) - jnp.log(1.0 - z)

    for l in range(L):
        m = masks[l, 0]
        h = jnp.maximum(jnp.dot(m * z, w1[l], precision=hi) + b1[l, 0], 0.0)
        h = jnp.maximum(jnp.dot(h, w2[l], precision=hi) + b2[l, 0], 0.0)
        log_scale = jnp.tanh(jnp.dot(h, ws[l], precision=hi) + bs[l, 0])
        trans = jnp.dot(h, wt[l], precision=hi) + bt[l, 0]
        z = m * z + (1.0 - m) * (z * jnp.exp(log_scale) + trans)
        ldj = ldj + jnp.sum((1.0 - m) * log_scale, axis=1)

    log_pz = jnp.sum(-0.5 * (LOG_2PI + z * z), axis=1)
    return log_pz + ldj


if __name__ == "__main__":
    B = 8                  # batch (padded to TB=128 rows inside the wrapper)
    D = 28 * 28            # 784, fixed by the checkerboard mask in get_mask()
    H = 256                # hidden size (module default is 1024; reduced for a small test)
    n_flows = 4            # as in Flow.__init__
    L = 2 * n_flows        # total Coupling layers

    key = jax.random.PRNGKey(0)
    k_x, k_noise, k_p = jax.random.split(key, 3)

    # integer-valued "pixels" in [0, 255]
    x = jnp.floor(jax.random.uniform(k_x, (B, D), minval=0.0, maxval=256.0))
    # dequantize: z + rand_like(z)  (stateful torch RNG -> jax.random in wrapper glue)
    noise = jax.random.uniform(k_noise, (B, D), dtype=jnp.float32)
    x_deq = (x + noise).astype(jnp.float32)

    # checkerboard masks, alternating mask / 1 - mask per Coupling (reference only)
    base = get_mask()                                            # (1, 784)
    masks = np.stack([base if l % 2 == 0 else 1.0 - base
                      for l in range(L)]).astype(np.float32)     # (L, 1, D)
    masks = jnp.asarray(masks)

    # deterministic small random params (module zero-inits last Linear; see NOTE above)
    ks = jax.random.split(k_p, 8)
    def init(k, shape, scale):
        return (scale * jax.random.normal(k, shape)).astype(jnp.float32)
    w1 = init(ks[0], (L, D, H), 1.0 / np.sqrt(D))
    b1 = init(ks[1], (L, 1, H), 0.01)
    w2 = init(ks[2], (L, H, H), 1.0 / np.sqrt(H))
    b2 = init(ks[3], (L, 1, H), 0.01)
    ws = init(ks[4], (L, H, D), 0.01 / np.sqrt(H))
    bs = init(ks[5], (L, 1, D), 0.001)
    wt = init(ks[6], (L, H, D), 0.01 / np.sqrt(H))
    bt = init(ks[7], (L, 1, D), 0.001)

    # Weights are streamed as bf16 (the kernel is weight-bandwidth bound); the
    # reference uses the same rounded values so the check isolates kernel error.
    w1 = w1.astype(jnp.bfloat16).astype(jnp.float32)
    w2 = w2.astype(jnp.bfloat16).astype(jnp.float32)
    ws = ws.astype(jnp.bfloat16).astype(jnp.float32)
    wt = wt.astype(jnp.bfloat16).astype(jnp.float32)

    # ---- pack params for the kernel: checkerboard-reduced, permuted, bf16 ----
    idx0 = np.nonzero(base[0] == 1.0)[0]      # mask==1 lanes -> group 0 (392)
    idx1 = np.nonzero(base[0] == 0.0)[0]      # mask==0 lanes -> group 1 (392)
    half = int(idx0.shape[0])

    in_idx = [idx0 if l % 2 == 0 else idx1 for l in range(L)]    # NN input lanes
    out_idx = [idx1 if l % 2 == 0 else idx0 for l in range(L)]   # updated lanes

    w1r = jnp.stack([w1[l][in_idx[l], :] for l in range(L)]).astype(jnp.bfloat16)
    w2b = w2.astype(jnp.bfloat16)
    wsr = jnp.stack([ws[l][:, out_idx[l]] for l in range(L)]).astype(jnp.bfloat16)
    wtr = jnp.stack([wt[l][:, out_idx[l]] for l in range(L)]).astype(jnp.bfloat16)
    bsr = jnp.stack([bs[l][:, out_idx[l]] for l in range(L)])
    btr = jnp.stack([bt[l][:, out_idx[l]] for l in range(L)])

    # permute pixels into the two checkerboard groups; pad batch to TB tiles
    bpad = ((B + TB - 1) // TB) * TB
    x_perm = jnp.zeros((2, bpad, half), jnp.float32)
    x_perm = x_perm.at[0, :B].set(x_deq[:, idx0])
    x_perm = x_perm.at[1, :B].set(x_deq[:, idx1])

    log_px = jax.jit(flow_logpx)(x_perm, w1r, b1, w2b, b2, wsr, bsr, wtr, btr)
    log_px = jax.block_until_ready(log_px)[:B]

    ref = reference_logpx(x_deq, masks, w1, b1, w2, b2, ws, bs, wt, bt)
    ref = np.asarray(jax.block_until_ready(ref))
    got = np.asarray(log_px)
    rel_err = np.max(np.abs(got - ref) / (np.abs(ref) + 1e-6))
    assert got.shape == (B,), got.shape
    assert rel_err < 2e-2, f"mismatch vs reference, max rel err = {rel_err}"

    print("KERNEL_OK")
</pallas_src>

<mosaic_0001>
module attributes {stable_mosaic.version = 11 : i64} {
  func.func @flow_kernel(%arg0: i32, %arg1: i32, %arg2: memref<2x128x392xf32, #tpu.memory_space<vmem>>, %arg3: memref<1x392x256xbf16, #tpu.memory_space<vmem>>, %arg4: memref<1x1x256xf32, #tpu.memory_space<vmem>>, %arg5: memref<1x256x256xbf16, #tpu.memory_space<vmem>>, %arg6: memref<1x1x256xf32, #tpu.memory_space<vmem>>, %arg7: memref<1x256x392xbf16, #tpu.memory_space<vmem>>, %arg8: memref<1x1x392xf32, #tpu.memory_space<vmem>>, %arg9: memref<1x256x392xbf16, #tpu.memory_space<vmem>>, %arg10: memref<1x1x392xf32, #tpu.memory_space<vmem>>, %arg11: memref<128x1xf32, #tpu.memory_space<vmem>>, %arg12: memref<2x128x392xf32, #tpu.memory_space<vmem>>, %arg13: memref<128x1xf32, #tpu.memory_space<vmem>>) attributes {dimension_semantics = [#tpu.dimension_semantics<parallel>, #tpu.dimension_semantics<arbitrary>], iteration_bounds = array<i64: 1, 8>, scalar_prefetch = 0 : i64, scratch_operands = 2 : i64, tpu.core_type = #tpu.core_type<tc>, window_params = [{transform_indices = @transform_0, window_bounds = array<i64: 2, 128, 392>}, {transform_indices = @transform_1, window_bounds = array<i64: 1, 392, 256>}, {transform_indices = @transform_2, window_bounds = array<i64: 1, 1, 256>}, {transform_indices = @transform_3, window_bounds = array<i64: 1, 256, 256>}, {transform_indices = @transform_4, window_bounds = array<i64: 1, 1, 256>}, {transform_indices = @transform_5, window_bounds = array<i64: 1, 256, 392>}, {transform_indices = @transform_6, window_bounds = array<i64: 1, 1, 392>}, {transform_indices = @transform_7, window_bounds = array<i64: 1, 256, 392>}, {transform_indices = @transform_8, window_bounds = array<i64: 1, 1, 392>}, {transform_indices = @transform_9, window_bounds = array<i64: 128, 1>}]} {
    %c0_i32 = arith.constant 0 : i32
    %0 = arith.cmpi eq, %arg1, %c0_i32 : i32
    %1 = arith.extui %0 : i1 to i32
    %c0_i32_0 = arith.constant 0 : i32
    %2 = arith.cmpi ne, %1, %c0_i32_0 : i32
    scf.if %2 {
      %c0 = arith.constant 0 : index
      %c0_16 = arith.constant 0 : index
      %c0_17 = arith.constant 0 : index
      %32 = vector.load %arg2[%c0, %c0_16, %c0_17] : memref<2x128x392xf32, #tpu.memory_space<vmem>>, vector<2x128x392xf32>
      %cst = arith.constant 2.560000e+02 : f32
      %33 = vector.broadcast %cst : f32 to vector<2x128x392xf32>
      %34 = arith.divf %32, %33 : vector<2x128x392xf32>
      %cst_18 = arith.constant 0.999989986 : f32
      %35 = vector.broadcast %cst_18 : f32 to vector<2x128x392xf32>
      %36 = arith.mulf %34, %35 : vector<2x128x392xf32>
      %cst_19 = arith.constant 5.000000e-06 : f32
      %37 = vector.broadcast %cst_19 : f32 to vector<2x128x392xf32>
      %38 = arith.addf %36, %37 : vector<2x128x392xf32>
      %39 = math.log %38 : vector<2x128x392xf32>
      %cst_20 = arith.constant 0.000000e+00 : f32
      %40 = vector.broadcast %cst_20 : f32 to vector<2x128x392xf32>
      %41 = arith.subf %40, %39 : vector<2x128x392xf32>
      %cst_21 = arith.constant 1.000000e+00 : f32
      %42 = vector.broadcast %cst_21 : f32 to vector<2x128x392xf32>
      %43 = arith.subf %42, %38 : vector<2x128x392xf32>
      %44 = math.log %43 : vector<2x128x392xf32>
      %45 = arith.subf %41, %44 : vector<2x128x392xf32>
      %46 = vector.extract_strided_slice %45 {offsets = [0, 0, 0], sizes = [1, 128, 392], strides = [1, 1, 1]} : vector<2x128x392xf32> to vector<1x128x392xf32>
      %47 = vector.shape_cast %46 : vector<1x128x392xf32> to vector<128x392xf32>
      %48 = vector.extract_strided_slice %45 {offsets = [1, 0, 0], sizes = [1, 128, 392], strides = [1, 1, 1]} : vector<2x128x392xf32> to vector<1x128x392xf32>
      %49 = vector.shape_cast %48 : vector<1x128x392xf32> to vector<128x392xf32>
      %50 = arith.addf %47, %49 : vector<128x392xf32>
      %cst_22 = arith.constant dense<0.000000e+00> : vector<128xf32>
      %51 = vector.multi_reduction <add>, %50, %cst_22 [1] : vector<128x392xf32> to vector<128xf32>
      %52 = vector.shape_cast %51 : vector<128xf32> to vector<128x1xf32>
      %cst_23 = arith.constant -4347.41895 : f32
      %53 = vector.broadcast %cst_23 : f32 to vector<128x1xf32>
      %54 = arith.addf %53, %52 : vector<128x1xf32>
      %c0_24 = arith.constant 0 : index
      %c0_25 = arith.constant 0 : index
      %55 = vector.load %arg13[%c0_24, %c0_25] : memref<128x1xf32, #tpu.memory_space<vmem>>, vector<128x1xf32>
      tpu.vector_store %arg13[%c0_24, %c0_25], %54 {strides = array<i32>} : memref<128x1xf32, #tpu.memory_space<vmem>>, vector<128x1xf32>,
      %56 = math.log %38 : vector<2x128x392xf32>
      %cst_26 = arith.constant 1.000000e+00 : f32
      %57 = vector.broadcast %cst_26 : f32 to vector<2x128x392xf32>
      %58 = arith.subf %57, %38 : vector<2x128x392xf32>
      %59 = math.log %58 : vector<2x128x392xf32>
      %60 = arith.subf %56, %59 : vector<2x128x392xf32>
      %c0_27 = arith.constant 0 : index
      %c0_28 = arith.constant 0 : index
      %c0_29 = arith.constant 0 : index
      %61 = vector.load %arg12[%c0_27, %c0_28, %c0_29] : memref<2x128x392xf32, #tpu.memory_space<vmem>>, vector<2x128x392xf32>
      tpu.vector_store %arg12[%c0_27, %c0_28, %c0_29], %60 {strides = array<i32>} : memref<2x128x392xf32, #tpu.memory_space<vmem>>, vector<2x128x392xf32>,
    } else {
    }
    %c2_i32 = arith.constant 2 : i32
    %c0_i32_1 = arith.constant 0 : i32
    %3 = arith.cmpi eq, %c2_i32, %c0_i32_1 : i32
    %c1_i32 = arith.constant 1 : i32
    %4 = arith.select %3, %c1_i32, %c2_i32 : i32
    %5 = arith.remsi %arg1, %4 : i32
    %c0_i32_2 = arith.constant 0 : i32
    %6 = arith.cmpi ne, %5, %c0_i32_2 : i32
    %c0_i32_3 = arith.constant 0 : i32
    %7 = arith.cmpi slt, %5, %c0_i32_3 : i32
    %c0_i32_4 = arith.constant 0 : i32
    %8 = arith.cmpi slt, %4, %c0_i32_4 : i32
    %9 = arith.xori %7, %8 : i1
    %10 = arith.andi %9, %6 : i1
    %11 = arith.addi %5, %4 : i32
    %12 = arith.select %10, %11, %5 : i32
    %c0_i32_5 = arith.constant 0 : i32
    %13 = arith.cmpi eq, %12, %c0_i32_5 : i32
    %14 = arith.extui %13 : i1 to i32
    %c0_i32_6 = arith.constant 0 : i32
    %15 = arith.cmpi ne, %14, %c0_i32_6 : i32
    scf.if %15 {
      %c0 = arith.constant 0 : index
      %c0_16 = arith.constant 0 : index
      %c0_17 = arith.constant 0 : index
      %32 = vector.load %arg12[%c0, %c0_16, %c0_17] : memref<2x128x392xf32, #tpu.memory_space<vmem>>, vector<1x128x392xf32>
      %33 = vector.shape_cast %32 : vector<1x128x392xf32> to vector<128x392xf32>
      %34 = arith.truncf %33 : vector<128x392xf32> to vector<128x392xbf16>
      %c0_18 = arith.constant 0 : index
      %c0_19 = arith.constant 0 : index
      %c0_20 = arith.constant 0 : index
      %35 = vector.load %arg3[%c0_18, %c0_19, %c0_20] : memref<1x392x256xbf16, #tpu.memory_space<vmem>>, vector<1x392x256xbf16>
      %36 = vector.shape_cast %35 : vector<1x392x256xbf16> to vector<392x256xbf16>
      %cst = arith.constant dense<0.000000e+00> : vector<128x256xf32>
      %37 = tpu.matmul %34, %36, %cst {dimension_numbers = #tpu.dot_dimension_numbers<[1], [0], [0], [1], [0, 0, 1, 1], [], []>} : vector<128x392xbf16>, vector<392x256xbf16>, vector<128x256xf32> -> vector<128x256xf32>
      %c0_21 = arith.constant 0 : index
      %c0_22 = arith.constant 0 : index
      %c0_23 = arith.constant 0 : index
      %38 = vector.load %arg4[%c0_21, %c0_22, %c0_23] : memref<1x1x256xf32, #tpu.memory_space<vmem>>, vector<1x1x256xf32>
      %39 = vector.shape_cast %38 : vector<1x1x256xf32> to vector<1x256xf32>
      %40 = vector.broadcast %39 : vector<1x256xf32> to vector<128x256xf32>
      %41 = arith.addf %37, %40 : vector<128x256xf32>
      %cst_24 = arith.constant 0.000000e+00 : f32
      %42 = vector.broadcast %cst_24 : f32 to vector<128x256xf32>
      %43 = arith.maximumf %41, %42 : vector<128x256xf32>
      %44 = arith.truncf %43 : vector<128x256xf32> to vector<128x256xbf16>
      %c0_25 = arith.constant 0 : index
      %c0_26 = arith.constant 0 : index
      %c0_27 = arith.constant 0 : index
      %45 = vector.load %arg5[%c0_25, %c0_26, %c0_27] : memref<1x256x256xbf16, #tpu.memory_space<vmem>>, vector<1x256x256xbf16>
      %46 = vector.shape_cast %45 : vector<1x256x256xbf16> to vector<256x256xbf16>
      %cst_28 = arith.constant dense<0.000000e+00> : vector<128x256xf32>
      %47 = tpu.matmul %44, %46, %cst_28 {dimension_numbers = #tpu.dot_dimension_numbers<[1], [0], [0], [1], [0, 0, 1, 1], [], []>} : vector<128x256xbf16>, vector<256x256xbf16>, vector<128x256xf32> -> vector<128x256xf32>
      %c0_29 = arith.constant 0 : index
      %c0_30 = arith.constant 0 : index
      %c0_31 = arith.constant 0 : index
      %48 = vector.load %arg6[%c0_29, %c0_30, %c0_31] : memref<1x1x256xf32, #tpu.memory_space<vmem>>, vector<1x1x256xf32>
      %49 = vector.shape_cast %48 : vector<1x1x256xf32> to vector<1x256xf32>
      %50 = vector.broadcast %49 : vector<1x256xf32> to vector<128x256xf32>
      %51 = arith.addf %47, %50 : vector<128x256xf32>
      %cst_32 = arith.constant 0.000000e+00 : f32
      %52 = vector.broadcast %cst_32 : f32 to vector<128x256xf32>
      %53 = arith.maximumf %51, %52 : vector<128x256xf32>
      %54 = arith.truncf %53 : vector<128x256xf32> to vector<128x256xbf16>
      %c0_33 = arith.constant 0 : index
      %c0_34 = arith.constant 0 : index
      %c0_35 = arith.constant 0 : index
      %55 = vector.load %arg7[%c0_33, %c0_34, %c0_35] : memref<1x256x392xbf16, #tpu.memory_space<vmem>>, vector<1x256x392xbf16>
      %56 = vector.shape_cast %55 : vector<1x256x392xbf16> to vector<256x392xbf16>
      %cst_36 = arith.constant dense<0.000000e+00> : vector<128x392xf32>
      %57 = tpu.matmul %54, %56, %cst_36 {dimension_numbers = #tpu.dot_dimension_numbers<[1], [0], [0], [1], [0, 0, 1, 1], [], []>} : vector<128x256xbf16>, vector<256x392xbf16>, vector<128x392xf32> -> vector<128x392xf32>
      %c0_37 = arith.constant 0 : index
      %c0_38 = arith.constant 0 : index
      %c0_39 = arith.constant 0 : index
      %58 = vector.load %arg8[%c0_37, %c0_38, %c0_39] : memref<1x1x392xf32, #tpu.memory_space<vmem>>, vector<1x1x392xf32>
      %59 = vector.shape_cast %58 : vector<1x1x392xf32> to vector<1x392xf32>
      %60 = vector.broadcast %59 : vector<1x392xf32> to vector<128x392xf32>
      %61 = arith.addf %57, %60 : vector<128x392xf32>
      %c0_40 = arith.constant 0 : index
      %c0_41 = arith.constant 0 : index
      %c0_42 = arith.constant 0 : index
      %62 = vector.load %arg9[%c0_40, %c0_41, %c0_42] : memref<1x256x392xbf16, #tpu.memory_space<vmem>>, vector<1x256x392xbf16>
      %63 = vector.shape_cast %62 : vector<1x256x392xbf16> to vector<256x392xbf16>
      %cst_43 = arith.constant dense<0.000000e+00> : vector<128x392xf32>
      %64 = tpu.matmul %54, %63, %cst_43 {dimension_numbers = #tpu.dot_dimension_numbers<[1], [0], [0], [1], [0, 0, 1, 1], [], []>} : vector<128x256xbf16>, vector<256x392xbf16>, vector<128x392xf32> -> vector<128x392xf32>
      %c0_44 = arith.constant 0 : index
      %c0_45 = arith.constant 0 : index
      %c0_46 = arith.constant 0 : index
      %65 = vector.load %arg10[%c0_44, %c0_45, %c0_46] : memref<1x1x392xf32, #tpu.memory_space<vmem>>, vector<1x1x392xf32>
      %66 = vector.shape_cast %65 : vector<1x1x392xf32> to vector<1x392xf32>
      %67 = vector.broadcast %66 : vector<1x392xf32> to vector<128x392xf32>
      %68 = arith.addf %64, %67 : vector<128x392xf32>
      %69 = math.tanh %61 : vector<128x392xf32>
      %c1 = arith.constant 1 : index
      %c0_47 = arith.constant 0 : index
      %c0_48 = arith.constant 0 : index
      %70 = vector.load %arg12[%c1, %c0_47, %c0_48] : memref<2x128x392xf32, #tpu.memory_space<vmem>>, vector<1x128x392xf32>
      %71 = vector.shape_cast %70 : vector<1x128x392xf32> to vector<128x392xf32>
      %72 = math.exp %69 : vector<128x392xf32>
      %73 = arith.mulf %71, %72 : vector<128x392xf32>
      %74 = arith.addf %73, %68 : vector<128x392xf32>
      %c1_49 = arith.constant 1 : index
      %c0_50 = arith.constant 0 : index
      %c0_51 = arith.constant 0 : index
      %75 = vector.load %arg12[%c1_49, %c0_50, %c0_51] : memref<2x128x392xf32, #tpu.memory_space<vmem>>, vector<1x128x392xf32>
      %76 = vector.shape_cast %75 : vector<1x128x392xf32> to vector<128x392xf32>
      %77 = vector.shape_cast %74 : vector<128x392xf32> to vector<1x128x392xf32>
      tpu.vector_store %arg12[%c1_49, %c0_50, %c0_51], %77 {strides = array<i32>} : memref<2x128x392xf32, #tpu.memory_space<vmem>>, vector<1x128x392xf32>,
      %c0_52 = arith.constant 0 : index
      %c0_53 = arith.constant 0 : index
      %78 = vector.load %arg13[%c0_52, %c0_53] : memref<128x1xf32, #tpu.memory_space<vmem>>, vector<128x1xf32>
      %cst_54 = arith.constant dense<0.000000e+00> : vector<128xf32>
      %79 = vector.multi_reduction <add>, %69, %cst_54 [1] : vector<128x392xf32> to vector<128xf32>
      %80 = vector.shape_cast %79 : vector<128xf32> to vector<128x1xf32>
      %81 = arith.addf %78, %80 : vector<128x1xf32>
      %c0_55 = arith.constant 0 : index
      %c0_56 = arith.constant 0 : index
      %82 = vector.load %arg13[%c0_55, %c0_56] : memref<128x1xf32, #tpu.memory_space<vmem>>, vector<128x1xf32>
      tpu.vector_store %arg13[%c0_55, %c0_56], %81 {strides = array<i32>} : memref<128x1xf32, #tpu.memory_space<vmem>>, vector<128x1xf32>,
    } else {
    }
    %c2_i32_7 = arith.constant 2 : i32
    %c0_i32_8 = arith.constant 0 : i32
    %16 = arith.cmpi eq, %c2_i32_7, %c0_i32_8 : i32
    %c1_i32_9 = arith.constant 1 : i32
    %17 = arith.select %16, %c1_i32_9, %c2_i32_7 : i32
    %18 = arith.remsi %arg1, %17 : i32
    %c0_i32_10 = arith.constant 0 : i32
    %19 = arith.cmpi ne, %18, %c0_i32_10 : i32
    %c0_i32_11 = arith.constant 0 : i32
    %20 = arith.cmpi slt, %18, %c0_i32_11 : i32
    %c0_i32_12 = arith.constant 0 : i32
    %21 = arith.cmpi slt, %17, %c0_i32_12 : i32
    %22 = arith.xori %20, %21 : i1
    %23 = arith.andi %22, %19 : i1
    %24 = arith.addi %18, %17 : i32
    %25 = arith.select %23, %24, %18 : i32
    %c1_i32_13 = arith.constant 1 : i32
    %26 = arith.cmpi eq, %25, %c1_i32_13 : i32
    %27 = arith.extui %26 : i1 to i32
    %c0_i32_14 = arith.constant 0 : i32
    %28 = arith.cmpi ne, %27, %c0_i32_14 : i32
    scf.if %28 {
      %c1 = arith.constant 1 : index
      %c0 = arith.constant 0 : index
      %c0_16 = arith.constant 0 : index
      %32 = vector.load %arg12[%c1, %c0, %c0_16] : memref<2x128x392xf32, #tpu.memory_space<vmem>>, vector<1x128x392xf32>
      %33 = vector.shape_cast %32 : vector<1x128x392xf32> to vector<128x392xf32>
      %34 = arith.truncf %33 : vector<128x392xf32> to vector<128x392xbf16>
      %c0_17 = arith.constant 0 : index
      %c0_18 = arith.constant 0 : index
      %c0_19 = arith.constant 0 : index
      %35 = vector.load %arg3[%c0_17, %c0_18, %c0_19] : memref<1x392x256xbf16, #tpu.memory_space<vmem>>, vector<1x392x256xbf16>
      %36 = vector.shape_cast %35 : vector<1x392x256xbf16> to vector<392x256xbf16>
      %cst = arith.constant dense<0.000000e+00> : vector<128x256xf32>
      %37 = tpu.matmul %34, %36, %cst {dimension_numbers = #tpu.dot_dimension_numbers<[1], [0], [0], [1], [0, 0, 1, 1], [], []>} : vector<128x392xbf16>, vector<392x256xbf16>, vector<128x256xf32> -> vector<128x256xf32>
      %c0_20 = arith.constant 0 : index
      %c0_21 = arith.constant 0 : index
      %c0_22 = arith.constant 0 : index
      %38 = vector.load %arg4[%c0_20, %c0_21, %c0_22] : memref<1x1x256xf32, #tpu.memory_space<vmem>>, vector<1x1x256xf32>
      %39 = vector.shape_cast %38 : vector<1x1x256xf32> to vector<1x256xf32>
      %40 = vector.broadcast %39 : vector<1x256xf32> to vector<128x256xf32>
      %41 = arith.addf %37, %40 : vector<128x256xf32>
      %cst_23 = arith.constant 0.000000e+00 : f32
      %42 = vector.broadcast %cst_23 : f32 to vector<128x256xf32>
      %43 = arith.maximumf %41, %42 : vector<128x256xf32>
      %44 = arith.truncf %43 : vector<128x256xf32> to vector<128x256xbf16>
      %c0_24 = arith.constant 0 : index
      %c0_25 = arith.constant 0 : index
      %c0_26 = arith.constant 0 : index
      %45 = vector.load %arg5[%c0_24, %c0_25, %c0_26] : memref<1x256x256xbf16, #tpu.memory_space<vmem>>, vector<1x256x256xbf16>
      %46 = vector.shape_cast %45 : vector<1x256x256xbf16> to vector<256x256xbf16>
      %cst_27 = arith.constant dense<0.000000e+00> : vector<128x256xf32>
      %47 = tpu.matmul %44, %46, %cst_27 {dimension_numbers = #tpu.dot_dimension_numbers<[1], [0], [0], [1], [0, 0, 1, 1], [], []>} : vector<128x256xbf16>, vector<256x256xbf16>, vector<128x256xf32> -> vector<128x256xf32>
      %c0_28 = arith.constant 0 : index
      %c0_29 = arith.constant 0 : index
      %c0_30 = arith.constant 0 : index
      %48 = vector.load %arg6[%c0_28, %c0_29, %c0_30] : memref<1x1x256xf32, #tpu.memory_space<vmem>>, vector<1x1x256xf32>
      %49 = vector.shape_cast %48 : vector<1x1x256xf32> to vector<1x256xf32>
      %50 = vector.broadcast %49 : vector<1x256xf32> to vector<128x256xf32>
      %51 = arith.addf %47, %50 : vector<128x256xf32>
      %cst_31 = arith.constant 0.000000e+00 : f32
      %52 = vector.broadcast %cst_31 : f32 to vector<128x256xf32>
      %53 = arith.maximumf %51, %52 : vector<128x256xf32>
      %54 = arith.truncf %53 : vector<128x256xf32> to vector<128x256xbf16>
      %c0_32 = arith.constant 0 : index
      %c0_33 = arith.constant 0 : index
      %c0_34 = arith.constant 0 : index
      %55 = vector.load %arg7[%c0_32, %c0_33, %c0_34] : memref<1x256x392xbf16, #tpu.memory_space<vmem>>, vector<1x256x392xbf16>
      %56 = vector.shape_cast %55 : vector<1x256x392xbf16> to vector<256x392xbf16>
      %cst_35 = arith.constant dense<0.000000e+00> : vector<128x392xf32>
      %57 = tpu.matmul %54, %56, %cst_35 {dimension_numbers = #tpu.dot_dimension_numbers<[1], [0], [0], [1], [0, 0, 1, 1], [], []>} : vector<128x256xbf16>, vector<256x392xbf16>, vector<128x392xf32> -> vector<128x392xf32>
      %c0_36 = arith.constant 0 : index
      %c0_37 = arith.constant 0 : index
      %c0_38 = arith.constant 0 : index
      %58 = vector.load %arg8[%c0_36, %c0_37, %c0_38] : memref<1x1x392xf32, #tpu.memory_space<vmem>>, vector<1x1x392xf32>
      %59 = vector.shape_cast %58 : vector<1x1x392xf32> to vector<1x392xf32>
      %60 = vector.broadcast %59 : vector<1x392xf32> to vector<128x392xf32>
      %61 = arith.addf %57, %60 : vector<128x392xf32>
      %c0_39 = arith.constant 0 : index
      %c0_40 = arith.constant 0 : index
      %c0_41 = arith.constant 0 : index
      %62 = vector.load %arg9[%c0_39, %c0_40, %c0_41] : memref<1x256x392xbf16, #tpu.memory_space<vmem>>, vector<1x256x392xbf16>
      %63 = vector.shape_cast %62 : vector<1x256x392xbf16> to vector<256x392xbf16>
      %cst_42 = arith.constant dense<0.000000e+00> : vector<128x392xf32>
      %64 = tpu.matmul %54, %63, %cst_42 {dimension_numbers = #tpu.dot_dimension_numbers<[1], [0], [0], [1], [0, 0, 1, 1], [], []>} : vector<128x256xbf16>, vector<256x392xbf16>, vector<128x392xf32> -> vector<128x392xf32>
      %c0_43 = arith.constant 0 : index
      %c0_44 = arith.constant 0 : index
      %c0_45 = arith.constant 0 : index
      %65 = vector.load %arg10[%c0_43, %c0_44, %c0_45] : memref<1x1x392xf32, #tpu.memory_space<vmem>>, vector<1x1x392xf32>
      %66 = vector.shape_cast %65 : vector<1x1x392xf32> to vector<1x392xf32>
      %67 = vector.broadcast %66 : vector<1x392xf32> to vector<128x392xf32>
      %68 = arith.addf %64, %67 : vector<128x392xf32>
      %69 = math.tanh %61 : vector<128x392xf32>
      %c0_46 = arith.constant 0 : index
      %c0_47 = arith.constant 0 : index
      %c0_48 = arith.constant 0 : index
      %70 = vector.load %arg12[%c0_46, %c0_47, %c0_48] : memref<2x128x392xf32, #tpu.memory_space<vmem>>, vector<1x128x392xf32>
      %71 = vector.shape_cast %70 : vector<1x128x392xf32> to vector<128x392xf32>
      %72 = math.exp %69 : vector<128x392xf32>
      %73 = arith.mulf %71, %72 : vector<128x392xf32>
      %74 = arith.addf %73, %68 : vector<128x392xf32>
      %c0_49 = arith.constant 0 : index
      %c0_50 = arith.constant 0 : index
      %c0_51 = arith.constant 0 : index
      %75 = vector.load %arg12[%c0_49, %c0_50, %c0_51] : memref<2x128x392xf32, #tpu.memory_space<vmem>>, vector<1x128x392xf32>
      %76 = vector.shape_cast %75 : vector<1x128x392xf32> to vector<128x392xf32>
      %77 = vector.shape_cast %74 : vector<128x392xf32> to vector<1x128x392xf32>
      tpu.vector_store %arg12[%c0_49, %c0_50, %c0_51], %77 {strides = array<i32>} : memref<2x128x392xf32, #tpu.memory_space<vmem>>, vector<1x128x392xf32>,
      %c0_52 = arith.constant 0 : index
      %c0_53 = arith.constant 0 : index
      %78 = vector.load %arg13[%c0_52, %c0_53] : memref<128x1xf32, #tpu.memory_space<vmem>>, vector<128x1xf32>
      %cst_54 = arith.constant dense<0.000000e+00> : vector<128xf32>
      %79 = vector.multi_reduction <add>, %69, %cst_54 [1] : vector<128x392xf32> to vector<128xf32>
      %80 = vector.shape_cast %79 : vector<128xf32> to vector<128x1xf32>
      %81 = arith.addf %78, %80 : vector<128x1xf32>
      %c0_55 = arith.constant 0 : index
      %c0_56 = arith.constant 0 : index
      %82 = vector.load %arg13[%c0_55, %c0_56] : memref<128x1xf32, #tpu.memory_space<vmem>>, vector<128x1xf32>
      tpu.vector_store %arg13[%c0_55, %c0_56], %81 {strides = array<i32>} : memref<128x1xf32, #tpu.memory_space<vmem>>, vector<128x1xf32>,
    } else {
    }
    %c7_i32 = arith.constant 7 : i32
    %29 = arith.cmpi eq, %arg1, %c7_i32 : i32
    %30 = arith.extui %29 : i1 to i32
    %c0_i32_15 = arith.constant 0 : i32
    %31 = arith.cmpi ne, %30, %c0_i32_15 : i32
    scf.if %31 {
      %c0 = arith.constant 0 : index
      %c0_16 = arith.constant 0 : index
      %c0_17 = arith.constant 0 : index
      %32 = vector.load %arg12[%c0, %c0_16, %c0_17] : memref<2x128x392xf32, #tpu.memory_space<vmem>>, vector<1x128x392xf32>
      %33 = vector.shape_cast %32 : vector<1x128x392xf32> to vector<128x392xf32>
      %c0_18 = arith.constant 0 : index
      %c0_19 = arith.constant 0 : index
      %c0_20 = arith.constant 0 : index
      %34 = vector.load %arg12[%c0_18, %c0_19, %c0_20] : memref<2x128x392xf32, #tpu.memory_space<vmem>>, vector<1x128x392xf32>
      %35 = vector.shape_cast %34 : vector<1x128x392xf32> to vector<128x392xf32>
      %36 = arith.mulf %33, %35 : vector<128x392xf32>
      %cst = arith.constant dense<0.000000e+00> : vector<128xf32>
      %37 = vector.multi_reduction <add>, %36, %cst [1] : vector<128x392xf32> to vector<128xf32>
      %38 = vector.shape_cast %37 : vector<128xf32> to vector<128x1xf32>
      %c1 = arith.constant 1 : index
      %c0_21 = arith.constant 0 : index
      %c0_22 = arith.constant 0 : index
      %39 = vector.load %arg12[%c1, %c0_21, %c0_22] : memref<2x128x392xf32, #tpu.memory_space<vmem>>, vector<1x128x392xf32>
      %40 = vector.shape_cast %39 : vector<1x128x392xf32> to vector<128x392xf32>
      %c1_23 = arith.constant 1 : index
      %c0_24 = arith.constant 0 : index
      %c0_25 = arith.constant 0 : index
      %41 = vector.load %arg12[%c1_23, %c0_24, %c0_25] : memref<2x128x392xf32, #tpu.memory_space<vmem>>, vector<1x128x392xf32>
      %42 = vector.shape_cast %41 : vector<1x128x392xf32> to vector<128x392xf32>
      %43 = arith.mulf %40, %42 : vector<128x392xf32>
      %cst_26 = arith.constant dense<0.000000e+00> : vector<128xf32>
      %44 = vector.multi_reduction <add>, %43, %cst_26 [1] : vector<128x392xf32> to vector<128xf32>
      %45 = vector.shape_cast %44 : vector<128xf32> to vector<128x1xf32>
      %46 = arith.addf %38, %45 : vector<128x1xf32>
      %cst_27 = arith.constant 1440.89563 : f32
      %47 = vector.broadcast %cst_27 : f32 to vector<128x1xf32>
      %48 = arith.addf %47, %46 : vector<128x1xf32>
      %cst_28 = arith.constant -5.000000e-01 : f32
      %49 = vector.broadcast %cst_28 : f32 to vector<128x1xf32>
      %50 = arith.mulf %49, %48 : vector<128x1xf32>
      %c0_29 = arith.constant 0 : index
      %c0_30 = arith.constant 0 : index
      %51 = vector.load %arg13[%c0_29, %c0_30] : memref<128x1xf32, #tpu.memory_space<vmem>>, vector<128x1xf32>
      %52 = arith.addf %50, %51 : vector<128x1xf32>
      %c0_31 = arith.constant 0 : index
      %c0_32 = arith.constant 0 : index
      %53 = vector.load %arg11[%c0_31, %c0_32] : memref<128x1xf32, #tpu.memory_space<vmem>>, vector<128x1xf32>
      tpu.vector_store %arg11[%c0_31, %c0_32], %52 {strides = array<i32>} : memref<128x1xf32, #tpu.memory_space<vmem>>, vector<128x1xf32>,
    } else {
    }
    return
  }
  func.func @transform_0(%arg0: i32, %arg1: i32) -> (i32, i32, i32) {
    %c0_i32 = arith.constant 0 : i32
    %c0_i32_0 = arith.constant 0 : i32
    %c0_i32_1 = arith.constant 0 : i32
    return %c0_i32, %arg0, %c0_i32_0 : i32, i32, i32
  }
  func.func @transform_1(%arg0: i32, %arg1: i32) -> (i32, i32, i32) {
    %c0_i32 = arith.constant 0 : i32
    %c0_i32_0 = arith.constant 0 : i32
    %c0_i32_1 = arith.constant 0 : i32
    return %arg1, %c0_i32, %c0_i32_0 : i32, i32, i32
  }
  func.func @transform_2(%arg0: i32, %arg1: i32) -> (i32, i32, i32) {
    %c0_i32 = arith.constant 0 : i32
    %c0_i32_0 = arith.constant 0 : i32
    %c0_i32_1 = arith.constant 0 : i32
    return %arg1, %c0_i32, %c0_i32_0 : i32, i32, i32
  }
  func.func @transform_3(%arg0: i32, %arg1: i32) -> (i32, i32, i32) {
    %c0_i32 = arith.constant 0 : i32
    %c0_i32_0 = arith.constant 0 : i32
    %c0_i32_1 = arith.constant 0 : i32
    return %arg1, %c0_i32, %c0_i32_0 : i32, i32, i32
  }
  func.func @transform_4(%arg0: i32, %arg1: i32) -> (i32, i32, i32) {
    %c0_i32 = arith.constant 0 : i32
    %c0_i32_0 = arith.constant 0 : i32
    %c0_i32_1 = arith.constant 0 : i32
    return %arg1, %c0_i32, %c0_i32_0 : i32, i32, i32
  }
  func.func @transform_5(%arg0: i32, %arg1: i32) -> (i32, i32, i32) {
    %c0_i32 = arith.constant 0 : i32
    %c0_i32_0 = arith.constant 0 : i32
    %c0_i32_1 = arith.constant 0 : i32
    return %arg1, %c0_i32, %c0_i32_0 : i32, i32, i32
  }
  func.func @transform_6(%arg0: i32, %arg1: i32) -> (i32, i32, i32) {
    %c0_i32 = arith.constant 0 : i32
    %c0_i32_0 = arith.constant 0 : i32
    %c0_i32_1 = arith.constant 0 : i32
    return %arg1, %c0_i32, %c0_i32_0 : i32, i32, i32
  }
  func.func @transform_7(%arg0: i32, %arg1: i32) -> (i32, i32, i32) {
    %c0_i32 = arith.constant 0 : i32
    %c0_i32_0 = arith.constant 0 : i32
    %c0_i32_1 = arith.constant 0 : i32
    return %arg1, %c0_i32, %c0_i32_0 : i32, i32, i32
  }
  func.func @transform_8(%arg0: i32, %arg1: i32) -> (i32, i32, i32) {
    %c0_i32 = arith.constant 0 : i32
    %c0_i32_0 = arith.constant 0 : i32
    %c0_i32_1 = arith.constant 0 : i32
    return %arg1, %c0_i32, %c0_i32_0 : i32, i32, i32
  }
  func.func @transform_9(%arg0: i32, %arg1: i32) -> (i32, i32) {
    %c0_i32 = arith.constant 0 : i32
    %c0_i32_0 = arith.constant 0 : i32
    return %arg0, %c0_i32 : i32, i32
  }
}

</mosaic_0001>

<bundles_post_ra>
// kernel: flow_logpx.1
= control target key start
LH: loop header
LB: loop body
LE: loop exit
PB: predicated region body
PF: predicated region fallthrough
CT: control target
= control target key end

     0   :  { %s11240_s30 = smov 0   ;;  %s11242_s10 = smov 0   ;;  %s15217_s0 = inlined_call_operand.vmem [shape: f32[2,128,392], index: 0, kind: input, shape index: {}]   ;;  %s15218_s1 = inlined_call_operand.vmem [shape: bf16[8,392,256], index: 1, kind: input, shape index: {}]   ;;  %s15219_s2 = inlined_call_operand.vmem [shape: f32[8,1,256], index: 2, kind: input, shape index: {}]   ;;  %s15220_s3 = inlined_call_operand.vmem [shape: bf16[8,256,256], index: 3, kind: input, shape index: {}]   ;;  %s15221_s4 = inlined_call_operand.vmem [shape: f32[8,1,256], index: 4, kind: input, shape index: {}]   ;;  %s15222_s5 = inlined_call_operand.vmem [shape: bf16[8,256,392], index: 5, kind: input, shape index: {}]   ;;  %s15223_s6 = inlined_call_operand.vmem [shape: f32[8,1,392], index: 6, kind: input, shape index: {}]   ;;  %s15224_s7 = inlined_call_operand.vmem [shape: bf16[8,256,392], index: 7, kind: input, shape index: {}]   ;;  %s15225_s8 = inlined_call_operand.vmem [shape: f32[8,1,392], index: 8, kind: input, shape index: {}]   ;;  %s15226_s9 = inlined_call_operand.vmem [shape: f32[128,1], index: 9, kind: output, shape index: {}]  }
   0x1   :  { %15227 = sst [smem:[#allocation31_spill]] %s15218_s1  ;;  %s11244_s11 = smov 0  }
   0x2   :  { %15228 = sst [smem:[#allocation32_spill]] %s15219_s2 }
   0x3 LB: > { %s28_s12 = sadd.s32 1, %s11184_s10  ;;  %p8961_p0 = scmp.ge.s32.totalorder %s11188_s11, 1  ;;  %s11188_s11 = sphi %s11244_s11, %s19_s11   ;;  %s11184_s10 = sphi %s11242_s10, %s15286_s10   ;;  %s11180_s30 = sphi %s11240_s30, %s15285_s30  }
   0x4   : > { %p29_p1 = scmp.ge.s32.totalorder %s28_s12, 8  ;;  %p377_p2 = scmp.lt.s32.totalorder %s11188_s11, 9 }
   0x6   : > { %s15288_s12 = smov (%p29_p1, %s28_s12), 0  ;;  %p378_p3 = pnand %p8961_p0, %p377_p2 }
   0x7   : > { %15229 = sst [smem:[#allocation4_spill]] %s15288_s12  ;;  %p457_p4 = scmp.lt.s32.totalorder (!%p378_p3), %s11180_s30, 7 }
   0x8   : > { %381 = sbr.rel (%p378_p3) target bundleno = 2704 (0xa90), region = 56  ;;  %s15230_s2 = sld [smem:[#allocation32_spill]] (!%p378_p3) }
   0x9   : > { %s15231_s1 = sld [smem:[#allocation31_spill]] (!%p378_p3)  ;;  %p8973_p5 = scmp.ne.s32.totalorder (!%p378_p3), %s11180_s30, 0 }
   0xd   : > { %s458_s13 = scalar_select %p457_p4, %s11180_s30, 7 }
   0xf   : > { %s9489_s14 = smul.u32 392, %s458_s13  ;;  %s8963_s15 = sshll.u32 %s458_s13, 1 }
  0x10   : > { %s11265_s18 = scalar_lea.vmem %s15230_s2, %s8963_s15  ;;  %s9422_s19 = sshll.u32 %s458_s13, 8 }
  0x11   : > { %s11270_s22 = scalar_lea.vmem %s15231_s1, %s9489_s14  ;;  %s11275_s25 = scalar_lea.vmem %s15220_s3, %s9422_s19 }
  0x12   : > { %s11280_s28 = scalar_lea.vmem %s15221_s4, %s8963_s15  ;;  %s9423_s29 = sshll.u32 %s458_s13, 9 }
  0x13   : > { %s11285_s2 = scalar_lea.vmem %s15222_s5, %s9423_s29  ;;  %s8969_s12 = sshll.u32 %s458_s13, 2 }
  0x14   : > { %s11290_s21 = scalar_lea.vmem %s15223_s6, %s8969_s12  ;;  %s11295_s24 = scalar_lea.vmem %s15224_s7, %s9423_s29 }
  0x15   : > { %s11300_s27 = scalar_lea.vmem %s15225_s8, %s8969_s12  ;;  %503 = sbr.rel (%p8973_p5) target bundleno = 568 (0x238), region = 60 }
  0x1a   : > { %v512_v0 = vld [vmem:[%s15217_s0 + $0x40] sm:$0xff]  ;;  %v513_v1 = vld [vmem:[%s15217_s0 + $0x48] sm:$0xff]  ;;  %v514_v2 = vld [vmem:[%s15217_s0 + $0x50] sm:$0xff]  ;;  %vm1979_vm0 = vcmask 64512   ;;  %vm2090_vm1 = vcmask 7168  }
  0x1b   : > { %v515_v3 = vld [vmem:[%s15217_s0 + $0x58] sm:$0xff]  ;;  %v576_v4 = vld [vmem:[%s15217_s0 + $0x240] sm:$0xff]  ;;  %v577_v5 = vld [vmem:[%s15217_s0 + $0x248] sm:$0xff]  ;;  %v641_v6 = vmul.f32 0.00390625, %v512_v0  ;;  %v642_v7 = vmul.f32 0.00390625, %v513_v1  ;;  %v643_v8 = vmul.f32 0.00390625, %v514_v2 }
  0x1c   : > { %v578_v9 = vld [vmem:[%s15217_s0 + $0x250] sm:$0xff]  ;;  %v579_v10 = vld [vmem:[%s15217_s0 + $0x258] sm:$0xff]  ;;  %v644_v11 = vmul.f32 0.00390625, %v515_v3  ;;  %v705_v12 = vmul.f32 0.00390625, %v576_v4  ;;  %v706_v13 = vmul.f32 0.00390625, %v577_v5  ;;  %v504_v27 = vld [vmem:[%s15217_s0] sm:$0xff] }
  0x1d   : > { %v707_v14 = vmul.f32 0.00390625, %v578_v9  ;;  %v708_v15 = vmul.f32 0.00390625, %v579_v10  ;;  %v769_v16 = vmul.f32 0.99999, %v641_v6  ;;  %v770_v17 = vmul.f32 0.99999, %v642_v7 }
  0x1e   : > { %v771_v18 = vmul.f32 0.99999, %v643_v8  ;;  %v772_v19 = vmul.f32 0.99999, %v644_v11  ;;  %v833_v20 = vmul.f32 0.99999, %v705_v12 }
  0x1f   : > { %v834_v21 = vmul.f32 0.99999, %v706_v13  ;;  %v835_v22 = vmul.f32 0.99999, %v707_v14  ;;  %v836_v23 = vmul.f32 0.99999, %v708_v15 }
  0x20   : > { %v897_v24 = vadd.f32 5e-06, %v769_v16  ;;  %v898_v25 = vadd.f32 5e-06, %v770_v17  ;;  %v899_v26 = vadd.f32 5e-06, %v771_v18 }
  0x21   : > { %v900_v28 = vadd.f32 5e-06, %v772_v19  ;;  %v961_v29 = vadd.f32 5e-06, %v833_v20  ;;  %v11330_v30 = vadd.f32 5e-06, %v834_v21 }
  0x22   : > { %v11332_v31 = vadd.f32 5e-06, %v835_v22  ;;  %v11334_v32 = vadd.f32 5e-06, %v836_v23  ;;  %9514 = vlog2.f32 %v897_v24  ;;  %v1409_v33 = vsub.f32 1.0, %v897_v24  ;;  %v505_v34 = vld [vmem:[%s15217_s0 + $0x8] sm:$0xff] }
  0x23   : > { %9516 = vlog2.f32 %v898_v25  ;;  %v1410_v35 = vsub.f32 1.0, %v898_v25  ;;  %v1411_v36 = vsub.f32 1.0, %v899_v26  ;;  %v1412_v37 = vsub.f32 1.0, %v900_v28  ;;  %v506_v38 = vld [vmem:[%s15217_s0 + $0x10] sm:$0xff]  ;;  %v507_v39 = vld [vmem:[%s15217_s0 + $0x18] sm:$0xff]  ;;  %v568_v40 = vld [vmem:[%s15217_s0 + $0x200] sm:$0xff] }
  0x24   : > { %9518 = vlog2.f32 %v899_v26  ;;  %v1473_v41 = vsub.f32 1.0, %v961_v29  ;;  %v1474_v42 = vsub.f32 1.0, %v11330_v30  ;;  %v1475_v43 = vsub.f32 1.0, %v11332_v31  ;;  %v569_v44 = vld [vmem:[%s15217_s0 + $0x208] sm:$0xff]  ;;  %v570_v45 = vld [vmem:[%s15217_s0 + $0x210] sm:$0xff]  ;;  %v571_v46 = vld [vmem:[%s15217_s0 + $0x218] sm:$0xff] }
  0x25   : > { %9520 = vlog2.f32 %v900_v28  ;;  %v1476_v47 = vsub.f32 1.0, %v11334_v32  ;;  %v633_v48 = vmul.f32 0.00390625, %v504_v27  ;;  %v634_v49 = vmul.f32 0.00390625, %v505_v34  ;;  %v516_v10 = vld [vmem:[%s15217_s0 + $0x60] sm:$0xff]  ;;  %v517_v11 = vld [vmem:[%s15217_s0 + $0x68] sm:$0xff]  ;;  %v518_v15 = vld [vmem:[%s15217_s0 + $0x70] sm:$0xff] }
  0x26   : > { %9522 = vlog2.f32 %v961_v29  ;;  %v635_v50 = vmul.f32 0.00390625, %v506_v38  ;;  %v636_v51 = vmul.f32 0.00390625, %v507_v39  ;;  %v697_v52 = vmul.f32 0.00390625, %v568_v40  ;;  %v519_v16 = vld [vmem:[%s15217_s0 + $0x78] sm:$0xff]  ;;  %v580_v21 = vld [vmem:[%s15217_s0 + $0x260] sm:$0xff]  ;;  %v581_v24 = vld [vmem:[%s15217_s0 + $0x268] sm:$0xff] }
  0x27   : > { %9524 = vlog2.f32 %v11330_v30  ;;  %v698_v53 = vmul.f32 0.00390625, %v569_v44  ;;  %v699_v54 = vmul.f32 0.00390625, %v570_v45  ;;  %v700_v55 = vmul.f32 0.00390625, %v571_v46  ;;  %v582_v29 = vld [vmem:[%s15217_s0 + $0x270] sm:$0xff] }
  0x28   : > { %9526 = vlog2.f32 %v11332_v31  ;;  %v761_v56 = vmul.f32 0.99999, %v633_v48  ;;  %v762_v57 = vmul.f32 0.99999, %v634_v49  ;;  %v763_v58 = vmul.f32 0.99999, %v635_v50 }
  0x29   : > { %9528 = vlog2.f32 %v11334_v32  ;;  %v764_v59 = vmul.f32 0.99999, %v636_v51  ;;  %v825_v60 = vmul.f32 0.99999, %v697_v52  ;;  %v826_v61 = vmul.f32 0.99999, %v698_v53 }
  0x2a   : > { %9530 = vlog2.f32 %v1409_v33  ;;  %v827_v62 = vmul.f32 0.99999, %v699_v54  ;;  %v828_v63 = vmul.f32 0.99999, %v700_v55  ;;  %v11363_v0 = vadd.f32 5e-06, %v761_v56 }
  0x2b   : > { %9532 = vlog2.f32 %v1410_v35  ;;  %v11365_v1 = vadd.f32 5e-06, %v762_v57  ;;  %v11367_v2 = vadd.f32 5e-06, %v763_v58  ;;  %v11369_v3 = vadd.f32 5e-06, %v764_v59 }
  0x2c   : > { %9534 = vlog2.f32 %v1411_v36  ;;  %v11371_v4 = vadd.f32 5e-06, %v825_v60  ;;  %v11373_v5 = vadd.f32 5e-06, %v826_v61  ;;  %v11375_v6 = vadd.f32 5e-06, %v827_v62 }
  0x2d   : > { %9536 = vlog2.f32 %v1412_v37  ;;  %v11377_v7 = vadd.f32 5e-06, %v828_v63  ;;  %v1401_v8 = vsub.f32 1.0, %v11363_v0  ;;  %v1402_v9 = vsub.f32 1.0, %v11365_v1  ;;  %v583_v35 = vld [vmem:[%s15217_s0 + $0x278] sm:$0xff] }
  0x2e   : > { %9538 = vlog2.f32 %v1473_v41  ;;  %v1403_v12 = vsub.f32 1.0, %v11367_v2  ;;  %v1404_v13 = vsub.f32 1.0, %v11369_v3  ;;  %v1465_v14 = vsub.f32 1.0, %v11371_v4 }
  0x2f   : > { %v9515_v17 = vpop.eup %9514  ;;  %9540 = vlog2.f32 %v1474_v42  ;;  %v1466_v18 = vsub.f32 1.0, %v11373_v5  ;;  %v1467_v19 = vsub.f32 1.0, %v11375_v6  ;;  %v1468_v20 = vsub.f32 1.0, %v11377_v7 }
  0x30   : > { %v9517_v22 = vpop.eup %9516  ;;  %v11402_v23 = vmul.f32 0.6931472, %v9515_v17  ;;  %9542 = vlog2.f32 %v1475_v43  ;;  %v645_v25 = vmul.f32 0.00390625, %v516_v10  ;;  %v646_v26 = vmul.f32 0.00390625, %v517_v11 }
  0x31   : > { %v9519_v27 = vpop.eup %9518  ;;  %v11407_v28 = vmul.f32 0.6931472, %v9517_v22  ;;  %9544 = vlog2.f32 %v1476_v47  ;;  %v647_v30 = vmul.f32 0.00390625, %v518_v15  ;;  %v648_v31 = vmul.f32 0.00390625, %v519_v16 }
  0x32   : > { %v9521_v32 = vpop.eup %9520  ;;  %v11412_v33 = vmul.f32 0.6931472, %v9519_v27  ;;  %v1281_v34 = vsub.f32 0.0, %v11402_v23  ;;  %9546 = vlog2.f32 %v11363_v0  ;;  %v11419_v36 = vmul.f32 0.00390625, %v580_v21 }
  0x33   : > { %v9523_v37 = vpop.eup %9522  ;;  %v11421_v38 = vmul.f32 0.6931472, %v9521_v32  ;;  %v1282_v39 = vsub.f32 0.0, %v11407_v28  ;;  %9548 = vlog2.f32 %v11365_v1  ;;  %v11425_v40 = vmul.f32 0.00390625, %v581_v24 }
  0x34   : > { %v9525_v41 = vpop.eup %9524  ;;  %v11427_v42 = vmul.f32 0.6931472, %v9523_v37  ;;  %v1283_v43 = vsub.f32 0.0, %v11412_v33  ;;  %9550 = vlog2.f32 %v11367_v2  ;;  %v11431_v44 = vmul.f32 0.00390625, %v582_v29 }
  0x35   : > { %v9527_v45 = vpop.eup %9526  ;;  %v11433_v46 = vmul.f32 0.6931472, %v9525_v41  ;;  %v1284_v47 = vsub.f32 0.0, %v11421_v38  ;;  %9552 = vlog2.f32 %v11369_v3  ;;  %v11437_v48 = vmul.f32 0.00390625, %v583_v35 }
  0x36   : > { %v9529_v49 = vpop.eup %9528  ;;  %v11439_v50 = vmul.f32 0.6931472, %v9527_v45  ;;  %v1345_v51 = vsub.f32 0.0, %v11427_v42  ;;  %9554 = vlog2.f32 %v11371_v4  ;;  %v11443_v52 = vmul.f32 0.99999, %v645_v25 }
  0x37   : > { %v9531_v53 = vpop.eup %9530  ;;  %v11445_v54 = vmul.f32 0.6931472, %v9529_v49  ;;  %v1346_v55 = vsub.f32 0.0, %v11433_v46  ;;  %9556 = vlog2.f32 %v11373_v5  ;;  %v11449_v56 = vmul.f32 0.99999, %v646_v26 }
  0x38   : > { %v9533_v57 = vpop.eup %9532  ;;  %v1347_v58 = vsub.f32 0.0, %v11439_v50  ;;  %v1546_v59 = vmul.f32 0.6931472, %v9531_v53  ;;  %9558 = vlog2.f32 %v11375_v6  ;;  %v11453_v60 = vmul.f32 0.99999, %v647_v30  ;;  %v508_v53 = vld [vmem:[%s15217_s0 + $0x20] sm:$0xff] }
  0x39   : > { %v9535_v61 = vpop.eup %9534  ;;  %v1348_v62 = vsub.f32 0.0, %v11445_v54  ;;  %v1548_v63 = vmul.f32 0.6931472, %v9533_v57  ;;  %9560 = vlog2.f32 %v11377_v7  ;;  %v11457_v10 = vmul.f32 0.99999, %v648_v31 }
  0x3a   : > { %v9537_v11 = vpop.eup %9536  ;;  %v1550_v15 = vmul.f32 0.6931472, %v9535_v61  ;;  %v1793_v16 = vsub.f32 %v1281_v34, %v1546_v59  ;;  %v2115_v17 = vsub.f32 %v11402_v23, %v1546_v59  ;;  %9562 = vlog2.f32 %v1401_v8 }
  0x3b   : > { %v9539_v21 = vpop.eup %9538  ;;  %v1552_v22 = vmul.f32 0.6931472, %v9537_v11  ;;  %v1794_v24 = vsub.f32 %v1282_v39, %v1548_v63  ;;  %v2116_v25 = vsub.f32 %v11407_v28, %v1548_v63  ;;  %9564 = vlog2.f32 %v1402_v9  ;;  %v509_v63 = vld [vmem:[%s15217_s0 + $0x28] sm:$0xff]  ;;  %v510_v11 = vld [vmem:[%s15217_s0 + $0x30] sm:$0xff] }
  0x3c   : > { %v9541_v26 = vpop.eup %9540  ;;  %v1674_v27 = vmul.f32 0.6931472, %v9539_v21  ;;  %v1795_v29 = vsub.f32 %v1283_v43, %v1550_v15  ;;  %v2117_v30 = vsub.f32 %v11412_v33, %v1550_v15  ;;  %2243 = vst [vmem:[#allocation2 + $0x40] sm:$0xff] %v2115_v17  ;;  %9566 = vlog2.f32 %v1403_v12 }
  0x3d   : > { %v9543_v23 = vpop.eup %9542  ;;  %v1676_v0 = vmul.f32 0.6931472, %v9541_v26  ;;  %v1796_v8 = vsub.f32 %v1284_v47, %v1552_v22  ;;  %v2118_v31 = vsub.f32 %v11421_v38, %v1552_v22  ;;  %2244 = vst [vmem:[#allocation2 + $0x48] sm:$0xff] %v2116_v25  ;;  %9568 = vlog2.f32 %v1404_v13 }
  0x3e   : > { %v9545_v1 = vpop.eup %9544  ;;  %v1678_v9 = vmul.f32 0.6931472, %v9543_v23  ;;  %v1857_v28 = vsub.f32 %v1345_v51, %v1674_v27  ;;  %v2179_v32 = vsub.f32 %v11427_v42, %v1674_v27  ;;  %2245 = vst [vmem:[#allocation2 + $0x50] sm:$0xff] %v2117_v30  ;;  %9570 = vlog2.f32 %v1465_v14 }
  0x3f   : > { %v9547_v2 = vpop.eup %9546  ;;  %v1680_v12 = vmul.f32 0.6931472, %v9545_v1  ;;  %v1858_v33 = vsub.f32 %v1346_v55, %v1676_v0  ;;  %v2180_v34 = vsub.f32 %v11433_v46, %v1676_v0  ;;  %2246 = vst.msk [vmem:[#allocation2 + $0x58] sm:$0xff] %vm1979_vm0, %v2118_v31  ;;  %9572 = vlog2.f32 %v1466_v18 }
  0x40   : > { %v9549_v3 = vpop.eup %9548  ;;  %v1859_v13 = vsub.f32 %v1347_v58, %v1678_v9  ;;  %v1921_v35 = vadd.f32 %v1857_v28, %v1793_v16  ;;  %v2181_v37 = vsub.f32 %v11439_v50, %v1678_v9  ;;  %2307 = vst [vmem:[#allocation2 + $0x240] sm:$0xff] %v2179_v32  ;;  %v11479_v38 = vmul.f32 0.6931472, %v9547_v2 }
  0x41   : > { %v9551_v4 = vpop.eup %9550  ;;  %v1860_v14 = vsub.f32 %v1348_v62, %v1680_v12  ;;  %v1922_v39 = vadd.f32 %v1858_v33, %v1794_v24  ;;  %v2182_v41 = vsub.f32 %v11445_v54, %v1680_v12  ;;  %2308 = vst [vmem:[#allocation2 + $0x248] sm:$0xff] %v2180_v34  ;;  %v11482_v42 = vmul.f32 0.6931472, %v9549_v3 }
  0x42   : > { %v9553_v43 = vpop.eup %9552  ;;  %v1923_v45 = vadd.f32 %v1859_v13, %v1795_v29  ;;  %2309 = vst [vmem:[#allocation2 + $0x250] sm:$0xff] %v2181_v37  ;;  %v11484_v5 = vmul.f32 0.6931472, %v9551_v4  ;;  %v1273_v18 = vsub.f32 0.0, %v11479_v38  ;;  %9574 = vlog2.f32 %v1467_v19 }
  0x43   : > { %v9555_v46 = vpop.eup %9554  ;;  %v1924_v47 = vadd.f32 %v1860_v14, %v1796_v8  ;;  %v1990_v49 = vadd.f32 %v1922_v39, %v1921_v35  ;;  %2310 = vst.msk [vmem:[#allocation2 + $0x258] sm:$0xff] %vm1979_vm0, %v2182_v41  ;;  %v11490_v50 = vmul.f32 0.6931472, %v9553_v43  ;;  %v1274_v51 = vsub.f32 0.0, %v11482_v42 }
  0x44   : > { %v9557_v54 = vpop.eup %9556  ;;  %v11496_v55 = vmul.f32 0.6931472, %v9555_v46  ;;  %v1275_v57 = vsub.f32 0.0, %v11484_v5  ;;  %9576 = vlog2.f32 %v1468_v20  ;;  %v837_v6 = vmul.f32 0.99999, %v11419_v36 }
  0x45   : > { %v9559_v19 = vpop.eup %9558  ;;  %v1991_v58 = vadd.f32 %v1990_v49, %v1923_v45  ;;  %v1992_v59 = vsel %vm1979_vm0, %v1924_v47, 0.0  ;;  %v11503_v61 = vmul.f32 0.6931472, %v9557_v54  ;;  %v1276_v62 = vsub.f32 0.0, %v11490_v50 }
  0x46   : > { %v9561_v7 = vpop.eup %9560  ;;  %v11512_v20 = vmul.f32 0.6931472, %v9559_v19  ;;  %v1337_v36 = vsub.f32 0.0, %v11496_v55  ;;  %v838_v15 = vmul.f32 0.99999, %v11425_v40  ;;  %v11516_v16 = vmul.f32 0.00390625, %v508_v53 }
  0x47   : > { %v9563_v17 = vpop.eup %9562  ;;  %v1993_v21 = vadd.f32 %v1992_v59, %v1991_v58  ;;  %v11518_v22 = vmul.f32 0.6931472, %v9561_v7  ;;  %v1338_v24 = vsub.f32 0.0, %v11503_v61  ;;  %v839_v25 = vmul.f32 0.99999, %v11431_v44  ;;  %v572_v7 = vld [vmem:[%s15217_s0 + $0x220] sm:$0xff] }
  0x48   : > { %v9565_v26 = vpop.eup %9564  ;;  %v1339_v27 = vsub.f32 0.0, %v11512_v20  ;;  %v1530_v29 = vmul.f32 0.6931472, %v9563_v17  ;;  %v840_v30 = vmul.f32 0.99999, %v11437_v48  ;;  %v11524_v23 = vmul.f32 0.00390625, %v509_v63 }
  0x49   : > { %v9567_v0 = vpop.eup %9566  ;;  %1994 = vadd.xlane.f32.xlu1 %v1993_v21  ;;  %v1340_v40 = vsub.f32 0.0, %v11518_v22  ;;  %v1532_v8 = vmul.f32 0.6931472, %v9565_v26  ;;  %v11528_v31 = vadd.f32 5e-06, %v11443_v52  ;;  %v11530_v1 = vmul.f32 0.00390625, %v510_v11 }
  0x4a   : > { %v9569_v9 = vpop.eup %9568  ;;  %v1534_v44 = vmul.f32 0.6931472, %v9567_v0  ;;  %v1785_v28 = vsub.f32 %v1273_v18, %v1530_v29  ;;  %v2107_v32 = vsub.f32 %v11479_v38, %v1530_v29  ;;  %v11534_v2 = vadd.f32 5e-06, %v11449_v56 }
  0x4b   : > { %v9571_v48 = vpop.eup %9570  ;;  %v1536_v12 = vmul.f32 0.6931472, %v9569_v9  ;;  %v1786_v33 = vsub.f32 %v1274_v51, %v1532_v8  ;;  %v2108_v34 = vsub.f32 %v11482_v42, %v1532_v8  ;;  %v11538_v3 = vadd.f32 5e-06, %v11453_v60 }
  0x4c   : > { %v9573_v52 = vpop.eup %9572  ;;  %v1658_v13 = vmul.f32 0.6931472, %v9571_v48  ;;  %v1787_v35 = vsub.f32 %v1275_v57, %v1534_v44  ;;  %v2109_v37 = vsub.f32 %v11484_v5, %v1534_v44  ;;  %2235 = vst [vmem:[#allocation2] sm:$0xff] %v2107_v32  ;;  %v11542_v4 = vadd.f32 5e-06, %v11457_v10 }
  0x4d   : > { %v1660_v38 = vmul.f32 0.6931472, %v9573_v52  ;;  %v1788_v56 = vsub.f32 %v1276_v62, %v1536_v12  ;;  %v2110_v14 = vsub.f32 %v11490_v50, %v1536_v12  ;;  %2236 = vst [vmem:[#allocation2 + $0x8] sm:$0xff] %v2108_v34  ;;  %v11545_v39 = vadd.f32 5e-06, %v837_v6 }
  0x4e   : > { %v1849_v41 = vsub.f32 %v1337_v36, %v1658_v13  ;;  %v2171_v60 = vsub.f32 %v11496_v55, %v1658_v13  ;;  %2237 = vst [vmem:[#allocation2 + $0x10] sm:$0xff] %v2109_v37  ;;  %v11548_v42 = vadd.f32 5e-06, %v838_v15  ;;  %v11550_v43 = vadd.f32 5e-06, %v839_v25  ;;  %v574_v36 = vld [vmem:[%s15217_s0 + $0x230] sm:$0xff] }
  0x4f   : > { %v9575_v45 = vpop.eup %9574  ;;  %v1850_v5 = vsub.f32 %v1338_v24, %v1660_v38  ;;  %v2172_v10 = vsub.f32 %v11503_v61, %v1660_v38  ;;  %2238 = vst.msk [vmem:[#allocation2 + $0x18] sm:$0xff] %vm1979_vm0, %v2110_v14  ;;  %v11554_v18 = vadd.f32 5e-06, %v840_v30  ;;  %9578 = vlog2.f32 %v11528_v31  ;;  %v511_v61 = vld [vmem:[%s15217_s0 + $0x38] sm:$0xff] }
  0x50   : > { %v1662_v46 = vmul.f32 0.6931472, %v9575_v45  ;;  %v1913_v47 = vadd.f32 %v1849_v41, %v1785_v28  ;;  %2299 = vst [vmem:[#allocation2 + $0x200] sm:$0xff] %v2171_v60  ;;  %9580 = vlog2.f32 %v11534_v2  ;;  %v1413_v49 = vsub.f32 1.0, %v11528_v31 }
  0x51   : > { %v9577_v50 = vpop.eup %9576  ;;  %v1914_v51 = vadd.f32 %v1850_v5, %v1786_v33  ;;  %2300 = vst [vmem:[#allocation2 + $0x208] sm:$0xff] %v2172_v10  ;;  %9582 = vlog2.f32 %v11538_v3  ;;  %v1414_v53 = vsub.f32 1.0, %v11534_v2  ;;  %v1415_v54 = vsub.f32 1.0, %v11538_v3 }
  0x52   : > { %v1664_v55 = vmul.f32 0.6931472, %v9577_v50  ;;  %v1851_v57 = vsub.f32 %v1339_v27, %v1662_v46  ;;  %v2173_v6 = vsub.f32 %v11512_v20, %v1662_v46  ;;  %9584 = vlog2.f32 %v11542_v4  ;;  %v573_v20 = vld [vmem:[%s15217_s0 + $0x228] sm:$0xff] }
  0x53   : > { %v1977_v19 = vadd.f32 %v1914_v51, %v1913_v47  ;;  %9586 = vlog2.f32 %v11545_v39  ;;  %v1416_v58 = vsub.f32 1.0, %v11542_v4  ;;  %v1477_v59 = vsub.f32 1.0, %v11545_v39 }
  0x54   : > { %v1852_v62 = vsub.f32 %v1340_v40, %v1664_v55  ;;  %v1915_v63 = vadd.f32 %v1851_v57, %v1787_v35  ;;  %v2174_v11 = vsub.f32 %v11518_v22, %v1664_v55  ;;  %2301 = vst [vmem:[#allocation2 + $0x210] sm:$0xff] %v2173_v6  ;;  %9588 = vlog2.f32 %v11548_v42  ;;  %v575_v22 = vld [vmem:[%s15217_s0 + $0x238] sm:$0xff] }
  0x55   : > { %9590 = vlog2.f32 %v11550_v43  ;;  %v1478_v15 = vsub.f32 1.0, %v11548_v42  ;;  %v1479_v17 = vsub.f32 1.0, %v11550_v43  ;;  %v1480_v21 = vsub.f32 1.0, %v11554_v18 }
  0x56   : > { %v1916_v24 = vadd.f32 %v1852_v62, %v1788_v56  ;;  %v1978_v25 = vadd.f32 %v1977_v19, %v1915_v63  ;;  %2302 = vst.msk [vmem:[#allocation2 + $0x218] sm:$0xff] %vm1979_vm0, %v2174_v11  ;;  %9592 = vlog2.f32 %v11554_v18  ;;  %v640_v26 = vmul.f32 0.00390625, %v511_v61 }
  0x57   : > { %9594 = vlog2.f32 %v1413_v49  ;;  %v701_v27 = vmul.f32 0.00390625, %v572_v7  ;;  %v702_v29 = vmul.f32 0.00390625, %v573_v20  ;;  %v703_v30 = vmul.f32 0.00390625, %v574_v36 }
  0x58   : > { %v1980_v0 = vsel %vm1979_vm0, %v1916_v24, 0.0  ;;  %9596 = vlog2.f32 %v1414_v53  ;;  %v704_v40 = vmul.f32 0.00390625, %v575_v22  ;;  %v765_v8 = vmul.f32 0.99999, %v11516_v16 }
  0x59   : > { %v1981_v31 = vadd.f32 %v1980_v0, %v1978_v25  ;;  %9598 = vlog2.f32 %v1415_v54  ;;  %v766_v9 = vmul.f32 0.99999, %v11524_v23  ;;  %v767_v44 = vmul.f32 0.99999, %v11530_v1 }
  0x5a   : > { %9600 = vlog2.f32 %v1416_v58  ;;  %v768_v28 = vmul.f32 0.99999, %v640_v26  ;;  %v829_v32 = vmul.f32 0.99999, %v701_v27  ;;  %v830_v2 = vmul.f32 0.99999, %v702_v29 }
  0x5b   : > { %1982 = vadd.xlane.f32.xlu0 %v1981_v31  ;;  %9602 = vlog2.f32 %v1477_v59  ;;  %v831_v48 = vmul.f32 0.99999, %v703_v30  ;;  %v832_v12 = vmul.f32 0.99999, %v704_v40  ;;  %v893_v33 = vadd.f32 5e-06, %v765_v8 }
  0x5c   : > { %v9579_v34 = vpop.eup %9578  ;;  %9604 = vlog2.f32 %v1478_v15  ;;  %v894_v3 = vadd.f32 5e-06, %v766_v9  ;;  %v11594_v52 = vadd.f32 5e-06, %v767_v44  ;;  %v11596_v16 = vadd.f32 5e-06, %v768_v28 }
  0x5d   : > { %v9581_v13 = vpop.eup %9580  ;;  %v11598_v23 = vmul.f32 0.6931472, %v9579_v34  ;;  %9606 = vlog2.f32 %v1479_v17  ;;  %v11600_v1 = vadd.f32 5e-06, %v829_v32  ;;  %v11602_v35 = vadd.f32 5e-06, %v830_v2 }
  0x5e   : > { %v9583_v37 = vpop.eup %9582  ;;  %v11604_v4 = vmul.f32 0.6931472, %v9581_v13  ;;  %9608 = vlog2.f32 %v1480_v21  ;;  %v11606_v38 = vadd.f32 5e-06, %v831_v48  ;;  %v11608_v56 = vadd.f32 5e-06, %v832_v12 }
  0x5f   : > { %v9585_v14 = vpop.eup %9584  ;;  %v11610_v39 = vmul.f32 0.6931472, %v9583_v37  ;;  %v1285_v41 = vsub.f32 0.0, %v11598_v23  ;;  %9610 = vlog2.f32 %v893_v33  ;;  %v1405_v60 = vsub.f32 1.0, %v893_v33 }
  0x60   : > { %v9587_v42 = vpop.eup %9586  ;;  %v11613_v43 = vmul.f32 0.6931472, %v9585_v14  ;;  %v1286_v45 = vsub.f32 0.0, %v11604_v4  ;;  %9612 = vlog2.f32 %v894_v3  ;;  %v1406_v5 = vsub.f32 1.0, %v894_v3 }
  0x61   : > { %v9589_v10 = vpop.eup %9588  ;;  %v11616_v18 = vmul.f32 0.6931472, %v9587_v42  ;;  %v1287_v46 = vsub.f32 0.0, %v11610_v39  ;;  %9614 = vlog2.f32 %v11594_v52  ;;  %v1407_v47 = vsub.f32 1.0, %v11594_v52 }
  0x62   : > { %v9591_v49 = vpop.eup %9590  ;;  %v11621_v50 = vmul.f32 0.6931472, %v9589_v10  ;;  %v1288_v51 = vsub.f32 0.0, %v11613_v43  ;;  %9616 = vlog2.f32 %v11596_v16  ;;  %v1408_v53 = vsub.f32 1.0, %v11596_v16 }
  0x63   : > { %v9593_v54 = vpop.eup %9592  ;;  %v11626_v55 = vmul.f32 0.6931472, %v9591_v49  ;;  %v1349_v57 = vsub.f32 0.0, %v11616_v18  ;;  %9618 = vlog2.f32 %v11600_v1  ;;  %v1469_v6 = vsub.f32 1.0, %v11600_v1 }
  0x64   : > { %v9595_v19 = vpop.eup %9594  ;;  %v11631_v58 = vmul.f32 0.6931472, %v9593_v54  ;;  %v1350_v59 = vsub.f32 0.0, %v11621_v50  ;;  %9620 = vlog2.f32 %v11602_v35  ;;  %v1470_v61 = vsub.f32 1.0, %v11602_v35 }
  0x65   : > { %v9597_v62 = vpop.eup %9596  ;;  %v1351_v63 = vsub.f32 0.0, %v11626_v55  ;;  %v1554_v11 = vmul.f32 0.6931472, %v9595_v19  ;;  %9622 = vlog2.f32 %v11606_v38  ;;  %v1471_v7 = vsub.f32 1.0, %v11606_v38 }
  0x66   : > { %v9599_v20 = vpop.eup %9598  ;;  %v1352_v36 = vsub.f32 0.0, %v11631_v58  ;;  %v1556_v15 = vmul.f32 0.6931472, %v9597_v62  ;;  %9624 = vlog2.f32 %v11608_v56  ;;  %v1472_v17 = vsub.f32 1.0, %v11608_v56  ;;  %v589_v56 = vld [vmem:[%s15217_s0 + $0x2a8] sm:$0xff] }
  0x67   : > { %v9601_v21 = vpop.eup %9600  ;;  %v1558_v22 = vmul.f32 0.6931472, %v9599_v20  ;;  %v1797_v24 = vsub.f32 %v1285_v41, %v1554_v11  ;;  %v2119_v25 = vsub.f32 %v11598_v23, %v1554_v11  ;;  %9626 = vlog2.f32 %v1405_v60  ;;  %v524_v60 = vld [vmem:[%s15217_s0 + $0xa0] sm:$0xff]  ;;  %v590_v11 = vld [vmem:[%s15217_s0 + $0x2b0] sm:$0xff] }
  0x68   : > { %v9603_v26 = vpop.eup %9602  ;;  %v1560_v27 = vmul.f32 0.6931472, %v9601_v21  ;;  %v1798_v29 = vsub.f32 %v1286_v45, %v1556_v15  ;;  %v2120_v30 = vsub.f32 %v11604_v4, %v1556_v15  ;;  %9628 = vlog2.f32 %v1406_v5  ;;  %v591_v15 = vld [vmem:[%s15217_s0 + $0x2b8] sm:$0xff] }
  0x69   : > { %v9605_v0 = vpop.eup %9604  ;;  %v1682_v40 = vmul.f32 0.6931472, %v9603_v26  ;;  %v1799_v8 = vsub.f32 %v1287_v46, %v1558_v22  ;;  %v2121_v31 = vsub.f32 %v11610_v39, %v1558_v22  ;;  %2247 = vst [vmem:[#allocation2 + $0x60] sm:$0xff] %v2119_v25  ;;  %9630 = vlog2.f32 %v1407_v47 }
  0x6a   : > { %v9607_v9 = vpop.eup %9606  ;;  %v1684_v44 = vmul.f32 0.6931472, %v9605_v0  ;;  %v1800_v28 = vsub.f32 %v1288_v51, %v1560_v27  ;;  %v2122_v32 = vsub.f32 %v11613_v43, %v1560_v27  ;;  %2248 = vst [vmem:[#allocation2 + $0x68] sm:$0xff] %v2120_v30  ;;  %9632 = vlog2.f32 %v1408_v53  ;;  %v526_v51 = vld [vmem:[%s15217_s0 + $0xb0] sm:$0xff] }
  0x6b   : > { %v9609_v2 = vpop.eup %9608  ;;  %v1686_v48 = vmul.f32 0.6931472, %v9607_v9  ;;  %v1861_v12 = vsub.f32 %v1349_v57, %v1682_v40  ;;  %v2183_v33 = vsub.f32 %v11616_v18, %v1682_v40  ;;  %2249 = vst [vmem:[#allocation2 + $0x70] sm:$0xff] %v2121_v31  ;;  %9634 = vlog2.f32 %v1469_v6  ;;  %v527_v57 = vld [vmem:[%s15217_s0 + $0xb8] sm:$0xff]  ;;  %v588_v6 = vld [vmem:[%s15217_s0 + $0x2a0] sm:$0xff] }
  0x6c   : > { %v9611_v34 = vpop.eup %9610  ;;  %v1688_v3 = vmul.f32 0.6931472, %v9609_v2  ;;  %v1862_v52 = vsub.f32 %v1350_v59, %v1684_v44  ;;  %v2184_v16 = vsub.f32 %v11621_v50, %v1684_v44  ;;  %2250 = vst.msk [vmem:[#allocation2 + $0x78] sm:$0xff] %vm1979_vm0, %v2122_v32  ;;  %9636 = vlog2.f32 %v1470_v61  ;;  %v525_v50 = vld [vmem:[%s15217_s0 + $0xa8] sm:$0xff] }
  0x6d   : > { %v9613_v13 = vpop.eup %9612  ;;  %v1863_v23 = vsub.f32 %v1351_v63, %v1686_v48  ;;  %v1925_v1 = vadd.f32 %v1861_v12, %v1797_v24  ;;  %v2185_v35 = vsub.f32 %v11626_v55, %v1686_v48  ;;  %2311 = vst [vmem:[#allocation2 + $0x260] sm:$0xff] %v2183_v33  ;;  %v11650_v37 = vmul.f32 0.6931472, %v9611_v34 }
  0x6e   : > { %v9615_v4 = vpop.eup %9614  ;;  %v1864_v38 = vsub.f32 %v1352_v36, %v1688_v3  ;;  %v1926_v14 = vadd.f32 %v1862_v52, %v1798_v29  ;;  %v2186_v39 = vsub.f32 %v11631_v58, %v1688_v3  ;;  %2312 = vst [vmem:[#allocation2 + $0x268] sm:$0xff] %v2184_v16  ;;  %v11653_v41 = vmul.f32 0.6931472, %v9613_v13 }
  0x6f   : > { %v9617_v42 = vpop.eup %9616  ;;  %v1927_v43 = vadd.f32 %v1863_v23, %v1799_v8  ;;  %2313 = vst [vmem:[#allocation2 + $0x270] sm:$0xff] %v2185_v35  ;;  %v11658_v45 = vmul.f32 0.6931472, %v9615_v4  ;;  %v1277_v5 = vsub.f32 0.0, %v11650_v37  ;;  %9638 = vlog2.f32 %v1471_v7 }
  0x70   : > { %v9619_v10 = vpop.eup %9618  ;;  %v1928_v18 = vadd.f32 %v1864_v38, %v1800_v28  ;;  %v1996_v46 = vadd.f32 %v1926_v14, %v1925_v1  ;;  %2314 = vst.msk [vmem:[#allocation2 + $0x278] sm:$0xff] %vm1979_vm0, %v2186_v39  ;;  %v11662_v47 = vmul.f32 0.6931472, %v9617_v42  ;;  %v1278_v49 = vsub.f32 0.0, %v11653_v41 }
  0x71   : > { %v9621_v53 = vpop.eup %9620  ;;  %v11671_v54 = vmul.f32 0.6931472, %v9619_v10  ;;  %v1279_v55 = vsub.f32 0.0, %v11658_v45  ;;  %9640 = vlog2.f32 %v1472_v17  ;;  %v653_v19 = vmul.f32 0.00390625, %v524_v60 }
  0x72   : > { %v9623_v58 = vpop.eup %9622  ;;  %v1997_v59 = vadd.f32 %v1996_v46, %v1927_v43  ;;  %v1998_v61 = vsel %vm1979_vm0, %v1928_v18, 0.0  ;;  %v11683_v62 = vmul.f32 0.6931472, %v9621_v53  ;;  %v1280_v63 = vsub.f32 0.0, %v11662_v47 }
  0x73   : > { %v9625_v7 = vpop.eup %9624  ;;  %v11692_v20 = vmul.f32 0.6931472, %v9623_v58  ;;  %v1341_v36 = vsub.f32 0.0, %v11671_v54  ;;  %v654_v17 = vmul.f32 0.00390625, %v525_v50  ;;  %v655_v21 = vmul.f32 0.00390625, %v526_v51 }
  0x74   : > { %v9627_v22 = vpop.eup %9626  ;;  %v1999_v24 = vadd.f32 %v1998_v61, %v1997_v59  ;;  %v11698_v25 = vmul.f32 0.6931472, %v9625_v7  ;;  %v1342_v26 = vsub.f32 0.0, %v11683_v62  ;;  %v656_v27 = vmul.f32 0.00390625, %v527_v57 }
  0x75   : > { %v9629_v29 = vpop.eup %9628  ;;  %v1343_v30 = vsub.f32 0.0, %v11692_v20  ;;  %v1538_v0 = vmul.f32 0.6931472, %v9627_v22  ;;  %v717_v40 = vmul.f32 0.00390625, %v588_v6  ;;  %v718_v8 = vmul.f32 0.00390625, %v589_v56 }
  0x76   : > { %v9631_v31 = vpop.eup %9630  ;;  %2000 = vadd.xlane.f32.xlu1 %v1999_v24  ;;  %v1344_v9 = vsub.f32 0.0, %v11698_v25  ;;  %v1540_v44 = vmul.f32 0.6931472, %v9629_v29  ;;  %v719_v28 = vmul.f32 0.00390625, %v590_v11  ;;  %v720_v32 = vmul.f32 0.00390625, %v591_v15 }
  0x77   : > { %v9633_v2 = vpop.eup %9632  ;;  %v1542_v48 = vmul.f32 0.6931472, %v9631_v31  ;;  %v1789_v12 = vsub.f32 %v1277_v5, %v1538_v0  ;;  %v2111_v33 = vsub.f32 %v11650_v37, %v1538_v0  ;;  %v781_v34 = vmul.f32 0.99999, %v653_v19  ;;  %v523_v31 = vld [vmem:[%s15217_s0 + $0x98] sm:$0xff] }
  0x78   : > { %v9635_v3 = vpop.eup %9634  ;;  %v1544_v52 = vmul.f32 0.6931472, %v9633_v2  ;;  %v1790_v16 = vsub.f32 %v1278_v49, %v1540_v44  ;;  %v2112_v13 = vsub.f32 %v11653_v41, %v1540_v44  ;;  %v782_v23 = vmul.f32 0.99999, %v654_v17  ;;  %v585_v44 = vld [vmem:[%s15217_s0 + $0x288] sm:$0xff]  ;;  %v586_v2 = vld [vmem:[%s15217_s0 + $0x290] sm:$0xff] }
  0x79   : > { %v9637_v1 = vpop.eup %9636  ;;  %v1666_v35 = vmul.f32 0.6931472, %v9635_v3  ;;  %v1791_v4 = vsub.f32 %v1279_v55, %v1542_v48  ;;  %v2113_v38 = vsub.f32 %v11658_v45, %v1542_v48  ;;  %2239 = vst [vmem:[#allocation2 + $0x20] sm:$0xff] %v2111_v33  ;;  %v783_v14 = vmul.f32 0.99999, %v655_v21  ;;  %v587_v48 = vld [vmem:[%s15217_s0 + $0x298] sm:$0xff] }
  0x7a   : > { %v1668_v39 = vmul.f32 0.6931472, %v9637_v1  ;;  %v1792_v60 = vsub.f32 %v1280_v63, %v1544_v52  ;;  %v2114_v42 = vsub.f32 %v11662_v47, %v1544_v52  ;;  %2240 = vst [vmem:[#allocation2 + $0x28] sm:$0xff] %v2112_v13  ;;  %v784_v37 = vmul.f32 0.99999, %v656_v27 }
  0x7b   : > { %v1853_v43 = vsub.f32 %v1341_v36, %v1666_v35  ;;  %v2175_v5 = vsub.f32 %v11671_v54, %v1666_v35  ;;  %2241 = vst [vmem:[#allocation2 + $0x30] sm:$0xff] %v2113_v38  ;;  %v845_v10 = vmul.f32 0.99999, %v717_v40  ;;  %v846_v41 = vmul.f32 0.99999, %v718_v8 }
  0x7c   : > { %v9639_v18 = vpop.eup %9638  ;;  %v1854_v46 = vsub.f32 %v1342_v26, %v1668_v39  ;;  %v2176_v49 = vsub.f32 %v11683_v62, %v1668_v39  ;;  %2242 = vst.msk [vmem:[#allocation2 + $0x38] sm:$0xff] %vm1979_vm0, %v2114_v42  ;;  %v847_v45 = vmul.f32 0.99999, %v719_v28  ;;  %v848_v50 = vmul.f32 0.99999, %v720_v32 }
  0x7d   : > { %v1670_v51 = vmul.f32 0.6931472, %v9639_v18  ;;  %v1917_v53 = vadd.f32 %v1853_v43, %v1789_v12  ;;  %2303 = vst [vmem:[#allocation2 + $0x220] sm:$0xff] %v2175_v5  ;;  %v909_v47 = vadd.f32 5e-06, %v781_v34  ;;  %v652_v52 = vmul.f32 0.00390625, %v523_v31 }
  0x7e   : > { %v910_v55 = vadd.f32 5e-06, %v782_v23  ;;  %v9641_v57 = vpop.eup %9640  ;;  %v1918_v6 = vadd.f32 %v1854_v46, %v1790_v16  ;;  %2304 = vst [vmem:[#allocation2 + $0x228] sm:$0xff] %v2176_v49  ;;  %v911_v54 = vadd.f32 5e-06, %v783_v14  ;;  %v714_v13 = vmul.f32 0.00390625, %v585_v44 }
  0x7f   : > { %v912_v19 = vadd.f32 5e-06, %v784_v37  ;;  %v11710_v58 = vadd.f32 5e-06, %v845_v10  ;;  %v1672_v59 = vmul.f32 0.6931472, %v9641_v57  ;;  %v1855_v61 = vsub.f32 %v1343_v30, %v1670_v51 }
  0x80   : > { %v2177_v62 = vsub.f32 %v11692_v20, %v1670_v51  ;;  %v11713_v63 = vadd.f32 5e-06, %v846_v41  ;;  %v1984_v56 = vadd.f32 %v1918_v6, %v1917_v53  ;;  %v11715_v11 = vadd.f32 5e-06, %v847_v45  ;;  %v520_v20 = vld [vmem:[%s15217_s0 + $0x80] sm:$0xff]  ;;  %v522_v30 = vld [vmem:[%s15217_s0 + $0x90] sm:$0xff] }
  0x81   : > { %v11717_v7 = vadd.f32 5e-06, %v848_v50  ;;  %9642 = vlog2.f32 %v909_v47  ;;  %v1856_v36 = vsub.f32 %v1344_v9, %v1672_v59  ;;  %v1919_v15 = vadd.f32 %v1855_v61, %v1791_v4  ;;  %v584_v9 = vld [vmem:[%s15217_s0 + $0x280] sm:$0xff] }
  0x82   : > { %v2178_v17 = vsub.f32 %v11698_v25, %v1672_v59  ;;  %2305 = vst [vmem:[#allocation2 + $0x230] sm:$0xff] %v2177_v62  ;;  %9644 = vlog2.f32 %v910_v55  ;;  %v1421_v21 = vsub.f32 1.0, %v909_v47  ;;  %v1422_v22 = vsub.f32 1.0, %v910_v55  ;;  %v521_v25 = vld [vmem:[%s15217_s0 + $0x88] sm:$0xff] }
  0x83   : > { %9646 = vlog2.f32 %v911_v54  ;;  %v1423_v24 = vsub.f32 1.0, %v911_v54  ;;  %v1920_v26 = vadd.f32 %v1856_v36, %v1792_v60  ;;  %v1985_v27 = vadd.f32 %v1984_v56, %v1919_v15  ;;  %v532_v36 = vld [vmem:[%s15217_s0 + $0xe0] sm:$0xff] }
  0x84   : > { %2306 = vst.msk [vmem:[#allocation2 + $0x238] sm:$0xff] %vm1979_vm0, %v2178_v17  ;;  %9648 = vlog2.f32 %v912_v19  ;;  %v1424_v29 = vsub.f32 1.0, %v912_v19  ;;  %v1485_v0 = vsub.f32 1.0, %v11710_v58  ;;  %v1486_v40 = vsub.f32 1.0, %v11713_v63 }
  0x85   : > { %9650 = vlog2.f32 %v11710_v58  ;;  %v1487_v8 = vsub.f32 1.0, %v11715_v11  ;;  %v1986_v28 = vsel %vm1979_vm0, %v1920_v26, 0.0  ;;  %v1488_v32 = vsub.f32 1.0, %v11717_v7 }
  0x86   : > { %9652 = vlog2.f32 %v11713_v63  ;;  %v649_v12 = vmul.f32 0.00390625, %v520_v20  ;;  %v1987_v33 = vadd.f32 %v1986_v28, %v1985_v27  ;;  %v650_v34 = vmul.f32 0.00390625, %v521_v25  ;;  %v534_v25 = vld [vmem:[%s15217_s0 + $0xf0] sm:$0xff] }
  0x87   : > { %9654 = vlog2.f32 %v11715_v11  ;;  %v651_v3 = vmul.f32 0.00390625, %v522_v30  ;;  %v713_v16 = vmul.f32 0.00390625, %v584_v9  ;;  %v715_v23 = vmul.f32 0.00390625, %v586_v2 }
  0x88   : > { %9656 = vlog2.f32 %v11717_v7  ;;  %1988 = vadd.xlane.f32.xlu0 %v1987_v33  ;;  %v716_v1 = vmul.f32 0.00390625, %v587_v48  ;;  %v777_v35 = vmul.f32 0.99999, %v649_v12  ;;  %v778_v4 = vmul.f32 0.99999, %v650_v34 }
  0x89   : > { %9658 = vlog2.f32 %v1421_v21  ;;  %v779_v38 = vmul.f32 0.99999, %v651_v3  ;;  %v780_v14 = vmul.f32 0.99999, %v652_v52  ;;  %v841_v39 = vmul.f32 0.99999, %v713_v16 }
  0x8a   : > { %9660 = vlog2.f32 %v1422_v22  ;;  %v842_v60 = vmul.f32 0.99999, %v714_v13  ;;  %v843_v42 = vmul.f32 0.99999, %v715_v23  ;;  %v844_v37 = vmul.f32 0.99999, %v716_v1 }
  0x8b   : > { %9662 = vlog2.f32 %v1423_v24  ;;  %v11754_v43 = vadd.f32 5e-06, %v777_v35  ;;  %v11756_v5 = vadd.f32 5e-06, %v778_v4  ;;  %v11758_v10 = vadd.f32 5e-06, %v779_v38 }
  0x8c   : > { %9664 = vlog2.f32 %v1424_v29  ;;  %v11760_v41 = vadd.f32 5e-06, %v780_v14  ;;  %v11762_v18 = vadd.f32 5e-06, %v841_v39  ;;  %v11764_v49 = vadd.f32 5e-06, %v842_v60 }
  0x8d   : > { %9666 = vlog2.f32 %v1485_v0  ;;  %v11766_v45 = vadd.f32 5e-06, %v843_v42  ;;  %v11768_v50 = vadd.f32 5e-06, %v844_v37  ;;  %v1417_v47 = vsub.f32 1.0, %v11754_v43  ;;  %v533_v24 = vld [vmem:[%s15217_s0 + $0xe8] sm:$0xff] }
  0x8e   : > { %v9643_v46 = vpop.eup %9642  ;;  %9668 = vlog2.f32 %v1486_v40  ;;  %v1418_v55 = vsub.f32 1.0, %v11756_v5  ;;  %v1419_v54 = vsub.f32 1.0, %v11758_v10  ;;  %v1420_v19 = vsub.f32 1.0, %v11760_v41 }
  0x8f   : > { %v9645_v51 = vpop.eup %9644  ;;  %v11770_v53 = vmul.f32 0.6931472, %v9643_v46  ;;  %9670 = vlog2.f32 %v1487_v8  ;;  %v1481_v62 = vsub.f32 1.0, %v11762_v18  ;;  %v1482_v7 = vsub.f32 1.0, %v11764_v49  ;;  %v535_v8 = vld [vmem:[%s15217_s0 + $0xf8] sm:$0xff] }
  0x90   : > { %v9647_v57 = vpop.eup %9646  ;;  %v11774_v6 = vmul.f32 0.6931472, %v9645_v51  ;;  %9672 = vlog2.f32 %v1488_v32  ;;  %v1483_v22 = vsub.f32 1.0, %v11766_v45  ;;  %v1484_v29 = vsub.f32 1.0, %v11768_v50 }
  0x91   : > { %v9649_v58 = vpop.eup %9648  ;;  %v11778_v59 = vmul.f32 0.6931472, %v9647_v57  ;;  %v1293_v61 = vsub.f32 0.0, %v11770_v53  ;;  %9674 = vlog2.f32 %v11754_v43  ;;  %v11814_v31 = vmul.f32 0.00390625, %v532_v36 }
  0x92   : > { %v9651_v63 = vpop.eup %9650  ;;  %v11783_v56 = vmul.f32 0.6931472, %v9649_v58  ;;  %v1294_v11 = vsub.f32 0.0, %v11774_v6  ;;  %9676 = vlog2.f32 %v11756_v5  ;;  %v11820_v32 = vmul.f32 0.00390625, %v533_v24 }
  0x93   : > { %v9653_v15 = vpop.eup %9652  ;;  %v11791_v17 = vmul.f32 0.6931472, %v9651_v63  ;;  %v1295_v21 = vsub.f32 0.0, %v11778_v59  ;;  %9678 = vlog2.f32 %v11758_v10  ;;  %v11824_v33 = vmul.f32 0.00390625, %v534_v25 }
  0x94   : > { %v9655_v20 = vpop.eup %9654  ;;  %v11799_v26 = vmul.f32 0.6931472, %v9653_v15  ;;  %v1296_v27 = vsub.f32 0.0, %v11783_v56  ;;  %9680 = vlog2.f32 %v11760_v41  ;;  %v11828_v16 = vmul.f32 0.00390625, %v535_v8 }
  0x95   : > { %v9657_v30 = vpop.eup %9656  ;;  %v11807_v0 = vmul.f32 0.6931472, %v9655_v20  ;;  %v1357_v40 = vsub.f32 0.0, %v11791_v17  ;;  %9682 = vlog2.f32 %v11762_v18 }
  0x96   : > { %v9659_v9 = vpop.eup %9658  ;;  %v11816_v44 = vmul.f32 0.6931472, %v9657_v30  ;;  %v1358_v28 = vsub.f32 0.0, %v11799_v26  ;;  %9684 = vlog2.f32 %v11764_v49  ;;  %v596_v49 = vld [vmem:[%s15217_s0 + $0x2e0] sm:$0xff] }
  0x97   : > { %v9661_v2 = vpop.eup %9660  ;;  %v1359_v48 = vsub.f32 0.0, %v11807_v0  ;;  %v1570_v12 = vmul.f32 0.6931472, %v9659_v9  ;;  %9686 = vlog2.f32 %v11766_v45  ;;  %v599_v9 = vld [vmem:[%s15217_s0 + $0x2f8] sm:$0xff] }
  0x98   : > { %v9663_v34 = vpop.eup %9662  ;;  %v1360_v3 = vsub.f32 0.0, %v11816_v44  ;;  %v1572_v52 = vmul.f32 0.6931472, %v9661_v2  ;;  %9688 = vlog2.f32 %v11768_v50 }
  0x99   : > { %v9665_v13 = vpop.eup %9664  ;;  %v1574_v23 = vmul.f32 0.6931472, %v9663_v34  ;;  %v1805_v1 = vsub.f32 %v1293_v61, %v1570_v12  ;;  %v2127_v35 = vsub.f32 %v11770_v53, %v1570_v12  ;;  %9690 = vlog2.f32 %v1417_v47 }
  0x9a   : > { %v9667_v4 = vpop.eup %9666  ;;  %v1576_v38 = vmul.f32 0.6931472, %v9665_v13  ;;  %v1806_v14 = vsub.f32 %v1294_v11, %v1572_v52  ;;  %v2128_v39 = vsub.f32 %v11774_v6, %v1572_v52  ;;  %9692 = vlog2.f32 %v1418_v55 }
  0x9b   : > { %v9669_v60 = vpop.eup %9668  ;;  %v1698_v42 = vmul.f32 0.6931472, %v9667_v4  ;;  %v1807_v37 = vsub.f32 %v1295_v21, %v1574_v23  ;;  %v2129_v43 = vsub.f32 %v11778_v59, %v1574_v23  ;;  %2255 = vst [vmem:[#allocation2 + $0xa0] sm:$0xff] %v2127_v35  ;;  %9694 = vlog2.f32 %v1419_v54 }
  0x9c   : > { %v9671_v5 = vpop.eup %9670  ;;  %v1700_v10 = vmul.f32 0.6931472, %v9669_v60  ;;  %v1808_v46 = vsub.f32 %v1296_v27, %v1576_v38  ;;  %v2130_v51 = vsub.f32 %v11783_v56, %v1576_v38  ;;  %2256 = vst [vmem:[#allocation2 + $0xa8] sm:$0xff] %v2128_v39  ;;  %9696 = vlog2.f32 %v1420_v19 }
  0x9d   : > { %v9673_v53 = vpop.eup %9672  ;;  %v1702_v47 = vmul.f32 0.6931472, %v9671_v5  ;;  %v1869_v57 = vsub.f32 %v1357_v40, %v1698_v42  ;;  %v2191_v55 = vsub.f32 %v11791_v17, %v1698_v42  ;;  %2257 = vst [vmem:[#allocation2 + $0xb0] sm:$0xff] %v2129_v43  ;;  %9698 = vlog2.f32 %v1481_v62  ;;  %v598_v40 = vld [vmem:[%s15217_s0 + $0x2f0] sm:$0xff] }
  0x9e   : > { %v9675_v6 = vpop.eup %9674  ;;  %v1704_v54 = vmul.f32 0.6931472, %v9673_v53  ;;  %v1870_v58 = vsub.f32 %v1358_v28, %v1700_v10  ;;  %v2192_v59 = vsub.f32 %v11799_v26, %v1700_v10  ;;  %2258 = vst.msk [vmem:[#allocation2 + $0xb8] sm:$0xff] %vm1979_vm0, %v2130_v51  ;;  %9700 = vlog2.f32 %v1482_v7 }
  0x9f   : > { %v9677_v41 = vpop.eup %9676  ;;  %v1871_v19 = vsub.f32 %v1359_v48, %v1702_v47  ;;  %v1933_v61 = vadd.f32 %v1869_v57, %v1805_v1  ;;  %v2193_v63 = vsub.f32 %v11807_v0, %v1702_v47  ;;  %2319 = vst [vmem:[#allocation2 + $0x2a0] sm:$0xff] %v2191_v55  ;;  %v11844_v56 = vmul.f32 0.6931472, %v9675_v6  ;;  %v597_v0 = vld [vmem:[%s15217_s0 + $0x2e8] sm:$0xff] }
  0xa0   : > { %v9679_v18 = vpop.eup %9678  ;;  %v1872_v62 = vsub.f32 %v1360_v3, %v1704_v54  ;;  %v1934_v11 = vadd.f32 %v1870_v58, %v1806_v14  ;;  %v2194_v36 = vsub.f32 %v11816_v44, %v1704_v54  ;;  %2320 = vst [vmem:[#allocation2 + $0x2a8] sm:$0xff] %v2192_v59  ;;  %v11847_v15 = vmul.f32 0.6931472, %v9677_v41  ;;  %v528_v3 = vld [vmem:[%s15217_s0 + $0xc0] sm:$0xff]  ;;  %v529_v1 = vld [vmem:[%s15217_s0 + $0xc8] sm:$0xff] }
  0xa1   : > { %v9681_v7 = vpop.eup %9680  ;;  %v1935_v17 = vadd.f32 %v1871_v19, %v1807_v37  ;;  %2321 = vst [vmem:[#allocation2 + $0x2b0] sm:$0xff] %v2193_v63  ;;  %v11852_v21 = vmul.f32 0.6931472, %v9679_v18  ;;  %v1289_v24 = vsub.f32 0.0, %v11844_v56  ;;  %9702 = vlog2.f32 %v1483_v22 }
  0xa2   : > { %v9683_v20 = vpop.eup %9682  ;;  %v1936_v26 = vadd.f32 %v1872_v62, %v1808_v46  ;;  %v2008_v27 = vadd.f32 %v1934_v11, %v1933_v61  ;;  %2322 = vst.msk [vmem:[#allocation2 + $0x2b8] sm:$0xff] %vm1979_vm0, %v2194_v36  ;;  %v11858_v25 = vmul.f32 0.6931472, %v9681_v7  ;;  %v1290_v30 = vsub.f32 0.0, %v11847_v15 }
  0xa3   : > { %v9685_v8 = vpop.eup %9684  ;;  %v11867_v45 = vmul.f32 0.6931472, %v9683_v20  ;;  %v1291_v22 = vsub.f32 0.0, %v11852_v21  ;;  %9704 = vlog2.f32 %v1484_v29  ;;  %v725_v44 = vmul.f32 0.00390625, %v596_v49 }
  0xa4   : > { %v9687_v28 = vpop.eup %9686  ;;  %v2009_v2 = vadd.f32 %v2008_v27, %v1935_v17  ;;  %v2010_v48 = vsel %vm1979_vm0, %v1936_v26, 0.0  ;;  %v11876_v12 = vmul.f32 0.6931472, %v9685_v8  ;;  %v1292_v34 = vsub.f32 0.0, %v11858_v25 }
  0xa5   : > { %v9689_v52 = vpop.eup %9688  ;;  %v11882_v50 = vmul.f32 0.6931472, %v9687_v28  ;;  %v1353_v29 = vsub.f32 0.0, %v11867_v45  ;;  %v726_v13 = vmul.f32 0.00390625, %v597_v0  ;;  %v727_v23 = vmul.f32 0.00390625, %v598_v40 }
  0xa6   : > { %v9691_v35 = vpop.eup %9690  ;;  %v2011_v4 = vadd.f32 %v2010_v48, %v2009_v2  ;;  %v11888_v38 = vmul.f32 0.6931472, %v9689_v52  ;;  %v1354_v14 = vsub.f32 0.0, %v11876_v12  ;;  %v728_v39 = vmul.f32 0.00390625, %v599_v9 }
  0xa7   : > { %v9693_v60 = vpop.eup %9692  ;;  %v1355_v42 = vsub.f32 0.0, %v11882_v50  ;;  %v1562_v37 = vmul.f32 0.6931472, %v9691_v35  ;;  %v789_v43 = vmul.f32 0.99999, %v11814_v31  ;;  %v11893_v5 = vmul.f32 0.00390625, %v528_v3 }
  0xa8   : > { %v9695_v10 = vpop.eup %9694  ;;  %2012 = vadd.xlane.f32.xlu1 %v2011_v4  ;;  %v1356_v46 = vsub.f32 0.0, %v11888_v38  ;;  %v1564_v51 = vmul.f32 0.6931472, %v9693_v60  ;;  %v790_v53 = vmul.f32 0.99999, %v11820_v32  ;;  %v11897_v47 = vmul.f32 0.00390625, %v529_v1 }
  0xa9   : > { %v9697_v57 = vpop.eup %9696  ;;  %v1566_v55 = vmul.f32 0.6931472, %v9695_v10  ;;  %v1801_v6 = vsub.f32 %v1289_v24, %v1562_v37  ;;  %v2123_v54 = vsub.f32 %v11844_v56, %v1562_v37  ;;  %v791_v58 = vmul.f32 0.99999, %v11824_v33  ;;  %v530_v1 = vld [vmem:[%s15217_s0 + $0xd0] sm:$0xff]  ;;  %v593_v37 = vld [vmem:[%s15217_s0 + $0x2c8] sm:$0xff] }
  0xaa   : > { %v9699_v59 = vpop.eup %9698  ;;  %v1568_v31 = vmul.f32 0.6931472, %v9697_v57  ;;  %v1802_v41 = vsub.f32 %v1290_v30, %v1564_v51  ;;  %v2124_v19 = vsub.f32 %v11847_v15, %v1564_v51  ;;  %v792_v61 = vmul.f32 0.99999, %v11828_v16  ;;  %v595_v51 = vld [vmem:[%s15217_s0 + $0x2d8] sm:$0xff] }
  0xab   : > { %v9701_v63 = vpop.eup %9700  ;;  %v1690_v18 = vmul.f32 0.6931472, %v9699_v59  ;;  %v1803_v62 = vsub.f32 %v1291_v22, %v1566_v55  ;;  %v2125_v32 = vsub.f32 %v11852_v21, %v1566_v55  ;;  %2251 = vst [vmem:[#allocation2 + $0x80] sm:$0xff] %v2123_v54  ;;  %v853_v11 = vmul.f32 0.99999, %v725_v44 }
  0xac   : > { %v1692_v36 = vmul.f32 0.6931472, %v9701_v63  ;;  %v1804_v49 = vsub.f32 %v1292_v34, %v1568_v31  ;;  %v2126_v56 = vsub.f32 %v11858_v25, %v1568_v31  ;;  %2252 = vst [vmem:[#allocation2 + $0x88] sm:$0xff] %v2124_v19  ;;  %v854_v33 = vmul.f32 0.99999, %v726_v13 }
  0xad   : > { %v1865_v7 = vsub.f32 %v1353_v29, %v1690_v18  ;;  %v2187_v17 = vsub.f32 %v11867_v45, %v1690_v18  ;;  %2253 = vst [vmem:[#allocation2 + $0x90] sm:$0xff] %v2125_v32  ;;  %v855_v15 = vmul.f32 0.99999, %v727_v23  ;;  %v856_v24 = vmul.f32 0.99999, %v728_v39 }
  0xae   : > { %v9703_v16 = vpop.eup %9702  ;;  %v1866_v20 = vsub.f32 %v1354_v14, %v1692_v36  ;;  %v2188_v26 = vsub.f32 %v11876_v12, %v1692_v36  ;;  %2254 = vst.msk [vmem:[#allocation2 + $0x98] sm:$0xff] %vm1979_vm0, %v2126_v56  ;;  %v917_v21 = vadd.f32 5e-06, %v789_v43  ;;  %v918_v27 = vadd.f32 5e-06, %v790_v53  ;;  %v531_v14 = vld [vmem:[%s15217_s0 + $0xd8] sm:$0xff] }
  0xaf   : > { %v1694_v30 = vmul.f32 0.6931472, %v9703_v16  ;;  %v1929_v0 = vadd.f32 %v1865_v7, %v1801_v6  ;;  %2315 = vst [vmem:[#allocation2 + $0x280] sm:$0xff] %v2187_v17  ;;  %v919_v25 = vadd.f32 5e-06, %v791_v58  ;;  %v594_v43 = vld [vmem:[%s15217_s0 + $0x2d0] sm:$0xff] }
  0xb0   : > { %v11908_v40 = vadd.f32 5e-06, %v792_v61  ;;  %v9705_v8 = vpop.eup %9704  ;;  %v1930_v22 = vadd.f32 %v1866_v20, %v1802_v41  ;;  %2316 = vst [vmem:[#allocation2 + $0x288] sm:$0xff] %v2188_v26  ;;  %v11910_v45 = vadd.f32 5e-06, %v853_v11  ;;  %9706 = vlog2.f32 %v917_v21 }
  0xb1   : > { %v11912_v9 = vadd.f32 5e-06, %v854_v33  ;;  %v11914_v44 = vadd.f32 5e-06, %v855_v15  ;;  %v1696_v28 = vmul.f32 0.6931472, %v9705_v8  ;;  %v1867_v2 = vsub.f32 %v1355_v42, %v1694_v30 }
  0xb2   : > { %v2189_v48 = vsub.f32 %v11882_v50, %v1694_v30  ;;  %v11917_v12 = vadd.f32 5e-06, %v856_v24  ;;  %v2002_v34 = vadd.f32 %v1930_v22, %v1929_v0  ;;  %v1429_v3 = vsub.f32 1.0, %v917_v21  ;;  %v540_v21 = vld [vmem:[%s15217_s0 + $0x120] sm:$0xff] }
  0xb3   : > { %v1430_v52 = vsub.f32 1.0, %v918_v27  ;;  %v1868_v29 = vsub.f32 %v1356_v46, %v1696_v28  ;;  %v1931_v13 = vadd.f32 %v1867_v2, %v1803_v62  ;;  %v2190_v23 = vsub.f32 %v11888_v38, %v1696_v28  ;;  %v592_v38 = vld [vmem:[%s15217_s0 + $0x2c0] sm:$0xff] }
  0xb4   : > { %2317 = vst [vmem:[#allocation2 + $0x290] sm:$0xff] %v2189_v48  ;;  %9708 = vlog2.f32 %v918_v27  ;;  %v1431_v35 = vsub.f32 1.0, %v919_v25  ;;  %v1432_v50 = vsub.f32 1.0, %v11908_v40  ;;  %v1493_v4 = vsub.f32 1.0, %v11910_v45 }
  0xb5   : > { %9710 = vlog2.f32 %v919_v25  ;;  %v1932_v39 = vadd.f32 %v1868_v29, %v1804_v49  ;;  %v2003_v60 = vadd.f32 %v2002_v34, %v1931_v13  ;;  %2318 = vst.msk [vmem:[#allocation2 + $0x298] sm:$0xff] %vm1979_vm0, %v2190_v23  ;;  %v1494_v42 = vsub.f32 1.0, %v11912_v9  ;;  %v604_v13 = vld [vmem:[%s15217_s0 + $0x320] sm:$0xff] }
  0xb6   : > { %9712 = vlog2.f32 %v11908_v40  ;;  %v1495_v10 = vsub.f32 1.0, %v11914_v44  ;;  %v1496_v46 = vsub.f32 1.0, %v11917_v12  ;;  %v659_v53 = vmul.f32 0.00390625, %v530_v1  ;;  %v541_v40 = vld [vmem:[%s15217_s0 + $0x128] sm:$0xff] }
  0xb7   : > { %9714 = vlog2.f32 %v11910_v45  ;;  %v2004_v57 = vsel %vm1979_vm0, %v1932_v39, 0.0  ;;  %v660_v55 = vmul.f32 0.00390625, %v531_v14  ;;  %v721_v6 = vmul.f32 0.00390625, %v592_v38 }
  0xb8   : > { %9716 = vlog2.f32 %v11912_v9  ;;  %v2005_v54 = vadd.f32 %v2004_v57, %v2003_v60  ;;  %v722_v58 = vmul.f32 0.00390625, %v593_v37  ;;  %v723_v59 = vmul.f32 0.00390625, %v594_v43 }
  0xb9   : > { %9718 = vlog2.f32 %v11914_v44  ;;  %v724_v31 = vmul.f32 0.00390625, %v595_v51  ;;  %v785_v41 = vmul.f32 0.99999, %v11893_v5  ;;  %v786_v19 = vmul.f32 0.99999, %v11897_v47  ;;  %v542_v44 = vld [vmem:[%s15217_s0 + $0x130] sm:$0xff] }
  0xba   : > { %9720 = vlog2.f32 %v11917_v12  ;;  %2006 = vadd.xlane.f32.xlu0 %v2005_v54  ;;  %v787_v61 = vmul.f32 0.99999, %v659_v53  ;;  %v788_v63 = vmul.f32 0.99999, %v660_v55  ;;  %v849_v18 = vmul.f32 0.99999, %v721_v6 }
  0xbb   : > { %9722 = vlog2.f32 %v1429_v3  ;;  %v850_v62 = vmul.f32 0.99999, %v722_v58  ;;  %v851_v32 = vmul.f32 0.99999, %v723_v59  ;;  %v852_v11 = vmul.f32 0.99999, %v724_v31 }
  0xbc   : > { %9724 = vlog2.f32 %v1430_v52  ;;  %v11952_v36 = vadd.f32 5e-06, %v785_v41  ;;  %v11954_v49 = vadd.f32 5e-06, %v786_v19  ;;  %v11956_v56 = vadd.f32 5e-06, %v787_v61 }
  0xbd   : > { %9726 = vlog2.f32 %v1431_v35  ;;  %v11958_v5 = vadd.f32 5e-06, %v788_v63  ;;  %v11960_v47 = vadd.f32 5e-06, %v849_v18  ;;  %v11962_v33 = vadd.f32 5e-06, %v850_v62  ;;  %v9707_v24 = vpop.eup %9706 }
  0xbe   : > { %9728 = vlog2.f32 %v1432_v50  ;;  %v11964_v7 = vadd.f32 5e-06, %v851_v32  ;;  %v11966_v17 = vadd.f32 5e-06, %v852_v11  ;;  %v1425_v15 = vsub.f32 1.0, %v11952_v36  ;;  %v543_v12 = vld [vmem:[%s15217_s0 + $0x138] sm:$0xff] }
  0xbf   : > { %9730 = vlog2.f32 %v1493_v4  ;;  %v1426_v16 = vsub.f32 1.0, %v11954_v49  ;;  %v1427_v20 = vsub.f32 1.0, %v11956_v56  ;;  %v1428_v26 = vsub.f32 1.0, %v11958_v5  ;;  %v605_v4 = vld [vmem:[%s15217_s0 + $0x328] sm:$0xff]  ;;  %v607_v51 = vld [vmem:[%s15217_s0 + $0x338] sm:$0xff] }
  0xc0   : > { %9732 = vlog2.f32 %v1494_v42  ;;  %v11975_v30 = vmul.f32 0.6931472, %v9707_v24  ;;  %v1489_v0 = vsub.f32 1.0, %v11960_v47  ;;  %v1490_v25 = vsub.f32 1.0, %v11962_v33  ;;  %v606_v42 = vld [vmem:[%s15217_s0 + $0x330] sm:$0xff] }
  0xc1   : > { %v9709_v27 = vpop.eup %9708  ;;  %9734 = vlog2.f32 %v1495_v10  ;;  %v1491_v45 = vsub.f32 1.0, %v11964_v7  ;;  %v1492_v9 = vsub.f32 1.0, %v11966_v17  ;;  %v11996_v34 = vmul.f32 0.00390625, %v540_v21 }
  0xc2   : > { %v9711_v8 = vpop.eup %9710  ;;  %v11982_v22 = vmul.f32 0.6931472, %v9709_v27  ;;  %9736 = vlog2.f32 %v1496_v46  ;;  %v1301_v48 = vsub.f32 0.0, %v11975_v30  ;;  %v12005_v23 = vmul.f32 0.00390625, %v541_v40 }
  0xc3   : > { %v9713_v28 = vpop.eup %9712  ;;  %v11989_v2 = vmul.f32 0.6931472, %v9711_v8  ;;  %9738 = vlog2.f32 %v11952_v36  ;;  %v12014_v14 = vmul.f32 0.00390625, %v542_v44  ;;  %v12023_v37 = vmul.f32 0.00390625, %v543_v12 }
  0xc4   : > { %v9715_v3 = vpop.eup %9714  ;;  %v11998_v52 = vmul.f32 0.6931472, %v9713_v28  ;;  %v1302_v29 = vsub.f32 0.0, %v11982_v22  ;;  %9740 = vlog2.f32 %v11954_v49  ;;  %v12032_v53 = vmul.f32 0.00390625, %v604_v13 }
  0xc5   : > { %v9717_v1 = vpop.eup %9716  ;;  %v12007_v35 = vmul.f32 0.6931472, %v9715_v3  ;;  %v1303_v50 = vsub.f32 0.0, %v11989_v2  ;;  %9742 = vlog2.f32 %v11956_v56  ;;  %v12038_v54 = vmul.f32 0.00390625, %v605_v4 }
  0xc6   : > { %v9719_v38 = vpop.eup %9718  ;;  %v12016_v39 = vmul.f32 0.6931472, %v9717_v1  ;;  %v1304_v60 = vsub.f32 0.0, %v11998_v52  ;;  %9744 = vlog2.f32 %v11958_v5  ;;  %v12042_v41 = vmul.f32 0.00390625, %v606_v42 }
  0xc7   : > { %v9721_v43 = vpop.eup %9720  ;;  %v12025_v10 = vmul.f32 0.6931472, %v9719_v38  ;;  %v1365_v46 = vsub.f32 0.0, %v12007_v35  ;;  %9746 = vlog2.f32 %v11960_v47  ;;  %v12046_v18 = vmul.f32 0.00390625, %v607_v51 }
  0xc8   : > { %v9723_v57 = vpop.eup %9722  ;;  %v12034_v55 = vmul.f32 0.6931472, %v9721_v43  ;;  %v1366_v6 = vsub.f32 0.0, %v12016_v39  ;;  %9748 = vlog2.f32 %v11962_v33 }
  0xc9   : > { %v9725_v58 = vpop.eup %9724  ;;  %v1367_v59 = vsub.f32 0.0, %v12025_v10  ;;  %v1586_v31 = vmul.f32 0.6931472, %v9723_v57  ;;  %9750 = vlog2.f32 %v11964_v7  ;;  %v536_v57 = vld [vmem:[%s15217_s0 + $0x100] sm:$0xff]  ;;  %v797_v7 = vmul.f32 0.99999, %v11996_v34 }
  0xca   : > { %v9727_v19 = vpop.eup %9726  ;;  %v1368_v61 = vsub.f32 0.0, %v12034_v55  ;;  %v1588_v63 = vmul.f32 0.6931472, %v9725_v58  ;;  %9752 = vlog2.f32 %v11966_v17 }
  0xcb   : > { %v9729_v62 = vpop.eup %9728  ;;  %v1590_v32 = vmul.f32 0.6931472, %v9727_v19  ;;  %v1813_v11 = vsub.f32 %v1301_v48, %v1586_v31  ;;  %v2135_v24 = vsub.f32 %v11975_v30, %v1586_v31  ;;  %9754 = vlog2.f32 %v1425_v15 }
  0xcc   : > { %v9731_v21 = vpop.eup %9730  ;;  %v1592_v27 = vmul.f32 0.6931472, %v9729_v62  ;;  %v1814_v40 = vsub.f32 %v1302_v29, %v1588_v63  ;;  %v2136_v8 = vsub.f32 %v11982_v22, %v1588_v63  ;;  %9756 = vlog2.f32 %v1426_v16  ;;  %v537_v63 = vld [vmem:[%s15217_s0 + $0x108] sm:$0xff]  ;;  %v538_v62 = vld [vmem:[%s15217_s0 + $0x110] sm:$0xff] }
  0xcd   : > { %v9733_v44 = vpop.eup %9732  ;;  %v1714_v28 = vmul.f32 0.6931472, %v9731_v21  ;;  %v1815_v12 = vsub.f32 %v1303_v50, %v1590_v32  ;;  %v2137_v3 = vsub.f32 %v11989_v2, %v1590_v32  ;;  %2263 = vst [vmem:[#allocation2 + $0xe0] sm:$0xff] %v2135_v24  ;;  %9758 = vlog2.f32 %v1427_v20 }
  0xce   : > { %v9735_v30 = vpop.eup %9734  ;;  %v1716_v36 = vmul.f32 0.6931472, %v9733_v44  ;;  %v1816_v15 = vsub.f32 %v1304_v60, %v1592_v27  ;;  %v2138_v48 = vsub.f32 %v11998_v52, %v1592_v27  ;;  %2264 = vst [vmem:[#allocation2 + $0xe8] sm:$0xff] %v2136_v8  ;;  %9760 = vlog2.f32 %v1428_v26 }
  0xcf   : > { %v9737_v49 = vpop.eup %9736  ;;  %v1718_v16 = vmul.f32 0.6931472, %v9735_v30  ;;  %v1877_v22 = vsub.f32 %v1365_v46, %v1714_v28  ;;  %v2199_v29 = vsub.f32 %v12007_v35, %v1714_v28  ;;  %2265 = vst [vmem:[#allocation2 + $0xf0] sm:$0xff] %v2137_v3  ;;  %9762 = vlog2.f32 %v1489_v0 }
  0xd0   : > { %v9739_v56 = vpop.eup %9738  ;;  %v1720_v20 = vmul.f32 0.6931472, %v9737_v49  ;;  %v1878_v2 = vsub.f32 %v1366_v6, %v1716_v36  ;;  %v2200_v13 = vsub.f32 %v12016_v39, %v1716_v36  ;;  %2266 = vst.msk [vmem:[#allocation2 + $0xf8] sm:$0xff] %vm1979_vm0, %v2138_v48  ;;  %9764 = vlog2.f32 %v1490_v25 }
  0xd1   : > { %v9741_v5 = vpop.eup %9740  ;;  %v1879_v26 = vsub.f32 %v1367_v59, %v1718_v16  ;;  %v1941_v52 = vadd.f32 %v1877_v22, %v1813_v11  ;;  %v2201_v1 = vsub.f32 %v12025_v10, %v1718_v16  ;;  %2327 = vst [vmem:[#allocation2 + $0x2e0] sm:$0xff] %v2199_v29  ;;  %v12068_v35 = vmul.f32 0.6931472, %v9739_v56 }
  0xd2   : > { %v9743_v47 = vpop.eup %9742  ;;  %v1880_v0 = vsub.f32 %v1368_v61, %v1720_v20  ;;  %v1942_v50 = vadd.f32 %v1878_v2, %v1814_v40  ;;  %v2202_v4 = vsub.f32 %v12034_v55, %v1720_v20  ;;  %2328 = vst [vmem:[#allocation2 + $0x2e8] sm:$0xff] %v2200_v13  ;;  %v12071_v38 = vmul.f32 0.6931472, %v9741_v5 }
  0xd3   : > { %v9745_v39 = vpop.eup %9744  ;;  %v1943_v60 = vadd.f32 %v1879_v26, %v1815_v12  ;;  %2329 = vst [vmem:[#allocation2 + $0x2f0] sm:$0xff] %v2201_v1  ;;  %v12073_v33 = vmul.f32 0.6931472, %v9743_v47  ;;  %v1297_v25 = vsub.f32 0.0, %v12068_v35  ;;  %9766 = vlog2.f32 %v1491_v45 }
  0xd4   : > { %v9747_v42 = vpop.eup %9746  ;;  %v1944_v43 = vadd.f32 %v1880_v0, %v1816_v15  ;;  %v2020_v10 = vadd.f32 %v1942_v50, %v1941_v52  ;;  %2330 = vst.msk [vmem:[#allocation2 + $0x2f8] sm:$0xff] %vm1979_vm0, %v2202_v4  ;;  %v12079_v46 = vmul.f32 0.6931472, %v9745_v39  ;;  %v1298_v51 = vsub.f32 0.0, %v12071_v38 }
  0xd5   : > { %v9749_v55 = vpop.eup %9748  ;;  %v12085_v6 = vmul.f32 0.6931472, %v9747_v42  ;;  %v1299_v58 = vsub.f32 0.0, %v12073_v33  ;;  %9768 = vlog2.f32 %v1492_v9  ;;  %v798_v32 = vmul.f32 0.99999, %v12005_v23 }
  0xd6   : > { %v9751_v45 = vpop.eup %9750  ;;  %v2021_v59 = vadd.f32 %v2020_v10, %v1943_v60  ;;  %v2022_v31 = vsel %vm1979_vm0, %v1944_v43, 0.0  ;;  %v12092_v19 = vmul.f32 0.6931472, %v9749_v55  ;;  %v1300_v61 = vsub.f32 0.0, %v12079_v46 }
  0xd7   : > { %v9753_v17 = vpop.eup %9752  ;;  %v12101_v9 = vmul.f32 0.6931472, %v9751_v45  ;;  %v1361_v34 = vsub.f32 0.0, %v12085_v6  ;;  %v12105_v11 = vmul.f32 0.00390625, %v536_v57  ;;  %v799_v8 = vmul.f32 0.99999, %v12014_v14 }
  0xd8   : > { %v9755_v24 = vpop.eup %9754  ;;  %v2023_v21 = vadd.f32 %v2022_v31, %v2021_v59  ;;  %v12107_v27 = vmul.f32 0.6931472, %v9753_v17  ;;  %v1362_v40 = vsub.f32 0.0, %v12092_v19  ;;  %v800_v3 = vmul.f32 0.99999, %v12023_v37 }
  0xd9   : > { %v9757_v44 = vpop.eup %9756  ;;  %v1363_v28 = vsub.f32 0.0, %v12101_v9  ;;  %v1578_v12 = vmul.f32 0.6931472, %v9755_v24  ;;  %v12113_v30 = vmul.f32 0.00390625, %v537_v63  ;;  %v861_v48 = vmul.f32 0.99999, %v12032_v53 }
  0xda   : > { %v9759_v36 = vpop.eup %9758  ;;  %2024 = vadd.xlane.f32.xlu1 %v2023_v21  ;;  %v1364_v23 = vsub.f32 0.0, %v12107_v27  ;;  %v1580_v15 = vmul.f32 0.6931472, %v9757_v44  ;;  %v12117_v49 = vmul.f32 0.00390625, %v538_v62  ;;  %v862_v56 = vmul.f32 0.99999, %v12038_v54 }
  0xdb   : > { %v9761_v16 = vpop.eup %9760  ;;  %v1582_v22 = vmul.f32 0.6931472, %v9759_v36  ;;  %v1809_v14 = vsub.f32 %v1297_v25, %v1578_v12  ;;  %v2131_v29 = vsub.f32 %v12068_v35, %v1578_v12  ;;  %v863_v5 = vmul.f32 0.99999, %v12042_v41  ;;  %v603_v12 = vld [vmem:[%s15217_s0 + $0x318] sm:$0xff] }
  0xdc   : > { %v9763_v20 = vpop.eup %9762  ;;  %v1584_v37 = vmul.f32 0.6931472, %v9761_v16  ;;  %v1810_v2 = vsub.f32 %v1298_v51, %v1580_v15  ;;  %v2132_v13 = vsub.f32 %v12071_v38, %v1580_v15  ;;  %v864_v47 = vmul.f32 0.99999, %v12046_v18 }
  0xdd   : > { %v9765_v26 = vpop.eup %9764  ;;  %v1706_v52 = vmul.f32 0.6931472, %v9763_v20  ;;  %v1811_v1 = vsub.f32 %v1299_v58, %v1582_v22  ;;  %v2133_v53 = vsub.f32 %v12073_v33, %v1582_v22  ;;  %2259 = vst [vmem:[#allocation2 + $0xc0] sm:$0xff] %v2131_v29  ;;  %v925_v54 = vadd.f32 5e-06, %v797_v7 }
  0xde   : > { %v1708_v0 = vmul.f32 0.6931472, %v9765_v26  ;;  %v1812_v50 = vsub.f32 %v1300_v61, %v1584_v37  ;;  %v2134_v35 = vsub.f32 %v12079_v46, %v1584_v37  ;;  %2260 = vst [vmem:[#allocation2 + $0xc8] sm:$0xff] %v2132_v13  ;;  %v926_v38 = vadd.f32 5e-06, %v798_v32  ;;  %v600_v32 = vld [vmem:[%s15217_s0 + $0x300] sm:$0xff] }
  0xdf   : > { %v1873_v4 = vsub.f32 %v1361_v34, %v1706_v52  ;;  %v2195_v39 = vsub.f32 %v12085_v6, %v1706_v52  ;;  %2261 = vst [vmem:[#allocation2 + $0xd0] sm:$0xff] %v2133_v53  ;;  %v927_v41 = vadd.f32 5e-06, %v799_v8  ;;  %v928_v33 = vadd.f32 5e-06, %v800_v3  ;;  %v539_v34 = vld [vmem:[%s15217_s0 + $0x118] sm:$0xff] }
  0xe0   : > { %v9767_v60 = vpop.eup %9766  ;;  %v1874_v25 = vsub.f32 %v1362_v40, %v1708_v0  ;;  %v2196_v42 = vsub.f32 %v12092_v19, %v1708_v0  ;;  %2262 = vst.msk [vmem:[#allocation2 + $0xd8] sm:$0xff] %vm1979_vm0, %v2134_v35  ;;  %v12129_v18 = vadd.f32 5e-06, %v861_v48  ;;  %v12131_v46 = vadd.f32 5e-06, %v862_v56  ;;  %v602_v40 = vld [vmem:[%s15217_s0 + $0x310] sm:$0xff] }
  0xe1   : > { %v1710_v43 = vmul.f32 0.6931472, %v9767_v60  ;;  %v1937_v10 = vadd.f32 %v1873_v4, %v1809_v14  ;;  %2323 = vst [vmem:[#allocation2 + $0x2c0] sm:$0xff] %v2195_v39  ;;  %v12133_v51 = vadd.f32 5e-06, %v863_v5  ;;  %9770 = vlog2.f32 %v925_v54 }
  0xe2   : > { %v9769_v57 = vpop.eup %9768  ;;  %v1938_v55 = vadd.f32 %v1874_v25, %v1810_v2  ;;  %2324 = vst [vmem:[#allocation2 + $0x2c8] sm:$0xff] %v2196_v42  ;;  %v12135_v6 = vadd.f32 5e-06, %v864_v47  ;;  %v1437_v58 = vsub.f32 1.0, %v925_v54  ;;  %9772 = vlog2.f32 %v926_v38 }
  0xe3   : > { %v1712_v7 = vmul.f32 0.6931472, %v9769_v57  ;;  %v1875_v45 = vsub.f32 %v1363_v28, %v1710_v43  ;;  %v2197_v59 = vsub.f32 %v12101_v9, %v1710_v43  ;;  %9774 = vlog2.f32 %v927_v41 }
  0xe4   : > { %v2014_v31 = vadd.f32 %v1938_v55, %v1937_v10  ;;  %v1438_v19 = vsub.f32 1.0, %v926_v38  ;;  %v1439_v61 = vsub.f32 1.0, %v927_v41  ;;  %9776 = vlog2.f32 %v928_v33  ;;  %v548_v55 = vld [vmem:[%s15217_s0 + $0x160] sm:$0xff] }
  0xe5   : > { %v1876_v63 = vsub.f32 %v1364_v23, %v1712_v7  ;;  %v1939_v62 = vadd.f32 %v1875_v45, %v1811_v1  ;;  %v2198_v17 = vsub.f32 %v12107_v27, %v1712_v7  ;;  %2325 = vst [vmem:[#allocation2 + $0x2d0] sm:$0xff] %v2197_v59  ;;  %9778 = vlog2.f32 %v12129_v18  ;;  %v601_v27 = vld [vmem:[%s15217_s0 + $0x308] sm:$0xff] }
  0xe6   : > { %v1440_v9 = vsub.f32 1.0, %v928_v33  ;;  %v1501_v24 = vsub.f32 1.0, %v12129_v18  ;;  %v1502_v21 = vsub.f32 1.0, %v12131_v46  ;;  %9780 = vlog2.f32 %v12131_v46  ;;  %v549_v59 = vld [vmem:[%s15217_s0 + $0x168] sm:$0xff] }
  0xe7   : > { %v1940_v8 = vadd.f32 %v1876_v63, %v1812_v50  ;;  %v2015_v44 = vadd.f32 %v2014_v31, %v1939_v62  ;;  %2326 = vst.msk [vmem:[#allocation2 + $0x2d8] sm:$0xff] %vm1979_vm0, %v2198_v17  ;;  %v1503_v28 = vsub.f32 1.0, %v12133_v51  ;;  %9782 = vlog2.f32 %v12133_v51  ;;  %v550_v62 = vld [vmem:[%s15217_s0 + $0x170] sm:$0xff] }
  0xe8   : > { %v1504_v3 = vsub.f32 1.0, %v12135_v6  ;;  %v668_v36 = vmul.f32 0.00390625, %v539_v34  ;;  %v729_v23 = vmul.f32 0.00390625, %v600_v32  ;;  %9784 = vlog2.f32 %v12135_v6 }
  0xe9   : > { %v2016_v15 = vsel %vm1979_vm0, %v1940_v8, 0.0  ;;  %v730_v48 = vmul.f32 0.00390625, %v601_v27  ;;  %v731_v16 = vmul.f32 0.00390625, %v602_v40  ;;  %9786 = vlog2.f32 %v1437_v58 }
  0xea   : > { %v2017_v22 = vadd.f32 %v2016_v15, %v2015_v44  ;;  %v732_v14 = vmul.f32 0.00390625, %v603_v12  ;;  %v793_v29 = vmul.f32 0.99999, %v12105_v11  ;;  %9788 = vlog2.f32 %v1438_v19 }
  0xeb   : > { %v794_v56 = vmul.f32 0.99999, %v12113_v30  ;;  %v795_v20 = vmul.f32 0.99999, %v12117_v49  ;;  %v796_v37 = vmul.f32 0.99999, %v668_v36  ;;  %9790 = vlog2.f32 %v1439_v61 }
  0xec   : > { %2018 = vadd.xlane.f32.xlu0 %v2017_v22  ;;  %v857_v2 = vmul.f32 0.99999, %v729_v23  ;;  %v858_v13 = vmul.f32 0.99999, %v730_v48  ;;  %v859_v5 = vmul.f32 0.99999, %v731_v16  ;;  %9792 = vlog2.f32 %v1440_v9 }
  0xed   : > { %v860_v26 = vmul.f32 0.99999, %v732_v14  ;;  %v12167_v52 = vadd.f32 5e-06, %v793_v29  ;;  %v12169_v1 = vadd.f32 5e-06, %v794_v56  ;;  %9794 = vlog2.f32 %v1501_v24 }
  0xee   : > { %v12171_v53 = vadd.f32 5e-06, %v795_v20  ;;  %v12173_v11 = vadd.f32 5e-06, %v796_v37  ;;  %v12175_v30 = vadd.f32 5e-06, %v857_v2  ;;  %v9771_v49 = vpop.eup %9770  ;;  %9796 = vlog2.f32 %v1502_v21 }
  0xef   : > { %v12177_v47 = vadd.f32 5e-06, %v858_v13  ;;  %v12179_v0 = vadd.f32 5e-06, %v859_v5  ;;  %v12181_v50 = vadd.f32 5e-06, %v860_v26  ;;  %v9773_v35 = vpop.eup %9772  ;;  %9798 = vlog2.f32 %v1503_v28 }
  0xf0   : > { %v12183_v54 = vmul.f32 0.6931472, %v9771_v49  ;;  %v1433_v4 = vsub.f32 1.0, %v12167_v52  ;;  %v1434_v39 = vsub.f32 1.0, %v12169_v1  ;;  %v9775_v38 = vpop.eup %9774  ;;  %v12187_v41 = vmul.f32 0.6931472, %v9773_v35 }
  0xf1   : > { %9800 = vlog2.f32 %v1504_v3  ;;  %v1435_v60 = vsub.f32 1.0, %v12171_v53  ;;  %v1436_v25 = vsub.f32 1.0, %v12173_v11  ;;  %v9777_v42 = vpop.eup %9776  ;;  %v12191_v33 = vmul.f32 0.6931472, %v9775_v38  ;;  %v551_v9 = vld [vmem:[%s15217_s0 + $0x178] sm:$0xff] }
  0xf2   : > { %v1309_v18 = vsub.f32 0.0, %v12183_v54  ;;  %9802 = vlog2.f32 %v12167_v52  ;;  %v1497_v43 = vsub.f32 1.0, %v12175_v30  ;;  %v9779_v10 = vpop.eup %9778  ;;  %v12196_v46 = vmul.f32 0.6931472, %v9777_v42 }
  0xf3   : > { %v1310_v51 = vsub.f32 0.0, %v12187_v41  ;;  %9804 = vlog2.f32 %v12169_v1  ;;  %v1498_v57 = vsub.f32 1.0, %v12177_v47  ;;  %v9781_v6 = vpop.eup %9780  ;;  %v12204_v58 = vmul.f32 0.6931472, %v9779_v10 }
  0xf4   : > { %v1311_v7 = vsub.f32 0.0, %v12191_v33  ;;  %9806 = vlog2.f32 %v12171_v53  ;;  %v1499_v45 = vsub.f32 1.0, %v12179_v0  ;;  %v9783_v31 = vpop.eup %9782  ;;  %v12212_v19 = vmul.f32 0.6931472, %v9781_v6 }
  0xf5   : > { %v1312_v61 = vsub.f32 0.0, %v12196_v46  ;;  %9808 = vlog2.f32 %v12173_v11  ;;  %v1500_v63 = vsub.f32 1.0, %v12181_v50  ;;  %v9785_v17 = vpop.eup %9784  ;;  %v12220_v34 = vmul.f32 0.6931472, %v9783_v31 }
  0xf6   : > { %v1373_v32 = vsub.f32 0.0, %v12204_v58  ;;  %9810 = vlog2.f32 %v12175_v30  ;;  %v12227_v24 = vmul.f32 0.00390625, %v548_v55  ;;  %v9787_v21 = vpop.eup %9786  ;;  %v12229_v27 = vmul.f32 0.6931472, %v9785_v17 }
  0xf7   : > { %v1374_v40 = vsub.f32 0.0, %v12212_v19  ;;  %9812 = vlog2.f32 %v12177_v47  ;;  %v12233_v8 = vmul.f32 0.00390625, %v549_v59  ;;  %v9789_v44 = vpop.eup %9788  ;;  %v1375_v28 = vsub.f32 0.0, %v12220_v34  ;;  %v612_v47 = vld [vmem:[%s15217_s0 + $0x360] sm:$0xff] }
  0xf8   : > { %v1602_v12 = vmul.f32 0.6931472, %v9787_v21  ;;  %9814 = vlog2.f32 %v12179_v0  ;;  %v12237_v3 = vmul.f32 0.00390625, %v550_v62  ;;  %v9791_v36 = vpop.eup %9790  ;;  %v1376_v23 = vsub.f32 0.0, %v12229_v27  ;;  %v615_v21 = vld [vmem:[%s15217_s0 + $0x378] sm:$0xff] }
  0xf9   : > { %v1604_v15 = vmul.f32 0.6931472, %v9789_v44  ;;  %9816 = vlog2.f32 %v12181_v50  ;;  %v12241_v48 = vmul.f32 0.00390625, %v551_v9  ;;  %v9793_v16 = vpop.eup %9792  ;;  %v1606_v22 = vmul.f32 0.6931472, %v9791_v36 }
  0xfa   : > { %v1821_v14 = vsub.f32 %v1309_v18, %v1602_v12  ;;  %v2143_v29 = vsub.f32 %v12183_v54, %v1602_v12  ;;  %9818 = vlog2.f32 %v1433_v4  ;;  %v9795_v56 = vpop.eup %9794  ;;  %v1608_v20 = vmul.f32 0.6931472, %v9793_v16 }
  0xfb   : > { %v1822_v37 = vsub.f32 %v1310_v51, %v1604_v15  ;;  %v2144_v2 = vsub.f32 %v12187_v41, %v1604_v15  ;;  %9820 = vlog2.f32 %v1434_v39  ;;  %v9797_v13 = vpop.eup %9796  ;;  %v1730_v5 = vmul.f32 0.6931472, %v9795_v56 }
  0xfc   : > { %v1823_v26 = vsub.f32 %v1311_v7, %v1606_v22  ;;  %v2145_v52 = vsub.f32 %v12191_v33, %v1606_v22  ;;  %2271 = vst [vmem:[#allocation2 + $0x120] sm:$0xff] %v2143_v29  ;;  %9822 = vlog2.f32 %v1435_v60  ;;  %v9799_v1 = vpop.eup %9798  ;;  %v1732_v53 = vmul.f32 0.6931472, %v9797_v13 }
  0xfd   : > { %v1824_v49 = vsub.f32 %v1312_v61, %v1608_v20  ;;  %v2146_v35 = vsub.f32 %v12196_v46, %v1608_v20  ;;  %2272 = vst [vmem:[#allocation2 + $0x128] sm:$0xff] %v2144_v2  ;;  %9824 = vlog2.f32 %v1436_v25  ;;  %v1734_v4 = vmul.f32 0.6931472, %v9799_v1 }
  0xfe   : > { %v9801_v54 = vpop.eup %9800  ;;  %v1885_v38 = vsub.f32 %v1373_v32, %v1730_v5  ;;  %v2207_v39 = vsub.f32 %v12204_v58, %v1730_v5  ;;  %2273 = vst [vmem:[#allocation2 + $0x130] sm:$0xff] %v2145_v52  ;;  %9826 = vlog2.f32 %v1497_v43  ;;  %v1886_v42 = vsub.f32 %v1374_v40, %v1732_v53  ;;  %v614_v32 = vld [vmem:[%s15217_s0 + $0x370] sm:$0xff] }
  0xff   : > { %v9803_v41 = vpop.eup %9802  ;;  %v1736_v60 = vmul.f32 0.6931472, %v9801_v54  ;;  %v2208_v33 = vsub.f32 %v12212_v19, %v1732_v53  ;;  %2274 = vst.msk [vmem:[#allocation2 + $0x138] sm:$0xff] %vm1979_vm0, %v2146_v35  ;;  %9828 = vlog2.f32 %v1498_v57  ;;  %v1887_v25 = vsub.f32 %v1375_v28, %v1734_v4 }
 0x100   : > { %v9805_v11 = vpop.eup %9804  ;;  %v1949_v18 = vadd.f32 %v1885_v38, %v1821_v14  ;;  %v2209_v10 = vsub.f32 %v12220_v34, %v1734_v4  ;;  %2335 = vst [vmem:[#allocation2 + $0x320] sm:$0xff] %v2207_v39  ;;  %v12257_v46 = vmul.f32 0.6931472, %v9803_v41  ;;  %v1950_v51 = vadd.f32 %v1886_v42, %v1822_v37  ;;  %v613_v34 = vld [vmem:[%s15217_s0 + $0x368] sm:$0xff] }
 0x101   : > { %v9807_v30 = vpop.eup %9806  ;;  %v1888_v43 = vsub.f32 %v1376_v23, %v1736_v60  ;;  %v2210_v55 = vsub.f32 %v12229_v27, %v1736_v60  ;;  %2336 = vst [vmem:[#allocation2 + $0x328] sm:$0xff] %v2208_v33  ;;  %v12260_v6 = vmul.f32 0.6931472, %v9805_v11  ;;  %v1951_v58 = vadd.f32 %v1887_v25, %v1823_v26  ;;  %v544_v23 = vld [vmem:[%s15217_s0 + $0x140] sm:$0xff]  ;;  %v545_v14 = vld [vmem:[%s15217_s0 + $0x148] sm:$0xff] }
 0x102   : > { %v9809_v57 = vpop.eup %9808  ;;  %2337 = vst [vmem:[#allocation2 + $0x330] sm:$0xff] %v2209_v10  ;;  %v12265_v7 = vmul.f32 0.6931472, %v9807_v30  ;;  %v1305_v59 = vsub.f32 0.0, %v12257_v46  ;;  %9830 = vlog2.f32 %v1499_v45  ;;  %v2032_v61 = vadd.f32 %v1950_v51, %v1949_v18 }
 0x103   : > { %v9811_v31 = vpop.eup %9810  ;;  %v1952_v19 = vadd.f32 %v1888_v43, %v1824_v49  ;;  %2338 = vst.msk [vmem:[#allocation2 + $0x338] sm:$0xff] %vm1979_vm0, %v2210_v55  ;;  %v12271_v62 = vmul.f32 0.6931472, %v9809_v57  ;;  %v1306_v17 = vsub.f32 0.0, %v12260_v6  ;;  %9832 = vlog2.f32 %v1500_v63 }
 0x104   : > { %v9813_v9 = vpop.eup %9812  ;;  %v12280_v0 = vmul.f32 0.6931472, %v9811_v31  ;;  %v1307_v45 = vsub.f32 0.0, %v12265_v7  ;;  %v741_v27 = vmul.f32 0.00390625, %v612_v47  ;;  %v2033_v44 = vadd.f32 %v2032_v61, %v1951_v58 }
 0x105   : > { %v9815_v40 = vpop.eup %9814  ;;  %v2034_v28 = vsel %vm1979_vm0, %v1952_v19, 0.0  ;;  %v12289_v12 = vmul.f32 0.6931472, %v9813_v9  ;;  %v1308_v36 = vsub.f32 0.0, %v12271_v62  ;;  %v742_v16 = vmul.f32 0.00390625, %v613_v34 }
 0x106   : > { %v9817_v15 = vpop.eup %9816  ;;  %v12295_v50 = vmul.f32 0.6931472, %v9815_v40  ;;  %v1369_v63 = vsub.f32 0.0, %v12280_v0  ;;  %v743_v22 = vmul.f32 0.00390625, %v614_v32  ;;  %v2035_v56 = vadd.f32 %v2034_v28, %v2033_v44 }
 0x107   : > { %v9819_v29 = vpop.eup %9818  ;;  %v12301_v20 = vmul.f32 0.6931472, %v9817_v15  ;;  %v1370_v37 = vsub.f32 0.0, %v12289_v12  ;;  %v744_v2 = vmul.f32 0.00390625, %v615_v21  ;;  %v805_v52 = vmul.f32 0.99999, %v12227_v24 }
 0x108   : > { %v9821_v13 = vpop.eup %9820  ;;  %v1371_v5 = vsub.f32 0.0, %v12295_v50  ;;  %v1594_v26 = vmul.f32 0.6931472, %v9819_v29  ;;  %v12306_v1 = vmul.f32 0.00390625, %v544_v23  ;;  %2036 = vadd.xlane.f32.xlu1 %v2035_v56  ;;  %v806_v54 = vmul.f32 0.99999, %v12233_v8 }
 0x109   : > { %v9823_v53 = vpop.eup %9822  ;;  %v1372_v49 = vsub.f32 0.0, %v12301_v20  ;;  %v1596_v35 = vmul.f32 0.6931472, %v9821_v13  ;;  %v12310_v4 = vmul.f32 0.00390625, %v545_v14  ;;  %v807_v42 = vmul.f32 0.99999, %v12237_v3 }
 0x10a   : > { %v9825_v38 = vpop.eup %9824  ;;  %v1598_v39 = vmul.f32 0.6931472, %v9823_v53  ;;  %v1817_v41 = vsub.f32 %v1305_v59, %v1594_v26  ;;  %v2139_v60 = vsub.f32 %v12257_v46, %v1594_v26  ;;  %v808_v18 = vmul.f32 0.99999, %v12241_v48  ;;  %v546_v14 = vld [vmem:[%s15217_s0 + $0x150] sm:$0xff]  ;;  %v609_v26 = vld [vmem:[%s15217_s0 + $0x348] sm:$0xff] }
 0x10b   : > { %v9827_v33 = vpop.eup %9826  ;;  %v1600_v24 = vmul.f32 0.6931472, %v9825_v38  ;;  %v1818_v11 = vsub.f32 %v1306_v17, %v1596_v35  ;;  %v2140_v25 = vsub.f32 %v12260_v6, %v1596_v35  ;;  %v869_v51 = vmul.f32 0.99999, %v741_v27  ;;  %v611_v35 = vld [vmem:[%s15217_s0 + $0x358] sm:$0xff] }
 0x10c   : > { %v9829_v10 = vpop.eup %9828  ;;  %v1722_v30 = vmul.f32 0.6931472, %v9827_v33  ;;  %v1819_v43 = vsub.f32 %v1307_v45, %v1598_v39  ;;  %v2141_v8 = vsub.f32 %v12265_v7, %v1598_v39  ;;  %2267 = vst [vmem:[#allocation2 + $0x100] sm:$0xff] %v2139_v60  ;;  %v870_v3 = vmul.f32 0.99999, %v742_v16 }
 0x10d   : > { %v1724_v55 = vmul.f32 0.6931472, %v9829_v10  ;;  %v1820_v47 = vsub.f32 %v1308_v36, %v1600_v24  ;;  %v2142_v46 = vsub.f32 %v12271_v62, %v1600_v24  ;;  %2268 = vst [vmem:[#allocation2 + $0x108] sm:$0xff] %v2140_v25  ;;  %v871_v6 = vmul.f32 0.99999, %v743_v22 }
 0x10e   : > { %v1881_v57 = vsub.f32 %v1369_v63, %v1722_v30  ;;  %v2203_v58 = vsub.f32 %v12280_v0, %v1722_v30  ;;  %2269 = vst [vmem:[#allocation2 + $0x110] sm:$0xff] %v2141_v8  ;;  %v872_v59 = vmul.f32 0.99999, %v744_v2  ;;  %v933_v7 = vadd.f32 5e-06, %v805_v52  ;;  %v610_v52 = vld [vmem:[%s15217_s0 + $0x350] sm:$0xff] }
 0x10f   : > { %v9831_v48 = vpop.eup %9830  ;;  %v1882_v31 = vsub.f32 %v1370_v37, %v1724_v55  ;;  %v2204_v19 = vsub.f32 %v12289_v12, %v1724_v55  ;;  %2270 = vst.msk [vmem:[#allocation2 + $0x118] sm:$0xff] %vm1979_vm0, %v2142_v46  ;;  %v934_v61 = vadd.f32 5e-06, %v806_v54  ;;  %v935_v62 = vadd.f32 5e-06, %v807_v42  ;;  %v547_v37 = vld [vmem:[%s15217_s0 + $0x158] sm:$0xff] }
 0x110   : > { %v1726_v17 = vmul.f32 0.6931472, %v9831_v48  ;;  %v1945_v34 = vadd.f32 %v1881_v57, %v1817_v41  ;;  %2331 = vst [vmem:[#allocation2 + $0x300] sm:$0xff] %v2203_v58  ;;  %v12321_v32 = vadd.f32 5e-06, %v808_v18  ;;  %v9833_v9 = vpop.eup %9832  ;;  %9834 = vlog2.f32 %v933_v7 }
 0x111   : > { %v1946_v45 = vadd.f32 %v1882_v31, %v1818_v11  ;;  %2332 = vst [vmem:[#allocation2 + $0x308] sm:$0xff] %v2204_v19  ;;  %v12323_v0 = vadd.f32 5e-06, %v869_v51  ;;  %v12325_v21 = vadd.f32 5e-06, %v870_v3  ;;  %v1445_v23 = vsub.f32 1.0, %v933_v7 }
 0x112   : > { %v12327_v27 = vadd.f32 5e-06, %v871_v6  ;;  %v1728_v40 = vmul.f32 0.6931472, %v9833_v9  ;;  %v1883_v44 = vsub.f32 %v1371_v5, %v1726_v17  ;;  %v2205_v28 = vsub.f32 %v12295_v50, %v1726_v17  ;;  %v556_v7 = vld [vmem:[%s15217_s0 + $0x1a0] sm:$0xff] }
 0x113   : > { %v12330_v12 = vadd.f32 5e-06, %v872_v59  ;;  %v2026_v36 = vadd.f32 %v1946_v45, %v1945_v34  ;;  %v1446_v15 = vsub.f32 1.0, %v934_v61  ;;  %9836 = vlog2.f32 %v934_v61 }
 0x114   : > { %v1884_v63 = vsub.f32 %v1372_v49, %v1728_v40  ;;  %v1947_v16 = vadd.f32 %v1883_v44, %v1819_v43  ;;  %v2206_v22 = vsub.f32 %v12301_v20, %v1728_v40  ;;  %2333 = vst [vmem:[#allocation2 + $0x310] sm:$0xff] %v2205_v28  ;;  %9838 = vlog2.f32 %v935_v62  ;;  %v608_v20 = vld [vmem:[%s15217_s0 + $0x340] sm:$0xff] }
 0x115   : > { %v1447_v29 = vsub.f32 1.0, %v935_v62  ;;  %v1448_v50 = vsub.f32 1.0, %v12321_v32  ;;  %v1509_v56 = vsub.f32 1.0, %v12323_v0  ;;  %9840 = vlog2.f32 %v12321_v32  ;;  %v557_v32 = vld [vmem:[%s15217_s0 + $0x1a8] sm:$0xff] }
 0x116   : > { %v1948_v2 = vadd.f32 %v1884_v63, %v1820_v47  ;;  %v2027_v13 = vadd.f32 %v2026_v36, %v1947_v16  ;;  %2334 = vst.msk [vmem:[#allocation2 + $0x318] sm:$0xff] %vm1979_vm0, %v2206_v22  ;;  %v1510_v5 = vsub.f32 1.0, %v12325_v21  ;;  %9842 = vlog2.f32 %v12323_v0  ;;  %v620_v16 = vld [vmem:[%s15217_s0 + $0x3a0] sm:$0xff] }
 0x117   : > { %v1511_v53 = vsub.f32 1.0, %v12327_v27  ;;  %v1512_v49 = vsub.f32 1.0, %v12330_v12  ;;  %v675_v54 = vmul.f32 0.00390625, %v546_v14  ;;  %9844 = vlog2.f32 %v12325_v21 }
 0x118   : > { %v2028_v38 = vsel %vm1979_vm0, %v1948_v2, 0.0  ;;  %v676_v39 = vmul.f32 0.00390625, %v547_v37  ;;  %v737_v41 = vmul.f32 0.00390625, %v608_v20  ;;  %9846 = vlog2.f32 %v12327_v27  ;;  %v558_v27 = vld [vmem:[%s15217_s0 + $0x1b0] sm:$0xff] }
 0x119   : > { %v2029_v60 = vadd.f32 %v2028_v38, %v2027_v13  ;;  %v738_v42 = vmul.f32 0.00390625, %v609_v26  ;;  %v739_v33 = vmul.f32 0.00390625, %v610_v52  ;;  %9848 = vlog2.f32 %v12330_v12  ;;  %v559_v12 = vld [vmem:[%s15217_s0 + $0x1b8] sm:$0xff] }
 0x11a   : > { %v740_v24 = vmul.f32 0.00390625, %v611_v35  ;;  %v801_v11 = vmul.f32 0.99999, %v12306_v1  ;;  %v802_v25 = vmul.f32 0.99999, %v12310_v4  ;;  %9850 = vlog2.f32 %v1445_v23  ;;  %v623_v35 = vld [vmem:[%s15217_s0 + $0x3b8] sm:$0xff] }
 0x11b   : > { %2030 = vadd.xlane.f32.xlu0 %v2029_v60  ;;  %v803_v18 = vmul.f32 0.99999, %v675_v54  ;;  %v804_v10 = vmul.f32 0.99999, %v676_v39  ;;  %v865_v30 = vmul.f32 0.99999, %v737_v41  ;;  %9852 = vlog2.f32 %v1446_v15 }
 0x11c   : > { %v866_v43 = vmul.f32 0.99999, %v738_v42  ;;  %v867_v8 = vmul.f32 0.99999, %v739_v33  ;;  %v868_v51 = vmul.f32 0.99999, %v740_v24  ;;  %9854 = vlog2.f32 %v1447_v29 }
 0x11d   : > { %v12365_v55 = vadd.f32 5e-06, %v801_v11  ;;  %v12367_v47 = vadd.f32 5e-06, %v802_v25  ;;  %v12369_v46 = vadd.f32 5e-06, %v803_v18  ;;  %9856 = vlog2.f32 %v1448_v50  ;;  %v9835_v59 = vpop.eup %9834 }
 0x11e   : > { %v12371_v1 = vadd.f32 5e-06, %v804_v10  ;;  %v12373_v4 = vadd.f32 5e-06, %v865_v30  ;;  %v12375_v3 = vadd.f32 5e-06, %v866_v43  ;;  %9858 = vlog2.f32 %v1509_v56 }
 0x11f   : > { %v12377_v57 = vadd.f32 5e-06, %v867_v8  ;;  %v12379_v58 = vadd.f32 5e-06, %v868_v51  ;;  %v1441_v6 = vsub.f32 1.0, %v12365_v55  ;;  %9860 = vlog2.f32 %v1510_v5  ;;  %v621_v56 = vld [vmem:[%s15217_s0 + $0x3a8] sm:$0xff] }
 0x120   : > { %v1442_v48 = vsub.f32 1.0, %v12367_v47  ;;  %v1443_v31 = vsub.f32 1.0, %v12369_v46  ;;  %v1444_v19 = vsub.f32 1.0, %v12371_v1  ;;  %v9837_v61 = vpop.eup %9836  ;;  %v12388_v17 = vmul.f32 0.6931472, %v9835_v59  ;;  %v622_v5 = vld [vmem:[%s15217_s0 + $0x3b0] sm:$0xff] }
 0x121   : > { %9862 = vlog2.f32 %v1511_v53  ;;  %v1505_v34 = vsub.f32 1.0, %v12373_v4  ;;  %v1506_v62 = vsub.f32 1.0, %v12375_v3  ;;  %v9839_v9 = vpop.eup %9838  ;;  %v12395_v45 = vmul.f32 0.6931472, %v9837_v61 }
 0x122   : > { %9864 = vlog2.f32 %v1512_v49  ;;  %v1507_v0 = vsub.f32 1.0, %v12377_v57  ;;  %v1508_v21 = vsub.f32 1.0, %v12379_v58  ;;  %v9841_v40 = vpop.eup %9840  ;;  %v12402_v44 = vmul.f32 0.6931472, %v9839_v9 }
 0x123   : > { %v1317_v28 = vsub.f32 0.0, %v12388_v17  ;;  %9866 = vlog2.f32 %v12365_v55  ;;  %v12409_v36 = vmul.f32 0.00390625, %v556_v7  ;;  %v9843_v23 = vpop.eup %9842  ;;  %v12411_v15 = vmul.f32 0.6931472, %v9841_v40 }
 0x124   : > { %v1318_v63 = vsub.f32 0.0, %v12395_v45  ;;  %9868 = vlog2.f32 %v12367_v47  ;;  %v12418_v22 = vmul.f32 0.00390625, %v557_v32  ;;  %v9845_v14 = vpop.eup %9844  ;;  %v12420_v29 = vmul.f32 0.6931472, %v9843_v23 }
 0x125   : > { %v1319_v50 = vsub.f32 0.0, %v12402_v44  ;;  %9870 = vlog2.f32 %v12369_v46  ;;  %v12427_v37 = vmul.f32 0.00390625, %v558_v27  ;;  %v9847_v20 = vpop.eup %9846  ;;  %v12429_v2 = vmul.f32 0.6931472, %v9845_v14 }
 0x126   : > { %v1320_v13 = vsub.f32 0.0, %v12411_v15  ;;  %9872 = vlog2.f32 %v12371_v1  ;;  %v12436_v26 = vmul.f32 0.00390625, %v559_v12  ;;  %v9849_v52 = vpop.eup %9848  ;;  %v12438_v53 = vmul.f32 0.6931472, %v9847_v20 }
 0x127   : > { %v1381_v49 = vsub.f32 0.0, %v12420_v29  ;;  %9874 = vlog2.f32 %v12373_v4  ;;  %v12445_v54 = vmul.f32 0.00390625, %v620_v16  ;;  %v9851_v38 = vpop.eup %9850  ;;  %v12447_v39 = vmul.f32 0.6931472, %v9849_v52 }
 0x128   : > { %v1382_v41 = vsub.f32 0.0, %v12429_v2  ;;  %9876 = vlog2.f32 %v12375_v3  ;;  %v12451_v60 = vmul.f32 0.00390625, %v621_v56  ;;  %v9853_v42 = vpop.eup %9852  ;;  %v1383_v33 = vsub.f32 0.0, %v12438_v53 }
 0x129   : > { %v1618_v24 = vmul.f32 0.6931472, %v9851_v38  ;;  %9878 = vlog2.f32 %v12377_v57  ;;  %v12455_v11 = vmul.f32 0.00390625, %v622_v5  ;;  %v9855_v25 = vpop.eup %9854  ;;  %v1384_v18 = vsub.f32 0.0, %v12447_v39  ;;  %v552_v38 = vld [vmem:[%s15217_s0 + $0x180] sm:$0xff] }
 0x12a   : > { %v1620_v10 = vmul.f32 0.6931472, %v9853_v42  ;;  %9880 = vlog2.f32 %v12379_v58  ;;  %v12459_v30 = vmul.f32 0.00390625, %v623_v35  ;;  %v9857_v43 = vpop.eup %9856  ;;  %v1622_v8 = vmul.f32 0.6931472, %v9855_v25 }
 0x12b   : > { %v1829_v51 = vsub.f32 %v1317_v28, %v1618_v24  ;;  %v2151_v59 = vsub.f32 %v12388_v17, %v1618_v24  ;;  %9882 = vlog2.f32 %v1441_v6  ;;  %v9859_v7 = vpop.eup %9858  ;;  %v1624_v61 = vmul.f32 0.6931472, %v9857_v43  ;;  %v554_v43 = vld [vmem:[%s15217_s0 + $0x190] sm:$0xff] }
 0x12c   : > { %v1830_v32 = vsub.f32 %v1318_v63, %v1620_v10  ;;  %v2152_v9 = vsub.f32 %v12395_v45, %v1620_v10  ;;  %9884 = vlog2.f32 %v1442_v48  ;;  %v9861_v27 = vpop.eup %9860  ;;  %v1746_v40 = vmul.f32 0.6931472, %v9859_v7  ;;  %v553_v10 = vld [vmem:[%s15217_s0 + $0x188] sm:$0xff] }
 0x12d   : > { %v1831_v12 = vsub.f32 %v1319_v50, %v1622_v8  ;;  %v2153_v23 = vsub.f32 %v12402_v44, %v1622_v8  ;;  %2279 = vst [vmem:[#allocation2 + $0x160] sm:$0xff] %v2151_v59  ;;  %9886 = vlog2.f32 %v1443_v31  ;;  %v1748_v55 = vmul.f32 0.6931472, %v9861_v27 }
 0x12e   : > { %v9863_v17 = vpop.eup %9862  ;;  %v1832_v6 = vsub.f32 %v1320_v13, %v1624_v61  ;;  %v2154_v28 = vsub.f32 %v12411_v15, %v1624_v61  ;;  %2280 = vst [vmem:[#allocation2 + $0x168] sm:$0xff] %v2152_v9  ;;  %9888 = vlog2.f32 %v1444_v19  ;;  %v1893_v45 = vsub.f32 %v1381_v49, %v1746_v40 }
 0x12f   : > { %v9865_v47 = vpop.eup %9864  ;;  %v1750_v48 = vmul.f32 0.6931472, %v9863_v17  ;;  %v2215_v63 = vsub.f32 %v12420_v29, %v1746_v40  ;;  %2281 = vst [vmem:[#allocation2 + $0x170] sm:$0xff] %v2153_v23  ;;  %9890 = vlog2.f32 %v1505_v34  ;;  %v1894_v44 = vsub.f32 %v1382_v41, %v1748_v55 }
 0x130   : > { %v9867_v46 = vpop.eup %9866  ;;  %v1752_v31 = vmul.f32 0.6931472, %v9865_v47  ;;  %v2216_v16 = vsub.f32 %v12429_v2, %v1748_v55  ;;  %2282 = vst.msk [vmem:[#allocation2 + $0x178] sm:$0xff] %vm1979_vm0, %v2154_v28  ;;  %9892 = vlog2.f32 %v1506_v62  ;;  %v1957_v15 = vadd.f32 %v1893_v45, %v1829_v51 }
 0x131   : > { %v9869_v1 = vpop.eup %9868  ;;  %v1895_v19 = vsub.f32 %v1383_v33, %v1750_v48  ;;  %v2217_v14 = vsub.f32 %v12438_v53, %v1750_v48  ;;  %2343 = vst [vmem:[#allocation2 + $0x360] sm:$0xff] %v2215_v63  ;;  %v12481_v29 = vmul.f32 0.6931472, %v9867_v46  ;;  %v1958_v50 = vadd.f32 %v1894_v44, %v1830_v32 }
 0x132   : > { %v9871_v4 = vpop.eup %9870  ;;  %v1896_v34 = vsub.f32 %v1384_v18, %v1752_v31  ;;  %v2218_v56 = vsub.f32 %v12447_v39, %v1752_v31  ;;  %2344 = vst [vmem:[#allocation2 + $0x368] sm:$0xff] %v2216_v16  ;;  %v12484_v20 = vmul.f32 0.6931472, %v9869_v1  ;;  %9894 = vlog2.f32 %v1507_v0 }
 0x133   : > { %v9873_v2 = vpop.eup %9872  ;;  %v1959_v13 = vadd.f32 %v1895_v19, %v1831_v12  ;;  %2345 = vst [vmem:[#allocation2 + $0x370] sm:$0xff] %v2217_v14  ;;  %v12486_v3 = vmul.f32 0.6931472, %v9871_v4  ;;  %v1313_v62 = vsub.f32 0.0, %v12481_v29  ;;  %v2044_v53 = vadd.f32 %v1958_v50, %v1957_v15 }
 0x134   : > { %v9875_v5 = vpop.eup %9874  ;;  %v1960_v52 = vadd.f32 %v1896_v34, %v1832_v6  ;;  %2346 = vst.msk [vmem:[#allocation2 + $0x378] sm:$0xff] %vm1979_vm0, %v2218_v56  ;;  %v12492_v49 = vmul.f32 0.6931472, %v9873_v2  ;;  %v1314_v35 = vsub.f32 0.0, %v12484_v20  ;;  %9896 = vlog2.f32 %v1508_v21 }
 0x135   : > { %v9877_v39 = vpop.eup %9876  ;;  %v12498_v41 = vmul.f32 0.6931472, %v9875_v5  ;;  %v1315_v42 = vsub.f32 0.0, %v12486_v3  ;;  %v813_v57 = vmul.f32 0.99999, %v12409_v36  ;;  %v2045_v33 = vadd.f32 %v2044_v53, %v1959_v13 }
 0x136   : > { %v9879_v0 = vpop.eup %9878  ;;  %v2046_v24 = vsel %vm1979_vm0, %v1960_v52, 0.0  ;;  %v12505_v25 = vmul.f32 0.6931472, %v9877_v39  ;;  %v1316_v18 = vsub.f32 0.0, %v12492_v49  ;;  %v814_v8 = vmul.f32 0.99999, %v12418_v22 }
 0x137   : > { %v9881_v58 = vpop.eup %9880  ;;  %v12514_v21 = vmul.f32 0.6931472, %v9879_v0  ;;  %v1377_v36 = vsub.f32 0.0, %v12498_v41  ;;  %v12518_v51 = vmul.f32 0.00390625, %v552_v38  ;;  %v2047_v7 = vadd.f32 %v2046_v24, %v2045_v33 }
 0x138   : > { %v9883_v59 = vpop.eup %9882  ;;  %v12520_v61 = vmul.f32 0.6931472, %v9881_v58  ;;  %v1378_v32 = vsub.f32 0.0, %v12505_v25  ;;  %v815_v9 = vmul.f32 0.99999, %v12427_v37  ;;  %v12526_v17 = vmul.f32 0.00390625, %v553_v10 }
 0x139   : > { %v9885_v27 = vpop.eup %9884  ;;  %v1379_v40 = vsub.f32 0.0, %v12514_v21  ;;  %v1610_v12 = vmul.f32 0.6931472, %v9883_v59  ;;  %v816_v23 = vmul.f32 0.99999, %v12436_v26  ;;  %2048 = vadd.xlane.f32.xlu1 %v2047_v7  ;;  %v12530_v47 = vmul.f32 0.00390625, %v554_v43 }
 0x13a   : > { %v9887_v55 = vpop.eup %9886  ;;  %v1380_v22 = vsub.f32 0.0, %v12520_v61  ;;  %v1612_v6 = vmul.f32 0.6931472, %v9885_v27  ;;  %v877_v28 = vmul.f32 0.99999, %v12445_v54 }
 0x13b   : > { %v9889_v48 = vpop.eup %9888  ;;  %v1614_v45 = vmul.f32 0.6931472, %v9887_v55  ;;  %v1825_v37 = vsub.f32 %v1313_v62, %v1610_v12  ;;  %v2147_v63 = vsub.f32 %v12481_v29, %v1610_v12  ;;  %v878_v46 = vmul.f32 0.99999, %v12451_v60  ;;  %v619_v12 = vld [vmem:[%s15217_s0 + $0x398] sm:$0xff] }
 0x13c   : > { %v9891_v31 = vpop.eup %9890  ;;  %v1616_v26 = vmul.f32 0.6931472, %v9889_v48  ;;  %v1826_v44 = vsub.f32 %v1314_v35, %v1612_v6  ;;  %v2148_v16 = vsub.f32 %v12484_v20, %v1612_v6  ;;  %v879_v1 = vmul.f32 0.99999, %v12455_v11 }
 0x13d   : > { %v9893_v19 = vpop.eup %9892  ;;  %v1738_v15 = vmul.f32 0.6931472, %v9891_v31  ;;  %v1827_v14 = vsub.f32 %v1315_v42, %v1614_v45  ;;  %v2149_v54 = vsub.f32 %v12486_v3, %v1614_v45  ;;  %2275 = vst [vmem:[#allocation2 + $0x140] sm:$0xff] %v2147_v63  ;;  %v880_v4 = vmul.f32 0.99999, %v12459_v30 }
 0x13e   : > { %v1740_v34 = vmul.f32 0.6931472, %v9893_v19  ;;  %v1828_v50 = vsub.f32 %v1316_v18, %v1616_v26  ;;  %v2150_v29 = vsub.f32 %v12492_v49, %v1616_v26  ;;  %2276 = vst [vmem:[#allocation2 + $0x148] sm:$0xff] %v2148_v16  ;;  %v941_v60 = vadd.f32 5e-06, %v813_v57 }
 0x13f   : > { %v1889_v56 = vsub.f32 %v1377_v36, %v1738_v15  ;;  %v2211_v2 = vsub.f32 %v12498_v41, %v1738_v15  ;;  %2277 = vst [vmem:[#allocation2 + $0x150] sm:$0xff] %v2149_v54  ;;  %v942_v20 = vadd.f32 5e-06, %v814_v8  ;;  %v943_v11 = vadd.f32 5e-06, %v815_v9  ;;  %v9895_v13 = vpop.eup %9894  ;;  %v555_v36 = vld [vmem:[%s15217_s0 + $0x198] sm:$0xff] }
 0x140   : > { %v1890_v62 = vsub.f32 %v1378_v32, %v1740_v34  ;;  %v2212_v5 = vsub.f32 %v12505_v25, %v1740_v34  ;;  %2278 = vst.msk [vmem:[#allocation2 + $0x158] sm:$0xff] %vm1979_vm0, %v2150_v29  ;;  %v944_v3 = vadd.f32 5e-06, %v816_v23  ;;  %v12542_v30 = vadd.f32 5e-06, %v877_v28  ;;  %v616_v8 = vld [vmem:[%s15217_s0 + $0x380] sm:$0xff] }
 0x141   : > { %v1742_v52 = vmul.f32 0.6931472, %v9895_v13  ;;  %v1953_v53 = vadd.f32 %v1889_v56, %v1825_v37  ;;  %2339 = vst [vmem:[#allocation2 + $0x340] sm:$0xff] %v2211_v2  ;;  %v12544_v49 = vadd.f32 5e-06, %v878_v46  ;;  %v9897_v38 = vpop.eup %9896  ;;  %9898 = vlog2.f32 %v941_v60  ;;  %v618_v32 = vld [vmem:[%s15217_s0 + $0x390] sm:$0xff] }
 0x142   : > { %v12546_v35 = vadd.f32 5e-06, %v879_v1  ;;  %v1954_v39 = vadd.f32 %v1890_v62, %v1826_v44  ;;  %2340 = vst [vmem:[#allocation2 + $0x348] sm:$0xff] %v2212_v5  ;;  %v12548_v41 = vadd.f32 5e-06, %v880_v4  ;;  %v1453_v42 = vsub.f32 1.0, %v941_v60 }
 0x143   : > { %v1744_v57 = vmul.f32 0.6931472, %v9897_v38  ;;  %v1891_v0 = vsub.f32 %v1379_v40, %v1742_v52  ;;  %v2213_v33 = vsub.f32 %v12514_v21, %v1742_v52  ;;  %9900 = vlog2.f32 %v942_v20 }
 0x144   : > { %v2038_v24 = vadd.f32 %v1954_v39, %v1953_v53  ;;  %9902 = vlog2.f32 %v943_v11  ;;  %v1454_v25 = vsub.f32 1.0, %v942_v20  ;;  %v1455_v18 = vsub.f32 1.0, %v943_v11  ;;  %v564_v39 = vld [vmem:[%s15217_s0 + $0x1e0] sm:$0xff] }
 0x145   : > { %v1892_v10 = vsub.f32 %v1380_v22, %v1744_v57  ;;  %v1955_v43 = vadd.f32 %v1891_v0, %v1827_v14  ;;  %v2214_v58 = vsub.f32 %v12520_v61, %v1744_v57  ;;  %2341 = vst [vmem:[#allocation2 + $0x350] sm:$0xff] %v2213_v33  ;;  %9904 = vlog2.f32 %v944_v3  ;;  %v617_v61 = vld [vmem:[%s15217_s0 + $0x388] sm:$0xff] }
 0x146   : > { %9906 = vlog2.f32 %v12542_v30  ;;  %v1456_v21 = vsub.f32 1.0, %v944_v3  ;;  %v1517_v59 = vsub.f32 1.0, %v12542_v30  ;;  %v1518_v7 = vsub.f32 1.0, %v12544_v49  ;;  %v565_v33 = vld [vmem:[%s15217_s0 + $0x1e8] sm:$0xff] }
 0x147   : > { %v1956_v9 = vadd.f32 %v1892_v10, %v1828_v50  ;;  %v2039_v27 = vadd.f32 %v2038_v24, %v1955_v43  ;;  %2342 = vst.msk [vmem:[#allocation2 + $0x358] sm:$0xff] %vm1979_vm0, %v2214_v58  ;;  %9908 = vlog2.f32 %v12544_v49  ;;  %v1519_v40 = vsub.f32 1.0, %v12546_v35  ;;  %v566_v43 = vld [vmem:[%s15217_s0 + $0x1f0] sm:$0xff] }
 0x148   : > { %9910 = vlog2.f32 %v12546_v35  ;;  %v1520_v23 = vsub.f32 1.0, %v12548_v41  ;;  %v684_v55 = vmul.f32 0.00390625, %v555_v36  ;;  %v745_v22 = vmul.f32 0.00390625, %v616_v8 }
 0x149   : > { %v2040_v6 = vsel %vm1979_vm0, %v1956_v9, 0.0  ;;  %9912 = vlog2.f32 %v12548_v41  ;;  %v746_v28 = vmul.f32 0.00390625, %v617_v61  ;;  %v747_v48 = vmul.f32 0.00390625, %v618_v32 }
 0x14a   : > { %v2041_v45 = vadd.f32 %v2040_v6, %v2039_v27  ;;  %9914 = vlog2.f32 %v1453_v42  ;;  %v748_v37 = vmul.f32 0.00390625, %v619_v12  ;;  %v809_v63 = vmul.f32 0.99999, %v12518_v51 }
 0x14b   : > { %9916 = vlog2.f32 %v1454_v25  ;;  %v810_v46 = vmul.f32 0.99999, %v12526_v17  ;;  %v811_v31 = vmul.f32 0.99999, %v12530_v47  ;;  %v812_v26 = vmul.f32 0.99999, %v684_v55 }
 0x14c   : > { %2042 = vadd.xlane.f32.xlu0 %v2041_v45  ;;  %9918 = vlog2.f32 %v1455_v18  ;;  %v873_v44 = vmul.f32 0.99999, %v745_v22  ;;  %v874_v16 = vmul.f32 0.99999, %v746_v28  ;;  %v875_v1 = vmul.f32 0.99999, %v747_v48 }
 0x14d   : > { %9920 = vlog2.f32 %v1456_v21  ;;  %v876_v19 = vmul.f32 0.99999, %v748_v37  ;;  %v12580_v15 = vadd.f32 5e-06, %v809_v63  ;;  %v12582_v14 = vadd.f32 5e-06, %v810_v46 }
 0x14e   : > { %9922 = vlog2.f32 %v1517_v59  ;;  %v12584_v54 = vadd.f32 5e-06, %v811_v31  ;;  %v12586_v51 = vadd.f32 5e-06, %v812_v26  ;;  %v12588_v17 = vadd.f32 5e-06, %v873_v44  ;;  %v9899_v47 = vpop.eup %9898 }
 0x14f   : > { %9924 = vlog2.f32 %v1518_v7  ;;  %v12590_v4 = vadd.f32 5e-06, %v874_v16  ;;  %v12592_v34 = vadd.f32 5e-06, %v875_v1  ;;  %v12594_v50 = vadd.f32 5e-06, %v876_v19 }
 0x150   : > { %v9901_v29 = vpop.eup %9900  ;;  %v12596_v60 = vmul.f32 0.6931472, %v9899_v47  ;;  %9926 = vlog2.f32 %v1519_v40  ;;  %v1449_v56 = vsub.f32 1.0, %v12580_v15  ;;  %v1450_v2 = vsub.f32 1.0, %v12582_v14  ;;  %v567_v21 = vld [vmem:[%s15217_s0 + $0x1f8] sm:$0xff] }
 0x151   : > { %v9903_v20 = vpop.eup %9902  ;;  %v12600_v11 = vmul.f32 0.6931472, %v9901_v29  ;;  %9928 = vlog2.f32 %v1520_v23  ;;  %v1451_v13 = vsub.f32 1.0, %v12584_v54  ;;  %v1452_v62 = vsub.f32 1.0, %v12586_v51 }
 0x152   : > { %v9905_v5 = vpop.eup %9904  ;;  %v12604_v3 = vmul.f32 0.6931472, %v9903_v20  ;;  %v1325_v30 = vsub.f32 0.0, %v12596_v60  ;;  %9930 = vlog2.f32 %v12580_v15  ;;  %v1513_v52 = vsub.f32 1.0, %v12588_v17 }
 0x153   : > { %v9907_v53 = vpop.eup %9906  ;;  %v12609_v49 = vmul.f32 0.6931472, %v9905_v5  ;;  %v1326_v35 = vsub.f32 0.0, %v12600_v11  ;;  %9932 = vlog2.f32 %v12582_v14  ;;  %v1514_v38 = vsub.f32 1.0, %v12590_v4 }
 0x154   : > { %v9909_v41 = vpop.eup %9908  ;;  %v12617_v42 = vmul.f32 0.6931472, %v9907_v53  ;;  %v1327_v57 = vsub.f32 0.0, %v12604_v3  ;;  %9934 = vlog2.f32 %v12584_v54  ;;  %v1515_v0 = vsub.f32 1.0, %v12592_v34 }
 0x155   : > { %v9911_v24 = vpop.eup %9910  ;;  %v12625_v25 = vmul.f32 0.6931472, %v9909_v41  ;;  %v1328_v18 = vsub.f32 0.0, %v12609_v49  ;;  %9936 = vlog2.f32 %v12586_v51  ;;  %v1516_v10 = vsub.f32 1.0, %v12594_v50 }
 0x156   : > { %v9913_v58 = vpop.eup %9912  ;;  %v12633_v36 = vmul.f32 0.6931472, %v9911_v24  ;;  %v1389_v8 = vsub.f32 0.0, %v12617_v42  ;;  %9938 = vlog2.f32 %v12588_v17  ;;  %v12640_v59 = vmul.f32 0.00390625, %v564_v39 }
 0x157   : > { %v9915_v7 = vpop.eup %9914  ;;  %v12642_v61 = vmul.f32 0.6931472, %v9913_v58  ;;  %v1390_v32 = vsub.f32 0.0, %v12625_v25  ;;  %9940 = vlog2.f32 %v12590_v4  ;;  %v12646_v9 = vmul.f32 0.00390625, %v565_v33  ;;  %v628_v4 = vld [vmem:[%s15217_s0 + $0x3e0] sm:$0xff] }
 0x158   : > { %v9917_v27 = vpop.eup %9916  ;;  %v1391_v40 = vsub.f32 0.0, %v12633_v36  ;;  %v1634_v12 = vmul.f32 0.6931472, %v9915_v7  ;;  %9942 = vlog2.f32 %v12592_v34  ;;  %v12650_v23 = vmul.f32 0.00390625, %v566_v43  ;;  %v631_v7 = vld [vmem:[%s15217_s0 + $0x3f8] sm:$0xff] }
 0x159   : > { %v9919_v55 = vpop.eup %9918  ;;  %v1392_v22 = vsub.f32 0.0, %v12642_v61  ;;  %v1636_v6 = vmul.f32 0.6931472, %v9917_v27  ;;  %9944 = vlog2.f32 %v12594_v50  ;;  %v12654_v28 = vmul.f32 0.00390625, %v567_v21 }
 0x15a   : > { %v9921_v48 = vpop.eup %9920  ;;  %v1638_v45 = vmul.f32 0.6931472, %v9919_v55  ;;  %v1837_v37 = vsub.f32 %v1325_v30, %v1634_v12  ;;  %v2159_v63 = vsub.f32 %v12596_v60, %v1634_v12  ;;  %9946 = vlog2.f32 %v1449_v56 }
 0x15b   : > { %v9923_v46 = vpop.eup %9922  ;;  %v1640_v31 = vmul.f32 0.6931472, %v9921_v48  ;;  %v1838_v26 = vsub.f32 %v1326_v35, %v1636_v6  ;;  %v2160_v44 = vsub.f32 %v12600_v11, %v1636_v6  ;;  %9948 = vlog2.f32 %v1450_v2 }
 0x15c   : > { %v9925_v16 = vpop.eup %9924  ;;  %v1762_v1 = vmul.f32 0.6931472, %v9923_v46  ;;  %v1839_v19 = vsub.f32 %v1327_v57, %v1638_v45  ;;  %v2161_v15 = vsub.f32 %v12604_v3, %v1638_v45  ;;  %2287 = vst [vmem:[#allocation2 + $0x1a0] sm:$0xff] %v2159_v63  ;;  %9950 = vlog2.f32 %v1451_v13 }
 0x15d   : > { %v9927_v14 = vpop.eup %9926  ;;  %v1764_v54 = vmul.f32 0.6931472, %v9925_v16  ;;  %v1840_v47 = vsub.f32 %v1328_v18, %v1640_v31  ;;  %v2162_v29 = vsub.f32 %v12609_v49, %v1640_v31  ;;  %2288 = vst [vmem:[#allocation2 + $0x1a8] sm:$0xff] %v2160_v44  ;;  %9952 = vlog2.f32 %v1452_v62 }
 0x15e   : > { %v9929_v60 = vpop.eup %9928  ;;  %v1766_v56 = vmul.f32 0.6931472, %v9927_v14  ;;  %v1901_v20 = vsub.f32 %v1389_v8, %v1762_v1  ;;  %v2223_v2 = vsub.f32 %v12617_v42, %v1762_v1  ;;  %2289 = vst [vmem:[#allocation2 + $0x1b0] sm:$0xff] %v2161_v15  ;;  %9954 = vlog2.f32 %v1513_v52  ;;  %v630_v8 = vld [vmem:[%s15217_s0 + $0x3f0] sm:$0xff] }
 0x15f   : > { %v9931_v11 = vpop.eup %9930  ;;  %v1768_v13 = vmul.f32 0.6931472, %v9929_v60  ;;  %v1902_v5 = vsub.f32 %v1390_v32, %v1764_v54  ;;  %v2224_v3 = vsub.f32 %v12625_v25, %v1764_v54  ;;  %2290 = vst.msk [vmem:[#allocation2 + $0x1b8] sm:$0xff] %vm1979_vm0, %v2162_v29  ;;  %9956 = vlog2.f32 %v1514_v38 }
 0x160   : > { %v9933_v51 = vpop.eup %9932  ;;  %v1903_v62 = vsub.f32 %v1391_v40, %v1766_v56  ;;  %v1965_v30 = vadd.f32 %v1901_v20, %v1837_v37  ;;  %v2225_v53 = vsub.f32 %v12633_v36, %v1766_v56  ;;  %2351 = vst [vmem:[#allocation2 + $0x3a0] sm:$0xff] %v2223_v2  ;;  %v12670_v49 = vmul.f32 0.6931472, %v9931_v11  ;;  %v629_v36 = vld [vmem:[%s15217_s0 + $0x3e8] sm:$0xff] }
 0x161   : > { %v9935_v17 = vpop.eup %9934  ;;  %v1904_v52 = vsub.f32 %v1392_v22, %v1768_v13  ;;  %v1966_v35 = vadd.f32 %v1902_v5, %v1838_v26  ;;  %v2226_v39 = vsub.f32 %v12642_v61, %v1768_v13  ;;  %2352 = vst [vmem:[#allocation2 + $0x3a8] sm:$0xff] %v2224_v3  ;;  %v12673_v41 = vmul.f32 0.6931472, %v9933_v51  ;;  %v560_v22 = vld [vmem:[%s15217_s0 + $0x1c0] sm:$0xff]  ;;  %v561_v37 = vld [vmem:[%s15217_s0 + $0x1c8] sm:$0xff] }
 0x162   : > { %v9937_v38 = vpop.eup %9936  ;;  %v1967_v42 = vadd.f32 %v1903_v62, %v1839_v19  ;;  %2353 = vst [vmem:[#allocation2 + $0x3b0] sm:$0xff] %v2225_v53  ;;  %v12678_v57 = vmul.f32 0.6931472, %v9935_v17  ;;  %v1321_v33 = vsub.f32 0.0, %v12670_v49  ;;  %9958 = vlog2.f32 %v1515_v0 }
 0x163   : > { %v9939_v24 = vpop.eup %9938  ;;  %v1968_v25 = vadd.f32 %v1904_v52, %v1840_v47  ;;  %v2056_v18 = vadd.f32 %v1966_v35, %v1965_v30  ;;  %2354 = vst.msk [vmem:[#allocation2 + $0x3b8] sm:$0xff] %vm1979_vm0, %v2226_v39  ;;  %v12684_v43 = vmul.f32 0.6931472, %v9937_v38  ;;  %v1322_v58 = vsub.f32 0.0, %v12673_v41 }
 0x164   : > { %v9941_v21 = vpop.eup %9940  ;;  %v12693_v34 = vmul.f32 0.6931472, %v9939_v24  ;;  %v1323_v0 = vsub.f32 0.0, %v12678_v57  ;;  %9960 = vlog2.f32 %v1516_v10  ;;  %v757_v61 = vmul.f32 0.00390625, %v628_v4 }
 0x165   : > { %v9943_v32 = vpop.eup %9942  ;;  %v2057_v27 = vadd.f32 %v2056_v18, %v1967_v42  ;;  %v2058_v40 = vsel %vm1979_vm0, %v1968_v25, 0.0  ;;  %v12702_v12 = vmul.f32 0.6931472, %v9941_v21  ;;  %v1324_v55 = vsub.f32 0.0, %v12684_v43 }
 0x166   : > { %v9945_v6 = vpop.eup %9944  ;;  %v12708_v50 = vmul.f32 0.6931472, %v9943_v32  ;;  %v1385_v10 = vsub.f32 0.0, %v12693_v34  ;;  %v758_v48 = vmul.f32 0.00390625, %v629_v36  ;;  %v759_v45 = vmul.f32 0.00390625, %v630_v8 }
 0x167   : > { %v9947_v63 = vpop.eup %9946  ;;  %v2059_v46 = vadd.f32 %v2058_v40, %v2057_v27  ;;  %v12714_v31 = vmul.f32 0.6931472, %v9945_v6  ;;  %v1386_v26 = vsub.f32 0.0, %v12702_v12  ;;  %v760_v44 = vmul.f32 0.00390625, %v631_v7 }
 0x168   : > { %v9949_v16 = vpop.eup %9948  ;;  %v1387_v1 = vsub.f32 0.0, %v12708_v50  ;;  %v1626_v19 = vmul.f32 0.6931472, %v9947_v63  ;;  %v821_v15 = vmul.f32 0.99999, %v12640_v59  ;;  %v12719_v14 = vmul.f32 0.00390625, %v560_v22 }
 0x169   : > { %v9951_v54 = vpop.eup %9950  ;;  %2060 = vadd.xlane.f32.xlu1 %v2059_v46  ;;  %v1388_v47 = vsub.f32 0.0, %v12714_v31  ;;  %v1628_v29 = vmul.f32 0.6931472, %v9949_v16  ;;  %v822_v60 = vmul.f32 0.99999, %v12646_v9  ;;  %v12723_v56 = vmul.f32 0.00390625, %v561_v37 }
 0x16a   : > { %v9953_v20 = vpop.eup %9952  ;;  %v1630_v2 = vmul.f32 0.6931472, %v9951_v54  ;;  %v1833_v11 = vsub.f32 %v1321_v33, %v1626_v19  ;;  %v2155_v13 = vsub.f32 %v12670_v49, %v1626_v19  ;;  %v823_v5 = vmul.f32 0.99999, %v12650_v23  ;;  %v562_v37 = vld [vmem:[%s15217_s0 + $0x1d0] sm:$0xff] }
 0x16b   : > { %v9955_v3 = vpop.eup %9954  ;;  %v1632_v59 = vmul.f32 0.6931472, %v9953_v20  ;;  %v1834_v51 = vsub.f32 %v1322_v58, %v1628_v29  ;;  %v2156_v62 = vsub.f32 %v12673_v41, %v1628_v29  ;;  %v824_v30 = vmul.f32 0.99999, %v12654_v28  ;;  %v626_v54 = vld [vmem:[%s15217_s0 + $0x3d0] sm:$0xff] }
 0x16c   : > { %v9957_v53 = vpop.eup %9956  ;;  %v1754_v17 = vmul.f32 0.6931472, %v9955_v3  ;;  %v1835_v52 = vsub.f32 %v1323_v0, %v1630_v2  ;;  %v2157_v9 = vsub.f32 %v12678_v57, %v1630_v2  ;;  %2283 = vst [vmem:[#allocation2 + $0x180] sm:$0xff] %v2155_v13  ;;  %v885_v35 = vmul.f32 0.99999, %v757_v61 }
 0x16d   : > { %v1756_v39 = vmul.f32 0.6931472, %v9957_v53  ;;  %v1836_v4 = vsub.f32 %v1324_v55, %v1632_v59  ;;  %v2158_v49 = vsub.f32 %v12684_v43, %v1632_v59  ;;  %2284 = vst [vmem:[#allocation2 + $0x188] sm:$0xff] %v2156_v62  ;;  %v886_v23 = vmul.f32 0.99999, %v758_v48  ;;  %v1983_v53 = vpop.xlane.xlu0 %1982 }
 0x16e   : > { %v1897_v38 = vsub.f32 %v1385_v10, %v1754_v17  ;;  %v2219_v42 = vsub.f32 %v12693_v34, %v1754_v17  ;;  %2285 = vst [vmem:[#allocation2 + $0x190] sm:$0xff] %v2157_v9  ;;  %v887_v41 = vmul.f32 0.99999, %v759_v45  ;;  %v888_v33 = vmul.f32 0.99999, %v760_v44  ;;  %v12765_v44 = vpop.xlane.xlu1 %1994 }
 0x16f   : > { %v9959_v28 = vpop.eup %9958  ;;  %v1898_v24 = vsub.f32 %v1386_v26, %v1756_v39  ;;  %v2220_v25 = vsub.f32 %v12702_v12, %v1756_v39  ;;  %2286 = vst.msk [vmem:[#allocation2 + $0x198] sm:$0xff] %vm1979_vm0, %v2158_v49  ;;  %v949_v57 = vadd.f32 5e-06, %v821_v15  ;;  %v12734_v18 = vadd.f32 5e-06, %v822_v60  ;;  %v563_v26 = vld [vmem:[%s15217_s0 + $0x1d8] sm:$0xff] }
 0x170   : > { %v1758_v58 = vmul.f32 0.6931472, %v9959_v28  ;;  %v1961_v36 = vadd.f32 %v1897_v38, %v1833_v11  ;;  %2347 = vst [vmem:[#allocation2 + $0x380] sm:$0xff] %v2219_v42  ;;  %v12736_v43 = vadd.f32 5e-06, %v823_v5  ;;  %v625_v15 = vld [vmem:[%s15217_s0 + $0x3c8] sm:$0xff] }
 0x171   : > { %v12738_v8 = vadd.f32 5e-06, %v824_v30  ;;  %v9961_v21 = vpop.eup %9960  ;;  %v1962_v34 = vadd.f32 %v1898_v24, %v1834_v51  ;;  %2348 = vst [vmem:[#allocation2 + $0x388] sm:$0xff] %v2220_v25  ;;  %v12740_v0 = vadd.f32 5e-06, %v885_v35  ;;  %9962 = vlog2.f32 %v949_v57  ;;  %v627_v60 = vld [vmem:[%s15217_s0 + $0x3d8] sm:$0xff] }
 0x172   : > { %v12742_v7 = vadd.f32 5e-06, %v886_v23  ;;  %v12744_v61 = vadd.f32 5e-06, %v887_v41  ;;  %v1760_v32 = vmul.f32 0.6931472, %v9961_v21  ;;  %v1899_v27 = vsub.f32 %v1387_v1, %v1758_v58  ;;  %v2001_v35 = vpop.xlane.xlu1 %2000 }
 0x173   : > { %v2221_v40 = vsub.f32 %v12708_v50, %v1758_v58  ;;  %v12747_v12 = vadd.f32 5e-06, %v888_v33  ;;  %v2050_v55 = vadd.f32 %v1962_v34, %v1961_v36  ;;  %v1461_v22 = vsub.f32 1.0, %v949_v57  ;;  %v1989_v58 = vpop.xlane.xlu0 %1988 }
 0x174   : > { %v1462_v6 = vsub.f32 1.0, %v12734_v18  ;;  %v1900_v10 = vsub.f32 %v1388_v47, %v1760_v32  ;;  %v1963_v48 = vadd.f32 %v1899_v27, %v1835_v52  ;;  %v2222_v45 = vsub.f32 %v12714_v31, %v1760_v32  ;;  %v624_v31 = vld [vmem:[%s15217_s0 + $0x3c0] sm:$0xff] }
 0x175   : > { %2349 = vst [vmem:[#allocation2 + $0x390] sm:$0xff] %v2221_v40  ;;  %9964 = vlog2.f32 %v12734_v18  ;;  %v1463_v50 = vsub.f32 1.0, %v12736_v43  ;;  %v1464_v63 = vsub.f32 1.0, %v12738_v8  ;;  %v1525_v46 = vsub.f32 1.0, %v12740_v0 }
 0x176   : > { %9966 = vlog2.f32 %v12736_v43  ;;  %v1964_v16 = vadd.f32 %v1900_v10, %v1836_v4  ;;  %v2051_v1 = vadd.f32 %v2050_v55, %v1963_v48  ;;  %2350 = vst.msk [vmem:[#allocation2 + $0x398] sm:$0xff] %vm1979_vm0, %v2222_v45  ;;  %v1526_v19 = vsub.f32 1.0, %v12742_v7  ;;  %v2013_v34 = vpop.xlane.xlu1 %2012 }
 0x177   : > { %9968 = vlog2.f32 %v12738_v8  ;;  %v1527_v47 = vsub.f32 1.0, %v12744_v61  ;;  %v1528_v29 = vsub.f32 1.0, %v12747_v12  ;;  %v691_v20 = vmul.f32 0.00390625, %v562_v37 }
 0x178   : > { %9970 = vlog2.f32 %v12740_v0  ;;  %v2052_v2 = vsel %vm1979_vm0, %v1964_v16, 0.0  ;;  %v692_v11 = vmul.f32 0.00390625, %v563_v26  ;;  %v753_v13 = vmul.f32 0.00390625, %v624_v31  ;;  %v2007_v16 = vpop.xlane.xlu0 %2006 }
 0x179   : > { %9972 = vlog2.f32 %v12742_v7  ;;  %v2053_v5 = vadd.f32 %v2052_v2, %v2051_v1  ;;  %v754_v3 = vmul.f32 0.00390625, %v625_v15  ;;  %v755_v59 = vmul.f32 0.00390625, %v626_v54 }
 0x17a   : > { %9974 = vlog2.f32 %v12744_v61  ;;  %v756_v51 = vmul.f32 0.00390625, %v627_v60  ;;  %v817_v62 = vmul.f32 0.99999, %v12719_v14  ;;  %v818_v30 = vmul.f32 0.99999, %v12723_v56  ;;  %v2025_v54 = vpop.xlane.xlu1 %2024 }
 0x17b   : > { %9976 = vlog2.f32 %v12747_v12  ;;  %2054 = vadd.xlane.f32.xlu0 %v2053_v5  ;;  %v819_v17 = vmul.f32 0.99999, %v691_v20  ;;  %v820_v52 = vmul.f32 0.99999, %v692_v11  ;;  %v881_v9 = vmul.f32 0.99999, %v753_v13 }
 0x17c   : > { %9978 = vlog2.f32 %v1461_v22  ;;  %v882_v39 = vmul.f32 0.99999, %v754_v3  ;;  %v883_v4 = vmul.f32 0.99999, %v755_v59  ;;  %v884_v49 = vmul.f32 0.99999, %v756_v51 }
 0x17d   : > { %9980 = vlog2.f32 %v1462_v6  ;;  %v12788_v23 = vadd.f32 5e-06, %v817_v62  ;;  %v12790_v38 = vadd.f32 5e-06, %v818_v30  ;;  %v12792_v42 = vadd.f32 5e-06, %v819_v17 }
 0x17e   : > { %9982 = vlog2.f32 %v1463_v50  ;;  %v12794_v14 = vadd.f32 5e-06, %v820_v52  ;;  %v12796_v56 = vadd.f32 5e-06, %v881_v9  ;;  %v12798_v41 = vadd.f32 5e-06, %v882_v39  ;;  %v9963_v24 = vpop.eup %9962 }
 0x17f   : > { %9984 = vlog2.f32 %v1464_v63  ;;  %v12800_v33 = vadd.f32 5e-06, %v883_v4  ;;  %v12802_v28 = vadd.f32 5e-06, %v884_v49  ;;  %v1457_v25 = vsub.f32 1.0, %v12788_v23 }
 0x180   : > { %9986 = vlog2.f32 %v1525_v46  ;;  %v1458_v57 = vsub.f32 1.0, %v12790_v38  ;;  %v1459_v18 = vsub.f32 1.0, %v12792_v42  ;;  %v12807_v43 = vmul.f32 0.6931472, %v9963_v24 }
 0x181   : > { %9988 = vlog2.f32 %v1526_v19  ;;  %v1460_v8 = vsub.f32 1.0, %v12794_v14  ;;  %v1521_v21 = vsub.f32 1.0, %v12796_v56  ;;  %v1522_v61 = vsub.f32 1.0, %v12798_v41 }
 0x182   : > { %v9965_v36 = vpop.eup %9964  ;;  %9990 = vlog2.f32 %v1527_v47  ;;  %v1523_v32 = vsub.f32 1.0, %v12800_v33  ;;  %v1333_v12 = vsub.f32 0.0, %v12807_v43  ;;  %v2076_v10 = vadd.f32 -4347.419, %v12765_v44 }
 0x183   : > { %v9967_v0 = vpop.eup %9966  ;;  %v12811_v7 = vmul.f32 0.6931472, %v9965_v36  ;;  %9992 = vlog2.f32 %v1528_v29  ;;  %v2074_v50 = vadd.f32 -4347.419, %v1983_v53  ;;  %v2077_v31 = vadd.f32 -4347.419, %v2001_v35 }
 0x184   : > { %v9969_v27 = vpop.eup %9968  ;;  %v12815_v40 = vmul.f32 0.6931472, %v9967_v0  ;;  %9994 = vlog2.f32 %v12788_v23  ;;  %2093 = vst.msk [vmem:[#allocation3 + $0x10] sm:$0xff] %vm2090_vm1, %v2076_v10  ;;  %v2075_v15 = vadd.f32 -4347.419, %v1989_v58 }
 0x185   : > { %v9971_v55 = vpop.eup %9970  ;;  %v12819_v22 = vmul.f32 0.6931472, %v9969_v27  ;;  %v1334_v6 = vsub.f32 0.0, %v12811_v7  ;;  %9996 = vlog2.f32 %v12790_v38  ;;  %2091 = vst.msk [vmem:[#allocation3] sm:$0xff] %vm2090_vm1, %v2074_v50  ;;  %2094 = vst.msk [vmem:[#allocation3 + $0x18] sm:$0xff] %vm2090_vm1, %v2077_v31 }
 0x186   : > { %v9973_v48 = vpop.eup %9972  ;;  %v12824_v45 = vmul.f32 0.6931472, %v9971_v55  ;;  %v1335_v37 = vsub.f32 0.0, %v12815_v40  ;;  %9998 = vlog2.f32 %v12792_v42  ;;  %v2079_v20 = vadd.f32 -4347.419, %v2013_v34  ;;  %2092 = vst.msk [vmem:[#allocation3 + $0x8] sm:$0xff] %vm2090_vm1, %v2075_v15 }
 0x187   : > { %v9975_v63 = vpop.eup %9974  ;;  %v12828_v46 = vmul.f32 0.6931472, %v9973_v48  ;;  %v1336_v26 = vsub.f32 0.0, %v12819_v22  ;;  %10000 = vlog2.f32 %v12794_v14  ;;  %v2078_v5 = vadd.f32 -4347.419, %v2007_v16  ;;  %v2019_v48 = vpop.xlane.xlu0 %2018 }
 0x188   : > { %v9977_v44 = vpop.eup %9976  ;;  %v12833_v1 = vmul.f32 0.6931472, %v9975_v63  ;;  %v1397_v19 = vsub.f32 0.0, %v12824_v45  ;;  %10002 = vlog2.f32 %v12796_v56  ;;  %2096 = vst.msk [vmem:[#allocation3 + $0x28] sm:$0xff] %vm2090_vm1, %v2079_v20  ;;  %v2081_v62 = vadd.f32 -4347.419, %v2025_v54 }
 0x189   : > { %v9979_v47 = vpop.eup %9978  ;;  %v12838_v29 = vmul.f32 0.6931472, %v9977_v44  ;;  %v1398_v60 = vsub.f32 0.0, %v12828_v46  ;;  %10004 = vlog2.f32 %v12798_v41  ;;  %2095 = vst.msk [vmem:[#allocation3 + $0x20] sm:$0xff] %vm2090_vm1, %v2078_v5 }
 0x18a   : > { %v9981_v2 = vpop.eup %9980  ;;  %v1399_v11 = vsub.f32 0.0, %v12833_v1  ;;  %v1650_v13 = vmul.f32 0.6931472, %v9979_v47  ;;  %10006 = vlog2.f32 %v12800_v33  ;;  %2098 = vst.msk [vmem:[#allocation3 + $0x38] sm:$0xff] %vm2090_vm1, %v2081_v62 }
 0x18b   : > { %v9983_v3 = vpop.eup %9982  ;;  %v1400_v59 = vsub.f32 0.0, %v12838_v29  ;;  %v1652_v51 = vmul.f32 0.6931472, %v9981_v2  ;;  %10008 = vlog2.f32 %v12802_v28 }
 0x18c   : > { %v9985_v30 = vpop.eup %9984  ;;  %v1654_v53 = vmul.f32 0.6931472, %v9983_v3  ;;  %v1845_v17 = vsub.f32 %v1333_v12, %v1650_v13  ;;  %v2167_v52 = vsub.f32 %v12807_v43, %v1650_v13  ;;  %10010 = vlog2.f32 %v1457_v25 }
 0x18d   : > { %v9987_v9 = vpop.eup %9986  ;;  %v1656_v35 = vmul.f32 0.6931472, %v9985_v30  ;;  %v1846_v39 = vsub.f32 %v1334_v6, %v1652_v51  ;;  %v2168_v4 = vsub.f32 %v12811_v7, %v1652_v51  ;;  %10012 = vlog2.f32 %v1458_v57 }
 0x18e   : > { %v9989_v49 = vpop.eup %9988  ;;  %v1778_v24 = vmul.f32 0.6931472, %v9987_v9  ;;  %v1847_v58 = vsub.f32 %v1335_v37, %v1654_v53  ;;  %v2169_v36 = vsub.f32 %v12815_v40, %v1654_v53  ;;  %2295 = vst [vmem:[#allocation2 + $0x1e0] sm:$0xff] %v2167_v52  ;;  %10014 = vlog2.f32 %v1459_v18 }
 0x18f   : > { %v9991_v23 = vpop.eup %9990  ;;  %v1780_v25 = vmul.f32 0.6931472, %v9989_v49  ;;  %v1848_v43 = vsub.f32 %v1336_v26, %v1656_v35  ;;  %v2170_v34 = vsub.f32 %v12819_v22, %v1656_v35  ;;  %2296 = vst [vmem:[#allocation2 + $0x1e8] sm:$0xff] %v2168_v4  ;;  %10016 = vlog2.f32 %v1460_v8 }
 0x190   : > { %v9993_v38 = vpop.eup %9992  ;;  %v1782_v57 = vmul.f32 0.6931472, %v9991_v23  ;;  %v1909_v0 = vsub.f32 %v1397_v19, %v1778_v24  ;;  %v2231_v7 = vsub.f32 %v12824_v45, %v1778_v24  ;;  %2297 = vst [vmem:[#allocation2 + $0x1f0] sm:$0xff] %v2169_v36  ;;  %10018 = vlog2.f32 %v1521_v21 }
 0x191   : > { %v9995_v42 = vpop.eup %9994  ;;  %v1784_v18 = vmul.f32 0.6931472, %v9993_v38  ;;  %v1910_v27 = vsub.f32 %v1398_v60, %v1780_v25  ;;  %v2232_v40 = vsub.f32 %v12828_v46, %v1780_v25  ;;  %2298 = vst.msk [vmem:[#allocation2 + $0x1f8] sm:$0xff] %vm1979_vm0, %v2170_v34  ;;  %10020 = vlog2.f32 %v1522_v61  ;;  %v2037_v63 = vpop.xlane.xlu1 %2036 }
 0x192   : > { %v9997_v14 = vpop.eup %9996  ;;  %v1911_v8 = vsub.f32 %v1399_v11, %v1782_v57  ;;  %v1973_v12 = vadd.f32 %v1909_v0, %v1845_v17  ;;  %v2233_v55 = vsub.f32 %v12833_v1, %v1782_v57  ;;  %2359 = vst [vmem:[#allocation2 + $0x3e0] sm:$0xff] %v2231_v7  ;;  %v1524_v22 = vsub.f32 1.0, %v12802_v28 }
 0x193   : > { %v9999_v56 = vpop.eup %9998  ;;  %v1912_v21 = vsub.f32 %v1400_v59, %v1784_v18  ;;  %v1974_v6 = vadd.f32 %v1910_v27, %v1846_v39  ;;  %v2234_v10 = vsub.f32 %v12838_v29, %v1784_v18  ;;  %2360 = vst [vmem:[#allocation2 + $0x3e8] sm:$0xff] %v2232_v40  ;;  %10022 = vlog2.f32 %v1523_v32 }
 0x194   : > { %v10001_v45 = vpop.eup %10000  ;;  %v1975_v37 = vadd.f32 %v1911_v8, %v1847_v58  ;;  %2361 = vst [vmem:[#allocation2 + $0x3f0] sm:$0xff] %v2233_v55  ;;  %v1130_v46 = vmul.f32 0.6931472, %v9995_v42  ;;  %10024 = vlog2.f32 %v1524_v22  ;;  %v2080_v26 = vadd.f32 -4347.419, %v2019_v48 }
 0x195   : > { %v10003_v41 = vpop.eup %10002  ;;  %v1976_v61 = vadd.f32 %v1912_v21, %v1848_v43  ;;  %v2068_v50 = vadd.f32 %v1974_v6, %v1973_v12  ;;  %2362 = vst.msk [vmem:[#allocation2 + $0x3f8] sm:$0xff] %vm1979_vm0, %v2234_v10  ;;  %v1132_v1 = vmul.f32 0.6931472, %v9997_v14  ;;  %v2083_v33 = vadd.f32 -4347.419, %v2037_v63 }
 0x196   : > { %v10005_v28 = vpop.eup %10004  ;;  %v1258_v15 = vmul.f32 0.6931472, %v10003_v41  ;;  %2097 = vst.msk [vmem:[#allocation3 + $0x30] sm:$0xff] %vm2090_vm1, %v2080_v26  ;;  %v1134_v47 = vmul.f32 0.6931472, %v9999_v56  ;;  %v1329_v20 = vsub.f32 0.0, %v1130_v46 }
 0x197   : > { %v10007_v31 = vpop.eup %10006  ;;  %v2069_v16 = vadd.f32 %v2068_v50, %v1975_v37  ;;  %v2070_v44 = vsel %vm1979_vm0, %v1976_v61, 0.0  ;;  %v1260_v29 = vmul.f32 0.6931472, %v10005_v28  ;;  %2100 = vst.msk [vmem:[#allocation3 + $0x48] sm:$0xff] %vm2090_vm1, %v2083_v33  ;;  %v1136_v13 = vmul.f32 0.6931472, %v10001_v45 }
 0x198   : > { %v10009_v19 = vpop.eup %10008  ;;  %v1330_v5 = vsub.f32 0.0, %v1132_v1  ;;  %v1262_v51 = vmul.f32 0.6931472, %v10007_v31  ;;  %v1393_v62 = vsub.f32 0.0, %v1258_v15  ;;  %v1331_v52 = vsub.f32 0.0, %v1134_v47 }
 0x199   : > { %v10011_v32 = vpop.eup %10010  ;;  %v2071_v54 = vadd.f32 %v2070_v44, %v2069_v16  ;;  %v1394_v9 = vsub.f32 0.0, %v1260_v29  ;;  %v1264_v49 = vmul.f32 0.6931472, %v10009_v19  ;;  %v1332_v34 = vsub.f32 0.0, %v1136_v13 }
 0x19a   : > { %v10013_v60 = vpop.eup %10012  ;;  %v1642_v2 = vmul.f32 0.6931472, %v10011_v32  ;;  %v1395_v38 = vsub.f32 0.0, %v1262_v51 }
 0x19b   : > { %v10015_v11 = vpop.eup %10014  ;;  %2072 = vadd.xlane.f32.xlu1 %v2071_v54  ;;  %v1644_v3 = vmul.f32 0.6931472, %v10013_v60  ;;  %v1396_v27 = vsub.f32 0.0, %v1264_v49 }
 0x19c   : > { %v10017_v59 = vpop.eup %10016  ;;  %v1646_v30 = vmul.f32 0.6931472, %v10015_v11  ;;  %v2163_v53 = vsub.f32 %v1130_v46, %v1642_v2  ;;  %v1841_v58 = vsub.f32 %v1329_v20, %v1642_v2 }
 0x19d   : > { %v10019_v17 = vpop.eup %10018  ;;  %v1648_v35 = vmul.f32 0.6931472, %v10017_v59  ;;  %v2164_v39 = vsub.f32 %v1132_v1, %v1644_v3  ;;  %v1842_v25 = vsub.f32 %v1330_v5, %v1644_v3 }
 0x19e   : > { %v10021_v4 = vpop.eup %10020  ;;  %v1770_v24 = vmul.f32 0.6931472, %v10019_v17  ;;  %v2165_v36 = vsub.f32 %v1134_v47, %v1646_v30  ;;  %2291 = vst [vmem:[#allocation2 + $0x1c0] sm:$0xff] %v2163_v53  ;;  %v1843_v14 = vsub.f32 %v1331_v52, %v1646_v30 }
 0x19f   : > { %v1772_v23 = vmul.f32 0.6931472, %v10021_v4  ;;  %v2166_v43 = vsub.f32 %v1136_v13, %v1648_v35  ;;  %2292 = vst [vmem:[#allocation2 + $0x1c8] sm:$0xff] %v2164_v39  ;;  %v1844_v56 = vsub.f32 %v1332_v34, %v1648_v35 }
 0x1a0   : > { %v1905_v57 = vsub.f32 %v1393_v62, %v1770_v24  ;;  %v2227_v0 = vsub.f32 %v1258_v15, %v1770_v24  ;;  %2293 = vst [vmem:[#allocation2 + $0x1d0] sm:$0xff] %v2165_v36  ;;  %v10023_v7 = vpop.eup %10022 }
 0x1a1   : > { %v1906_v42 = vsub.f32 %v1394_v9, %v1772_v23  ;;  %v2228_v18 = vsub.f32 %v1260_v29, %v1772_v23  ;;  %2294 = vst.msk [vmem:[#allocation2 + $0x1d8] sm:$0xff] %vm1979_vm0, %v2166_v43  ;;  %v1774_v40 = vmul.f32 0.6931472, %v10023_v7  ;;  %v10025_v12 = vpop.eup %10024 }
 0x1a2   : > { %v1969_v8 = vadd.f32 %v1905_v57, %v1841_v58  ;;  %2355 = vst [vmem:[#allocation2 + $0x3c0] sm:$0xff] %v2227_v0  ;;  %v1776_v22 = vmul.f32 0.6931472, %v10025_v12 }
 0x1a3   : > { %v1970_v55 = vadd.f32 %v1906_v42, %v1842_v25  ;;  %2356 = vst [vmem:[#allocation2 + $0x3c8] sm:$0xff] %v2228_v18  ;;  %v1907_v21 = vsub.f32 %v1395_v38, %v1774_v40  ;;  %v2229_v6 = vsub.f32 %v1262_v51, %v1774_v40 }
 0x1a4   : > { %v2031_v48 = vpop.xlane.xlu0 %2030  ;;  %v1908_v45 = vsub.f32 %v1396_v27, %v1776_v22  ;;  %v2230_v41 = vsub.f32 %v1264_v49, %v1776_v22 }
 0x1a5   : > { %v2062_v10 = vadd.f32 %v1970_v55, %v1969_v8  ;;  %v1971_v37 = vadd.f32 %v1907_v21, %v1843_v14  ;;  %2357 = vst [vmem:[#allocation2 + $0x3d0] sm:$0xff] %v2229_v6  ;;  %v2082_v61 = vadd.f32 -4347.419, %v2031_v48 }
 0x1a6   : > { %v1972_v50 = vadd.f32 %v1908_v45, %v1844_v56  ;;  %2358 = vst.msk [vmem:[#allocation2 + $0x3d8] sm:$0xff] %vm1979_vm0, %v2230_v41 }
 0x1a7   : > { %v2063_v63 = vadd.f32 %v2062_v10, %v1971_v37  ;;  %2099 = vst.msk [vmem:[#allocation3 + $0x40] sm:$0xff] %vm2090_vm1, %v2082_v61 }
 0x1a8   : > { %v2064_v28 = vsel %vm1979_vm0, %v1972_v50, 0.0 }
 0x1a9   : > { %v2065_v46 = vadd.f32 %v2064_v28, %v2063_v63 }
 0x1ab   : > { %2066 = vadd.xlane.f32.xlu0 %v2065_v46 }
 0x1c2   : > { %v2049_v26 = vpop.xlane.xlu1 %2048 }
 0x1c3   : > { %v2085_v31 = vadd.f32 -4347.419, %v2049_v26 }
 0x1c5   : > { %2102 = vst.msk [vmem:[#allocation3 + $0x58] sm:$0xff] %vm2090_vm1, %v2085_v31 }
 0x1d5   : > { %v2043_v16 = vpop.xlane.xlu0 %2042 }
 0x1d6   : > { %v2084_v44 = vadd.f32 -4347.419, %v2043_v16 }
 0x1d8   : > { %2101 = vst.msk [vmem:[#allocation3 + $0x50] sm:$0xff] %vm2090_vm1, %v2084_v44 }
 0x1f2   : > { %v2061_v1 = vpop.xlane.xlu1 %2060 }
 0x1f3   : > { %v2087_v19 = vadd.f32 -4347.419, %v2061_v1 }
 0x1f5   : > { %2104 = vst.msk [vmem:[#allocation3 + $0x68] sm:$0xff] %vm2090_vm1, %v2087_v19 }
 0x204   : > { %v2055_v15 = vpop.xlane.xlu0 %2054 }
 0x205   : > { %v2086_v33 = vadd.f32 -4347.419, %v2055_v15 }
 0x207   : > { %2103 = vst.msk [vmem:[#allocation3 + $0x60] sm:$0xff] %vm2090_vm1, %v2086_v33 }
 0x224   : > { %v2073_v32 = vpop.xlane.xlu1 %2072 }
 0x225   : > { %v2089_v54 = vadd.f32 -4347.419, %v2073_v32 }
 0x227   : > { %2106 = vst.msk [vmem:[#allocation3 + $0x78] sm:$0xff] %vm2090_vm1, %v2089_v54 }
 0x234   : > { %v2067_v47 = vpop.xlane.xlu0 %2066 }
 0x235   : > { %v2088_v29 = vadd.f32 -4347.419, %v2067_v47 }
 0x237   : > { %2105 = vst.msk [vmem:[#allocation3 + $0x70] sm:$0xff] %vm2090_vm1, %v2088_v29 }
 0x238 PF: > { %p2363_p6 = scmp.lt.s32.totalorder %s11180_s30, 0  ;;  %s2364_s1 = ssub.s32 0, %s11180_s30 }
 0x239   : > { %s8974_s14 = smin.u32 %s11180_s30, %s2364_s1 }
 0x23a   : > { %s2366_s23 = sand.u32 1, %s8974_s14  }
 0x23b   : > { %s2367_s29 = ssub.s32 0, %s2366_s23 }
 0x23c   : > { %s15290_s29 = smov (!%p2363_p6, %s2367_s29), %s2366_s23 }
 0x23d   : > { %p8976_p7 = scmp.lt.s32.totalorder %s15290_s29, 0  ;;  %s2373_s19 = sadd.s32 2, %s15290_s29 }
 0x23f   : > { %s15292_s19 = smov (!%p8976_p7, %s2373_s19), %s15290_s29 }
 0x240   : > { %p8977_p8 = scmp.ne.s32.totalorder %s15292_s19, 0 }
 0x242   : > { %2378 = sbr.rel (%p8977_p8) target bundleno = 1528 (0x5f8), region = 64 }
 0x247   : > { %v10026_v60 = vld [vmem:[%s11270_s22 + $0x74] ss:$8 sps:$4 sm:$0xff]   ;;  %v10028_v20 = vld [vmem:[%s11270_s22 + $0x70] ss:$8 sps:$4 sm:$0xff]   ;;  %v10029_v2 = vld [vmem:[%s11270_s22 + $0x64] ss:$8 sps:$4 sm:$0xff]  }
 0x248   : > { %2813 = vmatprep.subr.bf16.mxu0 %v10026_v60  ;;  %v10031_v11 = vld [vmem:[%s11270_s22 + $0x60] ss:$8 sps:$4 sm:$0xff]   ;;  %v10032_v13 = vld [vmem:[%s11270_s22 + $0x54] ss:$8 sps:$4 sm:$0xff]   ;;  %v10034_v5 = vld [vmem:[%s11270_s22 + $0x50] ss:$8 sps:$4 sm:$0xff]  }
 0x249   : > { %2814 = vmatpush1.bf16.msra.mxu0 %v10028_v20  ;;  %v10035_v3 = vld [vmem:[%s11270_s22 + $0x44] ss:$8 sps:$4 sm:$0xff]   ;;  %v10046_v59 = vld [vmem:[%s11270_s22 + $0x174] ss:$8 sps:$4 sm:$0xff]   ;;  %v10049_v51 = vld [vmem:[%s11270_s22 + $0x170] ss:$8 sps:$4 sm:$0xff]  }
 0x24a   : > { %2815 = vmatprep.subr.bf16.mxu0 %v10029_v2  ;;  %v10037_v62 = vld [vmem:[%s11270_s22 + $0x40] ss:$8 sps:$4 sm:$0xff]   ;;  %2926 = vmatprep.subr.bf16.mxu1 %v10046_v59  ;;  %v10038_v30 = vld [vmem:[%s11270_s22 + $0x34] ss:$8 sps:$4 sm:$0xff]   ;;  %v10052_v53 = vld [vmem:[%s11270_s22 + $0x164] ss:$8 sps:$4 sm:$0xff]  }
 0x24b   : > { %2927 = vmatpush1.bf16.msra.mxu1 %v10049_v51  ;;  %v10055_v17 = vld [vmem:[%s11270_s22 + $0x160] ss:$8 sps:$4 sm:$0xff]   ;;  %v10040_v52 = vld [vmem:[%s11270_s22 + $0x30] ss:$8 sps:$4 sm:$0xff]   ;;  %v10041_v9 = vld [vmem:[%s11270_s22 + $0x24] ss:$8 sps:$4 sm:$0xff]  }
 0x24c   : > { %2928 = vmatprep.subr.bf16.mxu1 %v10052_v53  ;;  %v10058_v35 = vld [vmem:[%s11270_s22 + $0x154] ss:$8 sps:$4 sm:$0xff]   ;;  %v10061_v39 = vld [vmem:[%s11270_s22 + $0x150] ss:$8 sps:$4 sm:$0xff]   ;;  %v10064_v4 = vld [vmem:[%s11270_s22 + $0x144] ss:$8 sps:$4 sm:$0xff]  }
 0x24d   : > { %2816 = vmatpush1.bf16.msra.mxu0 %v10031_v11  ;;  %v10043_v49 = vld [vmem:[%s11270_s22 + $0x20] ss:$8 sps:$4 sm:$0xff]   ;;  %v10044_v24 = vld [vmem:[%s11270_s22 + $0x14] ss:$8 sps:$4 sm:$0xff]   ;;  %v10048_v23 = vld [vmem:[%s11270_s22 + $0x10] ss:$8 sps:$4 sm:$0xff]  }
 0x24e   : > { %2817 = vmatprep.subr.bf16.mxu0 %v10032_v13  ;;  %v10067_v58 = vld [vmem:[%s11270_s22 + $0x140] ss:$8 sps:$4 sm:$0xff]   ;;  %v10070_v36 = vld [vmem:[%s11270_s22 + $0x134] ss:$8 sps:$4 sm:$0xff]   ;;  %v10050_v25 = vld [vmem:[%s11270_s22 + $0x4] ss:$8 sps:$4 sm:$0xff]  }
 0x24f   : > { %2929 = vmatpush1.bf16.msra.mxu1 %v10055_v17  ;;  %v10073_v43 = vld [vmem:[%s11270_s22 + $0x130] ss:$8 sps:$4 sm:$0xff]   ;;  %v10076_v34 = vld [vmem:[%s11270_s22 + $0x124] ss:$8 sps:$4 sm:$0xff]   ;;  %v10054_v38 = vld [vmem:[%s11270_s22] ss:$8 sps:$4 sm:$0xff]  }
 0x250   : > { %2930 = vmatprep.subr.bf16.mxu1 %v10058_v35  ;;  %v10056_v57 = vld [vmem:[%s11270_s22 + $0xf4] ss:$8 sps:$4 sm:$0xff]   ;;  %v10079_v0 = vld [vmem:[%s11270_s22 + $0x120] ss:$8 sps:$4 sm:$0xff]   ;;  %v10060_v42 = vld [vmem:[%s11270_s22 + $0xf0] ss:$8 sps:$4 sm:$0xff]  }
 0x251   : > { %2818 = vmatpush1.bf16.msra.mxu0 %v10034_v5  ;;  %v10082_v7 = vld [vmem:[%s11270_s22 + $0x114] ss:$8 sps:$4 sm:$0xff]   ;;  %vm2781_vm2 = vcmask 64512   ;;  %v10062_v40 = vld [vmem:[%s11270_s22 + $0xe4] ss:$8 sps:$4 sm:$0xff]   ;;  %vm2806_vm3 = vcmask 1043456  }
 0x252   : > { %2819 = vmatprep.subr.bf16.mxu0 %v10035_v3  ;;  %v2382_v18 = vld [vmem:[#allocation2 + $0x18] sm:$0xff]  ;;  %v10088_v12 = vld [vmem:[%s11270_s22 + $0x104] ss:$8 sps:$4 sm:$0xff]   ;;  %v10066_v21 = vld [vmem:[%s11270_s22 + $0xe0] ss:$8 sps:$4 sm:$0xff]   ;;  %vm5293_vm4 = vcmask 7168  }
 0x253   : > { %2931 = vmatpush1.bf16.msra.mxu1 %v10061_v39  ;;  %v2386_v27 = vld [vmem:[#allocation2 + $0x38] sm:$0xff]  ;;  %v2380_v55 = vld [vmem:[#allocation2 + $0x8] sm:$0xff]  ;;  %v2523_v22 = vld [vmem:[%s11270_s22 + $0x180] sm:$0xff] }
 0x254   : > { %2932 = vmatprep.subr.bf16.mxu1 %v10064_v4  ;;  %v10085_v14 = vld [vmem:[%s11270_s22 + $0x110] ss:$8 sps:$4 sm:$0xff]   ;;  %v2446_v8 = vpack.c.bf16 %v2386_v27, %v2382_v18  ;;  %v2384_v56 = vld [vmem:[#allocation2 + $0x28] sm:$0xff]  ;;  %v10068_v10 = vld [vmem:[%s11270_s22 + $0xd4] ss:$8 sps:$4 sm:$0xff]   ;;  %v9027_v45 = vcombine.high %v2523_v22, %v2523_v22  ;;  %v9026_v37 = vcombine.low %v2523_v22, %v2523_v22 }
 0x255   : > { %2820 = vmatpush1.bf16.msra.mxu0 %v10037_v62  ;;  %v2444_v6 = vpack.c.bf16 %v2384_v56, %v2380_v55  ;;  %v10091_v48 = vld [vmem:[%s11270_s22 + $0x100] ss:$8 sps:$4 sm:$0xff]   ;;  %v10072_v41 = vld [vmem:[%s11270_s22 + $0xd0] ss:$8 sps:$4 sm:$0xff]   ;;  %v10074_v61 = vld [vmem:[%s11270_s22 + $0xc4] ss:$8 sps:$4 sm:$0xff]  }
 0x256   : > { %2821 = vmatprep.subr.bf16.mxu0 %v10038_v30  ;;  %9029 = vmatprep.mubr.msk.bf16.mxu1 %vm2781_vm2, %v2446_v8  ;;  %v2381_v50 = vld [vmem:[#allocation2 + $0x10] sm:$0xff]  ;;  %v2808_v28 = vsel %vm2806_vm3, %v9026_v37, 0  ;;  %v2390_v46 = vld [vmem:[#allocation2 + $0x58] sm:$0xff]  ;;  %v10078_v31 = vld [vmem:[%s11270_s22 + $0xc0] ss:$8 sps:$4 sm:$0xff]  }
 0x257   : > { %2933 = vmatpush1.bf16.msra.mxu1 %v10067_v58  ;;  %2845 = vmatprep.mubr.bf16.mxu0 %v2444_v6  ;;  %v2385_v63 = vld [vmem:[#allocation2 + $0x30] sm:$0xff]  ;;  %v2394_v26 = vld [vmem:[#allocation2 + $0x78] sm:$0xff]  ;;  %v10086_v15 = vld [vmem:[%s11270_s22 + $0xa4] ss:$8 sps:$4 sm:$0xff]  }
 0x258   : > { %2934 = vmatprep.subr.bf16.mxu1 %v10070_v36  ;;  %v2445_v16 = vpack.c.bf16 %v2385_v63, %v2381_v50  ;;  %v10080_v44 = vld [vmem:[%s11270_s22 + $0xb4] ss:$8 sps:$4 sm:$0xff]   ;;  %v2450_v1 = vpack.c.bf16 %v2394_v26, %v2390_v46  ;;  %v10084_v19 = vld [vmem:[%s11270_s22 + $0xb0] ss:$8 sps:$4 sm:$0xff]   ;;  %v10090_v29 = vld [vmem:[%s11270_s22 + $0xa0] ss:$8 sps:$4 sm:$0xff]  }
 0x259   : > { %2822 = vmatpush1.bf16.msra.mxu0 %v10040_v52  ;;  %v2389_v33 = vld [vmem:[#allocation2 + $0x50] sm:$0xff]  ;;  %v2398_v54 = vld [vmem:[#allocation2 + $0x98] sm:$0xff]  ;;  %v10097_v13 = vld [vmem:[%s11270_s22 + $0x84] ss:$8 sps:$4 sm:$0xff]  }
 0x25a   : > { %2823 = vmatprep.subr.bf16.mxu0 %v10041_v9  ;;  %v2393_v32 = vld [vmem:[#allocation2 + $0x70] sm:$0xff]  ;;  %v2402_v47 = vld [vmem:[#allocation2 + $0xb8] sm:$0xff]  ;;  %v10105_v62 = vld [vmem:[%s11275_s25 + $0x64] ss:$8 sps:$4 sm:$0xff]  }
 0x25b   : > { %2935 = vmatpush1.bf16.msra.mxu1 %v10073_v43  ;;  %v2449_v60 = vpack.c.bf16 %v2393_v32, %v2389_v33  ;;  %v10092_v20 = vld [vmem:[%s11270_s22 + $0x94] ss:$8 sps:$4 sm:$0xff]   ;;  %v2454_v2 = vpack.c.bf16 %v2402_v47, %v2398_v54  ;;  %v10095_v11 = vld [vmem:[%s11270_s22 + $0x90] ss:$8 sps:$4 sm:$0xff]   ;;  %v10099_v30 = vld [vmem:[%s11270_s22 + $0x80] ss:$8 sps:$4 sm:$0xff]  }
 0x25c   : > { %2936 = vmatprep.subr.bf16.mxu1 %v10076_v34  ;;  %v2397_v5 = vld [vmem:[#allocation2 + $0x90] sm:$0xff]  ;;  %v2379_v53 = vld [vmem:[#allocation2] sm:$0xff]  ;;  %v2406_v52 = vld [vmem:[#allocation2 + $0xd8] sm:$0xff] }
 0x25d   : > { %2824 = vmatpush1.bf16.msra.mxu0 %v10043_v49  ;;  %v10100_v3 = vld [vmem:[%s11275_s25 + $0x70] ss:$8 sps:$4 sm:$0xff]   ;;  %v10102_v59 = vld [vmem:[%s11275_s25 + $0x74] ss:$8 sps:$4 sm:$0xff]   ;;  %v2383_v17 = vld [vmem:[#allocation2 + $0x20] sm:$0xff] }
 0x25e   : > { %2825 = vmatprep.subr.bf16.mxu0 %v10044_v24  ;;  %v2401_v51 = vld [vmem:[#allocation2 + $0xb0] sm:$0xff]  ;;  %v2410_v9 = vld [vmem:[#allocation2 + $0xf8] sm:$0xff]  ;;  %v2388_v35 = vld [vmem:[#allocation2 + $0x48] sm:$0xff]  ;;  %v2443_v36 = vpack.c.bf16 %v2383_v17, %v2379_v53 }
 0x25f   : > { %2937 = vmatpush1.bf16.msra.mxu1 %v10079_v0  ;;  %v10103_v39 = vld [vmem:[%s11275_s25 + $0x60] ss:$8 sps:$4 sm:$0xff]   ;;  %v2453_v49 = vpack.c.bf16 %v2401_v51, %v2397_v5  ;;  %v2458_v24 = vpack.c.bf16 %v2410_v9, %v2406_v52  ;;  %v10108_v58 = vld [vmem:[%s11275_s25 + $0x54] ss:$8 sps:$4 sm:$0xff]   ;;  %v10111_v34 = vld [vmem:[%s11275_s25 + $0x44] ss:$8 sps:$4 sm:$0xff]  }
 0x260   : > { %2938 = vmatprep.subr.bf16.mxu1 %v10082_v7  ;;  %v2392_v4 = vld [vmem:[#allocation2 + $0x68] sm:$0xff]  ;;  %v2391_v0 = vld [vmem:[#allocation2 + $0x60] sm:$0xff]  ;;  %v2414_v7 = vld [vmem:[#allocation2 + $0x118] sm:$0xff] }
 0x261   : > { %2826 = vmatpush1.bf16.msra.mxu0 %v10048_v23  ;;  %v2405_v23 = vld [vmem:[#allocation2 + $0xd0] sm:$0xff]  ;;  %v2448_v43 = vpack.c.bf16 %v2392_v4, %v2388_v35  ;;  %v2396_v18 = vld [vmem:[#allocation2 + $0x88] sm:$0xff]  ;;  %v2430_v33 = vld [vmem:[#allocation2 + $0x198] sm:$0xff] }
 0x262   : > { %2827 = vmatprep.subr.bf16.mxu0 %v10050_v25  ;;  %v10106_v25 = vld [vmem:[%s11275_s25 + $0x50] ss:$8 sps:$4 sm:$0xff]   ;;  %v10109_v27 = vld [vmem:[%s11275_s25 + $0x40] ss:$8 sps:$4 sm:$0xff]   ;;  %v10117_v22 = vld [vmem:[%s11275_s25 + $0x24] ss:$8 sps:$4 sm:$0xff]  }
 0x263   : > { %2939 = vmatpush1.bf16.msra.mxu1 %v10085_v14  ;;  %v10114_v14 = vld [vmem:[%s11275_s25 + $0x34] ss:$8 sps:$4 sm:$0xff]   ;;  %v2400_v8 = vld [vmem:[#allocation2 + $0xa8] sm:$0xff]  ;;  %v10112_v55 = vld [vmem:[%s11275_s25 + $0x30] ss:$8 sps:$4 sm:$0xff]  }
 0x264   : > { %2940 = vmatprep.subr.bf16.mxu1 %v10088_v12  ;;  %v2417_v6 = vld [vmem:[#allocation2 + $0x130] sm:$0xff]  ;;  %v10115_v37 = vld [vmem:[%s11275_s25 + $0x20] ss:$8 sps:$4 sm:$0xff]   ;;  %v2434_v32 = vld [vmem:[#allocation2 + $0x1b8] sm:$0xff] }
 0x265   : > { %2828 = vmatpush1.bf16.msra.mxu0 %v10054_v38  ;;  %v2409_v38 = vld [vmem:[#allocation2 + $0xf0] sm:$0xff]  ;;  %v2404_v63 = vld [vmem:[#allocation2 + $0xc8] sm:$0xff]  ;;  %v2403_v47 = vld [vmem:[#allocation2 + $0xc0] sm:$0xff] }
 0x266   : > { %2829 = vmatprep.subr.bf16.mxu0 %v10056_v57  ;;  %v2387_v57 = vld [vmem:[#allocation2 + $0x40] sm:$0xff]  ;;  %v10120_v50 = vld [vmem:[%s11275_s25 + $0x14] ss:$8 sps:$4 sm:$0xff]   ;;  %v10124_v5 = vld [vmem:[%s11275_s25 + $0xf0] ss:$8 sps:$4 sm:$0xff]  }
 0x267   : > { %2941 = vmatpush1.bf16.msra.mxu1 %v10091_v48  ;;  %v2447_v56 = vpack.c.bf16 %v2391_v0, %v2387_v57  ;;  %v2422_v48 = vld [vmem:[#allocation2 + $0x158] sm:$0xff]  ;;  %v10121_v54 = vld [vmem:[%s11275_s25] ss:$8 sps:$4 sm:$0xff]   ;;  %v2429_v51 = vld [vmem:[#allocation2 + $0x190] sm:$0xff] }
 0x268   : > { %9028 = vmatprep.subr.msk.bf16.mxu1 %vm2806_vm3, %v9027_v45  ;;  %v2426_v45 = vld [vmem:[#allocation2 + $0x178] sm:$0xff]  ;;  %v10127_v52 = vld [vmem:[%s11275_s25 + $0xe0] ss:$8 sps:$4 sm:$0xff]  }
 0x269   : > { %2830 = vmatpush2.bf16.msra.mxu0 %v10060_v42  ;;  %v2418_v42 = vld [vmem:[#allocation2 + $0x138] sm:$0xff]  ;;  %v2466_v26 = vpack.c.bf16 %v2426_v45, %v2422_v48  ;;  %v2411_v9 = vld [vmem:[#allocation2 + $0x100] sm:$0xff]  ;;  %v2420_v4 = vld [vmem:[#allocation2 + $0x148] sm:$0xff] }
 0x26a   : > { %2831 = vmatprep.subr.bf16.mxu0 %v10062_v40  ;;  %v2457_v40 = vpack.c.bf16 %v2409_v38, %v2405_v23  ;;  %v2462_v12 = vpack.c.bf16 %v2418_v42, %v2414_v7  ;;  %v2438_v53 = vld [vmem:[#allocation2 + $0x1d8] sm:$0xff]  ;;  %v2415_v35 = vld [vmem:[#allocation2 + $0x120] sm:$0xff]  ;;  %v2428_v42 = vld [vmem:[#allocation2 + $0x188] sm:$0xff] }
 0x26b   : > { %2957 = vmatpush2.bf16.msra.mxu1 %v2808_v28  ;;  %v2408_v28 = vld [vmem:[#allocation2 + $0xe8] sm:$0xff]  ;;  %v2442_v17 = vld [vmem:[#allocation2 + $0x1f8] sm:$0xff]  ;;  %v2419_v0 = vld [vmem:[#allocation2 + $0x140] sm:$0xff] }
 0x26c   : > { %3291 = vmatprep.subr.bf16.mxu1 %v10102_v59  ;;  %v10135_v23 = vld [vmem:[%s11275_s25 + $0xc4] ss:$8 sps:$4 sm:$0xff]   ;;  %v10133_v57 = vld [vmem:[%s11275_s25 + $0xc0] ss:$8 sps:$4 sm:$0xff]   ;;  %v10136_v48 = vld [vmem:[%s11275_s25 + $0xb0] ss:$8 sps:$4 sm:$0xff]  }
 0x26d   : > { %2832 = vmatpush2.bf16.msra.mxu0 %v10066_v21  ;;  %v2413_v21 = vld [vmem:[#allocation2 + $0x110] sm:$0xff]  ;;  %v2423_v7 = vld [vmem:[#allocation2 + $0x160] sm:$0xff] }
 0x26e   : > { %2833 = vmatprep.subr.bf16.mxu0 %v10068_v10  ;;  %2959 = vmatmul.mubr.bf16.vlgmr.msra.gmra.mxu1 %v2445_v16  ;;  %v2452_v10 = vpack.c.bf16 %v2400_v8, %v2396_v18  ;;  %v2461_v46 = vpack.c.bf16 %v2417_v6, %v2413_v21  ;;  %v10123_v16 = vld [vmem:[%s11275_s25 + $0x4] ss:$8 sps:$4 sm:$0xff]   ;;  %v10138_v45 = vld [vmem:[%s11275_s25 + $0xb4] ss:$8 sps:$4 sm:$0xff]  }
 0x26f   : > { %9030 = vmatprep.mubr.msk.bf16.mxu1 %vm2781_vm2, %v2450_v1  ;;  %3292 = vmatpush1.bf16.msra.mxu1 %v10100_v3  ;;  %v2421_v1 = vld [vmem:[#allocation2 + $0x150] sm:$0xff]  ;;  %v10129_v3 = vld [vmem:[%s11275_s25 + $0xe4] ss:$8 sps:$4 sm:$0xff]  }
 0x270   : > { %3293 = vmatprep.subr.bf16.mxu1 %v10105_v62  ;;  %v2433_v62 = vld [vmem:[#allocation2 + $0x1b0] sm:$0xff]  ;;  %v2432_v18 = vld [vmem:[#allocation2 + $0x1a8] sm:$0xff]  ;;  %v2427_v8 = vld [vmem:[#allocation2 + $0x180] sm:$0xff] }
 0x271   : > { %2834 = vmatpush2.bf16.msra.mxu0 %v10072_v41  ;;  %v2395_v41 = vld [vmem:[#allocation2 + $0x80] sm:$0xff] }
 0x272   : > { %2835 = vmatprep.subr.bf16.mxu0 %v10074_v61  ;;  %v2399_v61 = vld [vmem:[#allocation2 + $0xa0] sm:$0xff] }
 0x273   : > { %3294 = vmatpush1.bf16.msra.mxu1 %v10103_v39  ;;  %v10132_v39 = vld [vmem:[%s11275_s25 + $0xd4] ss:$8 sps:$4 sm:$0xff]   ;;  %v2435_v6 = vld [vmem:[#allocation2 + $0x1c0] sm:$0xff] }
 0x274   : > { %3295 = vmatprep.subr.bf16.mxu1 %v10108_v58  ;;  %v2474_v58 = vpack.c.bf16 %v2442_v17, %v2438_v53  ;;  %v10208_v17 = vld [vmem:[%s11285_s2 + $0x1a0] ss:$16 sps:$4 sm:$0xff]  }
 0x275   : > { %2836 = vmatpush2.bf16.msra.mxu0 %v10078_v31  ;;  %v10118_v31 = vld [vmem:[%s11275_s25 + $0x10] ss:$8 sps:$4 sm:$0xff]  }
 0x276   : > { %2837 = vmatprep.subr.bf16.mxu0 %v10080_v44  ;;  %2969 = vmatmul.mubr.bf16.gmra.mxu1 %v2449_v60  ;;  %v2451_v44 = vpack.c.bf16 %v2399_v61, %v2395_v41  ;;  %v10126_v60 = vld [vmem:[%s11275_s25 + $0xf4] ss:$8 sps:$4 sm:$0xff]   ;;  %v10141_v41 = vld [vmem:[%s11275_s25 + $0xa4] ss:$8 sps:$4 sm:$0xff]   ;;  %v10139_v61 = vld [vmem:[%s11275_s25 + $0xa0] ss:$8 sps:$4 sm:$0xff]  }
 0x277   : > { %9031 = vmatprep.mubr.msk.bf16.mxu1 %vm2781_vm2, %v2454_v2  ;;  %3296 = vmatpush1.bf16.msra.mxu1 %v10106_v25  ;;  %v2416_v2 = vld [vmem:[#allocation2 + $0x128] sm:$0xff]  ;;  %v2459_v25 = vpack.c.bf16 %v2415_v35, %v2411_v9 }
 0x278   : > { %3297 = vmatprep.subr.bf16.mxu1 %v10111_v34  ;;  %v2441_v34 = vld [vmem:[#allocation2 + $0x1f0] sm:$0xff] }
 0x279   : > { %2838 = vmatpush2.bf16.msra.mxu0 %v10084_v19  ;;  %v2425_v19 = vld [vmem:[#allocation2 + $0x170] sm:$0xff] }
 0x27a   : > { %2839 = vmatprep.subr.bf16.mxu0 %v10086_v15  ;;  %v2456_v15 = vpack.c.bf16 %v2408_v28, %v2404_v63  ;;  %v10142_v63 = vld [vmem:[%s11275_s25 + $0x90] ss:$8 sps:$4 sm:$0xff]   ;;  %v10147_v28 = vld [vmem:[%s11275_s25 + $0x84] ss:$8 sps:$4 sm:$0xff]  }
 0x27b   : > { %3298 = vmatpush1.bf16.msra.mxu1 %v10109_v27 }
 0x27c   : > { %3299 = vmatprep.subr.bf16.mxu1 %v10114_v14  ;;  %v2468_v14 = vpack.c.bf16 %v2432_v18, %v2428_v42 }
 0x27d   : > { %2840 = vmatpush2.bf16.msra.mxu0 %v10090_v29  ;;  %v2407_v29 = vld [vmem:[#allocation2 + $0xe0] sm:$0xff] }
 0x27e   : > { %2841 = vmatprep.subr.bf16.mxu0 %v10092_v20  ;;  %2979 = vmatmul.mubr.bf16.gmra.mxu1 %v2453_v49  ;;  %v2412_v20 = vld [vmem:[#allocation2 + $0x108] sm:$0xff]  ;;  %v2455_v59 = vpack.c.bf16 %v2407_v29, %v2403_v47  ;;  %v10172_v47 = vld [vmem:[%s11285_s2 + $0x60] ss:$16 sps:$4 sm:$0xff]   ;;  %v10180_v29 = vld [vmem:[%s11285_s2 + $0x44] ss:$16 sps:$4 sm:$0xff]  }
 0x27f   : > { %9032 = vmatprep.mubr.msk.bf16.mxu1 %vm2781_vm2, %v2458_v24  ;;  %3300 = vmatpush1.bf16.msra.mxu1 %v10112_v55  ;;  %v2424_v49 = vld [vmem:[#allocation2 + $0x168] sm:$0xff]  ;;  %v2469_v24 = vpack.c.bf16 %v2433_v62, %v2429_v51  ;;  %v10202_v51 = vld [vmem:[%s11285_s2 + $0x1c0] ss:$16 sps:$4 sm:$0xff]   ;;  %v10210_v62 = vld [vmem:[%s11285_s2 + $0x1a4] ss:$16 sps:$4 sm:$0xff]  }
 0x280   : > { %3301 = vmatprep.subr.bf16.mxu1 %v10117_v22  ;;  %v2464_v38 = vpack.c.bf16 %v2424_v49, %v2420_v4  ;;  %v2436_v55 = vld [vmem:[#allocation2 + $0x1c8] sm:$0xff]  ;;  %v2526_v4 = vlaneseq  ;;  %v10222_v49 = vld [vmem:[%s11285_s2 + $0x164] ss:$16 sps:$4 sm:$0xff]  }
 0x281   : > { %2842 = vmatpush2.bf16.msra.mxu0 %v10095_v11  ;;  %v2465_v11 = vpack.c.bf16 %v2425_v19, %v2421_v1  ;;  %v2440_v22 = vld [vmem:[#allocation2 + $0x1e8] sm:$0xff]  ;;  %v10154_v1 = vld [vmem:[%s11285_s2 + $0xc0] ss:$16 sps:$4 sm:$0xff]   ;;  %v10162_v19 = vld [vmem:[%s11285_s2 + $0xa4] ss:$16 sps:$4 sm:$0xff]  }
 0x282   : > { %2843 = vmatprep.subr.bf16.mxu0 %v10097_v13  ;;  %v2470_v13 = vpack.c.bf16 %v2434_v32, %v2430_v33  ;;  %v2472_v21 = vpack.c.bf16 %v2440_v22, %v2436_v55  ;;  %v10168_v33 = vld [vmem:[%s11285_s2 + $0x84] ss:$16 sps:$4 sm:$0xff]   ;;  %v10166_v32 = vld [vmem:[%s11285_s2 + $0x80] ss:$16 sps:$4 sm:$0xff]  }
 0x283   : > { %3302 = vmatpush1.bf16.msra.mxu1 %v10115_v37 }
 0x284   : > { %3303 = vmatprep.subr.bf16.mxu1 %v10120_v50  ;;  %v10144_v50 = vld [vmem:[%s11275_s25 + $0x94] ss:$8 sps:$4 sm:$0xff]  }
 0x285   : > { %2844 = vmatpush2.bf16.msra.mxu0 %v10099_v30  ;;  %v2460_v30 = vpack.c.bf16 %v2416_v2, %v2412_v20  ;;  %v10186_v20 = vld [vmem:[%s11285_s2 + $0x24] ss:$16 sps:$4 sm:$0xff]   ;;  %v10184_v2 = vld [vmem:[%s11285_s2 + $0x20] ss:$16 sps:$4 sm:$0xff]  }
 0x286   : > { %2989 = vmatmul.mubr.bf16.gmra.mxu1 %v2457_v40  ;;  %v2463_v40 = vpack.c.bf16 %v2423_v7, %v2419_v0 }
 0x287   : > { %9033 = vmatprep.mubr.msk.bf16.mxu1 %vm2781_vm2, %v2462_v12  ;;  %3304 = vmatpush1.bf16.msra.mxu1 %v10118_v31  ;;  %v2431_v12 = vld [vmem:[#allocation2 + $0x1a0] sm:$0xff] }
 0x288   : > { %2846 = vmatmul.mubr.bf16.vlgmr.msra.gmra.mxu0 %v2443_v36  ;;  %3305 = vmatprep.subr.bf16.mxu1 %v10123_v16  ;;  %v10130_v36 = vld [vmem:[%s11275_s25 + $0xd0] ss:$8 sps:$4 sm:$0xff]   ;;  %v10150_v31 = vld [vmem:[%s11285_s2 + $0xe4] ss:$16 sps:$4 sm:$0xff]   ;;  %v10153_v16 = vld [vmem:[%s11285_s2 + $0xec] ss:$16 sps:$4 sm:$0xff]  }
 0x289   : > { %2855 = vmatprep.mubr.bf16.mxu0 %v2448_v43  ;;  %v2437_v43 = vld [vmem:[#allocation2 + $0x1d0] sm:$0xff]  ;;  %3858 = vmatprep.subr.bf16.mxu0 %v10150_v31 }
 0x28a   : > { %v2473_v27 = vpack.c.bf16 %v2441_v34, %v2437_v43 }
 0x28b   : > { %3306 = vmatpush1.bf16.msra.mxu1 %v10121_v54  ;;  %v10174_v54 = vld [vmem:[%s11285_s2 + $0x64] ss:$16 sps:$4 sm:$0xff]  }
 0x28c   : > { %3307 = vmatprep.subr.bf16.mxu1 %v10126_v60  ;;  %v10178_v60 = vld [vmem:[%s11285_s2 + $0x40] ss:$16 sps:$4 sm:$0xff]  }
 0x28e   : > { %2999 = vmatmul.mubr.bf16.gmra.mxu1 %v2461_v46  ;;  %v10145_v46 = vld [vmem:[%s11275_s25 + $0x80] ss:$8 sps:$4 sm:$0xff]  }
 0x28f   : > { %9034 = vmatprep.mubr.msk.bf16.mxu1 %vm2781_vm2, %v2466_v26  ;;  %3308 = vmatpush2.bf16.msra.mxu1 %v10124_v5  ;;  %v10148_v26 = vld [vmem:[%s11285_s2 + $0xe0] ss:$16 sps:$4 sm:$0xff]   ;;  %v10198_v5 = vld [vmem:[%s11285_s2 + $0x1e4] ss:$16 sps:$4 sm:$0xff]  }
 0x290   : > { %2856 = vmatmul.mubr.bf16.gmra.mxu0 %v2447_v56  ;;  %3309 = vmatprep.subr.bf16.mxu1 %v10129_v3  ;;  %v2467_v56 = vpack.c.bf16 %v2431_v12, %v2427_v8  ;;  %v10196_v3 = vld [vmem:[%s11285_s2 + $0x1e0] ss:$16 sps:$4 sm:$0xff]  }
 0x291   : > { %2865 = vmatprep.mubr.bf16.mxu0 %v2452_v10  ;;  %v2439_v10 = vld [vmem:[#allocation2 + $0x1e0] sm:$0xff]  ;;  %3859 = vmatpush1.bf16.msra.mxu0 %v10148_v26 }
 0x292   : > { %v2471_v37 = vpack.c.bf16 %v2439_v10, %v2435_v6 }
 0x293   : > { %3310 = vmatpush2.bf16.msra.mxu1 %v10127_v52  ;;  %v10216_v52 = vld [vmem:[%s11285_s2 + $0x184] ss:$16 sps:$4 sm:$0xff]  }
 0x294   : > { %3311 = vmatprep.subr.bf16.mxu1 %v10132_v39  ;;  %v10214_v39 = vld [vmem:[%s11285_s2 + $0x180] ss:$16 sps:$4 sm:$0xff]  }
 0x296   : > { %3009 = vmatmul.mubr.bf16.gmra.mxu1 %v2465_v11  ;;  %v10192_v11 = vld [vmem:[%s11285_s2 + $0x4] ss:$16 sps:$4 sm:$0xff]  }
 0x297   : > { %9035 = vmatprep.mubr.msk.bf16.mxu1 %vm2781_vm2, %v2470_v13  ;;  %3312 = vmatpush2.bf16.msra.mxu1 %v10130_v36  ;;  %v10190_v13 = vld [vmem:[%s11285_s2] ss:$16 sps:$4 sm:$0xff]  }
 0x298   : > { %2866 = vmatmul.mubr.bf16.gmra.mxu0 %v2451_v44  ;;  %3313 = vmatprep.subr.bf16.mxu1 %v10135_v23  ;;  %v10156_v44 = vld [vmem:[%s11285_s2 + $0xc4] ss:$16 sps:$4 sm:$0xff]   ;;  %v10220_v36 = vld [vmem:[%s11285_s2 + $0x160] ss:$16 sps:$4 sm:$0xff]   ;;  %v13011_v23 = vshrl.u32 %v2526_v4, 7 }
 0x299   : > { %2875 = vmatprep.mubr.bf16.mxu0 %v2456_v15  ;;  %3860 = vmatprep.subr.bf16.mxu0 %v10156_v44  ;;  %v10160_v15 = vld [vmem:[%s11285_s2 + $0xa0] ss:$16 sps:$4 sm:$0xff]  }
 0x29a   : > { %3861 = vmatpush1.bf16.msra.mxu0 %v10154_v1  ;;  %v13014_v43 = vsub.s32 1, %v13011_v23 }
 0x29b   : > { %3314 = vmatpush2.bf16.msra.mxu1 %v10133_v57  ;;  %3862 = vmatprep.subr.bf16.mxu0 %v10162_v19  ;;  %v2524_v57 = vld [vmem:[%s11265_s18] sm:$0x3] }
 0x29c   : > { %3315 = vmatprep.subr.bf16.mxu1 %v10138_v45  ;;  %v13023_v7 = vrot.slane %v2524_v57, %v13014_v43 }
 0x29e   : > { %3019 = vmatmul.mubr.bf16.gmra.mxu1 %v2469_v24  ;;  %3863 = vmatpush1.bf16.msra.mxu0 %v10160_v15 }
 0x29f   : > { %9036 = vmatprep.mubr.msk.bf16.mxu1 %vm2781_vm2, %v2474_v58  ;;  %3316 = vmatpush2.bf16.msra.mxu1 %v10136_v48 }
 0x2a0   : > { %2876 = vmatmul.mubr.bf16.gmra.mxu0 %v2455_v59  ;;  %3317 = vmatprep.subr.bf16.mxu1 %v10141_v41  ;;  %v10204_v59 = vld [vmem:[%s11285_s2 + $0x1c4] ss:$16 sps:$4 sm:$0xff]  }
 0x2a1   : > { %2885 = vmatprep.mubr.bf16.mxu0 %v2460_v30  ;;  %3864 = vmatprep.subr.bf16.mxu0 %v10168_v33 }
 0x2a2   : > { %3865 = vmatpush1.bf16.msra.mxu0 %v10166_v32 }
 0x2a3   : > { %3318 = vmatpush2.bf16.msra.mxu1 %v10139_v61  ;;  %3866 = vmatprep.subr.bf16.mxu0 %v10174_v54 }
 0x2a4   : > { %3319 = vmatprep.subr.bf16.mxu1 %v10144_v50 }
 0x2a6   : > { %3029 = vmatmul.mubr.bf16.gmra.mxu1 %v2473_v27  ;;  %3867 = vmatpush1.bf16.msra.mxu0 %v10172_v47  ;;  %v10151_v47 = vld [vmem:[%s11285_s2 + $0xe8] ss:$16 sps:$4 sm:$0xff]  }
 0x2a7   : > { %3320 = vmatpush2.bf16.msra.mxu1 %v10142_v63  ;;  %3868 = vmatprep.subr.bf16.mxu0 %v10180_v29 }
 0x2a8   : > { %2886 = vmatmul.mubr.bf16.gmra.mxu0 %v2459_v25  ;;  %3321 = vmatprep.subr.bf16.mxu1 %v10147_v28 }
 0x2a9   : > { %2895 = vmatprep.mubr.bf16.mxu0 %v2464_v38  ;;  %v13017_v38 = vsub.s32 0, %v13011_v23 }
 0x2aa   : > { %3869 = vmatpush1.bf16.msra.mxu0 %v10178_v60 }
 0x2ab   : > { %3322 = vmatpush2.bf16.msra.mxu1 %v10145_v46  ;;  %3870 = vmatprep.subr.bf16.mxu0 %v10186_v20  ;;  %v13028_v18 = vrot.slane %v2524_v57, %v13017_v38  ;;  %v10159_v20 = vld [vmem:[%s11285_s2 + $0xcc] ss:$16 sps:$4 sm:$0xff]   ;;  %v10163_v57 = vld [vmem:[%s11285_s2 + $0xa8] ss:$16 sps:$4 sm:$0xff]  }
 0x2ac   : > { %3971 = vmatprep.subr.bf16.mxu1 %v10153_v16 }
 0x2ae   : > { %3871 = vmatpush1.bf16.msra.mxu0 %v10184_v2 }
 0x2af   : > { %3872 = vmatprep.subr.bf16.mxu0 %v10192_v11 }
 0x2b0   : > { %2896 = vmatmul.mubr.bf16.gmra.mxu0 %v2463_v40 }
 0x2b1   : > { %2905 = vmatprep.mubr.bf16.mxu0 %v2468_v14 }
 0x2b2   : > { %3873 = vmatpush1.bf16.msra.mxu0 %v10190_v13 }
 0x2b3   : > { %3874 = vmatprep.subr.bf16.mxu0 %v10198_v5 }
 0x2b6   : > { %3875 = vmatpush2.bf16.msra.mxu0 %v10196_v3 }
 0x2b7   : > { %3876 = vmatprep.subr.bf16.mxu0 %v10204_v59 }
 0x2b8   : > { %2906 = vmatmul.mubr.bf16.gmra.mxu0 %v2467_v56 }
 0x2b9   : > { %2915 = vmatprep.mubr.bf16.mxu0 %v2472_v21 }
 0x2ba   : > { %3877 = vmatpush2.bf16.msra.mxu0 %v10202_v51 }
 0x2bb   : > { %3878 = vmatprep.subr.bf16.mxu0 %v10210_v62 }
 0x2be   : > { %3879 = vmatpush2.bf16.msra.mxu0 %v10208_v17 }
 0x2bf   : > { %3880 = vmatprep.subr.bf16.mxu0 %v10216_v52  ;;  %v10165_v52 = vld [vmem:[%s11285_s2 + $0xac] ss:$16 sps:$4 sm:$0xff]  }
 0x2c0   : > { %2916 = vmatmul.mubr.bf16.gmra.mxu0 %v2471_v37 }
 0x2c2   : > { %3881 = vmatpush2.bf16.msra.mxu0 %v10214_v39 }
 0x2c3   : > { %3882 = vmatprep.subr.bf16.mxu0 %v10222_v49 }
 0x2c6   : > { %3883 = vmatpush2.bf16.msra.mxu0 %v10220_v36 }
 0x32e   : > { %v2960_v30 = vpop.f32.mrf.mxu1 }
 0x330   : > { %v2962_v53 = vpop.f32.mrf.mxu1 }
 0x332   : > { %v2964_v9 = vpop.f32.mrf.mxu1 }
 0x334   : > { %v2966_v35 = vpop.f32.mrf.mxu1 }
 0x336   : > { %v2970_v24 = vpop.f32.mrf.mxu1 }
 0x338   : > { %v2972_v58 = vpop.f32.mrf.mxu1 }
 0x33a   : > { %v2974_v25 = vpop.f32.mrf.mxu1 }
 0x33c   : > { %v2976_v34 = vpop.f32.mrf.mxu1 }
 0x33e   : > { %v13020_v0 = vpop.f32.mrf.mxu1 }
 0x340   : > { %v13025_v42 = vpop.f32.mrf.mxu1 }
 0x342   : > { %v13030_v40 = vpop.f32.mrf.mxu1 }
 0x344   : > { %v13033_v12 = vpop.f32.mrf.mxu1 }
 0x346   : > { %v13037_v21 = vpop.f32.mrf.mxu1 }
 0x348   : > { %v2847_v27 = vpop.f32.mrf.mxu0  ;;  %v13040_v37 = vpop.f32.mrf.mxu1 }
 0x349   : > { %v2848_v55 = vadd.f32 %v2847_v27, %v13028_v18 }
 0x34a   : > { %v2849_v14 = vpop.f32.mrf.mxu0  ;;  %v13042_v63 = vpop.f32.mrf.mxu1 }
 0x34b   : > { %v2850_v8 = vadd.f32 %v2849_v14, %v13023_v7  ;;  %v2961_v41 = vadd.f32 %v2960_v30, %v2848_v55  ;;  %v10157_v30 = vld [vmem:[%s11285_s2 + $0xc8] ss:$16 sps:$4 sm:$0xff]  }
 0x34c   : > { %v2851_v22 = vpop.f32.mrf.mxu0  ;;  %v13045_v44 = vpop.f32.mrf.mxu1 }
 0x34d   : > { %v2852_v56 = vadd.f32 %v2851_v22, %v13028_v18  ;;  %v2963_v10 = vadd.f32 %v2962_v53, %v2850_v8  ;;  %v3039_v1 = vmax.f32 %v2961_v41, 0.0  ;;  %v10171_v8 = vld [vmem:[%s11285_s2 + $0x8c] ss:$16 sps:$4 sm:$0xff]   ;;  %v10169_v41 = vld [vmem:[%s11285_s2 + $0x88] ss:$16 sps:$4 sm:$0xff]  }
 0x34e   : > { %v2853_v6 = vpop.f32.mrf.mxu0  ;;  %v13049_v54 = vpop.f32.mrf.mxu1 }
 0x34f   : > { %v2965_v48 = vadd.f32 %v2964_v9, %v2852_v56  ;;  %v2854_v45 = vadd.f32 %v2853_v6, %v13023_v7  ;;  %v3040_v26 = vmax.f32 %v2963_v10, 0.0 }
 0x350   : > { %v2857_v61 = vpop.f32.mrf.mxu0  ;;  %v13054_v5 = vpop.f32.mrf.mxu1 }
 0x351   : > { %v2967_v50 = vadd.f32 %v2966_v35, %v2854_v45  ;;  %v3041_v28 = vmax.f32 %v2965_v48, 0.0  ;;  %v2858_v19 = vadd.f32 %v2857_v61, %v13028_v18 }
 0x352   : > { %v2859_v46 = vpop.f32.mrf.mxu0  ;;  %v13056_v62 = vpop.f32.mrf.mxu1 }
 0x353   : > { %v3042_v31 = vmax.f32 %v2967_v50, 0.0  ;;  %v2860_v16 = vadd.f32 %v2859_v46, %v13023_v7  ;;  %v3071_v29 = vpack.c.bf16 %v3041_v28, %v3039_v1  ;;  %v2971_v3 = vadd.f32 %v2970_v24, %v2858_v19  ;;  %v10175_v19 = vld [vmem:[%s11285_s2 + $0x68] ss:$16 sps:$4 sm:$0xff]  }
 0x354   : > { %v2861_v15 = vpop.f32.mrf.mxu0  ;;  %v13061_v4 = vpop.f32.mrf.mxu1 }
 0x355   : > { %v2862_v33 = vadd.f32 %v2861_v15, %v13028_v18  ;;  %v3072_v32 = vpack.c.bf16 %v3042_v31, %v3040_v26  ;;  %v2973_v2 = vadd.f32 %v2972_v58, %v2860_v16  ;;  %v3043_v49 = vmax.f32 %v2971_v3, 0.0  ;;  %v10181_v3 = vld [vmem:[%s11285_s2 + $0x48] ss:$16 sps:$4 sm:$0xff]  }
 0x356   : > { %v2863_v60 = vpop.f32.mrf.mxu0 }
 0x357   : > { %v2975_v11 = vadd.f32 %v2974_v25, %v2862_v33  ;;  %v2864_v13 = vadd.f32 %v2863_v60, %v13023_v7  ;;  %3323 = vmatprep.mubr.bf16.mxu1 %v3072_v32  ;;  %v3044_v9 = vmax.f32 %v2973_v2, 0.0  ;;  %v10183_v32 = vld [vmem:[%s11285_s2 + $0x4c] ss:$16 sps:$4 sm:$0xff]  }
 0x358   : > { %v2867_v59 = vpop.f32.mrf.mxu0  ;;  %3324 = vmatmul.mubr.bf16.vlgmr.msra.gmra.mxu1 %v3071_v29 }
 0x359   : > { %v2977_v51 = vadd.f32 %v2976_v34, %v2864_v13  ;;  %3972 = vmatpush1.bf16.msra.mxu1 %v10151_v47  ;;  %v3045_v53 = vmax.f32 %v2975_v11, 0.0  ;;  %v2868_v24 = vadd.f32 %v2867_v59, %v13028_v18  ;;  %v13065_v34 = vpop.f32.mrf.mxu1 }
 0x35a   : > { %v2869_v17 = vpop.f32.mrf.mxu0  ;;  %3973 = vmatprep.subr.bf16.mxu1 %v10159_v20 }
 0x35b   : > { %v3046_v35 = vmax.f32 %v2977_v51, 0.0  ;;  %v2870_v39 = vadd.f32 %v2869_v17, %v13023_v7  ;;  %v3073_v14 = vpack.c.bf16 %v3045_v53, %v3043_v49  ;;  %v2981_v6 = vadd.f32 %v13020_v0, %v2868_v24  ;;  %v13073_v48 = vpop.f32.mrf.mxu1 }
 0x35c   : > { %v2871_v58 = vpop.f32.mrf.mxu0 }
 0x35d   : > { %v2872_v36 = vadd.f32 %v2871_v58, %v13028_v18  ;;  %v3074_v25 = vpack.c.bf16 %v3046_v35, %v3044_v9  ;;  %3974 = vmatpush1.bf16.msra.mxu1 %v10157_v30  ;;  %v2983_v55 = vadd.f32 %v13025_v42, %v2870_v39  ;;  %v10177_v42 = vld [vmem:[%s11285_s2 + $0x6c] ss:$16 sps:$4 sm:$0xff]   ;;  %v3047_v26 = vmax.f32 %v2981_v6, 0.0  ;;  %v13080_v16 = vpop.f32.mrf.mxu1  ;;  %v10187_v39 = vld [vmem:[%s11285_s2 + $0x28] ss:$16 sps:$4 sm:$0xff]  }
 0x35e   : > { %v2873_v27 = vpop.f32.mrf.mxu0  ;;  %3975 = vmatprep.subr.bf16.mxu1 %v10165_v52  ;;  %v10195_v58 = vld [vmem:[%s11285_s2 + $0xc] ss:$16 sps:$4 sm:$0xff]  }
 0x35f   : > { %v2985_v22 = vadd.f32 %v13030_v40, %v2872_v36  ;;  %v2874_v56 = vadd.f32 %v2873_v27, %v13023_v7  ;;  %3333 = vmatprep.mubr.bf16.mxu1 %v3074_v25  ;;  %v3048_v40 = vmax.f32 %v2983_v55, 0.0  ;;  %v3016_v11 = vpop.f32.mrf.mxu1 }
 0x360   : > { %v2877_v10 = vpop.f32.mrf.mxu0  ;;  %3334 = vmatmul.mubr.bf16.gmra.mxu1 %v3073_v14 }
 0x361   : > { %v2987_v45 = vadd.f32 %v13033_v12, %v2874_v56  ;;  %3976 = vmatpush1.bf16.msra.mxu1 %v10163_v57  ;;  %v3049_v61 = vmax.f32 %v2985_v22, 0.0  ;;  %v2878_v0 = vadd.f32 %v2877_v10, %v13028_v18  ;;  %v13094_v9 = vpop.f32.mrf.mxu1  ;;  %v10193_v22 = vld [vmem:[%s11285_s2 + $0x8] ss:$16 sps:$4 sm:$0xff]  }
 0x362   : > { %v2879_v50 = vpop.f32.mrf.mxu0  ;;  %3977 = vmatprep.subr.bf16.mxu1 %v10171_v8 }
 0x363   : > { %v3050_v28 = vmax.f32 %v2987_v45, 0.0  ;;  %v2880_v46 = vadd.f32 %v2879_v50, %v13023_v7  ;;  %v3075_v33 = vpack.c.bf16 %v3049_v61, %v3047_v26  ;;  %v2991_v20 = vadd.f32 %v13037_v21, %v2878_v0  ;;  %v3022_v8 = vpop.f32.mrf.mxu1  ;;  %v10207_v26 = vld [vmem:[%s11285_s2 + $0x1cc] ss:$16 sps:$4 sm:$0xff]  }
 0x364   : > { %v2881_v31 = vpop.f32.mrf.mxu0 }
 0x365   : > { %v2882_v12 = vadd.f32 %v2881_v31, %v13028_v18  ;;  %v3076_v1 = vpack.c.bf16 %v3050_v28, %v3048_v40  ;;  %3978 = vmatpush1.bf16.msra.mxu1 %v10169_v41  ;;  %v2993_v47 = vadd.f32 %v13040_v37, %v2880_v46  ;;  %v10189_v37 = vld [vmem:[%s11285_s2 + $0x2c] ss:$16 sps:$4 sm:$0xff]   ;;  %v3051_v17 = vmax.f32 %v2991_v20, 0.0  ;;  %v3024_v50 = vpop.f32.mrf.mxu1  ;;  %v10199_v40 = vld [vmem:[%s11285_s2 + $0x1e8] ss:$16 sps:$4 sm:$0xff]  }
 0x366   : > { %v2883_v15 = vpop.f32.mrf.mxu0  ;;  %3979 = vmatprep.subr.bf16.mxu1 %v10177_v42 }
 0x367   : > { %v2995_v29 = vadd.f32 %v13042_v63, %v2882_v12  ;;  %v2884_v60 = vadd.f32 %v2883_v15, %v13023_v7  ;;  %3343 = vmatprep.mubr.bf16.mxu1 %v3076_v1  ;;  %v3052_v30 = vmax.f32 %v2993_v47, 0.0  ;;  %v3026_v15 = vpop.f32.mrf.mxu1 }
 0x368   : > { %v2887_v2 = vpop.f32.mrf.mxu0  ;;  %3344 = vmatmul.mubr.bf16.gmra.mxu1 %v3075_v33 }
 0x369   : > { %v2997_v13 = vadd.f32 %v13045_v44, %v2884_v60  ;;  %3980 = vmatpush1.bf16.msra.mxu1 %v10175_v19  ;;  %v3053_v59 = vmax.f32 %v2995_v29, 0.0  ;;  %v2888_v21 = vadd.f32 %v2887_v2, %v13028_v18  ;;  %v10213_v60 = vld [vmem:[%s11285_s2 + $0x1ac] ss:$16 sps:$4 sm:$0xff]  }
 0x36a   : > { %v2889_v51 = vpop.f32.mrf.mxu0  ;;  %3981 = vmatprep.subr.bf16.mxu1 %v10183_v32  ;;  %v10205_v32 = vld [vmem:[%s11285_s2 + $0x1c8] ss:$16 sps:$4 sm:$0xff]  }
 0x36b   : > { %v3054_v63 = vmax.f32 %v2997_v13, 0.0  ;;  %v2890_v53 = vadd.f32 %v2889_v51, %v13023_v7  ;;  %v3077_v24 = vpack.c.bf16 %v3053_v59, %v3051_v17  ;;  %v3001_v27 = vadd.f32 %v13049_v54, %v2888_v21  ;;  %v10211_v51 = vld [vmem:[%s11285_s2 + $0x1a8] ss:$16 sps:$4 sm:$0xff]  }
 0x36c   : > { %v2891_v52 = vpop.f32.mrf.mxu0 }
 0x36d   : > { %v2892_v44 = vadd.f32 %v2891_v52, %v13028_v18  ;;  %v3078_v35 = vpack.c.bf16 %v3054_v63, %v3052_v30  ;;  %3982 = vmatpush1.bf16.msra.mxu1 %v10181_v3  ;;  %v3003_v36 = vadd.f32 %v13054_v5, %v2890_v53  ;;  %v10201_v5 = vld [vmem:[%s11285_s2 + $0x1ec] ss:$16 sps:$4 sm:$0xff]   ;;  %v3055_v41 = vmax.f32 %v3001_v27, 0.0  ;;  %v3030_v3 = vpop.f32.mrf.mxu1 }
 0x36e   : > { %v2893_v49 = vpop.f32.mrf.mxu0  ;;  %3983 = vmatprep.subr.bf16.mxu1 %v10189_v37  ;;  %v10219_v63 = vld [vmem:[%s11285_s2 + $0x18c] ss:$16 sps:$4 sm:$0xff]  }
 0x36f   : > { %v3005_v25 = vadd.f32 %v13056_v62, %v2892_v44  ;;  %v2894_v57 = vadd.f32 %v2893_v49, %v13023_v7  ;;  %3353 = vmatprep.mubr.bf16.mxu1 %v3078_v35  ;;  %v3056_v10 = vmax.f32 %v3003_v36, 0.0  ;;  %v3032_v44 = vpop.f32.mrf.mxu1  ;;  %v10217_v49 = vld [vmem:[%s11285_s2 + $0x188] ss:$16 sps:$4 sm:$0xff]   ;;  %v10225_v36 = vld [vmem:[%s11285_s2 + $0x16c] ss:$16 sps:$4 sm:$0xff]  }
 0x370   : > { %v2897_v14 = vpop.f32.mrf.mxu0  ;;  %3354 = vmatmul.mubr.bf16.gmra.mxu1 %v3077_v24 }
 0x371   : > { %v3007_v55 = vadd.f32 %v13061_v4, %v2894_v57  ;;  %3984 = vmatpush1.bf16.msra.mxu1 %v10187_v39  ;;  %v3057_v56 = vmax.f32 %v3005_v25, 0.0  ;;  %v2898_v54 = vadd.f32 %v2897_v14, %v13028_v18 }
 0x372   : > { %v2899_v6 = vpop.f32.mrf.mxu0  ;;  %3985 = vmatprep.subr.bf16.mxu1 %v10195_v58 }
 0x373   : > { %v3058_v62 = vmax.f32 %v3007_v55, 0.0  ;;  %v2900_v45 = vadd.f32 %v2899_v6, %v13023_v7  ;;  %v3079_v46 = vpack.c.bf16 %v3057_v56, %v3055_v41  ;;  %v3011_v1 = vadd.f32 %v13065_v34, %v2898_v54  ;;  %v3034_v55 = vpop.f32.mrf.mxu1  ;;  %v10223_v6 = vld [vmem:[%s11285_s2 + $0x168] ss:$16 sps:$4 sm:$0xff]  }
 0x374   : > { %v2901_v61 = vpop.f32.mrf.mxu0 }
 0x375   : > { %v2902_v42 = vadd.f32 %v2901_v61, %v13028_v18  ;;  %v3080_v4 = vpack.c.bf16 %v3058_v62, %v3056_v10  ;;  %3986 = vmatpush1.bf16.msra.mxu1 %v10193_v22  ;;  %v3013_v0 = vadd.f32 %v13073_v48, %v2900_v45  ;;  %v3059_v2 = vmax.f32 %v3011_v1, 0.0  ;;  %v3036_v61 = vpop.f32.mrf.mxu1  ;;  %v10237_v1 = vld [vmem:[%s11285_s2 + $0x12c] ss:$16 sps:$4 sm:$0xff]  }
 0x376   : > { %v2903_v28 = vpop.f32.mrf.mxu0  ;;  %3987 = vmatprep.subr.bf16.mxu1 %v10201_v5 }
 0x377   : > { %v3015_v31 = vadd.f32 %v13080_v16, %v2902_v42  ;;  %v2904_v12 = vadd.f32 %v2903_v28, %v13023_v7  ;;  %3363 = vmatprep.mubr.bf16.mxu1 %v3080_v4  ;;  %v3060_v48 = vmax.f32 %v3013_v0, 0.0  ;;  %v10226_v0 = vld [vmem:[%s11285_s2 + $0x140] ss:$16 sps:$4 sm:$0xff]  }
 0x378   : > { %v2907_v19 = vpop.f32.mrf.mxu0  ;;  %3364 = vmatmul.mubr.bf16.gmra.mxu1 %v3079_v46 }
 0x379   : > { %v3017_v33 = vadd.f32 %v3016_v11, %v2904_v12  ;;  %3988 = vmatpush2.bf16.msra.mxu1 %v10199_v40  ;;  %v3061_v47 = vmax.f32 %v3015_v31, 0.0  ;;  %v2908_v13 = vadd.f32 %v2907_v19, %v13028_v18  ;;  %v10229_v31 = vld [vmem:[%s11285_s2 + $0x148] ss:$16 sps:$4 sm:$0xff]   ;;  %v10234_v12 = vld [vmem:[%s11285_s2 + $0x124] ss:$16 sps:$4 sm:$0xff]  }
 0x37a   : > { %v2909_v29 = vpop.f32.mrf.mxu0  ;;  %3989 = vmatprep.subr.bf16.mxu1 %v10207_v26  ;;  %v10231_v26 = vld [vmem:[%s11285_s2 + $0x14c] ss:$16 sps:$4 sm:$0xff]   ;;  %v10232_v19 = vld [vmem:[%s11285_s2 + $0x120] ss:$16 sps:$4 sm:$0xff]  }
 0x37b   : > { %v3062_v20 = vmax.f32 %v3017_v33, 0.0  ;;  %v2910_v16 = vadd.f32 %v2909_v29, %v13023_v7  ;;  %v3081_v30 = vpack.c.bf16 %v3061_v47, %v3059_v2  ;;  %v3021_v52 = vadd.f32 %v13094_v9, %v2908_v13  ;;  %v10240_v33 = vld [vmem:[%s11285_s2 + $0x104] ss:$16 sps:$4 sm:$0xff]   ;;  %v10238_v47 = vld [vmem:[%s11285_s2 + $0x100] ss:$16 sps:$4 sm:$0xff]  }
 0x37c   : > { %v2911_v34 = vpop.f32.mrf.mxu0  ;;  %v10241_v29 = vld [vmem:[%s11285_s2 + $0x108] ss:$16 sps:$4 sm:$0xff]  }
 0x37d   : > { %v2912_v59 = vadd.f32 %v2911_v34, %v13028_v18  ;;  %v3082_v11 = vpack.c.bf16 %v3062_v20, %v3060_v48  ;;  %3990 = vmatpush2.bf16.msra.mxu1 %v10205_v32  ;;  %v3023_v53 = vadd.f32 %v3022_v8, %v2910_v16  ;;  %v3063_v14 = vmax.f32 %v3021_v52, 0.0  ;;  %v10243_v32 = vld [vmem:[%s11285_s2 + $0x10c] ss:$16 sps:$4 sm:$0xff]   ;;  %v3119_v20 = vld [vmem:[%s11280_s28] sm:$0x3] }
 0x37e   : > { %v2913_v37 = vpop.f32.mrf.mxu0  ;;  %3991 = vmatprep.subr.bf16.mxu1 %v10213_v60  ;;  %v10246_v60 = vld [vmem:[%s11295_s24 + $0xe4] ss:$16 sps:$4 sm:$0xff]   ;;  %v13145_v48 = vld [vmem:[%s11295_s24 + $0xec] ss:$16 sps:$4 sm:$0xff]   ;;  %v13150_v2 = vrot.slane %v3119_v20, %v13014_v43  ;;  %v13153_v13 = vrot.slane %v3119_v20, %v13017_v38 }
 0x37f   : > { %v3025_v17 = vadd.f32 %v3024_v50, %v2912_v59  ;;  %v2914_v21 = vadd.f32 %v2913_v37, %v13023_v7  ;;  %3373 = vmatprep.mubr.bf16.mxu1 %v3082_v11  ;;  %v3064_v25 = vmax.f32 %v3023_v53, 0.0 }
 0x380   : > { %v2917_v35 = vpop.f32.mrf.mxu0  ;;  %3374 = vmatmul.mubr.bf16.gmra.mxu1 %v3081_v30 }
 0x381   : > { %v3027_v39 = vadd.f32 %v3026_v15, %v2914_v21  ;;  %3992 = vmatpush2.bf16.msra.mxu1 %v10211_v51  ;;  %v3065_v24 = vmax.f32 %v3025_v17, 0.0  ;;  %v2918_v8 = vadd.f32 %v2917_v35, %v13028_v18  ;;  %v10235_v15 = vld [vmem:[%s11285_s2 + $0x128] ss:$16 sps:$4 sm:$0xff]  }
 0x382   : > { %v2919_v58 = vpop.f32.mrf.mxu0  ;;  %3993 = vmatprep.subr.bf16.mxu1 %v10219_v63 }
 0x383   : > { %v3066_v57 = vmax.f32 %v3027_v39, 0.0  ;;  %v2920_v27 = vadd.f32 %v2919_v58, %v13023_v7  ;;  %v3083_v10 = vpack.c.bf16 %v3065_v24, %v3063_v14  ;;  %v3031_v54 = vadd.f32 %v3030_v3, %v2918_v8  ;;  %v10244_v39 = vld [vmem:[%s11295_s24 + $0xe0] ss:$16 sps:$4 sm:$0xff]  }
 0x384   : > { %v2921_v9 = vpop.f32.mrf.mxu0 }
 0x385   : > { %v2922_v22 = vadd.f32 %v2921_v9, %v13028_v18  ;;  %v3084_v56 = vpack.c.bf16 %v3066_v57, %v3064_v25  ;;  %3994 = vmatpush2.bf16.msra.mxu1 %v10217_v49  ;;  %v3033_v62 = vadd.f32 %v3032_v44, %v2920_v27  ;;  %v3067_v40 = vmax.f32 %v3031_v54, 0.0  ;;  %v13163_v49 = vld [vmem:[%s11295_s24 + $0xe8] ss:$16 sps:$4 sm:$0xff]   ;;  %v13169_v25 = vld [vmem:[%s11295_s24 + $0xcc] ss:$16 sps:$4 sm:$0xff]  }
 0x386   : > { %v2923_v5 = vpop.f32.mrf.mxu0  ;;  %3995 = vmatprep.subr.bf16.mxu1 %v10225_v36  ;;  %v10252_v36 = vld [vmem:[%s11295_s24 + $0xc4] ss:$16 sps:$4 sm:$0xff]   ;;  %v10250_v9 = vld [vmem:[%s11295_s24 + $0xc0] ss:$16 sps:$4 sm:$0xff]  }
 0x387   : > { %v3035_v45 = vadd.f32 %v3034_v55, %v2922_v22  ;;  %v2924_v41 = vadd.f32 %v2923_v5, %v13023_v7  ;;  %3383 = vmatprep.mubr.bf16.mxu1 %v3084_v56  ;;  %v3068_v42 = vmax.f32 %v3033_v62, 0.0  ;;  %v10228_v7 = vld [vmem:[%s11285_s2 + $0x144] ss:$16 sps:$4 sm:$0xff]   ;;  %v13182_v22 = vld [vmem:[%s11295_s24 + $0xc8] ss:$16 sps:$4 sm:$0xff]  }
 0x388   : > { %3384 = vmatmul.mubr.bf16.gmra.mxu1 %v3083_v10  ;;  %3884 = vmatprep.subr.bf16.mxu0 %v10228_v7  ;;  %v10258_v5 = vld [vmem:[%s11295_s24 + $0xa4] ss:$16 sps:$4 sm:$0xff]   ;;  %v13187_v10 = vld [vmem:[%s11295_s24 + $0xac] ss:$16 sps:$4 sm:$0xff]  }
 0x389   : > { %v3037_v50 = vadd.f32 %v3036_v61, %v2924_v41  ;;  %3996 = vmatpush2.bf16.msra.mxu1 %v10223_v6  ;;  %v3069_v18 = vmax.f32 %v3035_v45, 0.0  ;;  %3885 = vmatpush2.bf16.msra.mxu0 %v10226_v0 }
 0x38a   : > { %3997 = vmatprep.subr.bf16.mxu1 %v10231_v26  ;;  %3886 = vmatprep.subr.bf16.mxu0 %v10234_v12  ;;  %v10262_v12 = vld [vmem:[%s11295_s24 + $0x80] ss:$16 sps:$4 sm:$0xff]  }
 0x38b   : > { %v3070_v4 = vmax.f32 %v3037_v50, 0.0  ;;  %v3085_v46 = vpack.c.bf16 %v3069_v18, %v3067_v40  ;;  %v10256_v50 = vld [vmem:[%s11295_s24 + $0xa0] ss:$16 sps:$4 sm:$0xff]   ;;  %v13194_v18 = vld [vmem:[%s11295_s24 + $0xa8] ss:$16 sps:$4 sm:$0xff]  }
 0x38c   : > { %v10264_v40 = vld [vmem:[%s11295_s24 + $0x84] ss:$16 sps:$4 sm:$0xff]  }
 0x38d   : > { %v3086_v28 = vpack.c.bf16 %v3070_v4, %v3068_v42  ;;  %3998 = vmatpush2.bf16.msra.mxu1 %v10229_v31  ;;  %3887 = vmatpush2.bf16.msra.mxu0 %v10232_v19 }
 0x38e   : > { %3999 = vmatprep.subr.bf16.mxu1 %v10237_v1  ;;  %3888 = vmatprep.subr.bf16.mxu0 %v10240_v33  ;;  %v13214_v1 = vld [vmem:[%s11295_s24 + $0x88] ss:$16 sps:$4 sm:$0xff]   ;;  %v10270_v33 = vld [vmem:[%s11295_s24 + $0x64] ss:$16 sps:$4 sm:$0xff]  }
 0x38f   : > { %3393 = vmatprep.mubr.bf16.mxu1 %v3086_v28  ;;  %v13201_v28 = vld [vmem:[%s11295_s24 + $0x8c] ss:$16 sps:$4 sm:$0xff]  }
 0x390   : > { %3394 = vmatmul.mubr.bf16.gmra.mxu1 %v3085_v46 }
 0x391   : > { %4000 = vmatpush2.bf16.msra.mxu1 %v10235_v15  ;;  %3889 = vmatpush2.bf16.msra.mxu0 %v10238_v47 }
 0x392   : > { %4001 = vmatprep.subr.bf16.mxu1 %v10243_v32  ;;  %4490 = vmatprep.subr.bf16.mxu0 %v10246_v60  ;;  %v13219_v32 = vld [vmem:[%s11295_s24 + $0x6c] ss:$16 sps:$4 sm:$0xff]  }
 0x395   : > { %4002 = vmatpush2.bf16.msra.mxu1 %v10241_v29 }
 0x396   : > { %9425 = vmatprep.subr.bf16.mxu1 %v13145_v48 }
 0x418   : > { %v3325_v16 = vpop.f32.mrf.mxu1 }
 0x419   : > { %v3326_v51 = vadd.f32 %v3325_v16, %v13153_v13 }
 0x41a   : > { %v3327_v34 = vpop.f32.mrf.mxu1 }
 0x41b   : > { %v3328_v59 = vadd.f32 %v3327_v34, %v13150_v2  ;;  %v3404_v52 = vmax.f32 %v3326_v51, 0.0  ;;  %v10268_v34 = vld [vmem:[%s11295_s24 + $0x60] ss:$16 sps:$4 sm:$0xff]   ;;  %v10276_v51 = vld [vmem:[%s11295_s24 + $0x44] ss:$16 sps:$4 sm:$0xff]  }
 0x41c   : > { %v3329_v3 = vpop.f32.mrf.mxu1 }
 0x41d   : > { %v3330_v11 = vadd.f32 %v3329_v3, %v13153_v13  ;;  %v3405_v17 = vmax.f32 %v3328_v59, 0.0  ;;  %v13226_v3 = vld [vmem:[%s11295_s24 + $0x68] ss:$16 sps:$4 sm:$0xff]  }
 0x41e   : > { %v3331_v37 = vpop.f32.mrf.mxu1 }
 0x41f   : > { %v3332_v30 = vadd.f32 %v3331_v37, %v13150_v2  ;;  %v3406_v63 = vmax.f32 %v3330_v11, 0.0  ;;  %v13233_v37 = vld [vmem:[%s11295_s24 + $0x4c] ss:$16 sps:$4 sm:$0xff]  }
 0x420   : > { %v3335_v53 = vpop.f32.mrf.mxu1 }
 0x421   : > { %v3407_v21 = vmax.f32 %v3332_v30, 0.0  ;;  %v13165_v24 = vpack.c.bf16 %v3406_v63, %v3404_v52  ;;  %v3336_v14 = vadd.f32 %v3335_v53, %v13153_v13  ;;  %v10274_v52 = vld [vmem:[%s11295_s24 + $0x40] ss:$16 sps:$4 sm:$0xff]  }
 0x422   : > { %v3337_v44 = vpop.f32.mrf.mxu1 }
 0x423   : > { %v13159_v35 = vpack.c.bf16 %v3407_v21, %v3405_v17  ;;  %v3338_v57 = vadd.f32 %v3337_v44, %v13150_v2  ;;  %v3408_v41 = vmax.f32 %v3336_v14, 0.0  ;;  %v13246_v44 = vld [vmem:[%s11295_s24 + $0x48] ss:$16 sps:$4 sm:$0xff]  }
 0x424   : > { %v3339_v58 = vpop.f32.mrf.mxu1 }
 0x425   : > { %v3340_v27 = vadd.f32 %v3339_v58, %v13153_v13  ;;  %3890 = vmatprep.mubr.bf16.mxu0 %v13159_v35  ;;  %4003 = vmatprep.mubr.bf16.mxu1 %v13159_v35  ;;  %v3409_v62 = vmax.f32 %v3338_v57, 0.0  ;;  %v13251_v57 = vld [vmem:[%s11295_s24 + $0x2c] ss:$16 sps:$4 sm:$0xff]  }
 0x426   : > { %v3341_v8 = vpop.f32.mrf.mxu1  ;;  %3891 = vmatmul.mubr.bf16.vlgmr.msra.gmra.mxu0 %v13165_v24  ;;  %4004 = vmatmul.mubr.bf16.vlgmr.msra.gmra.mxu1 %v13165_v24 }
 0x427   : > { %v3342_v55 = vadd.f32 %v3341_v8, %v13150_v2  ;;  %4491 = vmatpush1.bf16.msra.mxu0 %v10244_v39  ;;  %9441 = vmatpush1.bf16.msra.mxu1 %v13163_v49  ;;  %v3410_v56 = vmax.f32 %v3340_v27, 0.0 }
 0x428   : > { %v3345_v6 = vpop.f32.mrf.mxu1  ;;  %4492 = vmatprep.subr.bf16.mxu0 %v10252_v36  ;;  %9426 = vmatprep.subr.bf16.mxu1 %v13169_v25  ;;  %v10282_v36 = vld [vmem:[%s11295_s24 + $0x24] ss:$16 sps:$4 sm:$0xff]  }
 0x429   : > { %v3411_v45 = vmax.f32 %v3342_v55, 0.0  ;;  %v13196_v42 = vpack.c.bf16 %v3410_v56, %v3408_v41  ;;  %v3346_v26 = vadd.f32 %v3345_v6, %v13153_v13  ;;  %v10280_v56 = vld [vmem:[%s11295_s24 + $0x20] ss:$16 sps:$4 sm:$0xff]   ;;  %v13258_v6 = vld [vmem:[%s11295_s24 + $0x28] ss:$16 sps:$4 sm:$0xff]  }
 0x42a   : > { %v3347_v54 = vpop.f32.mrf.mxu1  ;;  %v13265_v41 = vld [vmem:[%s11295_s24 + $0xc] ss:$16 sps:$4 sm:$0xff]  }
 0x42b   : > { %v13189_v61 = vpack.c.bf16 %v3411_v45, %v3409_v62  ;;  %4493 = vmatpush1.bf16.msra.mxu0 %v10250_v9  ;;  %9442 = vmatpush1.bf16.msra.mxu1 %v13182_v22  ;;  %v3348_v46 = vadd.f32 %v3347_v54, %v13150_v2  ;;  %v3412_v60 = vmax.f32 %v3346_v26, 0.0  ;;  %v10288_v45 = vld [vmem:[%s11295_s24 + $0x4] ss:$16 sps:$4 sm:$0xff]   ;;  %v13278_v26 = vld [vmem:[%s11295_s24 + $0x8] ss:$16 sps:$4 sm:$0xff]  }
 0x42c   : > { %v3349_v4 = vpop.f32.mrf.mxu1  ;;  %4494 = vmatprep.subr.bf16.mxu0 %v10258_v5  ;;  %9427 = vmatprep.subr.bf16.mxu1 %v13187_v10 }
 0x42d   : > { %v3350_v7 = vadd.f32 %v3349_v4, %v13153_v13  ;;  %3900 = vmatprep.mubr.bf16.mxu0 %v13189_v61  ;;  %4013 = vmatprep.mubr.bf16.mxu1 %v13189_v61  ;;  %v3413_v47 = vmax.f32 %v3348_v46, 0.0 }
 0x42e   : > { %v3351_v0 = vpop.f32.mrf.mxu1  ;;  %3901 = vmatmul.mubr.bf16.gmra.mxu0 %v13196_v42  ;;  %4014 = vmatmul.mubr.bf16.gmra.mxu1 %v13196_v42 }
 0x42f   : > { %v3352_v31 = vadd.f32 %v3351_v0, %v13150_v2  ;;  %4495 = vmatpush1.bf16.msra.mxu0 %v10256_v50  ;;  %9443 = vmatpush1.bf16.msra.mxu1 %v13194_v18  ;;  %v3414_v19 = vmax.f32 %v3350_v7, 0.0  ;;  %v10286_v7 = vld [vmem:[%s11295_s24] ss:$16 sps:$4 sm:$0xff]  }
 0x430   : > { %v3355_v15 = vpop.f32.mrf.mxu1  ;;  %4496 = vmatprep.subr.bf16.mxu0 %v10264_v40  ;;  %9428 = vmatprep.subr.bf16.mxu1 %v13201_v28 }
 0x431   : > { %v3415_v29 = vmax.f32 %v3352_v31, 0.0  ;;  %v13228_v59 = vpack.c.bf16 %v3414_v19, %v3412_v60  ;;  %v3356_v53 = vadd.f32 %v3355_v15, %v13153_v13  ;;  %v13283_v19 = vld [vmem:[%s11295_s24 + $0x1ec] ss:$16 sps:$4 sm:$0xff]  }
 0x432   : > { %v3357_v20 = vpop.f32.mrf.mxu1 }
 0x433   : > { %v13221_v16 = vpack.c.bf16 %v3415_v29, %v3413_v47  ;;  %4497 = vmatpush1.bf16.msra.mxu0 %v10262_v12  ;;  %9444 = vmatpush1.bf16.msra.mxu1 %v13214_v1  ;;  %v3358_v30 = vadd.f32 %v3357_v20, %v13150_v2  ;;  %v3416_v8 = vmax.f32 %v3356_v53, 0.0  ;;  %v10294_v12 = vld [vmem:[%s11295_s24 + $0x1e4] ss:$16 sps:$4 sm:$0xff]   ;;  %v10292_v20 = vld [vmem:[%s11295_s24 + $0x1e0] ss:$16 sps:$4 sm:$0xff]  }
 0x434   : > { %v3359_v11 = vpop.f32.mrf.mxu1  ;;  %4498 = vmatprep.subr.bf16.mxu0 %v10270_v33  ;;  %9429 = vmatprep.subr.bf16.mxu1 %v13219_v32 }
 0x435   : > { %v3360_v63 = vadd.f32 %v3359_v11, %v13153_v13  ;;  %3910 = vmatprep.mubr.bf16.mxu0 %v13221_v16  ;;  %4023 = vmatprep.mubr.bf16.mxu1 %v13221_v16  ;;  %v3417_v27 = vmax.f32 %v3358_v30, 0.0  ;;  %v10300_v30 = vld [vmem:[%s11295_s24 + $0x1c4] ss:$16 sps:$4 sm:$0xff]  }
 0x436   : > { %v3361_v17 = vpop.f32.mrf.mxu1  ;;  %3911 = vmatmul.mubr.bf16.gmra.mxu0 %v13228_v59  ;;  %4024 = vmatmul.mubr.bf16.gmra.mxu1 %v13228_v59 }
 0x437   : > { %v3362_v21 = vadd.f32 %v3361_v17, %v13150_v2  ;;  %4499 = vmatpush1.bf16.msra.mxu0 %v10268_v34  ;;  %9445 = vmatpush1.bf16.msra.mxu1 %v13226_v3  ;;  %v3418_v39 = vmax.f32 %v3360_v63, 0.0  ;;  %v13290_v34 = vld [vmem:[%s11295_s24 + $0x1e8] ss:$16 sps:$4 sm:$0xff]   ;;  %v13297_v63 = vld [vmem:[%s11295_s24 + $0x1cc] ss:$16 sps:$4 sm:$0xff]  }
 0x438   : > { %v3365_v58 = vpop.f32.mrf.mxu1  ;;  %4500 = vmatprep.subr.bf16.mxu0 %v10276_v51  ;;  %9430 = vmatprep.subr.bf16.mxu1 %v13233_v37 }
 0x439   : > { %v3419_v14 = vmax.f32 %v3362_v21, 0.0  ;;  %v13260_v5 = vpack.c.bf16 %v3418_v39, %v3416_v8  ;;  %v3366_v4 = vadd.f32 %v3365_v58, %v13153_v13  ;;  %v10298_v58 = vld [vmem:[%s11295_s24 + $0x1c0] ss:$16 sps:$4 sm:$0xff]   ;;  %v10306_v8 = vld [vmem:[%s11295_s24 + $0x1a4] ss:$16 sps:$4 sm:$0xff]  }
 0x43a   : > { %v3367_v55 = vpop.f32.mrf.mxu1 }
 0x43b   : > { %v13253_v9 = vpack.c.bf16 %v3419_v14, %v3417_v27  ;;  %4501 = vmatpush1.bf16.msra.mxu0 %v10274_v52  ;;  %9446 = vmatpush1.bf16.msra.mxu1 %v13246_v44  ;;  %v3368_v54 = vadd.f32 %v3367_v55, %v13150_v2  ;;  %v3420_v47 = vmax.f32 %v3366_v4, 0.0  ;;  %v13315_v55 = vld [vmem:[%s11295_s24 + $0x1ac] ss:$16 sps:$4 sm:$0xff]   ;;  %v10304_v4 = vld [vmem:[%s11295_s24 + $0x1a0] ss:$16 sps:$4 sm:$0xff]  }
 0x43c   : > { %v3369_v62 = vpop.f32.mrf.mxu1  ;;  %4502 = vmatprep.subr.bf16.mxu0 %v10282_v36  ;;  %9431 = vmatprep.subr.bf16.mxu1 %v13251_v57  ;;  %v13310_v36 = vld [vmem:[%s11295_s24 + $0x1c8] ss:$16 sps:$4 sm:$0xff]  }
 0x43d   : > { %v3370_v50 = vadd.f32 %v3369_v62, %v13153_v13  ;;  %3920 = vmatprep.mubr.bf16.mxu0 %v13253_v9  ;;  %4033 = vmatprep.mubr.bf16.mxu1 %v13253_v9  ;;  %v3421_v15 = vmax.f32 %v3368_v54, 0.0 }
 0x43e   : > { %v3371_v40 = vpop.f32.mrf.mxu1  ;;  %3921 = vmatmul.mubr.bf16.gmra.mxu0 %v13260_v5  ;;  %4034 = vmatmul.mubr.bf16.gmra.mxu1 %v13260_v5 }
 0x43f   : > { %v3372_v46 = vadd.f32 %v3371_v40, %v13150_v2  ;;  %4503 = vmatpush1.bf16.msra.mxu0 %v10280_v56  ;;  %9447 = vmatpush1.bf16.msra.mxu1 %v13258_v6  ;;  %v3422_v0 = vmax.f32 %v3370_v50, 0.0  ;;  %v13322_v40 = vld [vmem:[%s11295_s24 + $0x1a8] ss:$16 sps:$4 sm:$0xff]  }
 0x440   : > { %v3375_v31 = vpop.f32.mrf.mxu1  ;;  %4504 = vmatprep.subr.bf16.mxu0 %v10288_v45  ;;  %9432 = vmatprep.subr.bf16.mxu1 %v13265_v41 }
 0x441   : > { %v3423_v33 = vmax.f32 %v3372_v46, 0.0  ;;  %v13292_v11 = vpack.c.bf16 %v3422_v0, %v3420_v47  ;;  %v3376_v21 = vadd.f32 %v3375_v31, %v13153_v13  ;;  %v10312_v0 = vld [vmem:[%s11295_s24 + $0x184] ss:$16 sps:$4 sm:$0xff]   ;;  %v13329_v31 = vld [vmem:[%s11295_s24 + $0x18c] ss:$16 sps:$4 sm:$0xff]  }
 0x442   : > { %v3377_v29 = vpop.f32.mrf.mxu1 }
 0x443   : > { %v13285_v60 = vpack.c.bf16 %v3423_v33, %v3421_v15  ;;  %4505 = vmatpush1.bf16.msra.mxu0 %v10286_v7  ;;  %9448 = vmatpush1.bf16.msra.mxu1 %v13278_v26  ;;  %v3378_v53 = vadd.f32 %v3377_v29, %v13150_v2  ;;  %v3424_v45 = vmax.f32 %v3376_v21, 0.0  ;;  %v13347_v21 = vld [vmem:[%s11295_s24 + $0x16c] ss:$16 sps:$4 sm:$0xff]  }
 0x444   : > { %v3379_v51 = vpop.f32.mrf.mxu1  ;;  %4506 = vmatprep.subr.bf16.mxu0 %v10294_v12  ;;  %9433 = vmatprep.subr.bf16.mxu1 %v13283_v19 }
 0x445   : > { %v3380_v17 = vadd.f32 %v3379_v51, %v13153_v13  ;;  %3930 = vmatprep.mubr.bf16.mxu0 %v13285_v60  ;;  %4043 = vmatprep.mubr.bf16.mxu1 %v13285_v60  ;;  %v3425_v56 = vmax.f32 %v3378_v53, 0.0  ;;  %v13342_v51 = vld [vmem:[%s11295_s24 + $0x188] ss:$16 sps:$4 sm:$0xff]  }
 0x446   : > { %v3381_v52 = vpop.f32.mrf.mxu1  ;;  %3931 = vmatmul.mubr.bf16.gmra.mxu0 %v13292_v11  ;;  %4044 = vmatmul.mubr.bf16.gmra.mxu1 %v13292_v11 }
 0x447   : > { %v3382_v39 = vadd.f32 %v3381_v52, %v13150_v2  ;;  %4507 = vmatpush2.bf16.msra.mxu0 %v10292_v20  ;;  %9449 = vmatpush2.bf16.msra.mxu1 %v13290_v34  ;;  %v3426_v27 = vmax.f32 %v3380_v17, 0.0  ;;  %v10310_v20 = vld [vmem:[%s11295_s24 + $0x180] ss:$16 sps:$4 sm:$0xff]   ;;  %v10318_v17 = vld [vmem:[%s11295_s24 + $0x164] ss:$16 sps:$4 sm:$0xff]  }
 0x448   : > { %v3385_v14 = vpop.f32.mrf.mxu1  ;;  %4508 = vmatprep.subr.bf16.mxu0 %v10300_v30  ;;  %9434 = vmatprep.subr.bf16.mxu1 %v13297_v63 }
 0x449   : > { %v3427_v62 = vmax.f32 %v3382_v39, 0.0  ;;  %v13324_v46 = vpack.c.bf16 %v3426_v27, %v3424_v45  ;;  %v3386_v33 = vadd.f32 %v3385_v14, %v13153_v13 }
 0x44a   : > { %v3387_v54 = vpop.f32.mrf.mxu1 }
 0x44b   : > { %v13317_v50 = vpack.c.bf16 %v3427_v62, %v3425_v56  ;;  %4509 = vmatpush2.bf16.msra.mxu0 %v10298_v58  ;;  %9450 = vmatpush2.bf16.msra.mxu1 %v13310_v36  ;;  %v3388_v12 = vadd.f32 %v3387_v54, %v13150_v2  ;;  %v3428_v58 = vmax.f32 %v3386_v33, 0.0  ;;  %v13354_v56 = vld [vmem:[%s11295_s24 + $0x168] ss:$16 sps:$4 sm:$0xff]   ;;  %v10324_v54 = vld [vmem:[%s11295_s24 + $0x144] ss:$16 sps:$4 sm:$0xff]  }
 0x44c   : > { %v3389_v7 = vpop.f32.mrf.mxu1  ;;  %4510 = vmatprep.subr.bf16.mxu0 %v10306_v8  ;;  %9435 = vmatprep.subr.bf16.mxu1 %v13315_v55  ;;  %v10316_v8 = vld [vmem:[%s11295_s24 + $0x160] ss:$16 sps:$4 sm:$0xff]  }
 0x44d   : > { %v3390_v15 = vadd.f32 %v3389_v7, %v13153_v13  ;;  %3940 = vmatprep.mubr.bf16.mxu0 %v13317_v50  ;;  %4053 = vmatprep.mubr.bf16.mxu1 %v13317_v50  ;;  %v3429_v52 = vmax.f32 %v3388_v12, 0.0 }
 0x44e   : > { %v3391_v47 = vpop.f32.mrf.mxu1  ;;  %3941 = vmatmul.mubr.bf16.gmra.mxu0 %v13324_v46  ;;  %4054 = vmatmul.mubr.bf16.gmra.mxu1 %v13324_v46 }
 0x44f   : > { %v3392_v29 = vadd.f32 %v3391_v47, %v13150_v2  ;;  %4511 = vmatpush2.bf16.msra.mxu0 %v10304_v4  ;;  %9451 = vmatpush2.bf16.msra.mxu1 %v13322_v40  ;;  %v3430_v30 = vmax.f32 %v3390_v15, 0.0  ;;  %v13361_v4 = vld [vmem:[%s11295_s24 + $0x14c] ss:$16 sps:$4 sm:$0xff]   ;;  %v10322_v47 = vld [vmem:[%s11295_s24 + $0x140] ss:$16 sps:$4 sm:$0xff]  }
 0x450   : > { %v3395_v53 = vpop.f32.mrf.mxu1  ;;  %4512 = vmatprep.subr.bf16.mxu0 %v10312_v0  ;;  %9436 = vmatprep.subr.bf16.mxu1 %v13329_v31 }
 0x451   : > { %v3431_v39 = vmax.f32 %v3392_v29, 0.0  ;;  %v13356_v62 = vpack.c.bf16 %v3430_v30, %v3428_v58  ;;  %v3396_v12 = vadd.f32 %v3395_v53, %v13153_v13  ;;  %v13374_v29 = vld [vmem:[%s11295_s24 + $0x148] ss:$16 sps:$4 sm:$0xff]   ;;  %v13379_v30 = vld [vmem:[%s11295_s24 + $0x12c] ss:$16 sps:$4 sm:$0xff]  }
 0x452   : > { %v3397_v27 = vpop.f32.mrf.mxu1 }
 0x453   : > { %v13349_v14 = vpack.c.bf16 %v3431_v39, %v3429_v52  ;;  %4513 = vmatpush2.bf16.msra.mxu0 %v10310_v20  ;;  %9452 = vmatpush2.bf16.msra.mxu1 %v13342_v51  ;;  %v3398_v7 = vadd.f32 %v3397_v27, %v13150_v2  ;;  %v10328_v39 = vld [vmem:[%s11295_s24 + $0x120] ss:$16 sps:$4 sm:$0xff]   ;;  %v13388_v27 = vld [vmem:[%s11295_s24 + $0x128] ss:$16 sps:$4 sm:$0xff]  }
 0x454   : > { %v3399_v45 = vpop.f32.mrf.mxu1  ;;  %4514 = vmatprep.subr.bf16.mxu0 %v10318_v17  ;;  %9437 = vmatprep.subr.bf16.mxu1 %v13347_v21 }
 0x455   : > { %v3400_v0 = vadd.f32 %v3399_v45, %v13153_v13  ;;  %3950 = vmatprep.mubr.bf16.mxu0 %v13349_v14  ;;  %4063 = vmatprep.mubr.bf16.mxu1 %v13349_v14  ;;  %v10330_v13 = vld [vmem:[%s11295_s24 + $0x124] ss:$16 sps:$4 sm:$0xff]   ;;  %v3433_v53 = vmax.f32 %v3398_v7, 0.0  ;;  %v13395_v45 = vld [vmem:[%s11295_s24 + $0x10c] ss:$16 sps:$4 sm:$0xff]  }
 0x456   : > { %v3401_v15 = vpop.f32.mrf.mxu1  ;;  %3951 = vmatmul.mubr.bf16.gmra.mxu0 %v13356_v62  ;;  %4064 = vmatmul.mubr.bf16.gmra.mxu1 %v13356_v62  ;;  %v10337_v7 = vld [vmem:[%s11295_s24 + $0x108] ss:$16 sps:$4 sm:$0xff]  }
 0x457   : > { %v3402_v33 = vadd.f32 %v3401_v15, %v13150_v2  ;;  %4515 = vmatpush2.bf16.msra.mxu0 %v10316_v8  ;;  %9453 = vmatpush2.bf16.msra.mxu1 %v13354_v56  ;;  %v3434_v20 = vmax.f32 %v3400_v0, 0.0  ;;  %v3432_v2 = vmax.f32 %v3396_v12, 0.0  ;;  %v10336_v8 = vld [vmem:[%s11295_s24 + $0x104] ss:$16 sps:$4 sm:$0xff]  }
 0x458   : > { %4516 = vmatprep.subr.bf16.mxu0 %v10324_v54  ;;  %9438 = vmatprep.subr.bf16.mxu1 %v13361_v4  ;;  %v10334_v54 = vld [vmem:[%s11295_s24 + $0x100] ss:$16 sps:$4 sm:$0xff]  }
 0x459   : > { %v3435_v17 = vmax.f32 %v3402_v33, 0.0  ;;  %v13385_v58 = vpack.c.bf16 %v3434_v20, %v3432_v2 }
 0x45b   : > { %v13381_v52 = vpack.c.bf16 %v3435_v17, %v3433_v53  ;;  %4517 = vmatpush2.bf16.msra.mxu0 %v10322_v47  ;;  %9454 = vmatpush2.bf16.msra.mxu1 %v13374_v29 }
 0x45c   : > { %4518 = vmatprep.subr.bf16.mxu0 %v10330_v13  ;;  %9439 = vmatprep.subr.bf16.mxu1 %v13379_v30 }
 0x45d   : > { %3960 = vmatprep.mubr.bf16.mxu0 %v13381_v52  ;;  %4073 = vmatprep.mubr.bf16.mxu1 %v13381_v52 }
 0x45e   : > { %3961 = vmatmul.mubr.bf16.gmra.mxu0 %v13385_v58  ;;  %4074 = vmatmul.mubr.bf16.gmra.mxu1 %v13385_v58 }
 0x45f   : > { %4519 = vmatpush2.bf16.msra.mxu0 %v10328_v39  ;;  %4522 = vmatprep.mubr.bf16.mxu0 %v13159_v35 }
 0x460   : > { %9455 = vmatpush2.bf16.msra.mxu1 %v13388_v27  ;;  %4655 = vmatprep.mubr.bf16.mxu1 %v13221_v16 }
 0x461   : > { %4520 = vmatprep.subr.bf16.mxu0 %v10336_v8  ;;  %9440 = vmatprep.subr.bf16.mxu1 %v13395_v45 }
 0x463   : > { %4521 = vmatpush2.bf16.msra.mxu0 %v10334_v54 }
 0x464   : > { %9456 = vmatpush2.bf16.msra.mxu1 %v10337_v7  ;;  %4603 = vmatprep.subr.bf16.mxu0 %v13145_v48  ;;  %v3528_v48 = vsub.s32 2, %v13011_v23 }
 0x466   : > { %4523 = vmatmul.mubr.bf16.vlgmr.msra.gmra.mxu0 %v13165_v24 }
 0x467   : > { %4656 = vmatmul.mubr.bf16.vlgmr.msra.gmra.mxu1 %v13228_v59  ;;  %4532 = vmatprep.mubr.bf16.mxu0 %v13189_v61 }
 0x468   : > { %4604 = vmatpush1.bf16.msra.mxu0 %v13163_v49  ;;  %4665 = vmatprep.mubr.bf16.mxu1 %v13253_v9  ;;  %v3516_v49 = vld [vmem:[%s11290_s21] sm:$0xf] }
 0x469   : > { %4605 = vmatprep.subr.bf16.mxu0 %v13169_v25  ;;  %v3532_v25 = vsub.s32 3, %v13011_v23 }
 0x46c   : > { %4606 = vmatpush1.bf16.msra.mxu0 %v13182_v22  ;;  %v13470_v22 = vrot.slane %v3516_v49, %v13017_v38 }
 0x46d   : > { %4607 = vmatprep.subr.bf16.mxu0 %v13187_v10  ;;  %v13477_v10 = vrot.slane %v3516_v49, %v13014_v43 }
 0x46e   : > { %4533 = vmatmul.mubr.bf16.gmra.mxu0 %v13196_v42 }
 0x46f   : > { %4666 = vmatmul.mubr.bf16.gmra.mxu1 %v13260_v5  ;;  %4542 = vmatprep.mubr.bf16.mxu0 %v13221_v16 }
 0x470   : > { %4608 = vmatpush1.bf16.msra.mxu0 %v13194_v18  ;;  %4675 = vmatprep.mubr.bf16.mxu1 %v13285_v60 }
 0x471   : > { %4609 = vmatprep.subr.bf16.mxu0 %v13201_v28 }
 0x474   : > { %4610 = vmatpush1.bf16.msra.mxu0 %v13214_v1 }
 0x475   : > { %4611 = vmatprep.subr.bf16.mxu0 %v13219_v32 }
 0x476   : > { %4543 = vmatmul.mubr.bf16.gmra.mxu0 %v13228_v59 }
 0x477   : > { %4676 = vmatmul.mubr.bf16.gmra.mxu1 %v13292_v11  ;;  %4552 = vmatprep.mubr.bf16.mxu0 %v13253_v9 }
 0x478   : > { %4612 = vmatpush1.bf16.msra.mxu0 %v13226_v3  ;;  %4685 = vmatprep.mubr.bf16.mxu1 %v13317_v50 }
 0x479   : > { %4613 = vmatprep.subr.bf16.mxu0 %v13233_v37 }
 0x47c   : > { %4614 = vmatpush1.bf16.msra.mxu0 %v13246_v44 }
 0x47d   : > { %4615 = vmatprep.subr.bf16.mxu0 %v13251_v57 }
 0x47e   : > { %4553 = vmatmul.mubr.bf16.gmra.mxu0 %v13260_v5 }
 0x47f   : > { %4686 = vmatmul.mubr.bf16.gmra.mxu1 %v13324_v46  ;;  %4562 = vmatprep.mubr.bf16.mxu0 %v13285_v60 }
 0x480   : > { %4616 = vmatpush1.bf16.msra.mxu0 %v13258_v6  ;;  %4695 = vmatprep.mubr.bf16.mxu1 %v13349_v14 }
 0x481   : > { %4617 = vmatprep.subr.bf16.mxu0 %v13265_v41 }
 0x484   : > { %4618 = vmatpush1.bf16.msra.mxu0 %v13278_v26 }
 0x485   : > { %4619 = vmatprep.subr.bf16.mxu0 %v13283_v19 }
 0x486   : > { %4563 = vmatmul.mubr.bf16.gmra.mxu0 %v13292_v11 }
 0x487   : > { %4696 = vmatmul.mubr.bf16.gmra.mxu1 %v13356_v62  ;;  %4572 = vmatprep.mubr.bf16.mxu0 %v13317_v50 }
 0x488   : > { %4620 = vmatpush2.bf16.msra.mxu0 %v13290_v34  ;;  %4705 = vmatprep.mubr.bf16.mxu1 %v13381_v52 }
 0x489   : > { %4621 = vmatprep.subr.bf16.mxu0 %v13297_v63 }
 0x48c   : > { %4622 = vmatpush2.bf16.msra.mxu0 %v13310_v36 }
 0x48d   : > { %4623 = vmatprep.subr.bf16.mxu0 %v13315_v55 }
 0x48e   : > { %4573 = vmatmul.mubr.bf16.gmra.mxu0 %v13324_v46 }
 0x48f   : > { %4706 = vmatmul.mubr.bf16.gmra.mxu1 %v13385_v58  ;;  %4582 = vmatprep.mubr.bf16.mxu0 %v13349_v14 }
 0x490   : > { %4624 = vmatpush2.bf16.msra.mxu0 %v13322_v40 }
 0x491   : > { %4625 = vmatprep.subr.bf16.mxu0 %v13329_v31 }
 0x494   : > { %4626 = vmatpush2.bf16.msra.mxu0 %v13342_v51 }
 0x495   : > { %4627 = vmatprep.subr.bf16.mxu0 %v13347_v21 }
 0x496   : > { %4583 = vmatmul.mubr.bf16.gmra.mxu0 %v13356_v62 }
 0x497   : > { %4592 = vmatprep.mubr.bf16.mxu0 %v13381_v52 }
 0x498   : > { %4628 = vmatpush2.bf16.msra.mxu0 %v13354_v56 }
 0x499   : > { %4629 = vmatprep.subr.bf16.mxu0 %v13361_v4 }
 0x49c   : > { %4630 = vmatpush2.bf16.msra.mxu0 %v13374_v29 }
 0x49d   : > { %4631 = vmatprep.subr.bf16.mxu0 %v13379_v30 }
 0x49e   : > { %4593 = vmatmul.mubr.bf16.gmra.mxu0 %v13385_v58 }
 0x49f   : > { %4635 = vmatprep.mubr.bf16.mxu0 %v13159_v35  ;;  %v13474_v35 = vrot.slane %v3516_v49, %v3528_v48 }
 0x4a0   : > { %4632 = vmatpush2.bf16.msra.mxu0 %v13388_v27 }
 0x4a1   : > { %4633 = vmatprep.subr.bf16.mxu0 %v13395_v45 }
 0x4a4   : > { %4634 = vmatpush2.bf16.msra.mxu0 %v10337_v7 }
 0x4a7   : > { %4636 = vmatmul.mubr.bf16.vlgmr.msra.gmra.mxu0 %v13165_v24  ;;  %v13481_v24 = vrot.slane %v3516_v49, %v3532_v25 }
 0x4a8   : > { %4645 = vmatprep.mubr.bf16.mxu0 %v13189_v61 }
 0x4af   : > { %4646 = vmatmul.mubr.bf16.gmra.mxu0 %v13196_v42 }
 0x4e6   : > { %v3892_v61 = vpop.f32.mrf.mxu0  ;;  %v4005_v18 = vpop.f32.mrf.mxu1 }
 0x4e7   : > { %v3893_v42 = vadd.f32 %v3892_v61, %v13470_v22  ;;  %v4006_v28 = vadd.f32 %v4005_v18, %v13474_v35 }
 0x4e8   : > { %v3894_v1 = vpop.f32.mrf.mxu0  ;;  %v4007_v32 = vpop.f32.mrf.mxu1 }
 0x4e9   : > { %10340 = vtanh.f32 %v3893_v42  ;;  %v3895_v16 = vadd.f32 %v3894_v1, %v13477_v10  ;;  %v4008_v3 = vadd.f32 %v4007_v32, %v13481_v24 }
 0x4ea   : > { %10342 = vtanh.f32 %v4006_v28  ;;  %v3896_v59 = vpop.f32.mrf.mxu0  ;;  %v4009_v37 = vpop.f32.mrf.mxu1 }
 0x4eb   : > { %10344 = vtanh.f32 %v3895_v16  ;;  %v3897_v44 = vadd.f32 %v3896_v59, %v13470_v22  ;;  %v4010_v57 = vadd.f32 %v4009_v37, %v13474_v35 }
 0x4ec   : > { %10346 = vtanh.f32 %v4008_v3  ;;  %v3898_v9 = vpop.f32.mrf.mxu0  ;;  %v4011_v6 = vpop.f32.mrf.mxu1 }
 0x4ed   : > { %10348 = vtanh.f32 %v3897_v44  ;;  %v3899_v5 = vadd.f32 %v3898_v9, %v13477_v10  ;;  %v4012_v41 = vadd.f32 %v4011_v6, %v13481_v24 }
 0x4ee   : > { %10350 = vtanh.f32 %v4010_v57  ;;  %v3902_v26 = vpop.f32.mrf.mxu0  ;;  %v4015_v19 = vpop.f32.mrf.mxu1 }
 0x4ef   : > { %10352 = vtanh.f32 %v3899_v5  ;;  %v3903_v60 = vadd.f32 %v3902_v26, %v13470_v22  ;;  %v4016_v34 = vadd.f32 %v4015_v19, %v13474_v35 }
 0x4f0   : > { %10354 = vtanh.f32 %v4012_v41  ;;  %v3904_v11 = vpop.f32.mrf.mxu0  ;;  %v4017_v63 = vpop.f32.mrf.mxu1 }
 0x4f1   : > { %10356 = vtanh.f32 %v3903_v60  ;;  %v3905_v36 = vadd.f32 %v3904_v11, %v13477_v10  ;;  %v4018_v55 = vadd.f32 %v4017_v63, %v13481_v24 }
 0x4f2   : > { %10358 = vtanh.f32 %v4016_v34  ;;  %v3906_v50 = vpop.f32.mrf.mxu0  ;;  %v4019_v40 = vpop.f32.mrf.mxu1 }
 0x4f3   : > { %10360 = vtanh.f32 %v3905_v36  ;;  %v3907_v46 = vadd.f32 %v3906_v50, %v13470_v22  ;;  %v4020_v31 = vadd.f32 %v4019_v40, %v13474_v35 }
 0x4f4   : > { %10362 = vtanh.f32 %v4018_v55  ;;  %v3908_v51 = vpop.f32.mrf.mxu0  ;;  %v4021_v21 = vpop.f32.mrf.mxu1 }
 0x4f5   : > { %10364 = vtanh.f32 %v3907_v46  ;;  %v3909_v14 = vadd.f32 %v3908_v51, %v13477_v10  ;;  %v4022_v56 = vadd.f32 %v4021_v21, %v13481_v24 }
 0x4f6   : > { %v10341_v62 = vpop.eup %10340  ;;  %10366 = vtanh.f32 %v4020_v31  ;;  %v13499_v4 = vpop.f32.mrf.mxu0 }
 0x4f7   : > { %v13501_v0 = vpop.f32.mrf.mxu1  ;;  %v10343_v12 = vpop.eup %10342  ;;  %v4845_v15 = vmul.f32 1.442695, %v10341_v62  ;;  %10368 = vtanh.f32 %v3909_v14  ;;  %v3913_v21 = vadd.f32 %v13499_v4, %v13470_v22 }
 0x4f8   : > { %v10345_v33 = vpop.eup %10344  ;;  %v4849_v47 = vmul.f32 1.442695, %v10343_v12  ;;  %10370 = vtanh.f32 %v4022_v56  ;;  %v13503_v29 = vpop.f32.mrf.mxu0 }
 0x4f9   : > { %v13505_v20 = vpop.f32.mrf.mxu1  ;;  %v10347_v13 = vpop.eup %10346  ;;  %10372 = vpow2.f32 %v4845_v15  ;;  %v4847_v30 = vmul.f32 1.442695, %v10345_v33  ;;  %v5181_v39 = vadd.f32 %v10345_v33, %v10341_v62  ;;  %v4026_v33 = vadd.f32 %v13501_v0, %v13474_v35 }
 0x4fa   : > { %v10349_v53 = vpop.eup %10348  ;;  %10374 = vpow2.f32 %v4849_v47  ;;  %v4851_v17 = vmul.f32 1.442695, %v10347_v13  ;;  %v13507_v2 = vpop.f32.mrf.mxu0  ;;  %v5183_v42 = vsel %vm2781_vm2, %v10347_v13, 0.0  ;;  %v4028_v0 = vadd.f32 %v13505_v20, %v13481_v24 }
 0x4fb   : > { %v13509_v52 = vpop.f32.mrf.mxu1  ;;  %v10351_v58 = vpop.eup %10350  ;;  %10376 = vpow2.f32 %v4847_v30  ;;  %v4853_v27 = vmul.f32 1.442695, %v10349_v53  ;;  %v5182_v49 = vadd.f32 %v10343_v12, %v5181_v39 }
 0x4fc   : > { %v10353_v8 = vpop.eup %10352  ;;  %10378 = vpow2.f32 %v4851_v17  ;;  %v4857_v45 = vmul.f32 1.442695, %v10351_v58  ;;  %v13511_v54 = vpop.f32.mrf.mxu0 }
 0x4fd   : > { %v13513_v7 = vpop.f32.mrf.mxu1  ;;  %v10355_v61 = vpop.eup %10354  ;;  %10380 = vpow2.f32 %v4853_v27  ;;  %v4855_v18 = vmul.f32 1.442695, %v10353_v8  ;;  %v5184_v3 = vadd.f32 %v5183_v42, %v5182_v49  ;;  %v5187_v59 = vadd.f32 %v10353_v8, %v10349_v53 }
 0x4fe   : > { %v10357_v28 = vpop.eup %10356  ;;  %10382 = vpow2.f32 %v4857_v45  ;;  %v4859_v1 = vmul.f32 1.442695, %v10355_v61  ;;  %v13516_v32 = vpop.f32.mrf.mxu0  ;;  %v5189_v60 = vsel %vm2781_vm2, %v10355_v61, 0.0  ;;  %v3915_v27 = vadd.f32 %v13503_v29, %v13477_v10 }
 0x4ff   : > { %v13518_v16 = vpop.f32.mrf.mxu1  ;;  %v10359_v37 = vpop.eup %10358  ;;  %10384 = vpow2.f32 %v4855_v18  ;;  %v4861_v44 = vmul.f32 1.442695, %v10357_v28  ;;  %5185 = vadd.xlane.f32.xlu0 %v5184_v3  ;;  %v5188_v41 = vadd.f32 %v10351_v58, %v5187_v59  ;;  %v3917_v42 = vadd.f32 %v13507_v2, %v13470_v22 }
 0x500   : > { %v10361_v57 = vpop.eup %10360  ;;  %10386 = vpow2.f32 %v4859_v1  ;;  %v4865_v9 = vmul.f32 1.442695, %v10359_v37  ;;  %v13520_v6 = vpop.f32.mrf.mxu0  ;;  %v4030_v1 = vadd.f32 %v13509_v52, %v13474_v35  ;;  %v4032_v2 = vadd.f32 %v13513_v7, %v13481_v24 }
 0x501   : > { %v13522_v5 = vpop.f32.mrf.mxu1  ;;  %v10363_v26 = vpop.eup %10362  ;;  %10388 = vpow2.f32 %v4861_v44  ;;  %v4863_v19 = vmul.f32 1.442695, %v10361_v57  ;;  %v5190_v55 = vadd.f32 %v5189_v60, %v5188_v41  ;;  %v5193_v50 = vadd.f32 %v10361_v57, %v10357_v28 }
 0x502   : > { %v10365_v34 = vpop.eup %10364  ;;  %10390 = vpow2.f32 %v4865_v9  ;;  %v4867_v11 = vmul.f32 1.442695, %v10363_v26  ;;  %v13525_v63 = vpop.f32.mrf.mxu0  ;;  %v5195_v47 = vsel %vm2781_vm2, %v10363_v26, 0.0  ;;  %v3919_v57 = vadd.f32 %v13511_v54, %v13477_v10 }
 0x503   : > { %v13527_v36 = vpop.f32.mrf.mxu1  ;;  %v10367_v40 = vpop.eup %10366  ;;  %10392 = vpow2.f32 %v4863_v19  ;;  %v4869_v46 = vmul.f32 1.442695, %v10365_v34  ;;  %5191 = vadd.xlane.f32.xlu0 %v5190_v55  ;;  %v5194_v62 = vadd.f32 %v10359_v37, %v5193_v50  ;;  %v4148_v37 = vld [vmem:[%s11300_s27] sm:$0xf]  ;;  %v3923_v19 = vadd.f32 %v13516_v32, %v13470_v22 }
 0x504   : > { %v10369_v31 = vpop.eup %10368  ;;  %10394 = vpow2.f32 %v4867_v11  ;;  %v4873_v51 = vmul.f32 1.442695, %v10367_v40  ;;  %v13531_v14 = vpop.f32.mrf.mxu0  ;;  %v13571_v60 = vrot.slane %v4148_v37, %v13017_v38  ;;  %v4036_v54 = vadd.f32 %v13518_v16, %v13474_v35 }
 0x505   : > { %v13533_v56 = vpop.f32.mrf.mxu1  ;;  %v10371_v12 = vpop.eup %10370  ;;  %10396 = vpow2.f32 %v4869_v46  ;;  %v4871_v15 = vmul.f32 1.442695, %v10369_v31  ;;  %v5196_v17 = vadd.f32 %v5195_v47, %v5194_v62  ;;  %v5199_v39 = vadd.f32 %v10369_v31, %v10365_v34  ;;  %v4781_v46 = vld [vmem:[#allocation2 + $0x200] sm:$0xff]  ;;  %v4782_v62 = vld [vmem:[#allocation2 + $0x208] sm:$0xff] }
 0x506   : > { %v13538_v13 = vpop.eup %10372  ;;  %10398 = vpow2.f32 %v4873_v51  ;;  %v4875_v30 = vmul.f32 1.442695, %v10371_v12  ;;  %v3932_v53 = vpop.f32.mrf.mxu0  ;;  %v5201_v28 = vsel %vm2781_vm2, %v10371_v12, 0.0  ;;  %v13577_v7 = vrot.slane %v4148_v37, %v3528_v48  ;;  %v4785_v12 = vld [vmem:[#allocation2 + $0x220] sm:$0xff] }
 0x507   : > { %v4045_v4 = vpop.f32.mrf.mxu1  ;;  %v13540_v58 = vpop.eup %10374  ;;  %10400 = vpow2.f32 %v4871_v15  ;;  %5197 = vadd.xlane.f32.xlu1 %v5196_v17  ;;  %v5200_v61 = vadd.f32 %v10367_v40, %v5199_v39  ;;  %v13580_v50 = vrot.slane %v4148_v37, %v13014_v43  ;;  %v3925_v38 = vadd.f32 %v13520_v6, %v13477_v10 }
 0x508   : > { %15232 = vst [vmem:[#allocation5_spill] sm:$0xff] %v13540_v58  ;;  %v13544_v8 = vpop.eup %10376  ;;  %10402 = vpow2.f32 %v4875_v30  ;;  %v3934_v45 = vpop.f32.mrf.mxu0  ;;  %v4038_v32 = vadd.f32 %v13522_v5, %v13481_v24  ;;  %v13590_v16 = vrot.slane %v4148_v37, %v3532_v25  ;;  %v3927_v43 = vadd.f32 %v13525_v63, %v13470_v22 }
 0x509   : > { %v4047_v49 = vpop.f32.mrf.mxu1  ;;  %v13548_v18 = vpop.eup %10378  ;;  %10404 = vtanh.f32 %v3913_v21  ;;  %v5202_v59 = vadd.f32 %v5201_v28, %v5200_v61  ;;  %v4040_v48 = vadd.f32 %v13527_v36, %v13474_v35  ;;  %v3929_v51 = vadd.f32 %v13531_v14, %v13477_v10  ;;  %v4790_v28 = vld [vmem:[#allocation2 + $0x248] sm:$0xff] }
 0x50a   : > { %15233 = vst [vmem:[#allocation6_spill] sm:$0xff] %v13548_v18  ;;  %v13553_v29 = vpop.eup %10380  ;;  %10406 = vtanh.f32 %v4026_v33  ;;  %v3936_v3 = vpop.f32.mrf.mxu0  ;;  %v4042_v23 = vadd.f32 %v13533_v56, %v13481_v24  ;;  %v13603_v25 = vadd.f32 %v3932_v53, %v13470_v22  ;;  %v13606_v63 = vadd.f32 %v4045_v4, %v13474_v35  ;;  %v4786_v56 = vld [vmem:[#allocation2 + $0x228] sm:$0xff] }
 0x50b   : > { %v4049_v20 = vpop.f32.mrf.mxu1  ;;  %v13558_v44 = vpop.eup %10382  ;;  %10408 = vtanh.f32 %v3915_v27  ;;  %5203 = vadd.xlane.f32.xlu1 %v5202_v59  ;;  %v13609_v14 = vadd.f32 %v3934_v45, %v13477_v10  ;;  %v13612_v15 = vadd.f32 %v4047_v49, %v13481_v24  ;;  %v13615_v30 = vmul.f32 %v13538_v13, %v4781_v46  ;;  %v4789_v27 = vld [vmem:[#allocation2 + $0x240] sm:$0xff] }
 0x50c   : > { %15234 = vst [vmem:[#allocation7_spill] sm:$0xff] %v13558_v44  ;;  %v13562_v9 = vpop.eup %10384  ;;  %10410 = vtanh.f32 %v4028_v0  ;;  %v3938_v41 = vpop.f32.mrf.mxu0  ;;  %v13620_v4 = vadd.f32 %v3936_v3, %v13470_v22  ;;  %v13623_v17 = vadd.f32 %v4049_v20, %v13474_v35  ;;  %v13626_v39 = vmul.f32 %v13544_v8, %v4782_v62  ;;  %v4793_v59 = vld [vmem:[#allocation2 + $0x260] sm:$0xff] }
 0x50d   : > { %v4051_v26 = vpop.f32.mrf.mxu1  ;;  %v13566_v52 = vpop.eup %10386  ;;  %10412 = vtanh.f32 %v3917_v42  ;;  %v13629_v45 = vadd.f32 %v3938_v41, %v13477_v10  ;;  %v13635_v42 = vmul.f32 %v13553_v29, %v4785_v12  ;;  %v13646_v20 = vmul.f32 %v13562_v9, %v4786_v56 }
 0x50e   : > { %15235 = vst [vmem:[#allocation8_spill] sm:$0xff] %v13566_v52  ;;  %v10389_v34 = vpop.eup %10388  ;;  %10414 = vtanh.f32 %v4030_v1  ;;  %v3942_v11 = vpop.f32.mrf.mxu0  ;;  %v13632_v13 = vadd.f32 %v4051_v26, %v13481_v24 }
 0x50f   : > { %v4055_v55 = vpop.f32.mrf.mxu1  ;;  %v13582_v40 = vpop.eup %10390  ;;  %10416 = vtanh.f32 %v3919_v57  ;;  %v13640_v8 = vadd.f32 %v3942_v11, %v13470_v22  ;;  %v13654_v26 = vmul.f32 %v10389_v34, %v4789_v27 }
 0x510   : > { %15236 = vst [vmem:[#allocation9_spill] sm:$0xff] %v13582_v40  ;;  %v10393_v31 = vpop.eup %10392  ;;  %10418 = vtanh.f32 %v4032_v2  ;;  %v3944_v6 = vpop.f32.mrf.mxu0  ;;  %v13643_v3 = vadd.f32 %v4055_v55, %v13474_v35  ;;  %v4794_v55 = vld [vmem:[#allocation2 + $0x268] sm:$0xff] }
 0x511   : > { %v4057_v21 = vpop.f32.mrf.mxu1  ;;  %v13598_v5 = vpop.eup %10394  ;;  %10420 = vtanh.f32 %v3923_v19  ;;  %v13649_v57 = vadd.f32 %v3944_v6, %v13477_v10  ;;  %v13659_v9 = vmul.f32 %v10393_v31, %v4790_v28 }
 0x512   : > { %15237 = vst [vmem:[#allocation10_spill] sm:$0xff] %v13598_v5  ;;  %v10397_v36 = vpop.eup %10396  ;;  %10422 = vtanh.f32 %v4036_v54  ;;  %v3946_v33 = vpop.f32.mrf.mxu0  ;;  %v13652_v29 = vadd.f32 %v4057_v21, %v13481_v24 }
 0x513   : > { %v4059_v47 = vpop.f32.mrf.mxu1  ;;  %v13617_v53 = vpop.eup %10398  ;;  %10424 = vtanh.f32 %v3925_v38  ;;  %v13657_v11 = vadd.f32 %v3946_v33, %v13470_v22  ;;  %v13664_v6 = vmul.f32 %v10397_v36, %v4793_v59 }
 0x514   : > { %15238 = vst [vmem:[#allocation11_spill] sm:$0xff] %v13617_v53  ;;  %v10401_v0 = vpop.eup %10400  ;;  %10426 = vtanh.f32 %v4038_v32  ;;  %v3948_v49 = vpop.f32.mrf.mxu0  ;;  %v13662_v46 = vadd.f32 %v4059_v47, %v13474_v35 }
 0x515   : > { %v4061_v61 = vpop.f32.mrf.mxu1  ;;  %v13637_v1 = vpop.eup %10402  ;;  %10428 = vtanh.f32 %v3927_v43  ;;  %v13667_v62 = vadd.f32 %v3948_v49, %v13477_v10  ;;  %v13672_v56 = vmul.f32 %v10401_v0, %v4794_v55 }
 0x516   : > { %15239 = vst [vmem:[#allocation12_spill] sm:$0xff] %v13637_v1  ;;  %v10405_v37 = vpop.eup %10404  ;;  %10430 = vtanh.f32 %v4040_v48  ;;  %v3952_v2 = vpop.f32.mrf.mxu0  ;;  %v13670_v33 = vadd.f32 %v4061_v61, %v13481_v24 }
 0x517   : > { %v4065_v41 = vpop.f32.mrf.mxu1  ;;  %v10407_v19 = vpop.eup %10406  ;;  %v4877_v54 = vmul.f32 1.442695, %v10405_v37  ;;  %10432 = vtanh.f32 %v3929_v51  ;;  %v13675_v59 = vadd.f32 %v3952_v2, %v13470_v22 }
 0x518   : > { %v10409_v38 = vpop.eup %10408  ;;  %v4881_v32 = vmul.f32 1.442695, %v10407_v19  ;;  %10434 = vtanh.f32 %v4042_v23  ;;  %v3954_v43 = vpop.f32.mrf.mxu0 }
 0x519   : > { %v4067_v48 = vpop.f32.mrf.mxu1  ;;  %v10411_v34 = vpop.eup %10410  ;;  %10436 = vpow2.f32 %v4877_v54  ;;  %v4879_v21 = vmul.f32 1.442695, %v10409_v38  ;;  %v5205_v51 = vadd.f32 %v10409_v38, %v10405_v37  ;;  %v13679_v38 = vadd.f32 %v4065_v41, %v13474_v35 }
 0x51a   : > { %v10413_v31 = vpop.eup %10412  ;;  %10438 = vpow2.f32 %v4881_v32  ;;  %v4883_v12 = vmul.f32 1.442695, %v10411_v34  ;;  %v3956_v23 = vpop.f32.mrf.mxu0  ;;  %v5207_v54 = vsel %vm2781_vm2, %v10411_v34, 0.0  ;;  %v13682_v2 = vadd.f32 %v3954_v43, %v13477_v10 }
 0x51b   : > { %v4069_v47 = vpop.f32.mrf.mxu1  ;;  %v10415_v27 = vpop.eup %10414  ;;  %10440 = vpow2.f32 %v4879_v21  ;;  %v4885_v36 = vmul.f32 1.442695, %v10413_v31  ;;  %v5206_v28 = vadd.f32 %v10407_v19, %v5205_v51  ;;  %v13685_v51 = vadd.f32 %v4067_v48, %v13481_v24 }
 0x51c   : > { %v10417_v37 = vpop.eup %10416  ;;  %10442 = vpow2.f32 %v4883_v12  ;;  %v4889_v49 = vmul.f32 1.442695, %v10415_v27  ;;  %v3958_v61 = vpop.f32.mrf.mxu0  ;;  %v13692_v43 = vadd.f32 %v4069_v47, %v13474_v35 }
 0x51d   : > { %v4071_v32 = vpop.f32.mrf.mxu1  ;;  %v10419_v1 = vpop.eup %10418  ;;  %10444 = vpow2.f32 %v4885_v36  ;;  %v4887_v0 = vmul.f32 1.442695, %v10417_v37  ;;  %v5208_v55 = vadd.f32 %v5207_v54, %v5206_v28  ;;  %v5211_v21 = vadd.f32 %v10417_v37, %v10413_v31 }
 0x51e   : > { %v10421_v53 = vpop.eup %10420  ;;  %10446 = vpow2.f32 %v4889_v49  ;;  %v4891_v19 = vmul.f32 1.442695, %v10419_v1  ;;  %v3962_v34 = vpop.f32.mrf.mxu0  ;;  %v13688_v36 = vadd.f32 %v3956_v23, %v13470_v22  ;;  %v5213_v37 = vsel %vm2781_vm2, %v10419_v1, 0.0 }
 0x51f   : > { %v4075_v12 = vpop.f32.mrf.mxu1  ;;  %v10423_v41 = vpop.eup %10422  ;;  %10448 = vpow2.f32 %v4887_v0  ;;  %v4893_v5 = vmul.f32 1.442695, %v10421_v53  ;;  %5209 = vadd.xlane.f32.xlu0 %v5208_v55  ;;  %v5212_v40 = vadd.f32 %v10415_v27, %v5211_v21  ;;  %v13695_v23 = vadd.f32 %v3958_v61, %v13477_v10 }
 0x520   : > { %v10425_v31 = vpop.eup %10424  ;;  %10450 = vpow2.f32 %v4891_v19  ;;  %v4897_v28 = vmul.f32 1.442695, %v10423_v41  ;;  %v3964_v48 = vpop.f32.mrf.mxu0  ;;  %v13698_v21 = vadd.f32 %v4071_v32, %v13481_v24  ;;  %v13705_v61 = vadd.f32 %v4075_v12, %v13474_v35 }
 0x521   : > { %v4077_v49 = vpop.f32.mrf.mxu1  ;;  %v10427_v54 = vpop.eup %10426  ;;  %10452 = vpow2.f32 %v4893_v5  ;;  %v4895_v52 = vmul.f32 1.442695, %v10425_v31  ;;  %v5214_v0 = vadd.f32 %v5213_v37, %v5212_v40  ;;  %v5217_v44 = vadd.f32 %v10425_v31, %v10421_v53 }
 0x522   : > { %v10429_v55 = vpop.eup %10428  ;;  %10454 = vpow2.f32 %v4897_v28  ;;  %v4899_v27 = vmul.f32 1.442695, %v10427_v54  ;;  %15240 = vst [vmem:[#allocation13_spill] sm:$0xff] %v13698_v21  ;;  %v3966_v1 = vpop.f32.mrf.mxu0  ;;  %v13701_v5 = vadd.f32 %v3962_v34, %v13470_v22  ;;  %v5219_v31 = vsel %vm2781_vm2, %v10427_v54, 0.0  ;;  %15242 = vst [vmem:[#allocation15_spill] sm:$0xff] %v13705_v61 }
 0x523   : > { %v4079_v19 = vpop.f32.mrf.mxu1  ;;  %v10431_v47 = vpop.eup %10430  ;;  %10456 = vpow2.f32 %v4895_v52  ;;  %v4901_v18 = vmul.f32 1.442695, %v10429_v55  ;;  %5215 = vadd.xlane.f32.xlu1 %v5214_v0  ;;  %v5218_v58 = vadd.f32 %v10423_v41, %v5217_v44  ;;  %v4799_v44 = vld [vmem:[#allocation2 + $0x290] sm:$0xff]  ;;  %v13715_v54 = vadd.f32 %v4077_v49, %v13481_v24 }
 0x524   : > { %15241 = vst [vmem:[#allocation14_spill] sm:$0xff] %v13701_v5  ;;  %v10433_v40 = vpop.eup %10432  ;;  %10458 = vpow2.f32 %v4899_v27  ;;  %v4905_v53 = vmul.f32 1.442695, %v10431_v47  ;;  %v3968_v32 = vpop.f32.mrf.mxu0  ;;  %v13712_v27 = vadd.f32 %v3964_v48, %v13477_v10 }
 0x525   : > { %v13707_v28 = vpop.f32.mrf.mxu1  ;;  %v10435_v37 = vpop.eup %10434  ;;  %10460 = vpow2.f32 %v4901_v18  ;;  %v4903_v52 = vmul.f32 1.442695, %v10433_v40  ;;  %v5220_v21 = vadd.f32 %v5219_v31, %v5218_v58  ;;  %v5223_v0 = vadd.f32 %v10433_v40, %v10429_v55  ;;  %15244 = vst [vmem:[#allocation17_spill] sm:$0xff] %v13715_v54  ;;  %v4800_v40 = vld [vmem:[#allocation2 + $0x298] sm:$0xff] }
 0x526   : > { %v13709_v41 = vpop.eup %10436  ;;  %10462 = vpow2.f32 %v4905_v53  ;;  %v4907_v34 = vmul.f32 1.442695, %v10435_v37  ;;  %15243 = vst [vmem:[#allocation16_spill] sm:$0xff] %v13712_v27  ;;  %v4524_v12 = vpop.f32.mrf.mxu0  ;;  %v13718_v18 = vadd.f32 %v3966_v1, %v13470_v22  ;;  %v5225_v48 = vsel %vm2781_vm2, %v10435_v37, 0.0 }
 0x527   : > { %v10439_v61 = vpop.eup %10438  ;;  %10464 = vpow2.f32 %v4903_v52  ;;  %5221 = vadd.xlane.f32.xlu0 %v5220_v21  ;;  %v5224_v5 = vadd.f32 %v10431_v47, %v5223_v0  ;;  %v4525_v58 = vadd.f32 %v4524_v12, %v13571_v60  ;;  %v4657_v55 = vpop.f32.mrf.mxu1  ;;  %v4803_v52 = vld [vmem:[#allocation2 + $0x2b0] sm:$0xff] }
 0x528   : > { %v13721_v53 = vpop.eup %10440  ;;  %10466 = vpow2.f32 %v4907_v34  ;;  %v4658_v49 = vadd.f32 %v4657_v55, %v13577_v7  ;;  %v4991_v31 = vmul.f32 %v10439_v61, %v4799_v44  ;;  %v4526_v54 = vpop.f32.mrf.mxu0 }
 0x529   : > { %v10443_v27 = vpop.eup %10442  ;;  %10468 = vtanh.f32 %v13603_v25  ;;  %v5226_v21 = vadd.f32 %v5225_v48, %v5224_v5  ;;  %v5037_v22 = vadd.f32 %v13615_v30, %v4525_v58  ;;  %v4527_v1 = vadd.f32 %v4526_v54, %v13580_v50  ;;  %v4659_v47 = vpop.f32.mrf.mxu1  ;;  %v4804_v58 = vld [vmem:[#allocation2 + $0x2b8] sm:$0xff] }
 0x52a   : > { %v13728_v0 = vpop.eup %10444  ;;  %10470 = vtanh.f32 %v13606_v63  ;;  %v5055_v34 = vadd.f32 %v4991_v31, %v4658_v49  ;;  %v4660_v37 = vadd.f32 %v4659_v47, %v13590_v16  ;;  %v4992_v12 = vmul.f32 %v10443_v27, %v4800_v40  ;;  %v4528_v61 = vpop.f32.mrf.mxu0  ;;  %v4807_v31 = vld [vmem:[#allocation2 + $0x2d0] sm:$0xff] }
 0x52b   : > { %v10447_v44 = vpop.eup %10446  ;;  %10472 = vtanh.f32 %v13609_v14  ;;  %5227 = vadd.xlane.f32.xlu1 %v5226_v21  ;;  %v13734_v25 = vadd.f32 %v4079_v19, %v13474_v35  ;;  %5101 = vst [vmem:[#allocation2 + $0x200] sm:$0xff] %v5037_v22  ;;  %v5038_v30 = vadd.f32 %v13626_v39, %v4527_v1  ;;  %v4529_v5 = vadd.f32 %v4528_v61, %v13571_v60  ;;  %v4661_v54 = vpop.f32.mrf.mxu1 }
 0x52c   : > { %v13738_v63 = vpop.eup %10448  ;;  %10474 = vtanh.f32 %v13612_v15  ;;  %5119 = vst [vmem:[#allocation2 + $0x290] sm:$0xff] %v5055_v34  ;;  %v5056_v27 = vadd.f32 %v4992_v12, %v4660_v37  ;;  %v4662_v55 = vadd.f32 %v4661_v54, %v13577_v7  ;;  %v4995_v14 = vmul.f32 %v10447_v44, %v4803_v52  ;;  %v4530_v40 = vpop.f32.mrf.mxu0  ;;  %v4808_v34 = vld [vmem:[#allocation2 + $0x2d8] sm:$0xff]  ;;  %v4811_v54 = vld [vmem:[#allocation2 + $0x2f0] sm:$0xff] }
 0x52d   : > { %v10451_v48 = vpop.eup %10450  ;;  %10476 = vtanh.f32 %v13620_v4  ;;  %v13744_v35 = vadd.f32 %v3968_v32, %v13477_v10  ;;  %5102 = vst [vmem:[#allocation2 + $0x208] sm:$0xff] %v5038_v30  ;;  %v5041_v39 = vadd.f32 %v13635_v42, %v4529_v5  ;;  %v4531_v19 = vadd.f32 %v4530_v40, %v13580_v50  ;;  %v4663_v49 = vpop.f32.mrf.mxu1  ;;  %v4797_v10 = vld [vmem:[#allocation2 + $0x280] sm:$0xff]  ;;  %v4798_v30 = vld [vmem:[#allocation2 + $0x288] sm:$0xff] }
 0x52e   : > { %v13748_v15 = vpop.eup %10452  ;;  %10478 = vtanh.f32 %v13623_v17  ;;  %5120 = vst.msk [vmem:[#allocation2 + $0x298] sm:$0xff] %vm2781_vm2, %v5056_v27  ;;  %v5059_v21 = vadd.f32 %v4995_v14, %v4662_v55  ;;  %v4664_v22 = vadd.f32 %v4663_v49, %v13590_v16  ;;  %v4996_v4 = vmul.f32 %v10451_v48, %v4804_v58  ;;  %v4534_v1 = vpop.f32.mrf.mxu0  ;;  %v4801_v40 = vld [vmem:[#allocation2 + $0x2a0] sm:$0xff] }
 0x52f   : > { %v10455_v32 = vpop.eup %10454  ;;  %10480 = vtanh.f32 %v13629_v45  ;;  %v13756_v42 = vadd.f32 %v13707_v28, %v13481_v24  ;;  %5105 = vst [vmem:[#allocation2 + $0x220] sm:$0xff] %v5041_v39  ;;  %v5042_v47 = vadd.f32 %v13646_v20, %v4531_v19  ;;  %v4535_v17 = vadd.f32 %v4534_v1, %v13571_v60  ;;  %v4667_v52 = vpop.f32.mrf.mxu1  ;;  %v4812_v19 = vld [vmem:[#allocation2 + $0x2f8] sm:$0xff] }
 0x530   : > { %v13760_v37 = vpop.eup %10456  ;;  %10482 = vtanh.f32 %v13632_v13  ;;  %5123 = vst [vmem:[#allocation2 + $0x2b0] sm:$0xff] %v5059_v21  ;;  %v5060_v12 = vadd.f32 %v4996_v4, %v4664_v22  ;;  %v4668_v61 = vadd.f32 %v4667_v52, %v13577_v7  ;;  %v4999_v45 = vmul.f32 %v10455_v32, %v4807_v31  ;;  %v4536_v44 = vpop.f32.mrf.mxu0  ;;  %v4802_v32 = vld [vmem:[#allocation2 + $0x2a8] sm:$0xff] }
 0x531   : > { %v10459_v24 = vpop.eup %10458  ;;  %10484 = vtanh.f32 %v13640_v8  ;;  %5106 = vst [vmem:[#allocation2 + $0x228] sm:$0xff] %v5042_v47  ;;  %v5045_v20 = vadd.f32 %v13654_v26, %v4535_v17  ;;  %v4537_v28 = vadd.f32 %v4536_v44, %v13580_v50  ;;  %v4669_v5 = vpop.f32.mrf.mxu1  ;;  %v4989_v58 = vmul.f32 %v13709_v41, %v4797_v10 }
 0x532   : > { %v13768_v13 = vpop.eup %10460  ;;  %10486 = vtanh.f32 %v13643_v3  ;;  %5124 = vst.msk [vmem:[#allocation2 + $0x2b8] sm:$0xff] %vm2781_vm2, %v5060_v12  ;;  %v5063_v27 = vadd.f32 %v4999_v45, %v4668_v61  ;;  %v4670_v55 = vadd.f32 %v4669_v5, %v13590_v16  ;;  %v5000_v14 = vmul.f32 %v10459_v24, %v4808_v34  ;;  %v4538_v8 = vpop.f32.mrf.mxu0  ;;  %v4805_v45 = vld [vmem:[#allocation2 + $0x2c0] sm:$0xff] }
 0x533   : > { %v10463_v48 = vpop.eup %10462  ;;  %10488 = vtanh.f32 %v13649_v57  ;;  %5109 = vst [vmem:[#allocation2 + $0x240] sm:$0xff] %v5045_v20  ;;  %v5046_v26 = vadd.f32 %v13659_v9, %v4537_v28  ;;  %v4539_v41 = vadd.f32 %v4538_v8, %v13571_v60  ;;  %v4671_v39 = vpop.f32.mrf.mxu1  ;;  %v4990_v3 = vmul.f32 %v13721_v53, %v4798_v30 }
 0x534   : > { %v13777_v49 = vpop.eup %10464  ;;  %10490 = vtanh.f32 %v13652_v29  ;;  %5127 = vst [vmem:[#allocation2 + $0x2d0] sm:$0xff] %v5063_v27  ;;  %v5064_v31 = vadd.f32 %v5000_v14, %v4670_v55  ;;  %v4672_v21 = vadd.f32 %v4671_v39, %v13577_v7  ;;  %v5003_v22 = vmul.f32 %v10463_v48, %v4811_v54  ;;  %v4540_v4 = vpop.f32.mrf.mxu0 }
 0x535   : > { %v10467_v57 = vpop.eup %10466  ;;  %10492 = vtanh.f32 %v13657_v11  ;;  %5110 = vst [vmem:[#allocation2 + $0x248] sm:$0xff] %v5046_v26  ;;  %v5049_v9 = vadd.f32 %v13664_v6, %v4539_v41  ;;  %v4541_v1 = vadd.f32 %v4540_v4, %v13580_v50  ;;  %v4673_v10 = vpop.f32.mrf.mxu1  ;;  %v4993_v53 = vmul.f32 %v13728_v0, %v4801_v40  ;;  %v4809_v4 = vld [vmem:[#allocation2 + $0x2e0] sm:$0xff] }
 0x536   : > { %v10469_v47 = vpop.eup %10468  ;;  %10494 = vtanh.f32 %v13662_v46  ;;  %5128 = vst.msk [vmem:[#allocation2 + $0x2d8] sm:$0xff] %vm2781_vm2, %v5064_v31  ;;  %v5067_v29 = vadd.f32 %v5003_v22, %v4672_v21  ;;  %v4674_v17 = vadd.f32 %v4673_v10, %v13590_v16  ;;  %v5004_v52 = vmul.f32 %v10467_v57, %v4812_v19  ;;  %v4544_v34 = vpop.f32.mrf.mxu0 }
 0x537   : > { %v10471_v11 = vpop.eup %10470  ;;  %v4909_v12 = vmul.f32 1.442695, %v10469_v47  ;;  %10496 = vtanh.f32 %v13667_v62  ;;  %5113 = vst [vmem:[#allocation2 + $0x260] sm:$0xff] %v5049_v9  ;;  %v5050_v6 = vadd.f32 %v13672_v56, %v4541_v1  ;;  %v4545_v0 = vadd.f32 %v4544_v34, %v13571_v60  ;;  %v13791_v61 = vpop.f32.mrf.mxu1 }
 0x538   : > { %v10473_v46 = vpop.eup %10472  ;;  %v4913_v44 = vmul.f32 1.442695, %v10471_v11  ;;  %10498 = vtanh.f32 %v13670_v33  ;;  %5131 = vst [vmem:[#allocation2 + $0x2f0] sm:$0xff] %v5067_v29  ;;  %v5068_v30 = vadd.f32 %v5004_v52, %v4674_v17  ;;  %v4546_v24 = vpop.f32.mrf.mxu0  ;;  %v13795_v20 = vmul.f32 %v13738_v63, %v4802_v32 }
 0x539   : > { %v10475_v28 = vpop.eup %10474  ;;  %10500 = vpow2.f32 %v4909_v12  ;;  %v4911_v62 = vmul.f32 1.442695, %v10473_v46  ;;  %v5229_v5 = vadd.f32 %v10473_v46, %v10469_v47  ;;  %5114 = vst [vmem:[#allocation2 + $0x268] sm:$0xff] %v5050_v6  ;;  %v5053_v56 = vadd.f32 %v4989_v58, %v4545_v0  ;;  %v13797_v54 = vpop.f32.mrf.mxu1  ;;  %v4806_v58 = vld [vmem:[#allocation2 + $0x2c8] sm:$0xff] }
 0x53a   : > { %v10477_v27 = vpop.eup %10476  ;;  %10502 = vpow2.f32 %v4913_v44  ;;  %v4915_v55 = vmul.f32 1.442695, %v10475_v28  ;;  %5132 = vst.msk [vmem:[#allocation2 + $0x2f8] sm:$0xff] %vm2781_vm2, %v5068_v30  ;;  %v4547_v33 = vadd.f32 %v4546_v24, %v13580_v50  ;;  %v4548_v14 = vpop.f32.mrf.mxu0  ;;  %v13802_v8 = vmul.f32 %v13748_v15, %v4805_v45 }
 0x53b   : > { %v10479_v63 = vpop.eup %10478  ;;  %10504 = vpow2.f32 %v4911_v62  ;;  %v4917_v40 = vmul.f32 1.442695, %v10477_v27  ;;  %v5230_v48 = vadd.f32 %v10471_v11, %v5229_v5  ;;  %v5231_v26 = vsel %vm2781_vm2, %v10475_v28, 0.0  ;;  %5117 = vst [vmem:[#allocation2 + $0x280] sm:$0xff] %v5053_v56  ;;  %v13806_v21 = vpop.f32.mrf.mxu1 }
 0x53c   : > { %v10481_v41 = vpop.eup %10480  ;;  %10506 = vpow2.f32 %v4915_v55  ;;  %v4921_v39 = vmul.f32 1.442695, %v10479_v63  ;;  %v5054_v19 = vadd.f32 %v4990_v3, %v4547_v33  ;;  %v4549_v31 = vadd.f32 %v4548_v14, %v13571_v60  ;;  %v4550_v22 = vpop.f32.mrf.mxu0 }
 0x53d   : > { %v10483_v15 = vpop.eup %10482  ;;  %10508 = vpow2.f32 %v4917_v40  ;;  %v4919_v57 = vmul.f32 1.442695, %v10481_v41  ;;  %v5232_v9 = vadd.f32 %v5231_v26, %v5230_v48  ;;  %v5235_v1 = vadd.f32 %v10481_v41, %v10477_v27 }
 0x53e   : > { %v10485_v10 = vpop.eup %10484  ;;  %10510 = vpow2.f32 %v4921_v39  ;;  %v4923_v32 = vmul.f32 1.442695, %v10483_v15  ;;  %5118 = vst [vmem:[#allocation2 + $0x288] sm:$0xff] %v5054_v19  ;;  %v5057_v47 = vadd.f32 %v4993_v53, %v4549_v31  ;;  %v4554_v29 = vpop.f32.mrf.mxu0  ;;  %v4998_v17 = vmul.f32 %v13760_v37, %v4806_v58  ;;  %v4815_v31 = vld [vmem:[#allocation2 + $0x310] sm:$0xff] }
 0x53f   : > { %v10487_v3 = vpop.eup %10486  ;;  %10512 = vpow2.f32 %v4919_v57  ;;  %v4925_v52 = vmul.f32 1.442695, %v10485_v10  ;;  %5233 = vadd.xlane.f32.xlu0 %v5232_v9  ;;  %v5236_v34 = vadd.f32 %v10479_v63, %v5235_v1  ;;  %v13810_v11 = vmul.f32 %v13768_v13, %v4809_v4  ;;  %v13814_v53 = vpop.f32.mrf.mxu1  ;;  %v4810_v9 = vld [vmem:[#allocation2 + $0x2e8] sm:$0xff] }
 0x540   : > { %v10489_v12 = vpop.eup %10488  ;;  %10514 = vpow2.f32 %v4923_v32  ;;  %v4929_v6 = vmul.f32 1.442695, %v10487_v3  ;;  %v5237_v0 = vsel %vm2781_vm2, %v10483_v15, 0.0  ;;  %5121 = vst [vmem:[#allocation2 + $0x2a0] sm:$0xff] %v5057_v47  ;;  %v4551_v45 = vadd.f32 %v4550_v22, %v13580_v50  ;;  %v4556_v46 = vpop.f32.mrf.mxu0  ;;  %v4816_v47 = vld [vmem:[#allocation2 + $0x318] sm:$0xff] }
 0x541   : > { %v10491_v37 = vpop.eup %10490  ;;  %10516 = vpow2.f32 %v4925_v52  ;;  %v4927_v44 = vmul.f32 1.442695, %v10489_v12  ;;  %v5238_v30 = vadd.f32 %v5237_v0, %v5236_v34  ;;  %v5241_v24 = vadd.f32 %v10489_v12, %v10485_v10  ;;  %v13821_v26 = vpop.f32.mrf.mxu1 }
 0x542   : > { %v10493_v28 = vpop.eup %10492  ;;  %10518 = vpow2.f32 %v4929_v6  ;;  %v4931_v13 = vmul.f32 1.442695, %v10491_v37  ;;  %v4678_v62 = vadd.f32 %v13791_v61, %v13577_v7  ;;  %v5058_v5 = vadd.f32 %v13795_v20, %v4551_v45  ;;  %v4558_v56 = vpop.f32.mrf.mxu0 }
 0x543   : > { %v10495_v27 = vpop.eup %10494  ;;  %10520 = vpow2.f32 %v4927_v44  ;;  %v4933_v55 = vmul.f32 1.442695, %v10493_v28  ;;  %5239 = vadd.xlane.f32.xlu1 %v5238_v30  ;;  %v5242_v33 = vadd.f32 %v10487_v3, %v5241_v24  ;;  %v4555_v14 = vadd.f32 %v4554_v29, %v13571_v60 }
 0x544   : > { %v10497_v63 = vpop.eup %10496  ;;  %10522 = vpow2.f32 %v4931_v13  ;;  %v4937_v40 = vmul.f32 1.442695, %v10495_v27  ;;  %v5243_v48 = vsel %vm2781_vm2, %v10491_v37, 0.0  ;;  %5122 = vst [vmem:[#allocation2 + $0x2a8] sm:$0xff] %v5058_v5  ;;  %v4557_v61 = vadd.f32 %v4556_v46, %v13580_v50  ;;  %v4560_v58 = vpop.f32.mrf.mxu0  ;;  %v4819_v46 = vld [vmem:[#allocation2 + $0x330] sm:$0xff]  ;;  %v4814_v13 = vld [vmem:[#allocation2 + $0x308] sm:$0xff] }
 0x545   : > { %v10499_v20 = vpop.eup %10498  ;;  %10524 = vpow2.f32 %v4933_v55  ;;  %v4935_v41 = vmul.f32 1.442695, %v10497_v63  ;;  %v5244_v39 = vadd.f32 %v5243_v48, %v5242_v33  ;;  %v5247_v19 = vadd.f32 %v10497_v63, %v10493_v28 }
 0x546   : > { %v10501_v22 = vpop.eup %10500  ;;  %10526 = vpow2.f32 %v4937_v40  ;;  %v4939_v4 = vmul.f32 1.442695, %v10499_v20  ;;  %v4680_v15 = vadd.f32 %v13797_v54, %v13590_v16  ;;  %v5061_v57 = vadd.f32 %v13802_v8, %v4555_v14  ;;  %v4564_v1 = vpop.f32.mrf.mxu0 }
 0x547   : > { %v10503_v10 = vpop.eup %10502  ;;  %10528 = vpow2.f32 %v4935_v41  ;;  %5245 = vadd.xlane.f32.xlu0 %v5244_v39  ;;  %v5248_v32 = vadd.f32 %v10495_v27, %v5247_v19  ;;  %v4682_v29 = vadd.f32 %v13806_v21, %v13577_v7  ;;  %v5062_v3 = vadd.f32 %v4998_v17, %v4557_v61  ;;  %v4689_v54 = vpop.f32.mrf.mxu1  ;;  %v4813_v17 = vld [vmem:[#allocation2 + $0x300] sm:$0xff]  ;;  %v4820_v27 = vld [vmem:[#allocation2 + $0x338] sm:$0xff]  ;;  %v4818_v19 = vld [vmem:[#allocation2 + $0x328] sm:$0xff] }
 0x548   : > { %v10505_v52 = vpop.eup %10504  ;;  %10530 = vpow2.f32 %v4939_v4  ;;  %v5249_v34 = vsel %vm2781_vm2, %v10499_v20, 0.0  ;;  %v5007_v12 = vmul.f32 %v10503_v10, %v4815_v31  ;;  %5125 = vst [vmem:[#allocation2 + $0x2c0] sm:$0xff] %v5061_v57  ;;  %v4559_v8 = vadd.f32 %v4558_v56, %v13571_v60  ;;  %v4566_v6 = vpop.f32.mrf.mxu0 }
 0x549   : > { %v10507_v0 = vpop.eup %10506  ;;  %10532 = vtanh.f32 %v13675_v59  ;;  %v5250_v45 = vadd.f32 %v5249_v34, %v5248_v32  ;;  %5126 = vst [vmem:[#allocation2 + $0x2c8] sm:$0xff] %v5062_v3  ;;  %v4561_v37 = vadd.f32 %v4560_v58, %v13580_v50  ;;  %v5002_v21 = vmul.f32 %v13777_v49, %v4810_v9  ;;  %v4817_v58 = vld [vmem:[#allocation2 + $0x320] sm:$0xff]  ;;  %v15246_v3 = vld [vmem:[#allocation14_spill] sm:$0xff] }
 0x54a   : > { %v10509_v44 = vpop.eup %10508  ;;  %10534 = vtanh.f32 %v13679_v38  ;;  %v5071_v30 = vadd.f32 %v5007_v12, %v4678_v62  ;;  %v5008_v24 = vmul.f32 %v10507_v0, %v4816_v47  ;;  %v5065_v28 = vadd.f32 %v13810_v11, %v4559_v8  ;;  %v4568_v5 = vpop.f32.mrf.mxu0  ;;  %v15245_v9 = vld [vmem:[#allocation13_spill] sm:$0xff] }
 0x54b   : > { %v10511_v56 = vpop.eup %10510  ;;  %10536 = vtanh.f32 %v13682_v2  ;;  %5251 = vadd.xlane.f32.xlu1 %v5250_v45  ;;  %v4684_v59 = vadd.f32 %v13814_v53, %v13590_v16  ;;  %v5066_v55 = vadd.f32 %v5002_v21, %v4561_v37  ;;  %v4565_v49 = vadd.f32 %v4564_v1, %v13571_v60  ;;  %v4691_v11 = vpop.f32.mrf.mxu1  ;;  %v4823_v53 = vld [vmem:[#allocation2 + $0x350] sm:$0xff]  ;;  %v4822_v37 = vld [vmem:[#allocation2 + $0x348] sm:$0xff] }
 0x54c   : > { %v10513_v33 = vpop.eup %10512  ;;  %10538 = vtanh.f32 %v13685_v51  ;;  %5135 = vst [vmem:[#allocation2 + $0x310] sm:$0xff] %v5071_v30  ;;  %v5072_v38 = vadd.f32 %v5008_v24, %v4680_v15  ;;  %v5011_v62 = vmul.f32 %v10511_v56, %v4819_v46  ;;  %5129 = vst [vmem:[#allocation2 + $0x2e0] sm:$0xff] %v5065_v28  ;;  %v5005_v14 = vmul.f32 %v10501_v22, %v4813_v17  ;;  %v4570_v63 = vpop.f32.mrf.mxu0  ;;  %v4824_v22 = vld [vmem:[#allocation2 + $0x358] sm:$0xff]  ;;  %v15249_v56 = vld [vmem:[#allocation17_spill] sm:$0xff] }
 0x54d   : > { %v10515_v40 = vpop.eup %10514  ;;  %10540 = vtanh.f32 %v13688_v36  ;;  %v4688_v2 = vadd.f32 %v13821_v26, %v13577_v7  ;;  %5130 = vst [vmem:[#allocation2 + $0x2e8] sm:$0xff] %v5066_v55  ;;  %v4567_v48 = vadd.f32 %v4566_v6, %v13580_v50  ;;  %v5006_v61 = vmul.f32 %v10505_v52, %v4814_v13  ;;  %v4693_v10 = vpop.f32.mrf.mxu1  ;;  %v4827_v52 = vld [vmem:[#allocation2 + $0x370] sm:$0xff]  ;;  %v4828_v24 = vld [vmem:[#allocation2 + $0x378] sm:$0xff] }
 0x54e   : > { %v10517_v51 = vpop.eup %10516  ;;  %10542 = vtanh.f32 %v13692_v43  ;;  %5136 = vst.msk [vmem:[#allocation2 + $0x318] sm:$0xff] %vm2781_vm2, %v5072_v38  ;;  %v5075_v20 = vadd.f32 %v5011_v62, %v4682_v29  ;;  %v5012_v41 = vmul.f32 %v10515_v40, %v4820_v27  ;;  %v5069_v39 = vadd.f32 %v5005_v14, %v4565_v49  ;;  %v4574_v31 = vpop.f32.mrf.mxu0  ;;  %v15247_v6 = vld [vmem:[#allocation15_spill] sm:$0xff] }
 0x54f   : > { %v10519_v36 = vpop.eup %10518  ;;  %10544 = vtanh.f32 %v13695_v23  ;;  %v4690_v26 = vadd.f32 %v4689_v54, %v13590_v16  ;;  %v5070_v4 = vadd.f32 %v5006_v61, %v4567_v48  ;;  %v4569_v15 = vadd.f32 %v4568_v5, %v13571_v60  ;;  %v4821_v54 = vld [vmem:[#allocation2 + $0x340] sm:$0xff]  ;;  %v13862_v55 = vpop.f32.mrf.mxu1  ;;  %v4783_v38 = vld [vmem:[#allocation2 + $0x210] sm:$0xff] }
 0x550   : > { %v10521_v57 = vpop.eup %10520  ;;  %10546 = vtanh.f32 %v15245_v9  ;;  %5139 = vst [vmem:[#allocation2 + $0x330] sm:$0xff] %v5075_v20  ;;  %v5076_v43 = vadd.f32 %v5012_v41, %v4684_v59  ;;  %v5015_v1 = vmul.f32 %v10519_v36, %v4823_v53  ;;  %5133 = vst [vmem:[#allocation2 + $0x300] sm:$0xff] %v5069_v39  ;;  %v5009_v32 = vmul.f32 %v10509_v44, %v4817_v58  ;;  %v4576_v47 = vpop.f32.mrf.mxu0  ;;  %v15248_v44 = vld [vmem:[#allocation16_spill] sm:$0xff]  ;;  %v4825_v48 = vld [vmem:[#allocation2 + $0x360] sm:$0xff] }
 0x551   : > { %v10523_v29 = vpop.eup %10522  ;;  %10548 = vtanh.f32 %v15246_v3  ;;  %v4692_v23 = vadd.f32 %v4691_v11, %v13577_v7  ;;  %5134 = vst [vmem:[#allocation2 + $0x308] sm:$0xff] %v5070_v4  ;;  %v4571_v34 = vadd.f32 %v4570_v63, %v13580_v50  ;;  %v5010_v12 = vmul.f32 %v10513_v33, %v4818_v19  ;;  %v15250_v20 = vld [vmem:[#allocation5_spill] sm:$0xff]  ;;  %v4784_v39 = vld [vmem:[#allocation2 + $0x218] sm:$0xff]  ;;  %v13875_v36 = vpop.f32.mrf.mxu1  ;;  %v4826_v9 = vld [vmem:[#allocation2 + $0x368] sm:$0xff] }
 0x552   : > { %v10525_v8 = vpop.eup %10524  ;;  %10550 = vtanh.f32 %v15247_v6  ;;  %5140 = vst.msk [vmem:[#allocation2 + $0x338] sm:$0xff] %vm2781_vm2, %v5076_v43  ;;  %v5079_v0 = vadd.f32 %v5015_v1, %v4688_v2  ;;  %v5016_v45 = vmul.f32 %v10523_v29, %v4824_v22  ;;  %v5073_v46 = vadd.f32 %v5009_v32, %v4569_v15  ;;  %v4578_v21 = vpop.f32.mrf.mxu0  ;;  %v15251_v32 = vld [vmem:[#allocation6_spill] sm:$0xff] }
 0x553   : > { %v10527_v17 = vpop.eup %10526  ;;  %10552 = vtanh.f32 %v15248_v44  ;;  %v4694_v30 = vadd.f32 %v4693_v10, %v13590_v16  ;;  %v5074_v28 = vadd.f32 %v5010_v12, %v4571_v34  ;;  %v4575_v13 = vadd.f32 %v4574_v31, %v13571_v60  ;;  %v4787_v34 = vld [vmem:[#allocation2 + $0x230] sm:$0xff] }
 0x554   : > { %v13859_v5 = vpop.eup %10528  ;;  %10554 = vtanh.f32 %v15249_v56  ;;  %5143 = vst [vmem:[#allocation2 + $0x350] sm:$0xff] %v5079_v0  ;;  %v5080_v59 = vadd.f32 %v5016_v45, %v4690_v26  ;;  %v5019_v27 = vmul.f32 %v10527_v17, %v4827_v52  ;;  %5137 = vst [vmem:[#allocation2 + $0x320] sm:$0xff] %v5073_v46  ;;  %v5013_v49 = vmul.f32 %v10517_v51, %v4821_v54  ;;  %v4580_v33 = vpop.f32.mrf.mxu0  ;;  %v4788_v46 = vld [vmem:[#allocation2 + $0x238] sm:$0xff] }
 0x555   : > { %v10531_v62 = vpop.eup %10530  ;;  %10556 = vtanh.f32 %v13718_v18  ;;  %5138 = vst [vmem:[#allocation2 + $0x328] sm:$0xff] %v5074_v28  ;;  %v4577_v11 = vadd.f32 %v4576_v47, %v13580_v50  ;;  %v5014_v14 = vmul.f32 %v10521_v57, %v4822_v37  ;;  %v13872_v41 = vmul.f32 %v15250_v20, %v4783_v38  ;;  %v15253_v38 = vld [vmem:[#allocation8_spill] sm:$0xff] }
 0x556   : > { %v10533_v63 = vpop.eup %10532  ;;  %10558 = vtanh.f32 %v13734_v25  ;;  %5144 = vst.msk [vmem:[#allocation2 + $0x358] sm:$0xff] %vm2781_vm2, %v5080_v59  ;;  %v5083_v40 = vadd.f32 %v5019_v27, %v4692_v23  ;;  %v5020_v2 = vmul.f32 %v10531_v62, %v4828_v24  ;;  %v5077_v53 = vadd.f32 %v5013_v49, %v4575_v13  ;;  %v13868_v61 = vpop.f32.mrf.mxu0  ;;  %v15252_v59 = vld [vmem:[#allocation7_spill] sm:$0xff] }
 0x557   : > { %v10535_v58 = vpop.eup %10534  ;;  %v4941_v51 = vmul.f32 1.442695, %v10533_v63  ;;  %10560 = vtanh.f32 %v13744_v35  ;;  %v5078_v18 = vadd.f32 %v5014_v14, %v4577_v11  ;;  %v4579_v26 = vadd.f32 %v4578_v21, %v13571_v60  ;;  %v4792_v11 = vld [vmem:[#allocation2 + $0x258] sm:$0xff]  ;;  %v4795_v14 = vld [vmem:[#allocation2 + $0x270] sm:$0xff] }
 0x558   : > { %v10537_v19 = vpop.eup %10536  ;;  %v4945_v31 = vmul.f32 1.442695, %v10535_v58  ;;  %10562 = vtanh.f32 %v13756_v42  ;;  %5147 = vst [vmem:[#allocation2 + $0x370] sm:$0xff] %v5083_v40  ;;  %v5084_v25 = vadd.f32 %v5020_v2, %v4694_v30  ;;  %5141 = vst [vmem:[#allocation2 + $0x340] sm:$0xff] %v5077_v53  ;;  %v13878_v22 = vpop.f32.mrf.mxu0  ;;  %v5017_v57 = vmul.f32 %v10525_v8, %v4825_v48  ;;  %v4791_v30 = vld [vmem:[#allocation2 + $0x250] sm:$0xff] }
 0x559   : > { %v10539_v4 = vpop.eup %10538  ;;  %10564 = vpow2.f32 %v4941_v51  ;;  %v4943_v35 = vmul.f32 1.442695, %v10537_v19  ;;  %v5253_v15 = vadd.f32 %v10537_v19, %v10533_v63  ;;  %5142 = vst [vmem:[#allocation2 + $0x348] sm:$0xff] %v5078_v18  ;;  %v13885_v47 = vmul.f32 %v15251_v32, %v4784_v39  ;;  %v13887_v8 = vpop.f32.mrf.mxu1 }
 0x55a   : > { %v10541_v43 = vpop.eup %10540  ;;  %10566 = vpow2.f32 %v4945_v31  ;;  %v4947_v1 = vmul.f32 1.442695, %v10539_v4  ;;  %v5255_v42 = vsel %vm2781_vm2, %v10539_v4, 0.0  ;;  %5148 = vst.msk [vmem:[#allocation2 + $0x378] sm:$0xff] %vm2781_vm2, %v5084_v25  ;;  %v13882_v10 = vpop.f32.mrf.mxu0  ;;  %v5081_v52 = vadd.f32 %v5017_v57, %v4579_v26  ;;  %v15255_v4 = vld [vmem:[#allocation10_spill] sm:$0xff] }
 0x55b   : > { %v10543_v29 = vpop.eup %10542  ;;  %10568 = vpow2.f32 %v4943_v35  ;;  %v4949_v3 = vmul.f32 1.442695, %v10541_v43  ;;  %v5254_v23 = vadd.f32 %v10535_v58, %v5253_v15  ;;  %v4581_v6 = vadd.f32 %v4580_v33, %v13580_v50  ;;  %v13902_v53 = vpop.f32.mrf.mxu1  ;;  %v15254_v58 = vld [vmem:[#allocation9_spill] sm:$0xff]  ;;  %v15256_v15 = vld [vmem:[#allocation11_spill] sm:$0xff] }
 0x55c   : > { %v10545_v12 = vpop.eup %10544  ;;  %10570 = vpow2.f32 %v4947_v1  ;;  %v4953_v54 = vmul.f32 1.442695, %v10543_v29  ;;  %v5018_v0 = vmul.f32 %v13859_v5, %v4826_v9  ;;  %v13891_v45 = vpop.f32.mrf.mxu0  ;;  %5145 = vst [vmem:[#allocation2 + $0x360] sm:$0xff] %v5081_v52  ;;  %v13896_v27 = vmul.f32 %v15252_v59, %v4787_v34  ;;  %v4829_v34 = vld [vmem:[#allocation2 + $0x380] sm:$0xff] }
 0x55d   : > { %v10547_v37 = vpop.eup %10546  ;;  %10572 = vpow2.f32 %v4949_v3  ;;  %v4951_v21 = vmul.f32 1.442695, %v10545_v12  ;;  %v5256_v17 = vadd.f32 %v5255_v42, %v5254_v23  ;;  %v5259_v44 = vadd.f32 %v10545_v12, %v10541_v43  ;;  %v13920_v23 = vpop.f32.mrf.mxu1 }
 0x55e   : > { %v10549_v24 = vpop.eup %10548  ;;  %10574 = vpow2.f32 %v4953_v54  ;;  %v4955_v28 = vmul.f32 1.442695, %v10547_v37  ;;  %v5082_v13 = vadd.f32 %v5018_v0, %v4581_v6  ;;  %v13893_v56 = vpop.f32.mrf.mxu0  ;;  %v13899_v62 = vmul.f32 %v15253_v38, %v4788_v46 }
 0x55f   : > { %v10551_v5 = vpop.eup %10550  ;;  %10576 = vpow2.f32 %v4951_v21  ;;  %v4957_v49 = vmul.f32 1.442695, %v10549_v24  ;;  %5257 = vadd.xlane.f32.xlu0 %v5256_v17  ;;  %v5260_v33 = vadd.f32 %v10543_v29, %v5259_v44  ;;  %v5261_v2 = vsel %vm2781_vm2, %v10547_v37, 0.0  ;;  %v4831_v37 = vld [vmem:[#allocation2 + $0x390] sm:$0xff] }
 0x560   : > { %v10553_v63 = vpop.eup %10552  ;;  %10578 = vpow2.f32 %v4955_v28  ;;  %v4961_v40 = vmul.f32 1.442695, %v10551_v5  ;;  %5146 = vst [vmem:[#allocation2 + $0x368] sm:$0xff] %v5082_v13  ;;  %v13904_v48 = vpop.f32.mrf.mxu0  ;;  %v13907_v51 = vmul.f32 %v15254_v58, %v4791_v30  ;;  %v13912_v35 = vmul.f32 %v15255_v4, %v4792_v11  ;;  %v4830_v30 = vld [vmem:[#allocation2 + $0x388] sm:$0xff]  ;;  %v4832_v28 = vld [vmem:[#allocation2 + $0x398] sm:$0xff]  ;;  %v4833_v11 = vld [vmem:[#allocation2 + $0x3a0] sm:$0xff] }
 0x561   : > { %v10555_v18 = vpop.eup %10554  ;;  %10580 = vpow2.f32 %v4957_v49  ;;  %v4959_v20 = vmul.f32 1.442695, %v10553_v63  ;;  %v5262_v39 = vadd.f32 %v5261_v2, %v5260_v33  ;;  %v5265_v19 = vadd.f32 %v10553_v63, %v10549_v24 }
 0x562   : > { %v10557_v31 = vpop.eup %10556  ;;  %10582 = vpow2.f32 %v4961_v40  ;;  %v4963_v25 = vmul.f32 1.442695, %v10555_v18  ;;  %v13909_v26 = vpop.f32.mrf.mxu0  ;;  %v13915_v57 = vmul.f32 %v15256_v15, %v4795_v14  ;;  %v4698_v42 = vadd.f32 %v13862_v55, %v13577_v7  ;;  %v4835_v40 = vld [vmem:[#allocation2 + $0x3b0] sm:$0xff] }
 0x563   : > { %v10559_v9 = vpop.eup %10558  ;;  %10584 = vpow2.f32 %v4959_v20  ;;  %v4965_v43 = vmul.f32 1.442695, %v10557_v31  ;;  %5263 = vadd.xlane.f32.xlu1 %v5262_v39  ;;  %v5266_v1 = vadd.f32 %v10551_v5, %v5265_v19  ;;  %v5267_v3 = vsel %vm2781_vm2, %v10555_v18, 0.0 }
 0x564   : > { %v10561_v32 = vpop.eup %10560  ;;  %10586 = vpow2.f32 %v4963_v25  ;;  %v4969_v29 = vmul.f32 1.442695, %v10559_v9  ;;  %v4585_v52 = vadd.f32 %v13868_v61, %v13571_v60  ;;  %v13924_v12 = vpop.f32.mrf.mxu0  ;;  %v4700_v17 = vadd.f32 %v13875_v36, %v13590_v16 }
 0x565   : > { %v10563_v54 = vpop.eup %10562  ;;  %10588 = vpow2.f32 %v4965_v43  ;;  %v4967_v6 = vmul.f32 1.442695, %v10561_v32  ;;  %v5268_v0 = vadd.f32 %v5267_v3, %v5266_v1  ;;  %v5271_v46 = vadd.f32 %v10561_v32, %v10557_v31  ;;  %v4709_v36 = vpop.f32.mrf.mxu1  ;;  %v4834_v31 = vld [vmem:[#allocation2 + $0x3a8] sm:$0xff]  ;;  %v4836_v43 = vld [vmem:[#allocation2 + $0x3b8] sm:$0xff] }
 0x566   : > { %v10565_v55 = vpop.eup %10564  ;;  %10590 = vpow2.f32 %v4969_v29  ;;  %v4971_v21 = vmul.f32 1.442695, %v10563_v54  ;;  %v4702_v44 = vadd.f32 %v13887_v8, %v13577_v7  ;;  %v4587_v59 = vadd.f32 %v13878_v22, %v13580_v50 }
 0x567   : > { %v10567_v61 = vpop.eup %10566  ;;  %10592 = vpow2.f32 %v4967_v6  ;;  %5269 = vadd.xlane.f32.xlu0 %v5268_v0  ;;  %v5272_v24 = vadd.f32 %v10559_v9, %v5271_v46  ;;  %v5021_v13 = vmul.f32 %v10565_v55, %v4829_v34  ;;  %v4637_v5 = vpop.f32.mrf.mxu0  ;;  %v5273_v33 = vsel %vm2781_vm2, %v10563_v54, 0.0  ;;  %v4837_v34 = vld [vmem:[#allocation2 + $0x3c0] sm:$0xff]  ;;  %v4839_v46 = vld [vmem:[#allocation2 + $0x3d0] sm:$0xff] }
 0x568   : > { %v10569_v49 = vpop.eup %10568  ;;  %10594 = vpow2.f32 %v4971_v21  ;;  %v5023_v38 = vmul.f32 %v10567_v61, %v4831_v37  ;;  %v4638_v8 = vadd.f32 %v4637_v5, %v13577_v7  ;;  %v4589_v18 = vadd.f32 %v13882_v10, %v13571_v60 }
 0x569   : > { %v10571_v14 = vpop.eup %10570  ;;  %v5274_v63 = vadd.f32 %v5273_v33, %v5272_v24  ;;  %v5085_v2 = vadd.f32 %v5021_v13, %v4585_v52  ;;  %v5022_v58 = vmul.f32 %v10569_v49, %v4830_v30  ;;  %v4639_v20 = vpop.f32.mrf.mxu0  ;;  %v4704_v9 = vadd.f32 %v13902_v53, %v13590_v16 }
 0x56a   : > { %v10573_v22 = vpop.eup %10572  ;;  %v5087_v39 = vadd.f32 %v5023_v38, %v4698_v42  ;;  %v5024_v19 = vmul.f32 %v10571_v14, %v4832_v28  ;;  %v5039_v25 = vadd.f32 %v13872_v41, %v4638_v8  ;;  %v4640_v4 = vadd.f32 %v4639_v20, %v13590_v16  ;;  %v4711_v41 = vpop.f32.mrf.mxu1  ;;  %v4841_v14 = vld [vmem:[#allocation2 + $0x3e0] sm:$0xff] }
 0x56b   : > { %v10575_v15 = vpop.eup %10574  ;;  %5275 = vadd.xlane.f32.xlu1 %v5274_v63  ;;  %5149 = vst [vmem:[#allocation2 + $0x380] sm:$0xff] %v5085_v2  ;;  %v5086_v1 = vadd.f32 %v5022_v58, %v4587_v59  ;;  %v5025_v32 = vmul.f32 %v10573_v22, %v4833_v11  ;;  %v4591_v10 = vadd.f32 %v13891_v45, %v13580_v50  ;;  %v4641_v29 = vpop.f32.mrf.mxu0  ;;  %v4840_v59 = vld [vmem:[#allocation2 + $0x3d8] sm:$0xff]  ;;  %v4843_v2 = vld [vmem:[#allocation2 + $0x3f0] sm:$0xff] }
 0x56c   : > { %v10577_v42 = vpop.eup %10576  ;;  %5151 = vst [vmem:[#allocation2 + $0x390] sm:$0xff] %v5087_v39  ;;  %v5088_v3 = vadd.f32 %v5024_v19, %v4700_v17  ;;  %v5027_v52 = vmul.f32 %v10575_v15, %v4835_v40  ;;  %5103 = vst [vmem:[#allocation2 + $0x210] sm:$0xff] %v5039_v25  ;;  %v5040_v54 = vadd.f32 %v13885_v47, %v4640_v4  ;;  %v4838_v47 = vld [vmem:[#allocation2 + $0x3c8] sm:$0xff]  ;;  %v4713_v8 = vpop.f32.mrf.mxu1  ;;  %v4796_v4 = vld [vmem:[#allocation2 + $0x278] sm:$0xff] }
 0x56d   : > { %v4642_v6 = vadd.f32 %v4641_v29, %v13577_v7  ;;  %v10579_v53 = vpop.eup %10578  ;;  %v4708_v0 = vadd.f32 %v13920_v23, %v13577_v7  ;;  %5150 = vst [vmem:[#allocation2 + $0x388] sm:$0xff] %v5086_v1  ;;  %v5089_v37 = vadd.f32 %v5025_v32, %v4589_v18  ;;  %v5026_v45 = vmul.f32 %v10577_v42, %v4834_v31  ;;  %v4643_v21 = vpop.f32.mrf.mxu0  ;;  %v4842_v31 = vld [vmem:[#allocation2 + $0x3e8] sm:$0xff] }
 0x56e   : > { %v4595_v55 = vadd.f32 %v13893_v56, %v13571_v60  ;;  %v10581_v17 = vpop.eup %10580  ;;  %5152 = vst.msk [vmem:[#allocation2 + $0x398] sm:$0xff] %vm2781_vm2, %v5088_v3  ;;  %v5091_v30 = vadd.f32 %v5027_v52, %v4702_v44  ;;  %v5028_v61 = vmul.f32 %v10579_v53, %v4836_v43  ;;  %5104 = vst.msk [vmem:[#allocation2 + $0x218] sm:$0xff] %vm2781_vm2, %v5040_v54  ;;  %v4844_v43 = vld [vmem:[#allocation2 + $0x3f8] sm:$0xff] }
 0x56f   : > { %v5043_v24 = vadd.f32 %v13896_v27, %v4642_v6  ;;  %v4644_v23 = vadd.f32 %v4643_v21, %v13590_v16  ;;  %v10583_v28 = vpop.eup %10582  ;;  %v4710_v13 = vadd.f32 %v4709_v36, %v13590_v16  ;;  %5153 = vst [vmem:[#allocation2 + $0x3a0] sm:$0xff] %v5089_v37  ;;  %v5090_v5 = vadd.f32 %v5026_v45, %v4591_v10  ;;  %v4647_v33 = vpop.f32.mrf.mxu0  ;;  %v15257_v6 = vld [vmem:[#allocation12_spill] sm:$0xff]  ;;  %v5165_v45 = vld [vmem:[#allocation3] sm:$0xff] }
 0x570   : > { %v5029_v56 = vmul.f32 %v10581_v17, %v4837_v34  ;;  %v4597_v49 = vadd.f32 %v13904_v48, %v13580_v50  ;;  %v10585_v44 = vpop.eup %10584  ;;  %5155 = vst [vmem:[#allocation2 + $0x3b0] sm:$0xff] %v5091_v30  ;;  %v5092_v38 = vadd.f32 %v5028_v61, %v4704_v9  ;;  %v5031_v11 = vmul.f32 %v10583_v28, %v4839_v46  ;;  %v5166_v17 = vld [vmem:[#allocation3 + $0x8] sm:$0xff]  ;;  %v5167_v30 = vld [vmem:[#allocation3 + $0x10] sm:$0xff] }
 0x571   : > { %5107 = vst [vmem:[#allocation2 + $0x230] sm:$0xff] %v5043_v24  ;;  %v5044_v27 = vadd.f32 %v13899_v62, %v4644_v23  ;;  %v4648_v63 = vadd.f32 %v4647_v33, %v13577_v7  ;;  %v10587_v36 = vpop.eup %10586  ;;  %v4712_v40 = vadd.f32 %v4711_v41, %v13577_v7  ;;  %5154 = vst [vmem:[#allocation2 + $0x3a8] sm:$0xff] %v5090_v5  ;;  %v4649_v20 = vpop.f32.mrf.mxu0  ;;  %v5168_v24 = vld [vmem:[#allocation3 + $0x18] sm:$0xff] }
 0x572   : > { %v5093_v58 = vadd.f32 %v5029_v56, %v4595_v55  ;;  %v5030_v18 = vmul.f32 %v10585_v44, %v4838_v47  ;;  %v4599_v48 = vadd.f32 %v13909_v26, %v13571_v60  ;;  %v10589_v22 = vpop.eup %10588  ;;  %5156 = vst.msk [vmem:[#allocation2 + $0x3b8] sm:$0xff] %vm2781_vm2, %v5092_v38  ;;  %v5095_v39 = vadd.f32 %v5031_v11, %v4708_v0  ;;  %v5170_v56 = vld [vmem:[#allocation3 + $0x28] sm:$0xff]  ;;  %v5171_v44 = vld [vmem:[#allocation3 + $0x30] sm:$0xff] }
 0x573   : > { %v5032_v19 = vmul.f32 %v10587_v36, %v4840_v59  ;;  %5108 = vst.msk [vmem:[#allocation2 + $0x238] sm:$0xff] %vm2781_vm2, %v5044_v27  ;;  %v5047_v62 = vadd.f32 %v13907_v51, %v4648_v63  ;;  %v4650_v25 = vadd.f32 %v4649_v20, %v13590_v16  ;;  %v10591_v15 = vpop.eup %10590  ;;  %v4714_v9 = vadd.f32 %v4713_v8, %v13590_v16  ;;  %v4651_v32 = vpop.f32.mrf.mxu0  ;;  %v5172_v8 = vld [vmem:[#allocation3 + $0x38] sm:$0xff]  ;;  %v5173_v63 = vld [vmem:[#allocation3 + $0x40] sm:$0xff] }
 0x574   : > { %5157 = vst [vmem:[#allocation2 + $0x3c0] sm:$0xff] %v5093_v58  ;;  %v5094_v60 = vadd.f32 %v5030_v18, %v4597_v49  ;;  %v5033_v26 = vmul.f32 %v10589_v22, %v4841_v14  ;;  %v4601_v1 = vadd.f32 %v13924_v12, %v13580_v50  ;;  %v10593_v10 = vpop.eup %10592  ;;  %5159 = vst [vmem:[#allocation2 + $0x3d0] sm:$0xff] %v5095_v39  ;;  %v5176_v39 = vld [vmem:[#allocation3 + $0x58] sm:$0xff] }
 0x575   : > { %v5096_v29 = vadd.f32 %v5032_v19, %v4710_v13  ;;  %v5035_v42 = vmul.f32 %v10591_v15, %v4843_v2  ;;  %5111 = vst [vmem:[#allocation2 + $0x250] sm:$0xff] %v5047_v62  ;;  %v5048_v51 = vadd.f32 %v13912_v35, %v4650_v25  ;;  %v4652_v3 = vadd.f32 %v4651_v32, %v13577_v7  ;;  %v10595_v52 = vpop.eup %10594  ;;  %v4653_v54 = vpop.f32.mrf.mxu0  ;;  %v5169_v13 = vld [vmem:[#allocation3 + $0x20] sm:$0xff]  ;;  %v5174_v2 = vld [vmem:[#allocation3 + $0x48] sm:$0xff]  ;;  %v5180_v32 = vld [vmem:[#allocation3 + $0x78] sm:$0xff] }
 0x576   : > { %5158 = vst [vmem:[#allocation2 + $0x3c8] sm:$0xff] %v5094_v60  ;;  %v5097_v41 = vadd.f32 %v5033_v26, %v4599_v48  ;;  %v5034_v34 = vmul.f32 %v10593_v10, %v4842_v31  ;;  %v4988_v53 = vmul.f32 %v15257_v6, %v4796_v4  ;;  %v5036_v12 = vmul.f32 %v10595_v52, %v4844_v43  ;;  %v5175_v48 = vld [vmem:[#allocation3 + $0x50] sm:$0xff]  ;;  %v5177_v62 = vld [vmem:[#allocation3 + $0x60] sm:$0xff]  ;;  %v5178_v15 = vld [vmem:[#allocation3 + $0x68] sm:$0xff] }
 0x577   : > { %5160 = vst.msk [vmem:[#allocation2 + $0x3d8] sm:$0xff] %vm2781_vm2, %v5096_v29  ;;  %v5099_v50 = vadd.f32 %v5035_v42, %v4712_v40  ;;  %5112 = vst.msk [vmem:[#allocation2 + $0x258] sm:$0xff] %vm2781_vm2, %v5048_v51  ;;  %v5051_v0 = vadd.f32 %v13915_v57, %v4652_v3  ;;  %v4654_v46 = vadd.f32 %v4653_v54, %v13590_v16  ;;  %v5179_v60 = vld [vmem:[#allocation3 + $0x70] sm:$0xff] }
 0x578   : > { %5161 = vst [vmem:[#allocation2 + $0x3e0] sm:$0xff] %v5097_v41  ;;  %v5098_v35 = vadd.f32 %v5034_v34, %v4601_v1  ;;  %v5100_v7 = vadd.f32 %v5036_v12, %v4714_v9 }
 0x579   : > { %5163 = vst [vmem:[#allocation2 + $0x3f0] sm:$0xff] %v5099_v50  ;;  %5115 = vst [vmem:[#allocation2 + $0x270] sm:$0xff] %v5051_v0  ;;  %v5052_v37 = vadd.f32 %v4988_v53, %v4654_v46 }
 0x57a   : > { %5162 = vst [vmem:[#allocation2 + $0x3e8] sm:$0xff] %v5098_v35  ;;  %5164 = vst.msk [vmem:[#allocation2 + $0x3f8] sm:$0xff] %vm2781_vm2, %v5100_v7 }
 0x57b   : > { %5116 = vst.msk [vmem:[#allocation2 + $0x278] sm:$0xff] %vm2781_vm2, %v5052_v37 }
 0x588   : > { %v5186_v55 = vpop.xlane.xlu0 %5185 }
 0x589   : > { %v5277_v21 = vadd.f32 %v5186_v55, %v5165_v45 }
 0x58b   : > { %5294 = vst.msk [vmem:[#allocation3] sm:$0xff] %vm5293_vm4, %v5277_v21 }
 0x58c   : > { %v5192_v57 = vpop.xlane.xlu0 %5191 }
 0x58d   : > { %v5278_v16 = vadd.f32 %v5192_v57, %v5166_v17 }
 0x58f   : > { %5295 = vst.msk [vmem:[#allocation3 + $0x8] sm:$0xff] %vm5293_vm4, %v5278_v16 }
 0x590   : > { %v5198_v61 = vpop.xlane.xlu1 %5197 }
 0x591   : > { %v5279_v47 = vadd.f32 %v5198_v61, %v5167_v30 }
 0x593   : > { %5296 = vst.msk [vmem:[#allocation3 + $0x10] sm:$0xff] %vm5293_vm4, %v5279_v47 }
 0x594   : > { %v5204_v23 = vpop.xlane.xlu1 %5203 }
 0x595   : > { %v5280_v28 = vadd.f32 %v5204_v23, %v5168_v24 }
 0x597   : > { %5297 = vst.msk [vmem:[#allocation3 + $0x18] sm:$0xff] %vm5293_vm4, %v5280_v28 }
 0x5a8   : > { %v5210_v59 = vpop.xlane.xlu0 %5209 }
 0x5a9   : > { %v5281_v5 = vadd.f32 %v5210_v59, %v5169_v13 }
 0x5ab   : > { %5298 = vst.msk [vmem:[#allocation3 + $0x20] sm:$0xff] %vm5293_vm4, %v5281_v5 }
 0x5ac   : > { %v5216_v49 = vpop.xlane.xlu1 %5215 }
 0x5ad   : > { %v5282_v33 = vadd.f32 %v5216_v49, %v5170_v56 }
 0x5af   : > { %5299 = vst.msk [vmem:[#allocation3 + $0x28] sm:$0xff] %vm5293_vm4, %v5282_v33 }
 0x5b0   : > { %v5222_v38 = vpop.xlane.xlu0 %5221 }
 0x5b1   : > { %v5283_v11 = vadd.f32 %v5222_v38, %v5171_v44 }
 0x5b3   : > { %5300 = vst.msk [vmem:[#allocation3 + $0x30] sm:$0xff] %vm5293_vm4, %v5283_v11 }
 0x5b4   : > { %v5228_v14 = vpop.xlane.xlu1 %5227 }
 0x5b5   : > { %v5284_v27 = vadd.f32 %v5228_v14, %v5172_v8 }
 0x5b7   : > { %5301 = vst.msk [vmem:[#allocation3 + $0x38] sm:$0xff] %vm5293_vm4, %v5284_v27 }
 0x5c8   : > { %v5234_v36 = vpop.xlane.xlu0 %5233 }
 0x5c9   : > { %v5285_v40 = vadd.f32 %v5234_v36, %v5173_v63 }
 0x5cb   : > { %5302 = vst.msk [vmem:[#allocation3 + $0x40] sm:$0xff] %vm5293_vm4, %v5285_v40 }
 0x5cc   : > { %v5240_v58 = vpop.xlane.xlu1 %5239 }
 0x5cd   : > { %v5286_v18 = vadd.f32 %v5240_v58, %v5174_v2 }
 0x5cf   : > { %5303 = vst.msk [vmem:[#allocation3 + $0x48] sm:$0xff] %vm5293_vm4, %v5286_v18 }
 0x5d0   : > { %v5246_v20 = vpop.xlane.xlu0 %5245 }
 0x5d1   : > { %v5287_v22 = vadd.f32 %v5246_v20, %v5175_v48 }
 0x5d3   : > { %5304 = vst.msk [vmem:[#allocation3 + $0x50] sm:$0xff] %vm5293_vm4, %v5287_v22 }
 0x5d4   : > { %v5252_v19 = vpop.xlane.xlu1 %5251 }
 0x5d5   : > { %v5288_v31 = vadd.f32 %v5252_v19, %v5176_v39 }
 0x5d7   : > { %5305 = vst.msk [vmem:[#allocation3 + $0x58] sm:$0xff] %vm5293_vm4, %v5288_v31 }
 0x5e8   : > { %v5258_v25 = vpop.xlane.xlu0 %5257 }
 0x5e9   : > { %v5289_v4 = vadd.f32 %v5258_v25, %v5177_v62 }
 0x5eb   : > { %5306 = vst.msk [vmem:[#allocation3 + $0x60] sm:$0xff] %vm5293_vm4, %v5289_v4 }
 0x5ec   : > { %v5264_v9 = vpop.xlane.xlu1 %5263 }
 0x5ed   : > { %v5290_v43 = vadd.f32 %v5264_v9, %v5178_v15 }
 0x5ef   : > { %5307 = vst.msk [vmem:[#allocation3 + $0x68] sm:$0xff] %vm5293_vm4, %v5290_v43 }
 0x5f0   : > { %v5270_v26 = vpop.xlane.xlu0 %5269 }
 0x5f1   : > { %v5291_v1 = vadd.f32 %v5270_v26, %v5179_v60 }
 0x5f3   : > { %5308 = vst.msk [vmem:[#allocation3 + $0x70] sm:$0xff] %vm5293_vm4, %v5291_v1 }
 0x5f4   : > { %v5276_v10 = vpop.xlane.xlu1 %5275 }
 0x5f5   : > { %v5292_v29 = vadd.f32 %v5276_v10, %v5180_v32 }
 0x5f7   : > { %5309 = vst.msk [vmem:[#allocation3 + $0x78] sm:$0xff] %vm5293_vm4, %v5292_v29 }
 0x5f8 PF: > { %p9197_p9 = scmp.ne.s32.totalorder %s15292_s19, 1 }
 0x5fa   : > { %5313 = sbr.rel (%p9197_p9) target bundleno = 2480 (0x9b0), region = 68 }
 0x5ff   : > { %v10596_v42 = vld [vmem:[%s11270_s22 + $0x74] ss:$8 sps:$4 sm:$0xff]   ;;  %v10598_v51 = vld [vmem:[%s11270_s22 + $0x70] ss:$8 sps:$4 sm:$0xff]   ;;  %v10599_v3 = vld [vmem:[%s11270_s22 + $0x64] ss:$8 sps:$4 sm:$0xff]  }
 0x600   : > { %5749 = vmatprep.subr.bf16.mxu0 %v10596_v42  ;;  %v10601_v52 = vld [vmem:[%s11270_s22 + $0x60] ss:$8 sps:$4 sm:$0xff]   ;;  %v10602_v41 = vld [vmem:[%s11270_s22 + $0x54] ss:$8 sps:$4 sm:$0xff]   ;;  %v10604_v34 = vld [vmem:[%s11270_s22 + $0x50] ss:$8 sps:$4 sm:$0xff]  }
 0x601   : > { %5750 = vmatpush1.bf16.msra.mxu0 %v10598_v51  ;;  %v10605_v54 = vld [vmem:[%s11270_s22 + $0x44] ss:$8 sps:$4 sm:$0xff]   ;;  %v10616_v6 = vld [vmem:[%s11270_s22 + $0x174] ss:$8 sps:$4 sm:$0xff]   ;;  %v10619_v53 = vld [vmem:[%s11270_s22 + $0x170] ss:$8 sps:$4 sm:$0xff]  }
 0x602   : > { %5751 = vmatprep.subr.bf16.mxu0 %v10599_v3  ;;  %v10607_v50 = vld [vmem:[%s11270_s22 + $0x40] ss:$8 sps:$4 sm:$0xff]   ;;  %5862 = vmatprep.subr.bf16.mxu1 %v10616_v6  ;;  %v10608_v12 = vld [vmem:[%s11270_s22 + $0x34] ss:$8 sps:$4 sm:$0xff]   ;;  %v10622_v0 = vld [vmem:[%s11270_s22 + $0x164] ss:$8 sps:$4 sm:$0xff]  }
 0x603   : > { %5863 = vmatpush1.bf16.msra.mxu1 %v10619_v53  ;;  %v10625_v46 = vld [vmem:[%s11270_s22 + $0x160] ss:$8 sps:$4 sm:$0xff]   ;;  %v10610_v35 = vld [vmem:[%s11270_s22 + $0x30] ss:$8 sps:$4 sm:$0xff]   ;;  %v10611_v7 = vld [vmem:[%s11270_s22 + $0x24] ss:$8 sps:$4 sm:$0xff]  }
 0x604   : > { %5864 = vmatprep.subr.bf16.mxu1 %v10622_v0  ;;  %v10628_v37 = vld [vmem:[%s11270_s22 + $0x154] ss:$8 sps:$4 sm:$0xff]   ;;  %v10631_v45 = vld [vmem:[%s11270_s22 + $0x150] ss:$8 sps:$4 sm:$0xff]   ;;  %v10634_v55 = vld [vmem:[%s11270_s22 + $0x144] ss:$8 sps:$4 sm:$0xff]  }
 0x605   : > { %5752 = vmatpush1.bf16.msra.mxu0 %v10601_v52  ;;  %v10613_v21 = vld [vmem:[%s11270_s22 + $0x20] ss:$8 sps:$4 sm:$0xff]   ;;  %v10614_v17 = vld [vmem:[%s11270_s22 + $0x14] ss:$8 sps:$4 sm:$0xff]   ;;  %v10618_v30 = vld [vmem:[%s11270_s22 + $0x10] ss:$8 sps:$4 sm:$0xff]  }
 0x606   : > { %5753 = vmatprep.subr.bf16.mxu0 %v10602_v41  ;;  %v10637_v57 = vld [vmem:[%s11270_s22 + $0x140] ss:$8 sps:$4 sm:$0xff]   ;;  %v10640_v16 = vld [vmem:[%s11270_s22 + $0x134] ss:$8 sps:$4 sm:$0xff]   ;;  %v10620_v61 = vld [vmem:[%s11270_s22 + $0x4] ss:$8 sps:$4 sm:$0xff]  }
 0x607   : > { %5865 = vmatpush1.bf16.msra.mxu1 %v10625_v46  ;;  %v10643_v47 = vld [vmem:[%s11270_s22 + $0x130] ss:$8 sps:$4 sm:$0xff]   ;;  %v10646_v24 = vld [vmem:[%s11270_s22 + $0x124] ss:$8 sps:$4 sm:$0xff]   ;;  %v10624_v23 = vld [vmem:[%s11270_s22] ss:$8 sps:$4 sm:$0xff]  }
 0x608   : > { %5866 = vmatprep.subr.bf16.mxu1 %v10628_v37  ;;  %v10626_v28 = vld [vmem:[%s11270_s22 + $0xf4] ss:$8 sps:$4 sm:$0xff]   ;;  %v10649_v13 = vld [vmem:[%s11270_s22 + $0x120] ss:$8 sps:$4 sm:$0xff]   ;;  %v10630_v5 = vld [vmem:[%s11270_s22 + $0xf0] ss:$8 sps:$4 sm:$0xff]  }
 0x609   : > { %5754 = vmatpush1.bf16.msra.mxu0 %v10604_v34  ;;  %v10652_v59 = vld [vmem:[%s11270_s22 + $0x114] ss:$8 sps:$4 sm:$0xff]   ;;  %vm5717_vm5 = vcmask 64512   ;;  %v10632_v33 = vld [vmem:[%s11270_s22 + $0xe4] ss:$8 sps:$4 sm:$0xff]   ;;  %vm5742_vm6 = vcmask 1043456  }
 0x60a   : > { %5755 = vmatprep.subr.bf16.mxu0 %v10605_v54  ;;  %v5318_v56 = vld [vmem:[#allocation2 + $0x218] sm:$0xff]  ;;  %v10658_v11 = vld [vmem:[%s11270_s22 + $0x104] ss:$8 sps:$4 sm:$0xff]   ;;  %v10636_v63 = vld [vmem:[%s11270_s22 + $0xe0] ss:$8 sps:$4 sm:$0xff]   ;;  %vm8228_vm7 = vcmask 7168  }
 0x60b   : > { %5867 = vmatpush1.bf16.msra.mxu1 %v10631_v45  ;;  %v5322_v49 = vld [vmem:[#allocation2 + $0x238] sm:$0xff]  ;;  %v5316_v8 = vld [vmem:[#allocation2 + $0x208] sm:$0xff]  ;;  %v5459_v14 = vld [vmem:[%s11270_s22 + $0x180] sm:$0xff] }
 0x60c   : > { %5868 = vmatprep.subr.bf16.mxu1 %v10634_v55  ;;  %v10655_v44 = vld [vmem:[%s11270_s22 + $0x110] ss:$8 sps:$4 sm:$0xff]   ;;  %v5382_v38 = vpack.c.bf16 %v5322_v49, %v5318_v56  ;;  %v5320_v27 = vld [vmem:[#allocation2 + $0x228] sm:$0xff]  ;;  %v10638_v40 = vld [vmem:[%s11270_s22 + $0xd4] ss:$8 sps:$4 sm:$0xff]   ;;  %v9247_v58 = vcombine.high %v5459_v14, %v5459_v14  ;;  %v9246_v18 = vcombine.low %v5459_v14, %v5459_v14 }
 0x60d   : > { %5756 = vmatpush1.bf16.msra.mxu0 %v10607_v50  ;;  %v5380_v36 = vpack.c.bf16 %v5320_v27, %v5316_v8  ;;  %v10661_v2 = vld [vmem:[%s11270_s22 + $0x100] ss:$8 sps:$4 sm:$0xff]   ;;  %v10642_v48 = vld [vmem:[%s11270_s22 + $0xd0] ss:$8 sps:$4 sm:$0xff]   ;;  %v10644_v20 = vld [vmem:[%s11270_s22 + $0xc4] ss:$8 sps:$4 sm:$0xff]  }
 0x60e   : > { %5757 = vmatprep.subr.bf16.mxu0 %v10608_v12  ;;  %9249 = vmatprep.mubr.msk.bf16.mxu1 %vm5717_vm5, %v5382_v38  ;;  %v5317_v22 = vld [vmem:[#allocation2 + $0x210] sm:$0xff]  ;;  %v5744_v19 = vsel %vm5742_vm6, %v9246_v18, 0  ;;  %v5326_v31 = vld [vmem:[#allocation2 + $0x258] sm:$0xff]  ;;  %v10648_v25 = vld [vmem:[%s11270_s22 + $0xc0] ss:$8 sps:$4 sm:$0xff]  }
 0x60f   : > { %5869 = vmatpush1.bf16.msra.mxu1 %v10637_v57  ;;  %5781 = vmatprep.mubr.bf16.mxu0 %v5380_v36  ;;  %v5321_v39 = vld [vmem:[#allocation2 + $0x230] sm:$0xff]  ;;  %v5330_v62 = vld [vmem:[#allocation2 + $0x278] sm:$0xff]  ;;  %v10656_v60 = vld [vmem:[%s11270_s22 + $0xa4] ss:$8 sps:$4 sm:$0xff]  }
 0x610   : > { %5870 = vmatprep.subr.bf16.mxu1 %v10640_v16  ;;  %v5381_v4 = vpack.c.bf16 %v5321_v39, %v5317_v22  ;;  %v10650_v15 = vld [vmem:[%s11270_s22 + $0xb4] ss:$8 sps:$4 sm:$0xff]   ;;  %v5386_v9 = vpack.c.bf16 %v5330_v62, %v5326_v31  ;;  %v10654_v43 = vld [vmem:[%s11270_s22 + $0xb0] ss:$8 sps:$4 sm:$0xff]   ;;  %v10660_v29 = vld [vmem:[%s11270_s22 + $0xa0] ss:$8 sps:$4 sm:$0xff]  }
 0x611   : > { %5758 = vmatpush1.bf16.msra.mxu0 %v10610_v35  ;;  %v5325_v26 = vld [vmem:[#allocation2 + $0x250] sm:$0xff]  ;;  %v5334_v32 = vld [vmem:[#allocation2 + $0x298] sm:$0xff]  ;;  %v10667_v41 = vld [vmem:[%s11270_s22 + $0x84] ss:$8 sps:$4 sm:$0xff]  }
 0x612   : > { %5759 = vmatprep.subr.bf16.mxu0 %v10611_v7  ;;  %v5329_v1 = vld [vmem:[#allocation2 + $0x270] sm:$0xff]  ;;  %v5338_v10 = vld [vmem:[#allocation2 + $0x2b8] sm:$0xff]  ;;  %v10675_v50 = vld [vmem:[%s11275_s25 + $0x64] ss:$8 sps:$4 sm:$0xff]  }
 0x613   : > { %5871 = vmatpush1.bf16.msra.mxu1 %v10643_v47  ;;  %v5385_v42 = vpack.c.bf16 %v5329_v1, %v5325_v26  ;;  %v10662_v51 = vld [vmem:[%s11270_s22 + $0x94] ss:$8 sps:$4 sm:$0xff]   ;;  %v5390_v3 = vpack.c.bf16 %v5338_v10, %v5334_v32  ;;  %v10665_v52 = vld [vmem:[%s11270_s22 + $0x90] ss:$8 sps:$4 sm:$0xff]   ;;  %v10669_v12 = vld [vmem:[%s11270_s22 + $0x80] ss:$8 sps:$4 sm:$0xff]  }
 0x614   : > { %5872 = vmatprep.subr.bf16.mxu1 %v10646_v24  ;;  %v5333_v34 = vld [vmem:[#allocation2 + $0x290] sm:$0xff]  ;;  %v5315_v0 = vld [vmem:[#allocation2 + $0x200] sm:$0xff]  ;;  %v5342_v35 = vld [vmem:[#allocation2 + $0x2d8] sm:$0xff] }
 0x615   : > { %5760 = vmatpush1.bf16.msra.mxu0 %v10613_v21  ;;  %v10670_v54 = vld [vmem:[%s11275_s25 + $0x70] ss:$8 sps:$4 sm:$0xff]   ;;  %v10672_v6 = vld [vmem:[%s11275_s25 + $0x74] ss:$8 sps:$4 sm:$0xff]   ;;  %v5319_v46 = vld [vmem:[#allocation2 + $0x220] sm:$0xff] }
 0x616   : > { %5761 = vmatprep.subr.bf16.mxu0 %v10614_v17  ;;  %v5337_v53 = vld [vmem:[#allocation2 + $0x2b0] sm:$0xff]  ;;  %v5346_v7 = vld [vmem:[#allocation2 + $0x2f8] sm:$0xff]  ;;  %v5324_v37 = vld [vmem:[#allocation2 + $0x248] sm:$0xff]  ;;  %v5379_v16 = vpack.c.bf16 %v5319_v46, %v5315_v0 }
 0x617   : > { %5873 = vmatpush1.bf16.msra.mxu1 %v10649_v13  ;;  %v10673_v45 = vld [vmem:[%s11275_s25 + $0x60] ss:$8 sps:$4 sm:$0xff]   ;;  %v5389_v21 = vpack.c.bf16 %v5337_v53, %v5333_v34  ;;  %v5394_v17 = vpack.c.bf16 %v5346_v7, %v5342_v35  ;;  %v10678_v57 = vld [vmem:[%s11275_s25 + $0x54] ss:$8 sps:$4 sm:$0xff]   ;;  %v10681_v24 = vld [vmem:[%s11275_s25 + $0x44] ss:$8 sps:$4 sm:$0xff]  }
 0x618   : > { %5874 = vmatprep.subr.bf16.mxu1 %v10652_v59  ;;  %v5328_v55 = vld [vmem:[#allocation2 + $0x268] sm:$0xff]  ;;  %v5327_v13 = vld [vmem:[#allocation2 + $0x260] sm:$0xff]  ;;  %v5350_v59 = vld [vmem:[#allocation2 + $0x318] sm:$0xff] }
 0x619   : > { %5762 = vmatpush1.bf16.msra.mxu0 %v10618_v30  ;;  %v5341_v30 = vld [vmem:[#allocation2 + $0x2d0] sm:$0xff]  ;;  %v5384_v47 = vpack.c.bf16 %v5328_v55, %v5324_v37  ;;  %v5332_v56 = vld [vmem:[#allocation2 + $0x288] sm:$0xff]  ;;  %v5366_v26 = vld [vmem:[#allocation2 + $0x398] sm:$0xff] }
 0x61a   : > { %5763 = vmatprep.subr.bf16.mxu0 %v10620_v61  ;;  %v10676_v61 = vld [vmem:[%s11275_s25 + $0x50] ss:$8 sps:$4 sm:$0xff]   ;;  %v10679_v49 = vld [vmem:[%s11275_s25 + $0x40] ss:$8 sps:$4 sm:$0xff]   ;;  %v10687_v14 = vld [vmem:[%s11275_s25 + $0x24] ss:$8 sps:$4 sm:$0xff]  }
 0x61b   : > { %5875 = vmatpush1.bf16.msra.mxu1 %v10655_v44  ;;  %v10684_v44 = vld [vmem:[%s11275_s25 + $0x34] ss:$8 sps:$4 sm:$0xff]   ;;  %v5336_v38 = vld [vmem:[#allocation2 + $0x2a8] sm:$0xff]  ;;  %v10682_v8 = vld [vmem:[%s11275_s25 + $0x30] ss:$8 sps:$4 sm:$0xff]  }
 0x61c   : > { %5876 = vmatprep.subr.bf16.mxu1 %v10658_v11  ;;  %v5353_v36 = vld [vmem:[#allocation2 + $0x330] sm:$0xff]  ;;  %v10685_v18 = vld [vmem:[%s11275_s25 + $0x20] ss:$8 sps:$4 sm:$0xff]   ;;  %v5370_v1 = vld [vmem:[#allocation2 + $0x3b8] sm:$0xff] }
 0x61d   : > { %5764 = vmatpush1.bf16.msra.mxu0 %v10624_v23  ;;  %v5345_v23 = vld [vmem:[#allocation2 + $0x2f0] sm:$0xff]  ;;  %v5340_v39 = vld [vmem:[#allocation2 + $0x2c8] sm:$0xff]  ;;  %v5339_v10 = vld [vmem:[#allocation2 + $0x2c0] sm:$0xff] }
 0x61e   : > { %5765 = vmatprep.subr.bf16.mxu0 %v10626_v28  ;;  %v5323_v28 = vld [vmem:[#allocation2 + $0x240] sm:$0xff]  ;;  %v10690_v22 = vld [vmem:[%s11275_s25 + $0x14] ss:$8 sps:$4 sm:$0xff]   ;;  %v10694_v34 = vld [vmem:[%s11275_s25 + $0xf0] ss:$8 sps:$4 sm:$0xff]  }
 0x61f   : > { %5877 = vmatpush1.bf16.msra.mxu1 %v10661_v2  ;;  %v5383_v27 = vpack.c.bf16 %v5327_v13, %v5323_v28  ;;  %v5358_v2 = vld [vmem:[#allocation2 + $0x358] sm:$0xff]  ;;  %v10691_v32 = vld [vmem:[%s11275_s25] ss:$8 sps:$4 sm:$0xff]   ;;  %v5365_v53 = vld [vmem:[#allocation2 + $0x390] sm:$0xff] }
 0x620   : > { %9248 = vmatprep.subr.msk.bf16.mxu1 %vm5742_vm6, %v9247_v58  ;;  %v5362_v58 = vld [vmem:[#allocation2 + $0x378] sm:$0xff]  ;;  %v10697_v35 = vld [vmem:[%s11275_s25 + $0xe0] ss:$8 sps:$4 sm:$0xff]  }
 0x621   : > { %5766 = vmatpush2.bf16.msra.mxu0 %v10630_v5  ;;  %v5354_v5 = vld [vmem:[#allocation2 + $0x338] sm:$0xff]  ;;  %v5402_v62 = vpack.c.bf16 %v5362_v58, %v5358_v2  ;;  %v5347_v7 = vld [vmem:[#allocation2 + $0x300] sm:$0xff]  ;;  %v5356_v55 = vld [vmem:[#allocation2 + $0x348] sm:$0xff] }
 0x622   : > { %5767 = vmatprep.subr.bf16.mxu0 %v10632_v33  ;;  %v5393_v33 = vpack.c.bf16 %v5345_v23, %v5341_v30  ;;  %v5398_v11 = vpack.c.bf16 %v5354_v5, %v5350_v59  ;;  %v5374_v0 = vld [vmem:[#allocation2 + $0x3d8] sm:$0xff]  ;;  %v5351_v37 = vld [vmem:[#allocation2 + $0x320] sm:$0xff]  ;;  %v5364_v5 = vld [vmem:[#allocation2 + $0x388] sm:$0xff] }
 0x623   : > { %5893 = vmatpush2.bf16.msra.mxu1 %v5744_v19  ;;  %v5344_v19 = vld [vmem:[#allocation2 + $0x2e8] sm:$0xff]  ;;  %v5378_v46 = vld [vmem:[#allocation2 + $0x3f8] sm:$0xff]  ;;  %v5355_v13 = vld [vmem:[#allocation2 + $0x340] sm:$0xff] }
 0x624   : > { %6227 = vmatprep.subr.bf16.mxu1 %v10672_v6  ;;  %v10705_v30 = vld [vmem:[%s11275_s25 + $0xc4] ss:$8 sps:$4 sm:$0xff]   ;;  %v10703_v28 = vld [vmem:[%s11275_s25 + $0xc0] ss:$8 sps:$4 sm:$0xff]   ;;  %v10706_v2 = vld [vmem:[%s11275_s25 + $0xb0] ss:$8 sps:$4 sm:$0xff]  }
 0x625   : > { %5768 = vmatpush2.bf16.msra.mxu0 %v10636_v63  ;;  %v5349_v63 = vld [vmem:[#allocation2 + $0x310] sm:$0xff]  ;;  %v5359_v59 = vld [vmem:[#allocation2 + $0x360] sm:$0xff] }
 0x626   : > { %5769 = vmatprep.subr.bf16.mxu0 %v10638_v40  ;;  %5895 = vmatmul.mubr.bf16.vlgmr.msra.gmra.mxu1 %v5381_v4  ;;  %v5388_v40 = vpack.c.bf16 %v5336_v38, %v5332_v56  ;;  %v5397_v31 = vpack.c.bf16 %v5353_v36, %v5349_v63  ;;  %v10693_v4 = vld [vmem:[%s11275_s25 + $0x4] ss:$8 sps:$4 sm:$0xff]   ;;  %v10708_v58 = vld [vmem:[%s11275_s25 + $0xb4] ss:$8 sps:$4 sm:$0xff]  }
 0x627   : > { %9250 = vmatprep.mubr.msk.bf16.mxu1 %vm5717_vm5, %v5386_v9  ;;  %6228 = vmatpush1.bf16.msra.mxu1 %v10670_v54  ;;  %v5357_v9 = vld [vmem:[#allocation2 + $0x350] sm:$0xff]  ;;  %v10699_v54 = vld [vmem:[%s11275_s25 + $0xe4] ss:$8 sps:$4 sm:$0xff]  }
 0x628   : > { %6229 = vmatprep.subr.bf16.mxu1 %v10675_v50  ;;  %v5369_v50 = vld [vmem:[#allocation2 + $0x3b0] sm:$0xff]  ;;  %v5368_v56 = vld [vmem:[#allocation2 + $0x3a8] sm:$0xff]  ;;  %v5363_v38 = vld [vmem:[#allocation2 + $0x380] sm:$0xff] }
 0x629   : > { %5770 = vmatpush2.bf16.msra.mxu0 %v10642_v48  ;;  %v5331_v48 = vld [vmem:[#allocation2 + $0x280] sm:$0xff] }
 0x62a   : > { %5771 = vmatprep.subr.bf16.mxu0 %v10644_v20  ;;  %v5335_v20 = vld [vmem:[#allocation2 + $0x2a0] sm:$0xff] }
 0x62b   : > { %6230 = vmatpush1.bf16.msra.mxu1 %v10673_v45  ;;  %v10702_v45 = vld [vmem:[%s11275_s25 + $0xd4] ss:$8 sps:$4 sm:$0xff]   ;;  %v5371_v36 = vld [vmem:[#allocation2 + $0x3c0] sm:$0xff] }
 0x62c   : > { %6231 = vmatprep.subr.bf16.mxu1 %v10678_v57  ;;  %v5410_v57 = vpack.c.bf16 %v5378_v46, %v5374_v0  ;;  %v10778_v46 = vld [vmem:[%s11285_s2 + $0x1a0] ss:$16 sps:$4 sm:$0xff]  }
 0x62d   : > { %5772 = vmatpush2.bf16.msra.mxu0 %v10648_v25  ;;  %v10688_v25 = vld [vmem:[%s11275_s25 + $0x10] ss:$8 sps:$4 sm:$0xff]  }
 0x62e   : > { %5773 = vmatprep.subr.bf16.mxu0 %v10650_v15  ;;  %5905 = vmatmul.mubr.bf16.gmra.mxu1 %v5385_v42  ;;  %v5387_v15 = vpack.c.bf16 %v5335_v20, %v5331_v48  ;;  %v10696_v42 = vld [vmem:[%s11275_s25 + $0xf4] ss:$8 sps:$4 sm:$0xff]   ;;  %v10711_v48 = vld [vmem:[%s11275_s25 + $0xa4] ss:$8 sps:$4 sm:$0xff]   ;;  %v10709_v20 = vld [vmem:[%s11275_s25 + $0xa0] ss:$8 sps:$4 sm:$0xff]  }
 0x62f   : > { %9251 = vmatprep.mubr.msk.bf16.mxu1 %vm5717_vm5, %v5390_v3  ;;  %6232 = vmatpush1.bf16.msra.mxu1 %v10676_v61  ;;  %v5352_v3 = vld [vmem:[#allocation2 + $0x328] sm:$0xff]  ;;  %v5395_v61 = vpack.c.bf16 %v5351_v37, %v5347_v7 }
 0x630   : > { %6233 = vmatprep.subr.bf16.mxu1 %v10681_v24  ;;  %v5377_v24 = vld [vmem:[#allocation2 + $0x3f0] sm:$0xff] }
 0x631   : > { %5774 = vmatpush2.bf16.msra.mxu0 %v10654_v43  ;;  %v5361_v43 = vld [vmem:[#allocation2 + $0x370] sm:$0xff] }
 0x632   : > { %5775 = vmatprep.subr.bf16.mxu0 %v10656_v60  ;;  %v5392_v60 = vpack.c.bf16 %v5344_v19, %v5340_v39  ;;  %v10712_v39 = vld [vmem:[%s11275_s25 + $0x90] ss:$8 sps:$4 sm:$0xff]   ;;  %v10717_v19 = vld [vmem:[%s11275_s25 + $0x84] ss:$8 sps:$4 sm:$0xff]  }
 0x633   : > { %6234 = vmatpush1.bf16.msra.mxu1 %v10679_v49 }
 0x634   : > { %6235 = vmatprep.subr.bf16.mxu1 %v10684_v44  ;;  %v5404_v44 = vpack.c.bf16 %v5368_v56, %v5364_v5 }
 0x635   : > { %5776 = vmatpush2.bf16.msra.mxu0 %v10660_v29  ;;  %v5343_v29 = vld [vmem:[#allocation2 + $0x2e0] sm:$0xff] }
 0x636   : > { %5777 = vmatprep.subr.bf16.mxu0 %v10662_v51  ;;  %5915 = vmatmul.mubr.bf16.gmra.mxu1 %v5389_v21  ;;  %v5348_v51 = vld [vmem:[#allocation2 + $0x308] sm:$0xff]  ;;  %v5391_v6 = vpack.c.bf16 %v5343_v29, %v5339_v10  ;;  %v10742_v10 = vld [vmem:[%s11285_s2 + $0x60] ss:$16 sps:$4 sm:$0xff]   ;;  %v10750_v29 = vld [vmem:[%s11285_s2 + $0x44] ss:$16 sps:$4 sm:$0xff]  }
 0x637   : > { %9252 = vmatprep.mubr.msk.bf16.mxu1 %vm5717_vm5, %v5394_v17  ;;  %6236 = vmatpush1.bf16.msra.mxu1 %v10682_v8  ;;  %v5360_v21 = vld [vmem:[#allocation2 + $0x368] sm:$0xff]  ;;  %v5405_v17 = vpack.c.bf16 %v5369_v50, %v5365_v53  ;;  %v10772_v53 = vld [vmem:[%s11285_s2 + $0x1c0] ss:$16 sps:$4 sm:$0xff]   ;;  %v10780_v50 = vld [vmem:[%s11285_s2 + $0x1a4] ss:$16 sps:$4 sm:$0xff]  }
 0x638   : > { %6237 = vmatprep.subr.bf16.mxu1 %v10687_v14  ;;  %v5400_v23 = vpack.c.bf16 %v5360_v21, %v5356_v55  ;;  %v5372_v8 = vld [vmem:[#allocation2 + $0x3c8] sm:$0xff]  ;;  %v5462_v55 = vlaneseq  ;;  %v10792_v21 = vld [vmem:[%s11285_s2 + $0x164] ss:$16 sps:$4 sm:$0xff]  }
 0x639   : > { %5778 = vmatpush2.bf16.msra.mxu0 %v10665_v52  ;;  %v5401_v52 = vpack.c.bf16 %v5361_v43, %v5357_v9  ;;  %v5376_v14 = vld [vmem:[#allocation2 + $0x3e8] sm:$0xff]  ;;  %v10724_v9 = vld [vmem:[%s11285_s2 + $0xc0] ss:$16 sps:$4 sm:$0xff]   ;;  %v10732_v43 = vld [vmem:[%s11285_s2 + $0xa4] ss:$16 sps:$4 sm:$0xff]  }
 0x63a   : > { %5779 = vmatprep.subr.bf16.mxu0 %v10667_v41  ;;  %v5406_v41 = vpack.c.bf16 %v5370_v1, %v5366_v26  ;;  %v5408_v63 = vpack.c.bf16 %v5376_v14, %v5372_v8  ;;  %v10738_v26 = vld [vmem:[%s11285_s2 + $0x84] ss:$16 sps:$4 sm:$0xff]   ;;  %v10736_v1 = vld [vmem:[%s11285_s2 + $0x80] ss:$16 sps:$4 sm:$0xff]  }
 0x63b   : > { %6238 = vmatpush1.bf16.msra.mxu1 %v10685_v18 }
 0x63c   : > { %6239 = vmatprep.subr.bf16.mxu1 %v10690_v22  ;;  %v10714_v22 = vld [vmem:[%s11275_s25 + $0x94] ss:$8 sps:$4 sm:$0xff]  }
 0x63d   : > { %5780 = vmatpush2.bf16.msra.mxu0 %v10669_v12  ;;  %v5396_v12 = vpack.c.bf16 %v5352_v3, %v5348_v51  ;;  %v10756_v51 = vld [vmem:[%s11285_s2 + $0x24] ss:$16 sps:$4 sm:$0xff]   ;;  %v10754_v3 = vld [vmem:[%s11285_s2 + $0x20] ss:$16 sps:$4 sm:$0xff]  }
 0x63e   : > { %5925 = vmatmul.mubr.bf16.gmra.mxu1 %v5393_v33  ;;  %v5399_v33 = vpack.c.bf16 %v5359_v59, %v5355_v13 }
 0x63f   : > { %9253 = vmatprep.mubr.msk.bf16.mxu1 %vm5717_vm5, %v5398_v11  ;;  %6240 = vmatpush1.bf16.msra.mxu1 %v10688_v25  ;;  %v5367_v11 = vld [vmem:[#allocation2 + $0x3a0] sm:$0xff] }
 0x640   : > { %5782 = vmatmul.mubr.bf16.vlgmr.msra.gmra.mxu0 %v5379_v16  ;;  %6241 = vmatprep.subr.bf16.mxu1 %v10693_v4  ;;  %v10700_v16 = vld [vmem:[%s11275_s25 + $0xd0] ss:$8 sps:$4 sm:$0xff]   ;;  %v10720_v25 = vld [vmem:[%s11285_s2 + $0xe4] ss:$16 sps:$4 sm:$0xff]   ;;  %v10723_v4 = vld [vmem:[%s11285_s2 + $0xec] ss:$16 sps:$4 sm:$0xff]  }
 0x641   : > { %5791 = vmatprep.mubr.bf16.mxu0 %v5384_v47  ;;  %v5373_v47 = vld [vmem:[#allocation2 + $0x3d0] sm:$0xff]  ;;  %6794 = vmatprep.subr.bf16.mxu0 %v10720_v25 }
 0x642   : > { %v5409_v49 = vpack.c.bf16 %v5377_v24, %v5373_v47 }
 0x643   : > { %6242 = vmatpush1.bf16.msra.mxu1 %v10691_v32  ;;  %v10744_v32 = vld [vmem:[%s11285_s2 + $0x64] ss:$16 sps:$4 sm:$0xff]  }
 0x644   : > { %6243 = vmatprep.subr.bf16.mxu1 %v10696_v42  ;;  %v10748_v42 = vld [vmem:[%s11285_s2 + $0x40] ss:$16 sps:$4 sm:$0xff]  }
 0x646   : > { %5935 = vmatmul.mubr.bf16.gmra.mxu1 %v5397_v31  ;;  %v10715_v31 = vld [vmem:[%s11275_s25 + $0x80] ss:$8 sps:$4 sm:$0xff]  }
 0x647   : > { %9254 = vmatprep.mubr.msk.bf16.mxu1 %vm5717_vm5, %v5402_v62  ;;  %6244 = vmatpush2.bf16.msra.mxu1 %v10694_v34  ;;  %v10718_v62 = vld [vmem:[%s11285_s2 + $0xe0] ss:$16 sps:$4 sm:$0xff]   ;;  %v10768_v34 = vld [vmem:[%s11285_s2 + $0x1e4] ss:$16 sps:$4 sm:$0xff]  }
 0x648   : > { %5792 = vmatmul.mubr.bf16.gmra.mxu0 %v5383_v27  ;;  %6245 = vmatprep.subr.bf16.mxu1 %v10699_v54  ;;  %v5403_v27 = vpack.c.bf16 %v5367_v11, %v5363_v38  ;;  %v10766_v54 = vld [vmem:[%s11285_s2 + $0x1e0] ss:$16 sps:$4 sm:$0xff]  }
 0x649   : > { %5801 = vmatprep.mubr.bf16.mxu0 %v5388_v40  ;;  %v5375_v40 = vld [vmem:[#allocation2 + $0x3e0] sm:$0xff]  ;;  %6795 = vmatpush1.bf16.msra.mxu0 %v10718_v62 }
 0x64a   : > { %v5407_v18 = vpack.c.bf16 %v5375_v40, %v5371_v36 }
 0x64b   : > { %6246 = vmatpush2.bf16.msra.mxu1 %v10697_v35  ;;  %v10786_v35 = vld [vmem:[%s11285_s2 + $0x184] ss:$16 sps:$4 sm:$0xff]  }
 0x64c   : > { %6247 = vmatprep.subr.bf16.mxu1 %v10702_v45  ;;  %v10784_v45 = vld [vmem:[%s11285_s2 + $0x180] ss:$16 sps:$4 sm:$0xff]  }
 0x64e   : > { %5945 = vmatmul.mubr.bf16.gmra.mxu1 %v5401_v52  ;;  %v10762_v52 = vld [vmem:[%s11285_s2 + $0x4] ss:$16 sps:$4 sm:$0xff]  }
 0x64f   : > { %9255 = vmatprep.mubr.msk.bf16.mxu1 %vm5717_vm5, %v5406_v41  ;;  %6248 = vmatpush2.bf16.msra.mxu1 %v10700_v16  ;;  %v10760_v41 = vld [vmem:[%s11285_s2] ss:$16 sps:$4 sm:$0xff]  }
 0x650   : > { %5802 = vmatmul.mubr.bf16.gmra.mxu0 %v5387_v15  ;;  %6249 = vmatprep.subr.bf16.mxu1 %v10705_v30  ;;  %v10726_v15 = vld [vmem:[%s11285_s2 + $0xc4] ss:$16 sps:$4 sm:$0xff]   ;;  %v10790_v16 = vld [vmem:[%s11285_s2 + $0x160] ss:$16 sps:$4 sm:$0xff]   ;;  %v14109_v30 = vshrl.u32 %v5462_v55, 7 }
 0x651   : > { %5811 = vmatprep.mubr.bf16.mxu0 %v5392_v60  ;;  %6796 = vmatprep.subr.bf16.mxu0 %v10726_v15  ;;  %v10730_v60 = vld [vmem:[%s11285_s2 + $0xa0] ss:$16 sps:$4 sm:$0xff]  }
 0x652   : > { %6797 = vmatpush1.bf16.msra.mxu0 %v10724_v9  ;;  %v14112_v47 = vsub.s32 1, %v14109_v30 }
 0x653   : > { %6250 = vmatpush2.bf16.msra.mxu1 %v10703_v28  ;;  %6798 = vmatprep.subr.bf16.mxu0 %v10732_v43  ;;  %v5460_v28 = vld [vmem:[%s11265_s18] sm:$0x3] }
 0x654   : > { %6251 = vmatprep.subr.bf16.mxu1 %v10708_v58  ;;  %v14121_v59 = vrot.slane %v5460_v28, %v14112_v47 }
 0x656   : > { %5955 = vmatmul.mubr.bf16.gmra.mxu1 %v5405_v17  ;;  %6799 = vmatpush1.bf16.msra.mxu0 %v10730_v60 }
 0x657   : > { %9256 = vmatprep.mubr.msk.bf16.mxu1 %vm5717_vm5, %v5410_v57  ;;  %6252 = vmatpush2.bf16.msra.mxu1 %v10706_v2 }
 0x658   : > { %5812 = vmatmul.mubr.bf16.gmra.mxu0 %v5391_v6  ;;  %6253 = vmatprep.subr.bf16.mxu1 %v10711_v48  ;;  %v10774_v6 = vld [vmem:[%s11285_s2 + $0x1c4] ss:$16 sps:$4 sm:$0xff]  }
 0x659   : > { %5821 = vmatprep.mubr.bf16.mxu0 %v5396_v12  ;;  %6800 = vmatprep.subr.bf16.mxu0 %v10738_v26 }
 0x65a   : > { %6801 = vmatpush1.bf16.msra.mxu0 %v10736_v1 }
 0x65b   : > { %6254 = vmatpush2.bf16.msra.mxu1 %v10709_v20  ;;  %6802 = vmatprep.subr.bf16.mxu0 %v10744_v32 }
 0x65c   : > { %6255 = vmatprep.subr.bf16.mxu1 %v10714_v22 }
 0x65e   : > { %5965 = vmatmul.mubr.bf16.gmra.mxu1 %v5409_v49  ;;  %6803 = vmatpush1.bf16.msra.mxu0 %v10742_v10  ;;  %v10721_v10 = vld [vmem:[%s11285_s2 + $0xe8] ss:$16 sps:$4 sm:$0xff]  }
 0x65f   : > { %6256 = vmatpush2.bf16.msra.mxu1 %v10712_v39  ;;  %6804 = vmatprep.subr.bf16.mxu0 %v10750_v29 }
 0x660   : > { %5822 = vmatmul.mubr.bf16.gmra.mxu0 %v5395_v61  ;;  %6257 = vmatprep.subr.bf16.mxu1 %v10717_v19 }
 0x661   : > { %5831 = vmatprep.mubr.bf16.mxu0 %v5400_v23  ;;  %v14115_v23 = vsub.s32 0, %v14109_v30 }
 0x662   : > { %6805 = vmatpush1.bf16.msra.mxu0 %v10748_v42 }
 0x663   : > { %6258 = vmatpush2.bf16.msra.mxu1 %v10715_v31  ;;  %6806 = vmatprep.subr.bf16.mxu0 %v10756_v51  ;;  %v14126_v56 = vrot.slane %v5460_v28, %v14115_v23  ;;  %v10729_v51 = vld [vmem:[%s11285_s2 + $0xcc] ss:$16 sps:$4 sm:$0xff]   ;;  %v10733_v28 = vld [vmem:[%s11285_s2 + $0xa8] ss:$16 sps:$4 sm:$0xff]  }
 0x664   : > { %6907 = vmatprep.subr.bf16.mxu1 %v10723_v4 }
 0x666   : > { %6807 = vmatpush1.bf16.msra.mxu0 %v10754_v3 }
 0x667   : > { %6808 = vmatprep.subr.bf16.mxu0 %v10762_v52 }
 0x668   : > { %5832 = vmatmul.mubr.bf16.gmra.mxu0 %v5399_v33 }
 0x669   : > { %5841 = vmatprep.mubr.bf16.mxu0 %v5404_v44 }
 0x66a   : > { %6809 = vmatpush1.bf16.msra.mxu0 %v10760_v41 }
 0x66b   : > { %6810 = vmatprep.subr.bf16.mxu0 %v10768_v34 }
 0x66e   : > { %6811 = vmatpush2.bf16.msra.mxu0 %v10766_v54 }
 0x66f   : > { %6812 = vmatprep.subr.bf16.mxu0 %v10774_v6 }
 0x670   : > { %5842 = vmatmul.mubr.bf16.gmra.mxu0 %v5403_v27 }
 0x671   : > { %5851 = vmatprep.mubr.bf16.mxu0 %v5408_v63 }
 0x672   : > { %6813 = vmatpush2.bf16.msra.mxu0 %v10772_v53 }
 0x673   : > { %6814 = vmatprep.subr.bf16.mxu0 %v10780_v50 }
 0x676   : > { %6815 = vmatpush2.bf16.msra.mxu0 %v10778_v46 }
 0x677   : > { %6816 = vmatprep.subr.bf16.mxu0 %v10786_v35  ;;  %v10735_v35 = vld [vmem:[%s11285_s2 + $0xac] ss:$16 sps:$4 sm:$0xff]  }
 0x678   : > { %5852 = vmatmul.mubr.bf16.gmra.mxu0 %v5407_v18 }
 0x67a   : > { %6817 = vmatpush2.bf16.msra.mxu0 %v10784_v45 }
 0x67b   : > { %6818 = vmatprep.subr.bf16.mxu0 %v10792_v21 }
 0x67e   : > { %6819 = vmatpush2.bf16.msra.mxu0 %v10790_v16 }
 0x6e6   : > { %v5896_v12 = vpop.f32.mrf.mxu1 }
 0x6e8   : > { %v5898_v0 = vpop.f32.mrf.mxu1 }
 0x6ea   : > { %v5900_v7 = vpop.f32.mrf.mxu1 }
 0x6ec   : > { %v5902_v37 = vpop.f32.mrf.mxu1 }
 0x6ee   : > { %v5906_v17 = vpop.f32.mrf.mxu1 }
 0x6f0   : > { %v5908_v57 = vpop.f32.mrf.mxu1 }
 0x6f2   : > { %v5910_v61 = vpop.f32.mrf.mxu1 }
 0x6f4   : > { %v5912_v24 = vpop.f32.mrf.mxu1 }
 0x6f6   : > { %v14118_v13 = vpop.f32.mrf.mxu1 }
 0x6f8   : > { %v14123_v5 = vpop.f32.mrf.mxu1 }
 0x6fa   : > { %v14128_v33 = vpop.f32.mrf.mxu1 }
 0x6fc   : > { %v14131_v11 = vpop.f32.mrf.mxu1 }
 0x6fe   : > { %v14135_v63 = vpop.f32.mrf.mxu1 }
 0x700   : > { %v5783_v49 = vpop.f32.mrf.mxu0  ;;  %v14138_v18 = vpop.f32.mrf.mxu1 }
 0x701   : > { %v5784_v8 = vadd.f32 %v5783_v49, %v14126_v56 }
 0x702   : > { %v5785_v44 = vpop.f32.mrf.mxu0  ;;  %v14140_v39 = vpop.f32.mrf.mxu1 }
 0x703   : > { %v5786_v38 = vadd.f32 %v5785_v44, %v14121_v59  ;;  %v5897_v48 = vadd.f32 %v5896_v12, %v5784_v8  ;;  %v10727_v12 = vld [vmem:[%s11285_s2 + $0xc8] ss:$16 sps:$4 sm:$0xff]  }
 0x704   : > { %v5787_v14 = vpop.f32.mrf.mxu0  ;;  %v14143_v15 = vpop.f32.mrf.mxu1 }
 0x705   : > { %v5788_v27 = vadd.f32 %v5787_v14, %v14126_v56  ;;  %v5899_v40 = vadd.f32 %v5898_v0, %v5786_v38  ;;  %v5975_v9 = vmax.f32 %v5897_v48, 0.0  ;;  %v10741_v38 = vld [vmem:[%s11285_s2 + $0x8c] ss:$16 sps:$4 sm:$0xff]   ;;  %v10739_v48 = vld [vmem:[%s11285_s2 + $0x88] ss:$16 sps:$4 sm:$0xff]  }
 0x706   : > { %v5789_v36 = vpop.f32.mrf.mxu0  ;;  %v14147_v32 = vpop.f32.mrf.mxu1 }
 0x707   : > { %v5901_v2 = vadd.f32 %v5900_v7, %v5788_v27  ;;  %v5790_v58 = vadd.f32 %v5789_v36, %v14121_v59  ;;  %v5976_v62 = vmax.f32 %v5899_v40, 0.0 }
 0x708   : > { %v5793_v20 = vpop.f32.mrf.mxu0  ;;  %v14152_v34 = vpop.f32.mrf.mxu1 }
 0x709   : > { %v5903_v22 = vadd.f32 %v5902_v37, %v5790_v58  ;;  %v5977_v19 = vmax.f32 %v5901_v2, 0.0  ;;  %v5794_v43 = vadd.f32 %v5793_v20, %v14126_v56 }
 0x70a   : > { %v5795_v31 = vpop.f32.mrf.mxu0  ;;  %v14154_v50 = vpop.f32.mrf.mxu1 }
 0x70b   : > { %v5978_v25 = vmax.f32 %v5903_v22, 0.0  ;;  %v5796_v4 = vadd.f32 %v5795_v31, %v14121_v59  ;;  %v6007_v29 = vpack.c.bf16 %v5977_v19, %v5975_v9  ;;  %v5907_v54 = vadd.f32 %v5906_v17, %v5794_v43  ;;  %v10745_v43 = vld [vmem:[%s11285_s2 + $0x68] ss:$16 sps:$4 sm:$0xff]  }
 0x70c   : > { %v5797_v60 = vpop.f32.mrf.mxu0  ;;  %v14159_v55 = vpop.f32.mrf.mxu1 }
 0x70d   : > { %v5798_v26 = vadd.f32 %v5797_v60, %v14126_v56  ;;  %v6008_v1 = vpack.c.bf16 %v5978_v25, %v5976_v62  ;;  %v5909_v3 = vadd.f32 %v5908_v57, %v5796_v4  ;;  %v5979_v21 = vmax.f32 %v5907_v54, 0.0  ;;  %v10751_v54 = vld [vmem:[%s11285_s2 + $0x48] ss:$16 sps:$4 sm:$0xff]  }
 0x70e   : > { %v5799_v42 = vpop.f32.mrf.mxu0 }
 0x70f   : > { %v5911_v52 = vadd.f32 %v5910_v61, %v5798_v26  ;;  %v5800_v41 = vadd.f32 %v5799_v42, %v14121_v59  ;;  %6259 = vmatprep.mubr.bf16.mxu1 %v6008_v1  ;;  %v5980_v7 = vmax.f32 %v5909_v3, 0.0  ;;  %v10753_v1 = vld [vmem:[%s11285_s2 + $0x4c] ss:$16 sps:$4 sm:$0xff]  }
 0x710   : > { %v5803_v6 = vpop.f32.mrf.mxu0  ;;  %6260 = vmatmul.mubr.bf16.vlgmr.msra.gmra.mxu1 %v6007_v29 }
 0x711   : > { %v5913_v53 = vadd.f32 %v5912_v24, %v5800_v41  ;;  %6908 = vmatpush1.bf16.msra.mxu1 %v10721_v10  ;;  %v5981_v0 = vmax.f32 %v5911_v52, 0.0  ;;  %v5804_v17 = vadd.f32 %v5803_v6, %v14126_v56  ;;  %v14163_v24 = vpop.f32.mrf.mxu1 }
 0x712   : > { %v5805_v46 = vpop.f32.mrf.mxu0  ;;  %6909 = vmatprep.subr.bf16.mxu1 %v10729_v51 }
 0x713   : > { %v5982_v37 = vmax.f32 %v5913_v53, 0.0  ;;  %v5806_v45 = vadd.f32 %v5805_v46, %v14121_v59  ;;  %v6009_v44 = vpack.c.bf16 %v5981_v0, %v5979_v21  ;;  %v5917_v36 = vadd.f32 %v14118_v13, %v5804_v17  ;;  %v14171_v2 = vpop.f32.mrf.mxu1 }
 0x714   : > { %v5807_v57 = vpop.f32.mrf.mxu0 }
 0x715   : > { %v5808_v16 = vadd.f32 %v5807_v57, %v14126_v56  ;;  %v6010_v61 = vpack.c.bf16 %v5982_v37, %v5980_v7  ;;  %6910 = vmatpush1.bf16.msra.mxu1 %v10727_v12  ;;  %v5919_v8 = vadd.f32 %v14123_v5, %v5806_v45  ;;  %v10747_v5 = vld [vmem:[%s11285_s2 + $0x6c] ss:$16 sps:$4 sm:$0xff]   ;;  %v5983_v62 = vmax.f32 %v5917_v36, 0.0  ;;  %v14178_v4 = vpop.f32.mrf.mxu1  ;;  %v10757_v45 = vld [vmem:[%s11285_s2 + $0x28] ss:$16 sps:$4 sm:$0xff]  }
 0x716   : > { %v5809_v49 = vpop.f32.mrf.mxu0  ;;  %6911 = vmatprep.subr.bf16.mxu1 %v10735_v35  ;;  %v10765_v57 = vld [vmem:[%s11285_s2 + $0xc] ss:$16 sps:$4 sm:$0xff]  }
 0x717   : > { %v5921_v14 = vadd.f32 %v14128_v33, %v5808_v16  ;;  %v5810_v27 = vadd.f32 %v5809_v49, %v14121_v59  ;;  %6269 = vmatprep.mubr.bf16.mxu1 %v6010_v61  ;;  %v5984_v33 = vmax.f32 %v5919_v8, 0.0  ;;  %v5952_v52 = vpop.f32.mrf.mxu1 }
 0x718   : > { %v5813_v40 = vpop.f32.mrf.mxu0  ;;  %6270 = vmatmul.mubr.bf16.gmra.mxu1 %v6009_v44 }
 0x719   : > { %v5923_v58 = vadd.f32 %v14131_v11, %v5810_v27  ;;  %6912 = vmatpush1.bf16.msra.mxu1 %v10733_v28  ;;  %v5985_v20 = vmax.f32 %v5921_v14, 0.0  ;;  %v5814_v13 = vadd.f32 %v5813_v40, %v14126_v56  ;;  %v14192_v7 = vpop.f32.mrf.mxu1  ;;  %v10763_v14 = vld [vmem:[%s11285_s2 + $0x8] ss:$16 sps:$4 sm:$0xff]  }
 0x71a   : > { %v5815_v22 = vpop.f32.mrf.mxu0  ;;  %6913 = vmatprep.subr.bf16.mxu1 %v10741_v38 }
 0x71b   : > { %v5986_v19 = vmax.f32 %v5923_v58, 0.0  ;;  %v5816_v31 = vadd.f32 %v5815_v22, %v14121_v59  ;;  %v6011_v26 = vpack.c.bf16 %v5985_v20, %v5983_v62  ;;  %v5927_v51 = vadd.f32 %v14135_v63, %v5814_v13  ;;  %v5958_v38 = vpop.f32.mrf.mxu1  ;;  %v10777_v62 = vld [vmem:[%s11285_s2 + $0x1cc] ss:$16 sps:$4 sm:$0xff]  }
 0x71c   : > { %v5817_v25 = vpop.f32.mrf.mxu0 }
 0x71d   : > { %v5818_v11 = vadd.f32 %v5817_v25, %v14126_v56  ;;  %v6012_v9 = vpack.c.bf16 %v5986_v19, %v5984_v33  ;;  %6914 = vmatpush1.bf16.msra.mxu1 %v10739_v48  ;;  %v5929_v10 = vadd.f32 %v14138_v18, %v5816_v31  ;;  %v10759_v18 = vld [vmem:[%s11285_s2 + $0x2c] ss:$16 sps:$4 sm:$0xff]   ;;  %v5987_v46 = vmax.f32 %v5927_v51, 0.0  ;;  %v5960_v22 = vpop.f32.mrf.mxu1  ;;  %v10769_v33 = vld [vmem:[%s11285_s2 + $0x1e8] ss:$16 sps:$4 sm:$0xff]  }
 0x71e   : > { %v5819_v60 = vpop.f32.mrf.mxu0  ;;  %6915 = vmatprep.subr.bf16.mxu1 %v10747_v5 }
 0x71f   : > { %v5931_v29 = vadd.f32 %v14140_v39, %v5818_v11  ;;  %v5820_v42 = vadd.f32 %v5819_v60, %v14121_v59  ;;  %6279 = vmatprep.mubr.bf16.mxu1 %v6012_v9  ;;  %v5988_v12 = vmax.f32 %v5929_v10, 0.0  ;;  %v5962_v60 = vpop.f32.mrf.mxu1 }
 0x720   : > { %v5823_v3 = vpop.f32.mrf.mxu0  ;;  %6280 = vmatmul.mubr.bf16.gmra.mxu1 %v6011_v26 }
 0x721   : > { %v5933_v41 = vadd.f32 %v14143_v15, %v5820_v42  ;;  %6916 = vmatpush1.bf16.msra.mxu1 %v10745_v43  ;;  %v5989_v6 = vmax.f32 %v5931_v29, 0.0  ;;  %v5824_v63 = vadd.f32 %v5823_v3, %v14126_v56  ;;  %v10783_v42 = vld [vmem:[%s11285_s2 + $0x1ac] ss:$16 sps:$4 sm:$0xff]  }
 0x722   : > { %v5825_v53 = vpop.f32.mrf.mxu0  ;;  %6917 = vmatprep.subr.bf16.mxu1 %v10753_v1  ;;  %v10775_v1 = vld [vmem:[%s11285_s2 + $0x1c8] ss:$16 sps:$4 sm:$0xff]  }
 0x723   : > { %v5990_v39 = vmax.f32 %v5933_v41, 0.0  ;;  %v5826_v0 = vadd.f32 %v5825_v53, %v14121_v59  ;;  %v6013_v17 = vpack.c.bf16 %v5989_v6, %v5987_v46  ;;  %v5937_v49 = vadd.f32 %v14147_v32, %v5824_v63  ;;  %v10781_v53 = vld [vmem:[%s11285_s2 + $0x1a8] ss:$16 sps:$4 sm:$0xff]  }
 0x724   : > { %v5827_v35 = vpop.f32.mrf.mxu0 }
 0x725   : > { %v5828_v15 = vadd.f32 %v5827_v35, %v14126_v56  ;;  %v6014_v37 = vpack.c.bf16 %v5990_v39, %v5988_v12  ;;  %6918 = vmatpush1.bf16.msra.mxu1 %v10751_v54  ;;  %v5939_v16 = vadd.f32 %v14152_v34, %v5826_v0  ;;  %v10771_v34 = vld [vmem:[%s11285_s2 + $0x1ec] ss:$16 sps:$4 sm:$0xff]   ;;  %v5991_v48 = vmax.f32 %v5937_v49, 0.0  ;;  %v5966_v54 = vpop.f32.mrf.mxu1 }
 0x726   : > { %v5829_v21 = vpop.f32.mrf.mxu0  ;;  %6919 = vmatprep.subr.bf16.mxu1 %v10759_v18  ;;  %v10789_v39 = vld [vmem:[%s11285_s2 + $0x18c] ss:$16 sps:$4 sm:$0xff]  }
 0x727   : > { %v5941_v61 = vadd.f32 %v14154_v50, %v5828_v15  ;;  %v5830_v28 = vadd.f32 %v5829_v21, %v14121_v59  ;;  %6289 = vmatprep.mubr.bf16.mxu1 %v6014_v37  ;;  %v5992_v40 = vmax.f32 %v5939_v16, 0.0  ;;  %v5968_v15 = vpop.f32.mrf.mxu1  ;;  %v10787_v21 = vld [vmem:[%s11285_s2 + $0x188] ss:$16 sps:$4 sm:$0xff]   ;;  %v10795_v16 = vld [vmem:[%s11285_s2 + $0x16c] ss:$16 sps:$4 sm:$0xff]  }
 0x728   : > { %v5833_v44 = vpop.f32.mrf.mxu0  ;;  %6290 = vmatmul.mubr.bf16.gmra.mxu1 %v6013_v17 }
 0x729   : > { %v5943_v8 = vadd.f32 %v14159_v55, %v5830_v28  ;;  %6920 = vmatpush1.bf16.msra.mxu1 %v10757_v45  ;;  %v5993_v27 = vmax.f32 %v5941_v61, 0.0  ;;  %v5834_v32 = vadd.f32 %v5833_v44, %v14126_v56 }
 0x72a   : > { %v5835_v36 = vpop.f32.mrf.mxu0  ;;  %6921 = vmatprep.subr.bf16.mxu1 %v10765_v57 }
 0x72b   : > { %v5994_v50 = vmax.f32 %v5943_v8, 0.0  ;;  %v5836_v58 = vadd.f32 %v5835_v36, %v14121_v59  ;;  %v6015_v31 = vpack.c.bf16 %v5993_v27, %v5991_v48  ;;  %v5947_v9 = vadd.f32 %v14163_v24, %v5834_v32  ;;  %v5970_v8 = vpop.f32.mrf.mxu1  ;;  %v10793_v36 = vld [vmem:[%s11285_s2 + $0x168] ss:$16 sps:$4 sm:$0xff]  }
 0x72c   : > { %v5837_v20 = vpop.f32.mrf.mxu0 }
 0x72d   : > { %v5838_v5 = vadd.f32 %v5837_v20, %v14126_v56  ;;  %v6016_v55 = vpack.c.bf16 %v5994_v50, %v5992_v40  ;;  %6922 = vmatpush1.bf16.msra.mxu1 %v10763_v14  ;;  %v5949_v13 = vadd.f32 %v14171_v2, %v5836_v58  ;;  %v5995_v3 = vmax.f32 %v5947_v9, 0.0  ;;  %v5972_v20 = vpop.f32.mrf.mxu1  ;;  %v10807_v9 = vld [vmem:[%s11285_s2 + $0x12c] ss:$16 sps:$4 sm:$0xff]  }
 0x72e   : > { %v5839_v19 = vpop.f32.mrf.mxu0  ;;  %6923 = vmatprep.subr.bf16.mxu1 %v10771_v34 }
 0x72f   : > { %v5951_v25 = vadd.f32 %v14178_v4, %v5838_v5  ;;  %v5840_v11 = vadd.f32 %v5839_v19, %v14121_v59  ;;  %6299 = vmatprep.mubr.bf16.mxu1 %v6016_v55  ;;  %v5996_v2 = vmax.f32 %v5949_v13, 0.0  ;;  %v10796_v13 = vld [vmem:[%s11285_s2 + $0x140] ss:$16 sps:$4 sm:$0xff]  }
 0x730   : > { %v5843_v43 = vpop.f32.mrf.mxu0  ;;  %6300 = vmatmul.mubr.bf16.gmra.mxu1 %v6015_v31 }
 0x731   : > { %v5953_v26 = vadd.f32 %v5952_v52, %v5840_v11  ;;  %6924 = vmatpush2.bf16.msra.mxu1 %v10769_v33  ;;  %v5997_v10 = vmax.f32 %v5951_v25, 0.0  ;;  %v5844_v41 = vadd.f32 %v5843_v43, %v14126_v56  ;;  %v10799_v25 = vld [vmem:[%s11285_s2 + $0x148] ss:$16 sps:$4 sm:$0xff]   ;;  %v10804_v11 = vld [vmem:[%s11285_s2 + $0x124] ss:$16 sps:$4 sm:$0xff]  }
 0x732   : > { %v5845_v29 = vpop.f32.mrf.mxu0  ;;  %6925 = vmatprep.subr.bf16.mxu1 %v10777_v62  ;;  %v10801_v62 = vld [vmem:[%s11285_s2 + $0x14c] ss:$16 sps:$4 sm:$0xff]   ;;  %v10802_v43 = vld [vmem:[%s11285_s2 + $0x120] ss:$16 sps:$4 sm:$0xff]  }
 0x733   : > { %v5998_v51 = vmax.f32 %v5953_v26, 0.0  ;;  %v5846_v4 = vadd.f32 %v5845_v29, %v14121_v59  ;;  %v6017_v12 = vpack.c.bf16 %v5997_v10, %v5995_v3  ;;  %v5957_v35 = vadd.f32 %v14192_v7, %v5844_v41  ;;  %v10810_v26 = vld [vmem:[%s11285_s2 + $0x104] ss:$16 sps:$4 sm:$0xff]   ;;  %v10808_v10 = vld [vmem:[%s11285_s2 + $0x100] ss:$16 sps:$4 sm:$0xff]  }
 0x734   : > { %v5847_v24 = vpop.f32.mrf.mxu0  ;;  %v10811_v29 = vld [vmem:[%s11285_s2 + $0x108] ss:$16 sps:$4 sm:$0xff]  }
 0x735   : > { %v5848_v6 = vadd.f32 %v5847_v24, %v14126_v56  ;;  %v6018_v52 = vpack.c.bf16 %v5998_v51, %v5996_v2  ;;  %6926 = vmatpush2.bf16.msra.mxu1 %v10775_v1  ;;  %v5959_v0 = vadd.f32 %v5958_v38, %v5846_v4  ;;  %v5999_v44 = vmax.f32 %v5957_v35, 0.0  ;;  %v10813_v1 = vld [vmem:[%s11285_s2 + $0x10c] ss:$16 sps:$4 sm:$0xff]   ;;  %v6055_v51 = vld [vmem:[%s11280_s28] sm:$0x3] }
 0x736   : > { %v5849_v18 = vpop.f32.mrf.mxu0  ;;  %6927 = vmatprep.subr.bf16.mxu1 %v10783_v42  ;;  %v10816_v42 = vld [vmem:[%s11295_s24 + $0xe4] ss:$16 sps:$4 sm:$0xff]   ;;  %v14243_v2 = vld [vmem:[%s11295_s24 + $0xec] ss:$16 sps:$4 sm:$0xff]   ;;  %v14248_v3 = vrot.slane %v6055_v51, %v14112_v47  ;;  %v14251_v41 = vrot.slane %v6055_v51, %v14115_v23 }
 0x737   : > { %v5961_v46 = vadd.f32 %v5960_v22, %v5848_v6  ;;  %v5850_v63 = vadd.f32 %v5849_v18, %v14121_v59  ;;  %6309 = vmatprep.mubr.bf16.mxu1 %v6018_v52  ;;  %v6000_v61 = vmax.f32 %v5959_v0, 0.0 }
 0x738   : > { %v5853_v37 = vpop.f32.mrf.mxu0  ;;  %6310 = vmatmul.mubr.bf16.gmra.mxu1 %v6017_v12 }
 0x739   : > { %v5963_v45 = vadd.f32 %v5962_v60, %v5850_v63  ;;  %6928 = vmatpush2.bf16.msra.mxu1 %v10781_v53  ;;  %v6001_v17 = vmax.f32 %v5961_v46, 0.0  ;;  %v5854_v38 = vadd.f32 %v5853_v37, %v14126_v56  ;;  %v10805_v60 = vld [vmem:[%s11285_s2 + $0x128] ss:$16 sps:$4 sm:$0xff]  }
 0x73a   : > { %v5855_v57 = vpop.f32.mrf.mxu0  ;;  %6929 = vmatprep.subr.bf16.mxu1 %v10789_v39 }
 0x73b   : > { %v6002_v28 = vmax.f32 %v5963_v45, 0.0  ;;  %v5856_v49 = vadd.f32 %v5855_v57, %v14121_v59  ;;  %v6019_v40 = vpack.c.bf16 %v6001_v17, %v5999_v44  ;;  %v5967_v32 = vadd.f32 %v5966_v54, %v5854_v38  ;;  %v10814_v45 = vld [vmem:[%s11295_s24 + $0xe0] ss:$16 sps:$4 sm:$0xff]  }
 0x73c   : > { %v5857_v7 = vpop.f32.mrf.mxu0 }
 0x73d   : > { %v5858_v14 = vadd.f32 %v5857_v7, %v14126_v56  ;;  %v6020_v27 = vpack.c.bf16 %v6002_v28, %v6000_v61  ;;  %6930 = vmatpush2.bf16.msra.mxu1 %v10787_v21  ;;  %v5969_v50 = vadd.f32 %v5968_v15, %v5856_v49  ;;  %v6003_v33 = vmax.f32 %v5967_v32, 0.0  ;;  %v14261_v21 = vld [vmem:[%s11295_s24 + $0xe8] ss:$16 sps:$4 sm:$0xff]   ;;  %v14267_v61 = vld [vmem:[%s11295_s24 + $0xcc] ss:$16 sps:$4 sm:$0xff]  }
 0x73e   : > { %v5859_v34 = vpop.f32.mrf.mxu0  ;;  %6931 = vmatprep.subr.bf16.mxu1 %v10795_v16  ;;  %v10822_v16 = vld [vmem:[%s11295_s24 + $0xc4] ss:$16 sps:$4 sm:$0xff]   ;;  %v10820_v7 = vld [vmem:[%s11295_s24 + $0xc0] ss:$16 sps:$4 sm:$0xff]  }
 0x73f   : > { %v5971_v58 = vadd.f32 %v5970_v8, %v5858_v14  ;;  %v5860_v48 = vadd.f32 %v5859_v34, %v14121_v59  ;;  %6319 = vmatprep.mubr.bf16.mxu1 %v6020_v27  ;;  %v6004_v5 = vmax.f32 %v5969_v50, 0.0  ;;  %v10798_v59 = vld [vmem:[%s11285_s2 + $0x144] ss:$16 sps:$4 sm:$0xff]   ;;  %v14280_v14 = vld [vmem:[%s11295_s24 + $0xc8] ss:$16 sps:$4 sm:$0xff]  }
 0x740   : > { %6320 = vmatmul.mubr.bf16.gmra.mxu1 %v6019_v40  ;;  %6820 = vmatprep.subr.bf16.mxu0 %v10798_v59  ;;  %v10828_v34 = vld [vmem:[%s11295_s24 + $0xa4] ss:$16 sps:$4 sm:$0xff]   ;;  %v14285_v40 = vld [vmem:[%s11295_s24 + $0xac] ss:$16 sps:$4 sm:$0xff]  }
 0x741   : > { %v5973_v22 = vadd.f32 %v5972_v20, %v5860_v48  ;;  %6932 = vmatpush2.bf16.msra.mxu1 %v10793_v36  ;;  %v6005_v56 = vmax.f32 %v5971_v58, 0.0  ;;  %6821 = vmatpush2.bf16.msra.mxu0 %v10796_v13 }
 0x742   : > { %6933 = vmatprep.subr.bf16.mxu1 %v10801_v62  ;;  %6822 = vmatprep.subr.bf16.mxu0 %v10804_v11  ;;  %v10832_v11 = vld [vmem:[%s11295_s24 + $0x80] ss:$16 sps:$4 sm:$0xff]  }
 0x743   : > { %v6006_v55 = vmax.f32 %v5973_v22, 0.0  ;;  %v6021_v31 = vpack.c.bf16 %v6005_v56, %v6003_v33  ;;  %v10826_v22 = vld [vmem:[%s11295_s24 + $0xa0] ss:$16 sps:$4 sm:$0xff]   ;;  %v14292_v56 = vld [vmem:[%s11295_s24 + $0xa8] ss:$16 sps:$4 sm:$0xff]  }
 0x744   : > { %v10834_v33 = vld [vmem:[%s11295_s24 + $0x84] ss:$16 sps:$4 sm:$0xff]  }
 0x745   : > { %v6022_v19 = vpack.c.bf16 %v6006_v55, %v6004_v5  ;;  %6934 = vmatpush2.bf16.msra.mxu1 %v10799_v25  ;;  %6823 = vmatpush2.bf16.msra.mxu0 %v10802_v43 }
 0x746   : > { %6935 = vmatprep.subr.bf16.mxu1 %v10807_v9  ;;  %6824 = vmatprep.subr.bf16.mxu0 %v10810_v26  ;;  %v14312_v9 = vld [vmem:[%s11295_s24 + $0x88] ss:$16 sps:$4 sm:$0xff]   ;;  %v10840_v26 = vld [vmem:[%s11295_s24 + $0x64] ss:$16 sps:$4 sm:$0xff]  }
 0x747   : > { %6329 = vmatprep.mubr.bf16.mxu1 %v6022_v19  ;;  %v14299_v19 = vld [vmem:[%s11295_s24 + $0x8c] ss:$16 sps:$4 sm:$0xff]  }
 0x748   : > { %6330 = vmatmul.mubr.bf16.gmra.mxu1 %v6021_v31 }
 0x749   : > { %6936 = vmatpush2.bf16.msra.mxu1 %v10805_v60  ;;  %6825 = vmatpush2.bf16.msra.mxu0 %v10808_v10 }
 0x74a   : > { %6937 = vmatprep.subr.bf16.mxu1 %v10813_v1  ;;  %7426 = vmatprep.subr.bf16.mxu0 %v10816_v42  ;;  %v14317_v1 = vld [vmem:[%s11295_s24 + $0x6c] ss:$16 sps:$4 sm:$0xff]  }
 0x74d   : > { %6938 = vmatpush2.bf16.msra.mxu1 %v10811_v29 }
 0x74e   : > { %9457 = vmatprep.subr.bf16.mxu1 %v14243_v2 }
 0x7d0   : > { %v6261_v4 = vpop.f32.mrf.mxu1 }
 0x7d1   : > { %v6262_v53 = vadd.f32 %v6261_v4, %v14251_v41 }
 0x7d2   : > { %v6263_v24 = vpop.f32.mrf.mxu1 }
 0x7d3   : > { %v6264_v6 = vadd.f32 %v6263_v24, %v14248_v3  ;;  %v6340_v35 = vmax.f32 %v6262_v53, 0.0  ;;  %v10838_v24 = vld [vmem:[%s11295_s24 + $0x60] ss:$16 sps:$4 sm:$0xff]   ;;  %v10846_v53 = vld [vmem:[%s11295_s24 + $0x44] ss:$16 sps:$4 sm:$0xff]  }
 0x7d4   : > { %v6265_v54 = vpop.f32.mrf.mxu1 }
 0x7d5   : > { %v6266_v52 = vadd.f32 %v6265_v54, %v14251_v41  ;;  %v6341_v46 = vmax.f32 %v6264_v6, 0.0  ;;  %v14324_v54 = vld [vmem:[%s11295_s24 + $0x68] ss:$16 sps:$4 sm:$0xff]  }
 0x7d6   : > { %v6267_v18 = vpop.f32.mrf.mxu1 }
 0x7d7   : > { %v6268_v12 = vadd.f32 %v6267_v18, %v14248_v3  ;;  %v6342_v39 = vmax.f32 %v6266_v52, 0.0  ;;  %v14331_v18 = vld [vmem:[%s11295_s24 + $0x4c] ss:$16 sps:$4 sm:$0xff]  }
 0x7d8   : > { %v6271_v0 = vpop.f32.mrf.mxu1 }
 0x7d9   : > { %v6343_v63 = vmax.f32 %v6268_v12, 0.0  ;;  %v14263_v17 = vpack.c.bf16 %v6342_v39, %v6340_v35  ;;  %v6272_v44 = vadd.f32 %v6271_v0, %v14251_v41  ;;  %v10844_v35 = vld [vmem:[%s11295_s24 + $0x40] ss:$16 sps:$4 sm:$0xff]  }
 0x7da   : > { %v6273_v15 = vpop.f32.mrf.mxu1 }
 0x7db   : > { %v14257_v37 = vpack.c.bf16 %v6343_v63, %v6341_v46  ;;  %v6274_v28 = vadd.f32 %v6273_v15, %v14248_v3  ;;  %v6344_v48 = vmax.f32 %v6272_v44, 0.0  ;;  %v14344_v15 = vld [vmem:[%s11295_s24 + $0x48] ss:$16 sps:$4 sm:$0xff]  }
 0x7dc   : > { %v6275_v57 = vpop.f32.mrf.mxu1 }
 0x7dd   : > { %v6276_v49 = vadd.f32 %v6275_v57, %v14251_v41  ;;  %6826 = vmatprep.mubr.bf16.mxu0 %v14257_v37  ;;  %6939 = vmatprep.mubr.bf16.mxu1 %v14257_v37  ;;  %v6345_v50 = vmax.f32 %v6274_v28, 0.0  ;;  %v14349_v28 = vld [vmem:[%s11295_s24 + $0x2c] ss:$16 sps:$4 sm:$0xff]  }
 0x7de   : > { %v6277_v38 = vpop.f32.mrf.mxu1  ;;  %6827 = vmatmul.mubr.bf16.vlgmr.msra.gmra.mxu0 %v14263_v17  ;;  %6940 = vmatmul.mubr.bf16.vlgmr.msra.gmra.mxu1 %v14263_v17 }
 0x7df   : > { %v6278_v8 = vadd.f32 %v6277_v38, %v14248_v3  ;;  %7427 = vmatpush1.bf16.msra.mxu0 %v10814_v45  ;;  %9473 = vmatpush1.bf16.msra.mxu1 %v14261_v21  ;;  %v6346_v27 = vmax.f32 %v6276_v49, 0.0 }
 0x7e0   : > { %v6281_v36 = vpop.f32.mrf.mxu1  ;;  %7428 = vmatprep.subr.bf16.mxu0 %v10822_v16  ;;  %9458 = vmatprep.subr.bf16.mxu1 %v14267_v61  ;;  %v10852_v16 = vld [vmem:[%s11295_s24 + $0x24] ss:$16 sps:$4 sm:$0xff]  }
 0x7e1   : > { %v6347_v58 = vmax.f32 %v6278_v8, 0.0  ;;  %v14294_v5 = vpack.c.bf16 %v6346_v27, %v6344_v48  ;;  %v6282_v62 = vadd.f32 %v6281_v36, %v14251_v41  ;;  %v10850_v27 = vld [vmem:[%s11295_s24 + $0x20] ss:$16 sps:$4 sm:$0xff]   ;;  %v14356_v36 = vld [vmem:[%s11295_s24 + $0x28] ss:$16 sps:$4 sm:$0xff]  }
 0x7e2   : > { %v6283_v32 = vpop.f32.mrf.mxu1  ;;  %v14363_v48 = vld [vmem:[%s11295_s24 + $0xc] ss:$16 sps:$4 sm:$0xff]  }
 0x7e3   : > { %v14287_v20 = vpack.c.bf16 %v6347_v58, %v6345_v50  ;;  %7429 = vmatpush1.bf16.msra.mxu0 %v10820_v7  ;;  %9474 = vmatpush1.bf16.msra.mxu1 %v14280_v14  ;;  %v6284_v31 = vadd.f32 %v6283_v32, %v14248_v3  ;;  %v6348_v42 = vmax.f32 %v6282_v62, 0.0  ;;  %v10858_v58 = vld [vmem:[%s11295_s24 + $0x4] ss:$16 sps:$4 sm:$0xff]   ;;  %v14376_v62 = vld [vmem:[%s11295_s24 + $0x8] ss:$16 sps:$4 sm:$0xff]  }
 0x7e4   : > { %v6285_v55 = vpop.f32.mrf.mxu1  ;;  %7430 = vmatprep.subr.bf16.mxu0 %v10828_v34  ;;  %9459 = vmatprep.subr.bf16.mxu1 %v14285_v40 }
 0x7e5   : > { %v6286_v59 = vadd.f32 %v6285_v55, %v14251_v41  ;;  %6836 = vmatprep.mubr.bf16.mxu0 %v14287_v20  ;;  %6949 = vmatprep.mubr.bf16.mxu1 %v14287_v20  ;;  %v6349_v10 = vmax.f32 %v6284_v31, 0.0 }
 0x7e6   : > { %v6287_v13 = vpop.f32.mrf.mxu1  ;;  %6837 = vmatmul.mubr.bf16.gmra.mxu0 %v14294_v5  ;;  %6950 = vmatmul.mubr.bf16.gmra.mxu1 %v14294_v5 }
 0x7e7   : > { %v6288_v25 = vadd.f32 %v6287_v13, %v14248_v3  ;;  %7431 = vmatpush1.bf16.msra.mxu0 %v10826_v22  ;;  %9475 = vmatpush1.bf16.msra.mxu1 %v14292_v56  ;;  %v6350_v43 = vmax.f32 %v6286_v59, 0.0  ;;  %v10856_v59 = vld [vmem:[%s11295_s24] ss:$16 sps:$4 sm:$0xff]  }
 0x7e8   : > { %v6291_v60 = vpop.f32.mrf.mxu1  ;;  %7432 = vmatprep.subr.bf16.mxu0 %v10834_v33  ;;  %9460 = vmatprep.subr.bf16.mxu1 %v14299_v19 }
 0x7e9   : > { %v6351_v29 = vmax.f32 %v6288_v25, 0.0  ;;  %v14326_v6 = vpack.c.bf16 %v6350_v43, %v6348_v42  ;;  %v6292_v0 = vadd.f32 %v6291_v60, %v14251_v41  ;;  %v14381_v43 = vld [vmem:[%s11295_s24 + $0x1ec] ss:$16 sps:$4 sm:$0xff]  }
 0x7ea   : > { %v6293_v51 = vpop.f32.mrf.mxu1 }
 0x7eb   : > { %v14319_v4 = vpack.c.bf16 %v6351_v29, %v6349_v10  ;;  %7433 = vmatpush1.bf16.msra.mxu0 %v10832_v11  ;;  %9476 = vmatpush1.bf16.msra.mxu1 %v14312_v9  ;;  %v6294_v12 = vadd.f32 %v6293_v51, %v14248_v3  ;;  %v6352_v38 = vmax.f32 %v6292_v0, 0.0  ;;  %v10864_v11 = vld [vmem:[%s11295_s24 + $0x1e4] ss:$16 sps:$4 sm:$0xff]   ;;  %v10862_v51 = vld [vmem:[%s11295_s24 + $0x1e0] ss:$16 sps:$4 sm:$0xff]  }
 0x7ec   : > { %v6295_v52 = vpop.f32.mrf.mxu1  ;;  %7434 = vmatprep.subr.bf16.mxu0 %v10840_v26  ;;  %9461 = vmatprep.subr.bf16.mxu1 %v14317_v1 }
 0x7ed   : > { %v6296_v39 = vadd.f32 %v6295_v52, %v14251_v41  ;;  %6846 = vmatprep.mubr.bf16.mxu0 %v14319_v4  ;;  %6959 = vmatprep.mubr.bf16.mxu1 %v14319_v4  ;;  %v6353_v49 = vmax.f32 %v6294_v12, 0.0  ;;  %v10870_v12 = vld [vmem:[%s11295_s24 + $0x1c4] ss:$16 sps:$4 sm:$0xff]  }
 0x7ee   : > { %v6297_v46 = vpop.f32.mrf.mxu1  ;;  %6847 = vmatmul.mubr.bf16.gmra.mxu0 %v14326_v6  ;;  %6960 = vmatmul.mubr.bf16.gmra.mxu1 %v14326_v6 }
 0x7ef   : > { %v6298_v63 = vadd.f32 %v6297_v46, %v14248_v3  ;;  %7435 = vmatpush1.bf16.msra.mxu0 %v10838_v24  ;;  %9477 = vmatpush1.bf16.msra.mxu1 %v14324_v54  ;;  %v6354_v45 = vmax.f32 %v6296_v39, 0.0  ;;  %v14388_v24 = vld [vmem:[%s11295_s24 + $0x1e8] ss:$16 sps:$4 sm:$0xff]   ;;  %v14395_v39 = vld [vmem:[%s11295_s24 + $0x1cc] ss:$16 sps:$4 sm:$0xff]  }
 0x7f0   : > { %v6301_v57 = vpop.f32.mrf.mxu1  ;;  %7436 = vmatprep.subr.bf16.mxu0 %v10846_v53  ;;  %9462 = vmatprep.subr.bf16.mxu1 %v14331_v18 }
 0x7f1   : > { %v6355_v44 = vmax.f32 %v6298_v63, 0.0  ;;  %v14358_v34 = vpack.c.bf16 %v6354_v45, %v6352_v38  ;;  %v6302_v55 = vadd.f32 %v6301_v57, %v14251_v41  ;;  %v10868_v57 = vld [vmem:[%s11295_s24 + $0x1c0] ss:$16 sps:$4 sm:$0xff]   ;;  %v10876_v38 = vld [vmem:[%s11295_s24 + $0x1a4] ss:$16 sps:$4 sm:$0xff]  }
 0x7f2   : > { %v6303_v8 = vpop.f32.mrf.mxu1 }
 0x7f3   : > { %v14351_v7 = vpack.c.bf16 %v6355_v44, %v6353_v49  ;;  %7437 = vmatpush1.bf16.msra.mxu0 %v10844_v35  ;;  %9478 = vmatpush1.bf16.msra.mxu1 %v14344_v15  ;;  %v6304_v32 = vadd.f32 %v6303_v8, %v14248_v3  ;;  %v6356_v10 = vmax.f32 %v6302_v55, 0.0  ;;  %v14413_v8 = vld [vmem:[%s11295_s24 + $0x1ac] ss:$16 sps:$4 sm:$0xff]   ;;  %v10874_v55 = vld [vmem:[%s11295_s24 + $0x1a0] ss:$16 sps:$4 sm:$0xff]  }
 0x7f4   : > { %v6305_v50 = vpop.f32.mrf.mxu1  ;;  %7438 = vmatprep.subr.bf16.mxu0 %v10852_v16  ;;  %9463 = vmatprep.subr.bf16.mxu1 %v14349_v28  ;;  %v14408_v16 = vld [vmem:[%s11295_s24 + $0x1c8] ss:$16 sps:$4 sm:$0xff]  }
 0x7f5   : > { %v6306_v22 = vadd.f32 %v6305_v50, %v14251_v41  ;;  %6856 = vmatprep.mubr.bf16.mxu0 %v14351_v7  ;;  %6969 = vmatprep.mubr.bf16.mxu1 %v14351_v7  ;;  %v6357_v60 = vmax.f32 %v6304_v32, 0.0 }
 0x7f6   : > { %v6307_v33 = vpop.f32.mrf.mxu1  ;;  %6857 = vmatmul.mubr.bf16.gmra.mxu0 %v14358_v34  ;;  %6970 = vmatmul.mubr.bf16.gmra.mxu1 %v14358_v34 }
 0x7f7   : > { %v6308_v31 = vadd.f32 %v6307_v33, %v14248_v3  ;;  %7439 = vmatpush1.bf16.msra.mxu0 %v10850_v27  ;;  %9479 = vmatpush1.bf16.msra.mxu1 %v14356_v36  ;;  %v6358_v13 = vmax.f32 %v6306_v22, 0.0  ;;  %v14420_v33 = vld [vmem:[%s11295_s24 + $0x1a8] ss:$16 sps:$4 sm:$0xff]  }
 0x7f8   : > { %v6311_v25 = vpop.f32.mrf.mxu1  ;;  %7440 = vmatprep.subr.bf16.mxu0 %v10858_v58  ;;  %9464 = vmatprep.subr.bf16.mxu1 %v14363_v48 }
 0x7f9   : > { %v6359_v26 = vmax.f32 %v6308_v31, 0.0  ;;  %v14390_v52 = vpack.c.bf16 %v6358_v13, %v6356_v10  ;;  %v6312_v63 = vadd.f32 %v6311_v25, %v14251_v41  ;;  %v10882_v13 = vld [vmem:[%s11295_s24 + $0x184] ss:$16 sps:$4 sm:$0xff]   ;;  %v14427_v25 = vld [vmem:[%s11295_s24 + $0x18c] ss:$16 sps:$4 sm:$0xff]  }
 0x7fa   : > { %v6313_v29 = vpop.f32.mrf.mxu1 }
 0x7fb   : > { %v14383_v42 = vpack.c.bf16 %v6359_v26, %v6357_v60  ;;  %7441 = vmatpush1.bf16.msra.mxu0 %v10856_v59  ;;  %9480 = vmatpush1.bf16.msra.mxu1 %v14376_v62  ;;  %v6314_v0 = vadd.f32 %v6313_v29, %v14248_v3  ;;  %v6360_v58 = vmax.f32 %v6312_v63, 0.0  ;;  %v14445_v63 = vld [vmem:[%s11295_s24 + $0x16c] ss:$16 sps:$4 sm:$0xff]  }
 0x7fc   : > { %v6315_v53 = vpop.f32.mrf.mxu1  ;;  %7442 = vmatprep.subr.bf16.mxu0 %v10864_v11  ;;  %9465 = vmatprep.subr.bf16.mxu1 %v14381_v43 }
 0x7fd   : > { %v6316_v46 = vadd.f32 %v6315_v53, %v14251_v41  ;;  %6866 = vmatprep.mubr.bf16.mxu0 %v14383_v42  ;;  %6979 = vmatprep.mubr.bf16.mxu1 %v14383_v42  ;;  %v6361_v27 = vmax.f32 %v6314_v0, 0.0  ;;  %v14440_v53 = vld [vmem:[%s11295_s24 + $0x188] ss:$16 sps:$4 sm:$0xff]  }
 0x7fe   : > { %v6317_v35 = vpop.f32.mrf.mxu1  ;;  %6867 = vmatmul.mubr.bf16.gmra.mxu0 %v14390_v52  ;;  %6980 = vmatmul.mubr.bf16.gmra.mxu1 %v14390_v52 }
 0x7ff   : > { %v6318_v45 = vadd.f32 %v6317_v35, %v14248_v3  ;;  %7443 = vmatpush2.bf16.msra.mxu0 %v10862_v51  ;;  %9481 = vmatpush2.bf16.msra.mxu1 %v14388_v24  ;;  %v6362_v49 = vmax.f32 %v6316_v46, 0.0  ;;  %v10880_v51 = vld [vmem:[%s11295_s24 + $0x180] ss:$16 sps:$4 sm:$0xff]   ;;  %v10888_v46 = vld [vmem:[%s11295_s24 + $0x164] ss:$16 sps:$4 sm:$0xff]  }
 0x800   : > { %v6321_v44 = vpop.f32.mrf.mxu1  ;;  %7444 = vmatprep.subr.bf16.mxu0 %v10870_v12  ;;  %9466 = vmatprep.subr.bf16.mxu1 %v14395_v39 }
 0x801   : > { %v6363_v50 = vmax.f32 %v6318_v45, 0.0  ;;  %v14422_v31 = vpack.c.bf16 %v6362_v49, %v6360_v58  ;;  %v6322_v26 = vadd.f32 %v6321_v44, %v14251_v41 }
 0x802   : > { %v6323_v32 = vpop.f32.mrf.mxu1 }
 0x803   : > { %v14415_v22 = vpack.c.bf16 %v6363_v50, %v6361_v27  ;;  %7445 = vmatpush2.bf16.msra.mxu0 %v10868_v57  ;;  %9482 = vmatpush2.bf16.msra.mxu1 %v14408_v16  ;;  %v6324_v11 = vadd.f32 %v6323_v32, %v14248_v3  ;;  %v6364_v57 = vmax.f32 %v6322_v26, 0.0  ;;  %v14452_v27 = vld [vmem:[%s11295_s24 + $0x168] ss:$16 sps:$4 sm:$0xff]   ;;  %v10894_v32 = vld [vmem:[%s11295_s24 + $0x144] ss:$16 sps:$4 sm:$0xff]  }
 0x804   : > { %v6325_v59 = vpop.f32.mrf.mxu1  ;;  %7446 = vmatprep.subr.bf16.mxu0 %v10876_v38  ;;  %9467 = vmatprep.subr.bf16.mxu1 %v14413_v8  ;;  %v10886_v38 = vld [vmem:[%s11295_s24 + $0x160] ss:$16 sps:$4 sm:$0xff]  }
 0x805   : > { %v6326_v60 = vadd.f32 %v6325_v59, %v14251_v41  ;;  %6876 = vmatprep.mubr.bf16.mxu0 %v14415_v22  ;;  %6989 = vmatprep.mubr.bf16.mxu1 %v14415_v22  ;;  %v6365_v35 = vmax.f32 %v6324_v11, 0.0 }
 0x806   : > { %v6327_v10 = vpop.f32.mrf.mxu1  ;;  %6877 = vmatmul.mubr.bf16.gmra.mxu0 %v14422_v31  ;;  %6990 = vmatmul.mubr.bf16.gmra.mxu1 %v14422_v31 }
 0x807   : > { %v6328_v29 = vadd.f32 %v6327_v10, %v14248_v3  ;;  %7447 = vmatpush2.bf16.msra.mxu0 %v10874_v55  ;;  %9483 = vmatpush2.bf16.msra.mxu1 %v14420_v33  ;;  %v6366_v12 = vmax.f32 %v6326_v60, 0.0  ;;  %v14459_v55 = vld [vmem:[%s11295_s24 + $0x14c] ss:$16 sps:$4 sm:$0xff]   ;;  %v10892_v10 = vld [vmem:[%s11295_s24 + $0x140] ss:$16 sps:$4 sm:$0xff]  }
 0x808   : > { %v6331_v0 = vpop.f32.mrf.mxu1  ;;  %7448 = vmatprep.subr.bf16.mxu0 %v10882_v13  ;;  %9468 = vmatprep.subr.bf16.mxu1 %v14427_v25 }
 0x809   : > { %v6367_v45 = vmax.f32 %v6328_v29, 0.0  ;;  %v14454_v50 = vpack.c.bf16 %v6366_v12, %v6364_v57  ;;  %v6332_v11 = vadd.f32 %v6331_v0, %v14251_v41  ;;  %v14472_v29 = vld [vmem:[%s11295_s24 + $0x148] ss:$16 sps:$4 sm:$0xff]   ;;  %v14477_v12 = vld [vmem:[%s11295_s24 + $0x12c] ss:$16 sps:$4 sm:$0xff]  }
 0x80a   : > { %v6333_v49 = vpop.f32.mrf.mxu1 }
 0x80b   : > { %v14447_v44 = vpack.c.bf16 %v6367_v45, %v6365_v35  ;;  %7449 = vmatpush2.bf16.msra.mxu0 %v10880_v51  ;;  %9484 = vmatpush2.bf16.msra.mxu1 %v14440_v53  ;;  %v6334_v59 = vadd.f32 %v6333_v49, %v14248_v3  ;;  %v10898_v45 = vld [vmem:[%s11295_s24 + $0x120] ss:$16 sps:$4 sm:$0xff]   ;;  %v14486_v49 = vld [vmem:[%s11295_s24 + $0x128] ss:$16 sps:$4 sm:$0xff]  }
 0x80c   : > { %v6335_v58 = vpop.f32.mrf.mxu1  ;;  %7450 = vmatprep.subr.bf16.mxu0 %v10888_v46  ;;  %9469 = vmatprep.subr.bf16.mxu1 %v14445_v63 }
 0x80d   : > { %v6336_v13 = vadd.f32 %v6335_v58, %v14251_v41  ;;  %6886 = vmatprep.mubr.bf16.mxu0 %v14447_v44  ;;  %6999 = vmatprep.mubr.bf16.mxu1 %v14447_v44  ;;  %v10900_v41 = vld [vmem:[%s11295_s24 + $0x124] ss:$16 sps:$4 sm:$0xff]   ;;  %v6369_v0 = vmax.f32 %v6334_v59, 0.0  ;;  %v14493_v58 = vld [vmem:[%s11295_s24 + $0x10c] ss:$16 sps:$4 sm:$0xff]  }
 0x80e   : > { %v6337_v60 = vpop.f32.mrf.mxu1  ;;  %6887 = vmatmul.mubr.bf16.gmra.mxu0 %v14454_v50  ;;  %7000 = vmatmul.mubr.bf16.gmra.mxu1 %v14454_v50  ;;  %v10907_v59 = vld [vmem:[%s11295_s24 + $0x108] ss:$16 sps:$4 sm:$0xff]  }
 0x80f   : > { %v6338_v26 = vadd.f32 %v6337_v60, %v14248_v3  ;;  %7451 = vmatpush2.bf16.msra.mxu0 %v10886_v38  ;;  %9485 = vmatpush2.bf16.msra.mxu1 %v14452_v27  ;;  %v6370_v51 = vmax.f32 %v6336_v13, 0.0  ;;  %v6368_v3 = vmax.f32 %v6332_v11, 0.0  ;;  %v10906_v38 = vld [vmem:[%s11295_s24 + $0x104] ss:$16 sps:$4 sm:$0xff]  }
 0x810   : > { %7452 = vmatprep.subr.bf16.mxu0 %v10894_v32  ;;  %9470 = vmatprep.subr.bf16.mxu1 %v14459_v55  ;;  %v10904_v32 = vld [vmem:[%s11295_s24 + $0x100] ss:$16 sps:$4 sm:$0xff]  }
 0x811   : > { %v6371_v46 = vmax.f32 %v6338_v26, 0.0  ;;  %v14483_v57 = vpack.c.bf16 %v6370_v51, %v6368_v3 }
 0x813   : > { %v14479_v35 = vpack.c.bf16 %v6371_v46, %v6369_v0  ;;  %7453 = vmatpush2.bf16.msra.mxu0 %v10892_v10  ;;  %9486 = vmatpush2.bf16.msra.mxu1 %v14472_v29 }
 0x814   : > { %7454 = vmatprep.subr.bf16.mxu0 %v10900_v41  ;;  %9471 = vmatprep.subr.bf16.mxu1 %v14477_v12 }
 0x815   : > { %6896 = vmatprep.mubr.bf16.mxu0 %v14479_v35  ;;  %7009 = vmatprep.mubr.bf16.mxu1 %v14479_v35 }
 0x816   : > { %6897 = vmatmul.mubr.bf16.gmra.mxu0 %v14483_v57  ;;  %7010 = vmatmul.mubr.bf16.gmra.mxu1 %v14483_v57 }
 0x817   : > { %7455 = vmatpush2.bf16.msra.mxu0 %v10898_v45  ;;  %7458 = vmatprep.mubr.bf16.mxu0 %v14257_v37 }
 0x818   : > { %9487 = vmatpush2.bf16.msra.mxu1 %v14486_v49  ;;  %7591 = vmatprep.mubr.bf16.mxu1 %v14319_v4 }
 0x819   : > { %7456 = vmatprep.subr.bf16.mxu0 %v10906_v38  ;;  %9472 = vmatprep.subr.bf16.mxu1 %v14493_v58 }
 0x81b   : > { %7457 = vmatpush2.bf16.msra.mxu0 %v10904_v32 }
 0x81c   : > { %9488 = vmatpush2.bf16.msra.mxu1 %v10907_v59  ;;  %7539 = vmatprep.subr.bf16.mxu0 %v14243_v2  ;;  %v6464_v2 = vsub.s32 2, %v14109_v30 }
 0x81e   : > { %7459 = vmatmul.mubr.bf16.vlgmr.msra.gmra.mxu0 %v14263_v17 }
 0x81f   : > { %7592 = vmatmul.mubr.bf16.vlgmr.msra.gmra.mxu1 %v14326_v6  ;;  %7468 = vmatprep.mubr.bf16.mxu0 %v14287_v20 }
 0x820   : > { %7540 = vmatpush1.bf16.msra.mxu0 %v14261_v21  ;;  %7601 = vmatprep.mubr.bf16.mxu1 %v14351_v7  ;;  %v6452_v21 = vld [vmem:[%s11290_s21] sm:$0xf] }
 0x821   : > { %7541 = vmatprep.subr.bf16.mxu0 %v14267_v61  ;;  %v6468_v61 = vsub.s32 3, %v14109_v30 }
 0x824   : > { %7542 = vmatpush1.bf16.msra.mxu0 %v14280_v14  ;;  %v14568_v14 = vrot.slane %v6452_v21, %v14115_v23 }
 0x825   : > { %7543 = vmatprep.subr.bf16.mxu0 %v14285_v40  ;;  %v14575_v40 = vrot.slane %v6452_v21, %v14112_v47 }
 0x826   : > { %7469 = vmatmul.mubr.bf16.gmra.mxu0 %v14294_v5 }
 0x827   : > { %7602 = vmatmul.mubr.bf16.gmra.mxu1 %v14358_v34  ;;  %7478 = vmatprep.mubr.bf16.mxu0 %v14319_v4 }
 0x828   : > { %7544 = vmatpush1.bf16.msra.mxu0 %v14292_v56  ;;  %7611 = vmatprep.mubr.bf16.mxu1 %v14383_v42 }
 0x829   : > { %7545 = vmatprep.subr.bf16.mxu0 %v14299_v19 }
 0x82c   : > { %7546 = vmatpush1.bf16.msra.mxu0 %v14312_v9 }
 0x82d   : > { %7547 = vmatprep.subr.bf16.mxu0 %v14317_v1 }
 0x82e   : > { %7479 = vmatmul.mubr.bf16.gmra.mxu0 %v14326_v6 }
 0x82f   : > { %7612 = vmatmul.mubr.bf16.gmra.mxu1 %v14390_v52  ;;  %7488 = vmatprep.mubr.bf16.mxu0 %v14351_v7 }
 0x830   : > { %7548 = vmatpush1.bf16.msra.mxu0 %v14324_v54  ;;  %7621 = vmatprep.mubr.bf16.mxu1 %v14415_v22 }
 0x831   : > { %7549 = vmatprep.subr.bf16.mxu0 %v14331_v18 }
 0x834   : > { %7550 = vmatpush1.bf16.msra.mxu0 %v14344_v15 }
 0x835   : > { %7551 = vmatprep.subr.bf16.mxu0 %v14349_v28 }
 0x836   : > { %7489 = vmatmul.mubr.bf16.gmra.mxu0 %v14358_v34 }
 0x837   : > { %7622 = vmatmul.mubr.bf16.gmra.mxu1 %v14422_v31  ;;  %7498 = vmatprep.mubr.bf16.mxu0 %v14383_v42 }
 0x838   : > { %7552 = vmatpush1.bf16.msra.mxu0 %v14356_v36  ;;  %7631 = vmatprep.mubr.bf16.mxu1 %v14447_v44 }
 0x839   : > { %7553 = vmatprep.subr.bf16.mxu0 %v14363_v48 }
 0x83c   : > { %7554 = vmatpush1.bf16.msra.mxu0 %v14376_v62 }
 0x83d   : > { %7555 = vmatprep.subr.bf16.mxu0 %v14381_v43 }
 0x83e   : > { %7499 = vmatmul.mubr.bf16.gmra.mxu0 %v14390_v52 }
 0x83f   : > { %7632 = vmatmul.mubr.bf16.gmra.mxu1 %v14454_v50  ;;  %7508 = vmatprep.mubr.bf16.mxu0 %v14415_v22 }
 0x840   : > { %7556 = vmatpush2.bf16.msra.mxu0 %v14388_v24  ;;  %7641 = vmatprep.mubr.bf16.mxu1 %v14479_v35 }
 0x841   : > { %7557 = vmatprep.subr.bf16.mxu0 %v14395_v39 }
 0x844   : > { %7558 = vmatpush2.bf16.msra.mxu0 %v14408_v16 }
 0x845   : > { %7559 = vmatprep.subr.bf16.mxu0 %v14413_v8 }
 0x846   : > { %7509 = vmatmul.mubr.bf16.gmra.mxu0 %v14422_v31 }
 0x847   : > { %7642 = vmatmul.mubr.bf16.gmra.mxu1 %v14483_v57  ;;  %7518 = vmatprep.mubr.bf16.mxu0 %v14447_v44 }
 0x848   : > { %7560 = vmatpush2.bf16.msra.mxu0 %v14420_v33 }
 0x849   : > { %7561 = vmatprep.subr.bf16.mxu0 %v14427_v25 }
 0x84c   : > { %7562 = vmatpush2.bf16.msra.mxu0 %v14440_v53 }
 0x84d   : > { %7563 = vmatprep.subr.bf16.mxu0 %v14445_v63 }
 0x84e   : > { %7519 = vmatmul.mubr.bf16.gmra.mxu0 %v14454_v50 }
 0x84f   : > { %7528 = vmatprep.mubr.bf16.mxu0 %v14479_v35 }
 0x850   : > { %7564 = vmatpush2.bf16.msra.mxu0 %v14452_v27 }
 0x851   : > { %7565 = vmatprep.subr.bf16.mxu0 %v14459_v55 }
 0x854   : > { %7566 = vmatpush2.bf16.msra.mxu0 %v14472_v29 }
 0x855   : > { %7567 = vmatprep.subr.bf16.mxu0 %v14477_v12 }
 0x856   : > { %7529 = vmatmul.mubr.bf16.gmra.mxu0 %v14483_v57 }
 0x857   : > { %7571 = vmatprep.mubr.bf16.mxu0 %v14257_v37  ;;  %v14572_v37 = vrot.slane %v6452_v21, %v6464_v2 }
 0x858   : > { %7568 = vmatpush2.bf16.msra.mxu0 %v14486_v49 }
 0x859   : > { %7569 = vmatprep.subr.bf16.mxu0 %v14493_v58 }
 0x85c   : > { %7570 = vmatpush2.bf16.msra.mxu0 %v10907_v59 }
 0x85f   : > { %7572 = vmatmul.mubr.bf16.vlgmr.msra.gmra.mxu0 %v14263_v17  ;;  %v14579_v17 = vrot.slane %v6452_v21, %v6468_v61 }
 0x860   : > { %7581 = vmatprep.mubr.bf16.mxu0 %v14287_v20 }
 0x867   : > { %7582 = vmatmul.mubr.bf16.gmra.mxu0 %v14294_v5 }
 0x89e   : > { %v6828_v20 = vpop.f32.mrf.mxu0  ;;  %v6941_v56 = vpop.f32.mrf.mxu1 }
 0x89f   : > { %v6829_v5 = vadd.f32 %v6828_v20, %v14568_v14  ;;  %v6942_v19 = vadd.f32 %v6941_v56, %v14572_v37 }
 0x8a0   : > { %v6830_v9 = vpop.f32.mrf.mxu0  ;;  %v6943_v1 = vpop.f32.mrf.mxu1 }
 0x8a1   : > { %10910 = vtanh.f32 %v6829_v5  ;;  %v6831_v4 = vadd.f32 %v6830_v9, %v14575_v40  ;;  %v6944_v54 = vadd.f32 %v6943_v1, %v14579_v17 }
 0x8a2   : > { %10912 = vtanh.f32 %v6942_v19  ;;  %v6832_v6 = vpop.f32.mrf.mxu0  ;;  %v6945_v18 = vpop.f32.mrf.mxu1 }
 0x8a3   : > { %10914 = vtanh.f32 %v6831_v4  ;;  %v6833_v15 = vadd.f32 %v6832_v6, %v14568_v14  ;;  %v6946_v28 = vadd.f32 %v6945_v18, %v14572_v37 }
 0x8a4   : > { %10916 = vtanh.f32 %v6944_v54  ;;  %v6834_v7 = vpop.f32.mrf.mxu0  ;;  %v6947_v36 = vpop.f32.mrf.mxu1 }
 0x8a5   : > { %10918 = vtanh.f32 %v6833_v15  ;;  %v6835_v34 = vadd.f32 %v6834_v7, %v14575_v40  ;;  %v6948_v48 = vadd.f32 %v6947_v36, %v14579_v17 }
 0x8a6   : > { %10920 = vtanh.f32 %v6946_v28  ;;  %v6838_v62 = vpop.f32.mrf.mxu0  ;;  %v6951_v43 = vpop.f32.mrf.mxu1 }
 0x8a7   : > { %10922 = vtanh.f32 %v6835_v34  ;;  %v6839_v42 = vadd.f32 %v6838_v62, %v14568_v14  ;;  %v6952_v24 = vadd.f32 %v6951_v43, %v14572_v37 }
 0x8a8   : > { %10924 = vtanh.f32 %v6948_v48  ;;  %v6840_v52 = vpop.f32.mrf.mxu0  ;;  %v6953_v39 = vpop.f32.mrf.mxu1 }
 0x8a9   : > { %10926 = vtanh.f32 %v6839_v42  ;;  %v6841_v16 = vadd.f32 %v6840_v52, %v14575_v40  ;;  %v6954_v8 = vadd.f32 %v6953_v39, %v14579_v17 }
 0x8aa   : > { %10928 = vtanh.f32 %v6952_v24  ;;  %v6842_v22 = vpop.f32.mrf.mxu0  ;;  %v6955_v33 = vpop.f32.mrf.mxu1 }
 0x8ab   : > { %10930 = vtanh.f32 %v6841_v16  ;;  %v6843_v31 = vadd.f32 %v6842_v22, %v14568_v14  ;;  %v6956_v25 = vadd.f32 %v6955_v33, %v14572_v37 }
 0x8ac   : > { %10932 = vtanh.f32 %v6954_v8  ;;  %v6844_v53 = vpop.f32.mrf.mxu0  ;;  %v6957_v63 = vpop.f32.mrf.mxu1 }
 0x8ad   : > { %10934 = vtanh.f32 %v6843_v31  ;;  %v6845_v44 = vadd.f32 %v6844_v53, %v14575_v40  ;;  %v6958_v27 = vadd.f32 %v6957_v63, %v14579_v17 }
 0x8ae   : > { %v10911_v50 = vpop.eup %10910  ;;  %10936 = vtanh.f32 %v6956_v25  ;;  %v14597_v55 = vpop.f32.mrf.mxu0 }
 0x8af   : > { %v14599_v13 = vpop.f32.mrf.mxu1  ;;  %v10913_v11 = vpop.eup %10912  ;;  %v7780_v60 = vmul.f32 1.442695, %v10911_v50  ;;  %10938 = vtanh.f32 %v6845_v44  ;;  %v6849_v63 = vadd.f32 %v14597_v55, %v14568_v14 }
 0x8b0   : > { %v10915_v26 = vpop.eup %10914  ;;  %v7784_v10 = vmul.f32 1.442695, %v10913_v11  ;;  %10940 = vtanh.f32 %v6958_v27  ;;  %v14601_v29 = vpop.f32.mrf.mxu0 }
 0x8b1   : > { %v14603_v51 = vpop.f32.mrf.mxu1  ;;  %v10917_v41 = vpop.eup %10916  ;;  %10942 = vpow2.f32 %v7780_v60  ;;  %v7782_v12 = vmul.f32 1.442695, %v10915_v26  ;;  %v8116_v45 = vadd.f32 %v10915_v26, %v10911_v50  ;;  %v6962_v26 = vadd.f32 %v14599_v13, %v14572_v37 }
 0x8b2   : > { %v10919_v0 = vpop.eup %10918  ;;  %10944 = vpow2.f32 %v7784_v10  ;;  %v7786_v46 = vmul.f32 1.442695, %v10917_v41  ;;  %v14605_v3 = vpop.f32.mrf.mxu0  ;;  %v8118_v5 = vsel %vm5717_vm5, %v10917_v41, 0.0  ;;  %v6964_v13 = vadd.f32 %v14603_v51, %v14579_v17 }
 0x8b3   : > { %v14607_v35 = vpop.f32.mrf.mxu1  ;;  %v10921_v57 = vpop.eup %10920  ;;  %10946 = vpow2.f32 %v7782_v12  ;;  %v7788_v49 = vmul.f32 1.442695, %v10919_v0  ;;  %v8117_v21 = vadd.f32 %v10913_v11, %v8116_v45 }
 0x8b4   : > { %v10923_v38 = vpop.eup %10922  ;;  %10948 = vpow2.f32 %v7786_v46  ;;  %v7792_v58 = vmul.f32 1.442695, %v10921_v57  ;;  %v14609_v32 = vpop.f32.mrf.mxu0 }
 0x8b5   : > { %v14611_v59 = vpop.f32.mrf.mxu1  ;;  %v10925_v20 = vpop.eup %10924  ;;  %10950 = vpow2.f32 %v7788_v49  ;;  %v7790_v56 = vmul.f32 1.442695, %v10923_v38  ;;  %v8119_v54 = vadd.f32 %v8118_v5, %v8117_v21  ;;  %v8122_v6 = vadd.f32 %v10923_v38, %v10919_v0 }
 0x8b6   : > { %v10927_v19 = vpop.eup %10926  ;;  %10952 = vpow2.f32 %v7792_v58  ;;  %v7794_v9 = vmul.f32 1.442695, %v10925_v20  ;;  %v14614_v1 = vpop.f32.mrf.mxu0  ;;  %v8124_v42 = vsel %vm5717_vm5, %v10925_v20, 0.0  ;;  %v6851_v49 = vadd.f32 %v14601_v29, %v14575_v40 }
 0x8b7   : > { %v14616_v4 = vpop.f32.mrf.mxu1  ;;  %v10929_v18 = vpop.eup %10928  ;;  %10954 = vpow2.f32 %v7790_v56  ;;  %v7796_v15 = vmul.f32 1.442695, %v10927_v19  ;;  %8120 = vadd.xlane.f32.xlu0 %v8119_v54  ;;  %v8123_v48 = vadd.f32 %v10921_v57, %v8122_v6  ;;  %v6853_v5 = vadd.f32 %v14605_v3, %v14568_v14 }
 0x8b8   : > { %v10931_v28 = vpop.eup %10930  ;;  %10956 = vpow2.f32 %v7794_v9  ;;  %v7800_v7 = vmul.f32 1.442695, %v10929_v18  ;;  %v14618_v36 = vpop.f32.mrf.mxu0  ;;  %v6966_v9 = vadd.f32 %v14607_v35, %v14572_v37  ;;  %v6968_v3 = vadd.f32 %v14611_v59, %v14579_v17 }
 0x8b9   : > { %v14620_v34 = vpop.f32.mrf.mxu1  ;;  %v10933_v62 = vpop.eup %10932  ;;  %10958 = vpow2.f32 %v7796_v15  ;;  %v7798_v43 = vmul.f32 1.442695, %v10931_v28  ;;  %v8125_v8 = vadd.f32 %v8124_v42, %v8123_v48  ;;  %v8128_v22 = vadd.f32 %v10931_v28, %v10927_v19 }
 0x8ba   : > { %v10935_v24 = vpop.eup %10934  ;;  %10960 = vpow2.f32 %v7800_v7  ;;  %v7802_v52 = vmul.f32 1.442695, %v10933_v62  ;;  %v14623_v39 = vpop.f32.mrf.mxu0  ;;  %v8130_v10 = vsel %vm5717_vm5, %v10933_v62, 0.0  ;;  %v6855_v28 = vadd.f32 %v14609_v32, %v14575_v40 }
 0x8bb   : > { %v14625_v16 = vpop.f32.mrf.mxu1  ;;  %v10937_v33 = vpop.eup %10936  ;;  %10962 = vpow2.f32 %v7798_v43  ;;  %v7804_v31 = vmul.f32 1.442695, %v10935_v24  ;;  %8126 = vadd.xlane.f32.xlu0 %v8125_v8  ;;  %v8129_v50 = vadd.f32 %v10929_v18, %v8128_v22  ;;  %v7084_v18 = vld [vmem:[%s11300_s27] sm:$0xf]  ;;  %v6859_v43 = vadd.f32 %v14614_v1, %v14568_v14 }
 0x8bc   : > { %v10939_v25 = vpop.eup %10938  ;;  %10964 = vpow2.f32 %v7802_v52  ;;  %v7808_v53 = vmul.f32 1.442695, %v10937_v33  ;;  %v14629_v44 = vpop.f32.mrf.mxu0  ;;  %v14669_v42 = vrot.slane %v7084_v18, %v14115_v23  ;;  %v6972_v32 = vadd.f32 %v14616_v4, %v14572_v37 }
 0x8bd   : > { %v14631_v27 = vpop.f32.mrf.mxu1  ;;  %v10941_v11 = vpop.eup %10940  ;;  %10966 = vpow2.f32 %v7804_v31  ;;  %v7806_v60 = vmul.f32 1.442695, %v10939_v25  ;;  %v8131_v46 = vadd.f32 %v8130_v10, %v8129_v50  ;;  %v8134_v45 = vadd.f32 %v10939_v25, %v10935_v24  ;;  %v7716_v31 = vld [vmem:[#allocation2] sm:$0xff]  ;;  %v7717_v50 = vld [vmem:[#allocation2 + $0x8] sm:$0xff] }
 0x8be   : > { %v14636_v41 = vpop.eup %10942  ;;  %10968 = vpow2.f32 %v7808_v53  ;;  %v7810_v12 = vmul.f32 1.442695, %v10941_v11  ;;  %v6868_v0 = vpop.f32.mrf.mxu0  ;;  %v8136_v19 = vsel %vm5717_vm5, %v10941_v11, 0.0  ;;  %v14675_v59 = vrot.slane %v7084_v18, %v6464_v2  ;;  %v7720_v11 = vld [vmem:[#allocation2 + $0x20] sm:$0xff] }
 0x8bf   : > { %v6981_v55 = vpop.f32.mrf.mxu1  ;;  %v14638_v57 = vpop.eup %10944  ;;  %10970 = vpow2.f32 %v7806_v60  ;;  %8132 = vadd.xlane.f32.xlu1 %v8131_v46  ;;  %v8135_v20 = vadd.f32 %v10937_v33, %v8134_v45  ;;  %v14678_v22 = vrot.slane %v7084_v18, %v14112_v47  ;;  %v6861_v23 = vadd.f32 %v14618_v36, %v14575_v40 }
 0x8c0   : > { %15258 = vst [vmem:[#allocation18_spill] sm:$0xff] %v14638_v57  ;;  %v14642_v38 = vpop.eup %10946  ;;  %10972 = vpow2.f32 %v7810_v12  ;;  %v6870_v58 = vpop.f32.mrf.mxu0  ;;  %v6974_v1 = vadd.f32 %v14620_v34, %v14579_v17  ;;  %v14688_v4 = vrot.slane %v7084_v18, %v6468_v61  ;;  %v6863_v47 = vadd.f32 %v14623_v39, %v14568_v14 }
 0x8c1   : > { %v6983_v21 = vpop.f32.mrf.mxu1  ;;  %v14646_v56 = vpop.eup %10948  ;;  %10974 = vtanh.f32 %v6849_v63  ;;  %v8137_v6 = vadd.f32 %v8136_v19, %v8135_v20  ;;  %v6976_v2 = vadd.f32 %v14625_v16, %v14572_v37  ;;  %v6865_v53 = vadd.f32 %v14629_v44, %v14575_v40  ;;  %v7725_v19 = vld [vmem:[#allocation2 + $0x48] sm:$0xff] }
 0x8c2   : > { %15259 = vst [vmem:[#allocation19_spill] sm:$0xff] %v14646_v56  ;;  %v14651_v29 = vpop.eup %10950  ;;  %10976 = vtanh.f32 %v6962_v26  ;;  %v6872_v54 = vpop.f32.mrf.mxu0  ;;  %v6978_v30 = vadd.f32 %v14631_v27, %v14579_v17  ;;  %v14701_v61 = vadd.f32 %v6868_v0, %v14568_v14  ;;  %v14704_v39 = vadd.f32 %v6981_v55, %v14572_v37  ;;  %v7721_v27 = vld [vmem:[#allocation2 + $0x28] sm:$0xff] }
 0x8c3   : > { %v6985_v51 = vpop.f32.mrf.mxu1  ;;  %v14656_v15 = vpop.eup %10952  ;;  %10978 = vtanh.f32 %v6851_v49  ;;  %8138 = vadd.xlane.f32.xlu1 %v8137_v6  ;;  %v14707_v44 = vadd.f32 %v6870_v58, %v14575_v40  ;;  %v14710_v60 = vadd.f32 %v6983_v21, %v14579_v17  ;;  %v14713_v12 = vmul.f32 %v14636_v41, %v7716_v31  ;;  %v7724_v49 = vld [vmem:[#allocation2 + $0x40] sm:$0xff] }
 0x8c4   : > { %15260 = vst [vmem:[#allocation20_spill] sm:$0xff] %v14656_v15  ;;  %v14660_v7 = vpop.eup %10954  ;;  %10980 = vtanh.f32 %v6964_v13  ;;  %v6874_v48 = vpop.f32.mrf.mxu0  ;;  %v14718_v55 = vadd.f32 %v6872_v54, %v14568_v14  ;;  %v14721_v46 = vadd.f32 %v6985_v51, %v14572_v37  ;;  %v14724_v45 = vmul.f32 %v14642_v38, %v7717_v50  ;;  %v7728_v6 = vld [vmem:[#allocation2 + $0x60] sm:$0xff] }
 0x8c5   : > { %v6987_v62 = vpop.f32.mrf.mxu1  ;;  %v14664_v35 = vpop.eup %10956  ;;  %10982 = vtanh.f32 %v6853_v5  ;;  %v14727_v58 = vadd.f32 %v6874_v48, %v14575_v40  ;;  %v14733_v5 = vmul.f32 %v14651_v29, %v7720_v11  ;;  %v14744_v51 = vmul.f32 %v14660_v7, %v7721_v27 }
 0x8c6   : > { %15261 = vst [vmem:[#allocation21_spill] sm:$0xff] %v14664_v35  ;;  %v10959_v24 = vpop.eup %10958  ;;  %10984 = vtanh.f32 %v6966_v9  ;;  %v6878_v52 = vpop.f32.mrf.mxu0  ;;  %v14730_v41 = vadd.f32 %v6987_v62, %v14579_v17 }
 0x8c7   : > { %v6991_v8 = vpop.f32.mrf.mxu1  ;;  %v14680_v33 = vpop.eup %10960  ;;  %10986 = vtanh.f32 %v6855_v28  ;;  %v14738_v38 = vadd.f32 %v6878_v52, %v14568_v14  ;;  %v14752_v62 = vmul.f32 %v10959_v24, %v7724_v49 }
 0x8c8   : > { %15262 = vst [vmem:[#allocation22_spill] sm:$0xff] %v14680_v33  ;;  %v10963_v25 = vpop.eup %10962  ;;  %10988 = vtanh.f32 %v6968_v3  ;;  %v6880_v36 = vpop.f32.mrf.mxu0  ;;  %v14741_v54 = vadd.f32 %v6991_v8, %v14572_v37  ;;  %v7729_v8 = vld [vmem:[#allocation2 + $0x68] sm:$0xff] }
 0x8c9   : > { %v6993_v63 = vpop.f32.mrf.mxu1  ;;  %v14696_v34 = vpop.eup %10964  ;;  %10990 = vtanh.f32 %v6859_v43  ;;  %v14747_v28 = vadd.f32 %v6880_v36, %v14575_v40  ;;  %v14757_v7 = vmul.f32 %v10963_v25, %v7725_v19 }
 0x8ca   : > { %15263 = vst [vmem:[#allocation23_spill] sm:$0xff] %v14696_v34  ;;  %v10967_v16 = vpop.eup %10966  ;;  %10992 = vtanh.f32 %v6972_v32  ;;  %v6882_v26 = vpop.f32.mrf.mxu0  ;;  %v14750_v29 = vadd.f32 %v6993_v63, %v14579_v17 }
 0x8cb   : > { %v6995_v10 = vpop.f32.mrf.mxu1  ;;  %v14715_v0 = vpop.eup %10968  ;;  %10994 = vtanh.f32 %v6861_v23  ;;  %v14755_v52 = vadd.f32 %v6882_v26, %v14568_v14  ;;  %v14762_v36 = vmul.f32 %v10967_v16, %v7728_v6 }
 0x8cc   : > { %15264 = vst [vmem:[#allocation24_spill] sm:$0xff] %v14715_v0  ;;  %v10971_v13 = vpop.eup %10970  ;;  %10996 = vtanh.f32 %v6974_v1  ;;  %v6884_v21 = vpop.f32.mrf.mxu0  ;;  %v14760_v31 = vadd.f32 %v6995_v10, %v14572_v37 }
 0x8cd   : > { %v6997_v20 = vpop.f32.mrf.mxu1  ;;  %v14735_v9 = vpop.eup %10972  ;;  %10998 = vtanh.f32 %v6863_v47  ;;  %v14765_v50 = vadd.f32 %v6884_v21, %v14575_v40  ;;  %v14770_v27 = vmul.f32 %v10971_v13, %v7729_v8 }
 0x8ce   : > { %15265 = vst [vmem:[#allocation25_spill] sm:$0xff] %v14735_v9  ;;  %v10975_v18 = vpop.eup %10974  ;;  %11000 = vtanh.f32 %v6976_v2  ;;  %v6888_v3 = vpop.f32.mrf.mxu0  ;;  %v14768_v26 = vadd.f32 %v6997_v20, %v14579_v17 }
 0x8cf   : > { %v7001_v48 = vpop.f32.mrf.mxu1  ;;  %v10977_v43 = vpop.eup %10976  ;;  %v7812_v32 = vmul.f32 1.442695, %v10975_v18  ;;  %11002 = vtanh.f32 %v6865_v53  ;;  %v14773_v6 = vadd.f32 %v6888_v3, %v14568_v14 }
 0x8d0   : > { %v10979_v23 = vpop.eup %10978  ;;  %v7816_v1 = vmul.f32 1.442695, %v10977_v43  ;;  %11004 = vtanh.f32 %v6978_v30  ;;  %v6890_v47 = vpop.f32.mrf.mxu0 }
 0x8d1   : > { %v7003_v2 = vpop.f32.mrf.mxu1  ;;  %v10981_v24 = vpop.eup %10980  ;;  %11006 = vpow2.f32 %v7812_v32  ;;  %v7814_v63 = vmul.f32 1.442695, %v10979_v23  ;;  %v8140_v53 = vadd.f32 %v10979_v23, %v10975_v18  ;;  %v14777_v23 = vadd.f32 %v7001_v48, %v14572_v37 }
 0x8d2   : > { %v10983_v25 = vpop.eup %10982  ;;  %11008 = vpow2.f32 %v7816_v1  ;;  %v7818_v11 = vmul.f32 1.442695, %v10981_v24  ;;  %v6892_v30 = vpop.f32.mrf.mxu0  ;;  %v8142_v32 = vsel %vm5717_vm5, %v10981_v24, 0.0  ;;  %v14780_v3 = vadd.f32 %v6890_v47, %v14575_v40 }
 0x8d3   : > { %v7005_v10 = vpop.f32.mrf.mxu1  ;;  %v10985_v49 = vpop.eup %10984  ;;  %11010 = vpow2.f32 %v7814_v63  ;;  %v7820_v16 = vmul.f32 1.442695, %v10983_v25  ;;  %v8141_v19 = vadd.f32 %v10977_v43, %v8140_v53  ;;  %v14783_v53 = vadd.f32 %v7003_v2, %v14579_v17 }
 0x8d4   : > { %v10987_v18 = vpop.eup %10986  ;;  %11012 = vpow2.f32 %v7818_v11  ;;  %v7824_v21 = vmul.f32 1.442695, %v10985_v49  ;;  %v6894_v20 = vpop.f32.mrf.mxu0  ;;  %v14790_v47 = vadd.f32 %v7005_v10, %v14572_v37 }
 0x8d5   : > { %v7007_v1 = vpop.f32.mrf.mxu1  ;;  %v10989_v9 = vpop.eup %10988  ;;  %11014 = vpow2.f32 %v7820_v16  ;;  %v7822_v13 = vmul.f32 1.442695, %v10987_v18  ;;  %v8143_v8 = vadd.f32 %v8142_v32, %v8141_v19  ;;  %v8146_v63 = vadd.f32 %v10987_v18, %v10983_v25 }
 0x8d6   : > { %v10991_v0 = vpop.eup %10990  ;;  %11016 = vpow2.f32 %v7824_v21  ;;  %v7826_v43 = vmul.f32 1.442695, %v10989_v9  ;;  %v6898_v24 = vpop.f32.mrf.mxu0  ;;  %v14786_v16 = vadd.f32 %v6892_v30, %v14568_v14  ;;  %v8148_v18 = vsel %vm5717_vm5, %v10989_v9, 0.0 }
 0x8d7   : > { %v7011_v11 = vpop.f32.mrf.mxu1  ;;  %v10993_v48 = vpop.eup %10992  ;;  %11018 = vpow2.f32 %v7822_v13  ;;  %v7828_v34 = vmul.f32 1.442695, %v10991_v0  ;;  %8144 = vadd.xlane.f32.xlu0 %v8143_v8  ;;  %v8147_v33 = vadd.f32 %v10985_v49, %v8146_v63  ;;  %v14793_v30 = vadd.f32 %v6894_v20, %v14575_v40 }
 0x8d8   : > { %v10995_v25 = vpop.eup %10994  ;;  %11020 = vpow2.f32 %v7826_v43  ;;  %v7832_v19 = vmul.f32 1.442695, %v10993_v48  ;;  %v6900_v2 = vpop.f32.mrf.mxu0  ;;  %v14796_v63 = vadd.f32 %v7007_v1, %v14579_v17  ;;  %v14803_v20 = vadd.f32 %v7011_v11, %v14572_v37 }
 0x8d9   : > { %v7013_v21 = vpop.f32.mrf.mxu1  ;;  %v10997_v32 = vpop.eup %10996  ;;  %11022 = vpow2.f32 %v7828_v34  ;;  %v7830_v35 = vmul.f32 1.442695, %v10995_v25  ;;  %v8149_v13 = vadd.f32 %v8148_v18, %v8147_v33  ;;  %v8152_v15 = vadd.f32 %v10995_v25, %v10991_v0 }
 0x8da   : > { %v10999_v8 = vpop.eup %10998  ;;  %11024 = vpow2.f32 %v7832_v19  ;;  %v7834_v49 = vmul.f32 1.442695, %v10997_v32  ;;  %15266 = vst [vmem:[#allocation26_spill] sm:$0xff] %v14796_v63  ;;  %v6902_v9 = vpop.f32.mrf.mxu0  ;;  %v14799_v34 = vadd.f32 %v6898_v24, %v14568_v14  ;;  %v8154_v25 = vsel %vm5717_vm5, %v10997_v32, 0.0  ;;  %15268 = vst [vmem:[#allocation28_spill] sm:$0xff] %v14803_v20 }
 0x8db   : > { %v7015_v43 = vpop.f32.mrf.mxu1  ;;  %v11001_v10 = vpop.eup %11000  ;;  %11026 = vpow2.f32 %v7830_v35  ;;  %v7836_v56 = vmul.f32 1.442695, %v10999_v8  ;;  %8150 = vadd.xlane.f32.xlu1 %v8149_v13  ;;  %v8153_v57 = vadd.f32 %v10993_v48, %v8152_v15  ;;  %v7734_v15 = vld [vmem:[#allocation2 + $0x90] sm:$0xff]  ;;  %v14813_v32 = vadd.f32 %v7013_v21, %v14579_v17 }
 0x8dc   : > { %15267 = vst [vmem:[#allocation27_spill] sm:$0xff] %v14799_v34  ;;  %v11003_v33 = vpop.eup %11002  ;;  %11028 = vpow2.f32 %v7834_v49  ;;  %v7840_v0 = vmul.f32 1.442695, %v11001_v10  ;;  %v6904_v1 = vpop.f32.mrf.mxu0  ;;  %v14810_v49 = vadd.f32 %v6900_v2, %v14575_v40 }
 0x8dd   : > { %v14805_v19 = vpop.f32.mrf.mxu1  ;;  %v11005_v18 = vpop.eup %11004  ;;  %11030 = vpow2.f32 %v7836_v56  ;;  %v7838_v35 = vmul.f32 1.442695, %v11003_v33  ;;  %v8155_v63 = vadd.f32 %v8154_v25, %v8153_v57  ;;  %v8158_v13 = vadd.f32 %v11003_v33, %v10999_v8  ;;  %15270 = vst [vmem:[#allocation30_spill] sm:$0xff] %v14813_v32  ;;  %v7735_v33 = vld [vmem:[#allocation2 + $0x98] sm:$0xff] }
 0x8de   : > { %v14807_v48 = vpop.eup %11006  ;;  %11032 = vpow2.f32 %v7840_v0  ;;  %v7842_v24 = vmul.f32 1.442695, %v11005_v18  ;;  %15269 = vst [vmem:[#allocation29_spill] sm:$0xff] %v14810_v49  ;;  %v7460_v11 = vpop.f32.mrf.mxu0  ;;  %v14816_v56 = vadd.f32 %v6902_v9, %v14568_v14  ;;  %v8160_v2 = vsel %vm5717_vm5, %v11005_v18, 0.0 }
 0x8df   : > { %v11009_v20 = vpop.eup %11008  ;;  %11034 = vpow2.f32 %v7838_v35  ;;  %8156 = vadd.xlane.f32.xlu0 %v8155_v63  ;;  %v8159_v34 = vadd.f32 %v11001_v10, %v8158_v13  ;;  %v7461_v57 = vadd.f32 %v7460_v11, %v14669_v42  ;;  %v7593_v8 = vpop.f32.mrf.mxu1  ;;  %v7738_v35 = vld [vmem:[#allocation2 + $0xb0] sm:$0xff] }
 0x8e0   : > { %v14819_v0 = vpop.eup %11010  ;;  %11036 = vpow2.f32 %v7842_v24  ;;  %v7594_v21 = vadd.f32 %v7593_v8, %v14675_v59  ;;  %v7926_v25 = vmul.f32 %v11009_v20, %v7734_v15  ;;  %v7462_v32 = vpop.f32.mrf.mxu0 }
 0x8e1   : > { %v11013_v49 = vpop.eup %11012  ;;  %11038 = vtanh.f32 %v14701_v61  ;;  %v8161_v63 = vadd.f32 %v8160_v2, %v8159_v34  ;;  %v7972_v14 = vadd.f32 %v14713_v12, %v7461_v57  ;;  %v7463_v9 = vadd.f32 %v7462_v32, %v14678_v22  ;;  %v7595_v10 = vpop.f32.mrf.mxu1  ;;  %v7739_v57 = vld [vmem:[#allocation2 + $0xb8] sm:$0xff] }
 0x8e2   : > { %v14826_v13 = vpop.eup %11014  ;;  %11040 = vtanh.f32 %v14704_v39  ;;  %v7990_v24 = vadd.f32 %v7926_v25, %v7594_v21  ;;  %v7596_v18 = vadd.f32 %v7595_v10, %v14688_v4  ;;  %v7927_v11 = vmul.f32 %v11013_v49, %v7735_v33  ;;  %v7464_v20 = vpop.f32.mrf.mxu0  ;;  %v7742_v25 = vld [vmem:[#allocation2 + $0xd0] sm:$0xff] }
 0x8e3   : > { %v11017_v15 = vpop.eup %11016  ;;  %11042 = vtanh.f32 %v14707_v44  ;;  %8162 = vadd.xlane.f32.xlu1 %v8161_v63  ;;  %v14832_v61 = vadd.f32 %v7015_v43, %v14572_v37  ;;  %8036 = vst [vmem:[#allocation2] sm:$0xff] %v7972_v14  ;;  %v7973_v12 = vadd.f32 %v14724_v45, %v7463_v9  ;;  %v7465_v34 = vadd.f32 %v7464_v20, %v14669_v42  ;;  %v7597_v32 = vpop.f32.mrf.mxu1 }
 0x8e4   : > { %v14836_v39 = vpop.eup %11018  ;;  %11044 = vtanh.f32 %v14710_v60  ;;  %8054 = vst [vmem:[#allocation2 + $0x90] sm:$0xff] %v7990_v24  ;;  %v7991_v49 = vadd.f32 %v7927_v11, %v7596_v18  ;;  %v7598_v8 = vadd.f32 %v7597_v32, %v14675_v59  ;;  %v7930_v44 = vmul.f32 %v11017_v15, %v7738_v35  ;;  %v7466_v33 = vpop.f32.mrf.mxu0  ;;  %v7743_v24 = vld [vmem:[#allocation2 + $0xd8] sm:$0xff]  ;;  %v7746_v32 = vld [vmem:[#allocation2 + $0xf0] sm:$0xff] }
 0x8e5   : > { %v11021_v2 = vpop.eup %11020  ;;  %11046 = vtanh.f32 %v14718_v55  ;;  %v14842_v37 = vadd.f32 %v6904_v1, %v14575_v40  ;;  %8037 = vst [vmem:[#allocation2 + $0x8] sm:$0xff] %v7973_v12  ;;  %v7976_v45 = vadd.f32 %v14733_v5, %v7465_v34  ;;  %v7467_v43 = vadd.f32 %v7466_v33, %v14678_v22  ;;  %v7599_v21 = vpop.f32.mrf.mxu1  ;;  %v7732_v40 = vld [vmem:[#allocation2 + $0x80] sm:$0xff]  ;;  %v7733_v12 = vld [vmem:[#allocation2 + $0x88] sm:$0xff] }
 0x8e6   : > { %v14846_v60 = vpop.eup %11022  ;;  %11048 = vtanh.f32 %v14721_v46  ;;  %8055 = vst.msk [vmem:[#allocation2 + $0x98] sm:$0xff] %vm5717_vm5, %v7991_v49  ;;  %v7994_v63 = vadd.f32 %v7930_v44, %v7598_v8  ;;  %v7600_v14 = vadd.f32 %v7599_v21, %v14688_v4  ;;  %v7931_v55 = vmul.f32 %v11021_v2, %v7739_v57  ;;  %v7470_v9 = vpop.f32.mrf.mxu0  ;;  %v7736_v33 = vld [vmem:[#allocation2 + $0xa0] sm:$0xff] }
 0x8e7   : > { %v11025_v1 = vpop.eup %11024  ;;  %11050 = vtanh.f32 %v14727_v58  ;;  %v14854_v5 = vadd.f32 %v14805_v19, %v14579_v17  ;;  %8040 = vst [vmem:[#allocation2 + $0x20] sm:$0xff] %v7976_v45  ;;  %v7977_v10 = vadd.f32 %v14744_v51, %v7467_v43  ;;  %v7471_v46 = vadd.f32 %v7470_v9, %v14669_v42  ;;  %v7603_v35 = vpop.f32.mrf.mxu1  ;;  %v7747_v43 = vld [vmem:[#allocation2 + $0xf8] sm:$0xff] }
 0x8e8   : > { %v14858_v18 = vpop.eup %11026  ;;  %11052 = vtanh.f32 %v14730_v41  ;;  %8058 = vst [vmem:[#allocation2 + $0xb0] sm:$0xff] %v7994_v63  ;;  %v7995_v11 = vadd.f32 %v7931_v55, %v7600_v14  ;;  %v7604_v20 = vadd.f32 %v7603_v35, %v14675_v59  ;;  %v7934_v58 = vmul.f32 %v11025_v1, %v7742_v25  ;;  %v7472_v15 = vpop.f32.mrf.mxu0  ;;  %v7737_v1 = vld [vmem:[#allocation2 + $0xa8] sm:$0xff] }
 0x8e9   : > { %v11029_v17 = vpop.eup %11028  ;;  %11054 = vtanh.f32 %v14738_v38  ;;  %8041 = vst [vmem:[#allocation2 + $0x28] sm:$0xff] %v7977_v10  ;;  %v7980_v51 = vadd.f32 %v14752_v62, %v7471_v46  ;;  %v7473_v19 = vadd.f32 %v7472_v15, %v14678_v22  ;;  %v7605_v34 = vpop.f32.mrf.mxu1  ;;  %v7924_v57 = vmul.f32 %v14807_v48, %v7732_v40 }
 0x8ea   : > { %v14866_v41 = vpop.eup %11030  ;;  %11056 = vtanh.f32 %v14741_v54  ;;  %8059 = vst.msk [vmem:[#allocation2 + $0xb8] sm:$0xff] %vm5717_vm5, %v7995_v11  ;;  %v7998_v49 = vadd.f32 %v7934_v58, %v7604_v20  ;;  %v7606_v8 = vadd.f32 %v7605_v34, %v14688_v4  ;;  %v7935_v44 = vmul.f32 %v11029_v17, %v7743_v24  ;;  %v7474_v38 = vpop.f32.mrf.mxu0  ;;  %v7740_v58 = vld [vmem:[#allocation2 + $0xc0] sm:$0xff] }
 0x8eb   : > { %v11033_v2 = vpop.eup %11032  ;;  %11058 = vtanh.f32 %v14747_v28  ;;  %8044 = vst [vmem:[#allocation2 + $0x40] sm:$0xff] %v7980_v51  ;;  %v7981_v62 = vadd.f32 %v14757_v7, %v7473_v19  ;;  %v7475_v48 = vadd.f32 %v7474_v38, %v14669_v42  ;;  %v7607_v45 = vpop.f32.mrf.mxu1  ;;  %v7925_v54 = vmul.f32 %v14819_v0, %v7733_v12 }
 0x8ec   : > { %v14875_v21 = vpop.eup %11034  ;;  %11060 = vtanh.f32 %v14750_v29  ;;  %8062 = vst [vmem:[#allocation2 + $0xd0] sm:$0xff] %v7998_v49  ;;  %v7999_v25 = vadd.f32 %v7935_v44, %v7606_v8  ;;  %v7608_v63 = vadd.f32 %v7607_v45, %v14675_v59  ;;  %v7938_v14 = vmul.f32 %v11033_v2, %v7746_v32  ;;  %v7476_v55 = vpop.f32.mrf.mxu0 }
 0x8ed   : > { %v11037_v28 = vpop.eup %11036  ;;  %11062 = vtanh.f32 %v14755_v52  ;;  %8045 = vst [vmem:[#allocation2 + $0x48] sm:$0xff] %v7981_v62  ;;  %v7984_v7 = vadd.f32 %v14762_v36, %v7475_v48  ;;  %v7477_v9 = vadd.f32 %v7476_v55, %v14678_v22  ;;  %v7609_v40 = vpop.f32.mrf.mxu1  ;;  %v7928_v0 = vmul.f32 %v14826_v13, %v7736_v33  ;;  %v7744_v55 = vld [vmem:[#allocation2 + $0xe0] sm:$0xff] }
 0x8ee   : > { %v11039_v10 = vpop.eup %11038  ;;  %11064 = vtanh.f32 %v14760_v31  ;;  %8063 = vst.msk [vmem:[#allocation2 + $0xd8] sm:$0xff] %vm5717_vm5, %v7999_v25  ;;  %v8002_v29 = vadd.f32 %v7938_v14, %v7608_v63  ;;  %v7610_v46 = vadd.f32 %v7609_v40, %v14688_v4  ;;  %v7939_v35 = vmul.f32 %v11037_v28, %v7747_v43  ;;  %v7480_v24 = vpop.f32.mrf.mxu0 }
 0x8ef   : > { %v11041_v52 = vpop.eup %11040  ;;  %v7844_v11 = vmul.f32 1.442695, %v11039_v10  ;;  %11066 = vtanh.f32 %v14765_v50  ;;  %8048 = vst [vmem:[#allocation2 + $0x60] sm:$0xff] %v7984_v7  ;;  %v7985_v36 = vadd.f32 %v14770_v27, %v7477_v9  ;;  %v7481_v13 = vadd.f32 %v7480_v24, %v14669_v42  ;;  %v14889_v20 = vpop.f32.mrf.mxu1 }
 0x8f0   : > { %v11043_v31 = vpop.eup %11042  ;;  %v7848_v15 = vmul.f32 1.442695, %v11041_v52  ;;  %11068 = vtanh.f32 %v14768_v26  ;;  %8066 = vst [vmem:[#allocation2 + $0xf0] sm:$0xff] %v8002_v29  ;;  %v8003_v12 = vadd.f32 %v7939_v35, %v7610_v46  ;;  %v7482_v17 = vpop.f32.mrf.mxu0  ;;  %v14893_v51 = vmul.f32 %v14836_v39, %v7737_v1 }
 0x8f1   : > { %v11045_v19 = vpop.eup %11044  ;;  %11070 = vpow2.f32 %v7844_v11  ;;  %v7846_v50 = vmul.f32 1.442695, %v11043_v31  ;;  %v8164_v34 = vadd.f32 %v11043_v31, %v11039_v10  ;;  %8049 = vst [vmem:[#allocation2 + $0x68] sm:$0xff] %v7985_v36  ;;  %v7988_v27 = vadd.f32 %v7924_v57, %v7481_v13  ;;  %v14895_v32 = vpop.f32.mrf.mxu1  ;;  %v7741_v57 = vld [vmem:[#allocation2 + $0xc8] sm:$0xff] }
 0x8f2   : > { %v11047_v49 = vpop.eup %11046  ;;  %11072 = vpow2.f32 %v7848_v15  ;;  %v7850_v8 = vmul.f32 1.442695, %v11045_v19  ;;  %8067 = vst.msk [vmem:[#allocation2 + $0xf8] sm:$0xff] %vm5717_vm5, %v8003_v12  ;;  %v7483_v26 = vadd.f32 %v7482_v17, %v14678_v22  ;;  %v7484_v44 = vpop.f32.mrf.mxu0  ;;  %v14900_v38 = vmul.f32 %v14846_v60, %v7740_v58 }
 0x8f3   : > { %v11049_v39 = vpop.eup %11048  ;;  %11074 = vpow2.f32 %v7846_v50  ;;  %v7852_v33 = vmul.f32 1.442695, %v11047_v49  ;;  %v8165_v2 = vadd.f32 %v11041_v52, %v8164_v34  ;;  %v8166_v62 = vsel %vm5717_vm5, %v11045_v19, 0.0  ;;  %8052 = vst [vmem:[#allocation2 + $0x80] sm:$0xff] %v7988_v27  ;;  %v14904_v63 = vpop.f32.mrf.mxu1 }
 0x8f4   : > { %v11051_v48 = vpop.eup %11050  ;;  %11076 = vpow2.f32 %v7850_v8  ;;  %v7856_v45 = vmul.f32 1.442695, %v11049_v39  ;;  %v7989_v43 = vadd.f32 %v7925_v54, %v7483_v26  ;;  %v7485_v25 = vadd.f32 %v7484_v44, %v14669_v42  ;;  %v7486_v14 = vpop.f32.mrf.mxu0 }
 0x8f5   : > { %v11053_v60 = vpop.eup %11052  ;;  %11078 = vpow2.f32 %v7852_v33  ;;  %v7854_v28 = vmul.f32 1.442695, %v11051_v48  ;;  %v8167_v7 = vadd.f32 %v8166_v62, %v8165_v2  ;;  %v8170_v9 = vadd.f32 %v11051_v48, %v11047_v49 }
 0x8f6   : > { %v11055_v40 = vpop.eup %11054  ;;  %11080 = vpow2.f32 %v7856_v45  ;;  %v7858_v1 = vmul.f32 1.442695, %v11053_v60  ;;  %8053 = vst [vmem:[#allocation2 + $0x88] sm:$0xff] %v7989_v43  ;;  %v7992_v10 = vadd.f32 %v7928_v0, %v7485_v25  ;;  %v7490_v29 = vpop.f32.mrf.mxu0  ;;  %v7933_v46 = vmul.f32 %v14858_v18, %v7741_v57  ;;  %v7750_v25 = vld [vmem:[#allocation2 + $0x110] sm:$0xff] }
 0x8f7   : > { %v11057_v54 = vpop.eup %11056  ;;  %11082 = vpow2.f32 %v7854_v28  ;;  %v7860_v35 = vmul.f32 1.442695, %v11055_v40  ;;  %8168 = vadd.xlane.f32.xlu0 %v8167_v7  ;;  %v8171_v24 = vadd.f32 %v11049_v39, %v8170_v9  ;;  %v14908_v52 = vmul.f32 %v14866_v41, %v7744_v55  ;;  %v14912_v0 = vpop.f32.mrf.mxu1  ;;  %v7745_v7 = vld [vmem:[#allocation2 + $0xe8] sm:$0xff] }
 0x8f8   : > { %v11059_v11 = vpop.eup %11058  ;;  %11084 = vpow2.f32 %v7858_v1  ;;  %v7864_v36 = vmul.f32 1.442695, %v11057_v54  ;;  %v8172_v13 = vsel %vm5717_vm5, %v11053_v60, 0.0  ;;  %8056 = vst [vmem:[#allocation2 + $0xa0] sm:$0xff] %v7992_v10  ;;  %v7487_v58 = vadd.f32 %v7486_v14, %v14678_v22  ;;  %v7492_v31 = vpop.f32.mrf.mxu0  ;;  %v7751_v10 = vld [vmem:[#allocation2 + $0x118] sm:$0xff] }
 0x8f9   : > { %v11061_v18 = vpop.eup %11060  ;;  %11086 = vpow2.f32 %v7860_v35  ;;  %v7862_v15 = vmul.f32 1.442695, %v11059_v11  ;;  %v8173_v12 = vadd.f32 %v8172_v13, %v8171_v24  ;;  %v8176_v17 = vadd.f32 %v11059_v11, %v11055_v40  ;;  %v14919_v62 = vpop.f32.mrf.mxu1 }
 0x8fa   : > { %v11063_v19 = vpop.eup %11062  ;;  %11088 = vpow2.f32 %v7864_v36  ;;  %v7866_v41 = vmul.f32 1.442695, %v11061_v18  ;;  %v7614_v50 = vadd.f32 %v14889_v20, %v14675_v59  ;;  %v7993_v34 = vadd.f32 %v14893_v51, %v7487_v58  ;;  %v7494_v27 = vpop.f32.mrf.mxu0 }
 0x8fb   : > { %v11065_v49 = vpop.eup %11064  ;;  %11090 = vpow2.f32 %v7862_v15  ;;  %v7868_v8 = vmul.f32 1.442695, %v11063_v19  ;;  %8174 = vadd.xlane.f32.xlu1 %v8173_v12  ;;  %v8177_v26 = vadd.f32 %v11057_v54, %v8176_v17  ;;  %v7491_v44 = vadd.f32 %v7490_v29, %v14669_v42 }
 0x8fc   : > { %v11067_v39 = vpop.eup %11066  ;;  %11092 = vpow2.f32 %v7866_v41  ;;  %v7872_v33 = vmul.f32 1.442695, %v11065_v49  ;;  %v8178_v2 = vsel %vm5717_vm5, %v11061_v18, 0.0  ;;  %8057 = vst [vmem:[#allocation2 + $0xa8] sm:$0xff] %v7993_v34  ;;  %v7493_v20 = vadd.f32 %v7492_v31, %v14678_v22  ;;  %v7496_v57 = vpop.f32.mrf.mxu0  ;;  %v7754_v31 = vld [vmem:[#allocation2 + $0x130] sm:$0xff]  ;;  %v7749_v41 = vld [vmem:[#allocation2 + $0x108] sm:$0xff] }
 0x8fd   : > { %v11069_v51 = vpop.eup %11068  ;;  %11094 = vpow2.f32 %v7868_v8  ;;  %v7870_v48 = vmul.f32 1.442695, %v11067_v39  ;;  %v8179_v45 = vadd.f32 %v8178_v2, %v8177_v26  ;;  %v8182_v43 = vadd.f32 %v11067_v39, %v11063_v19 }
 0x8fe   : > { %v11071_v14 = vpop.eup %11070  ;;  %11096 = vpow2.f32 %v7872_v33  ;;  %v7874_v55 = vmul.f32 1.442695, %v11069_v51  ;;  %v7616_v60 = vadd.f32 %v14895_v32, %v14688_v4  ;;  %v7996_v28 = vadd.f32 %v14900_v38, %v7491_v44  ;;  %v7500_v9 = vpop.f32.mrf.mxu0 }
 0x8ff   : > { %v11073_v40 = vpop.eup %11072  ;;  %11098 = vpow2.f32 %v7870_v48  ;;  %8180 = vadd.xlane.f32.xlu0 %v8179_v45  ;;  %v8183_v1 = vadd.f32 %v11065_v49, %v8182_v43  ;;  %v7618_v29 = vadd.f32 %v14904_v63, %v14675_v59  ;;  %v7997_v54 = vadd.f32 %v7933_v46, %v7493_v20  ;;  %v7625_v32 = vpop.f32.mrf.mxu1  ;;  %v7748_v46 = vld [vmem:[#allocation2 + $0x100] sm:$0xff]  ;;  %v7755_v49 = vld [vmem:[#allocation2 + $0x138] sm:$0xff]  ;;  %v7753_v43 = vld [vmem:[#allocation2 + $0x128] sm:$0xff] }
 0x900   : > { %v11075_v35 = vpop.eup %11074  ;;  %11100 = vpow2.f32 %v7874_v55  ;;  %v8184_v24 = vsel %vm5717_vm5, %v11069_v51, 0.0  ;;  %v7942_v11 = vmul.f32 %v11073_v40, %v7750_v25  ;;  %8060 = vst [vmem:[#allocation2 + $0xc0] sm:$0xff] %v7996_v28  ;;  %v7495_v38 = vadd.f32 %v7494_v27, %v14669_v42  ;;  %v7502_v36 = vpop.f32.mrf.mxu0 }
 0x901   : > { %v11077_v13 = vpop.eup %11076  ;;  %11102 = vtanh.f32 %v14773_v6  ;;  %v8185_v58 = vadd.f32 %v8184_v24, %v8183_v1  ;;  %8061 = vst [vmem:[#allocation2 + $0xc8] sm:$0xff] %v7997_v54  ;;  %v7497_v18 = vadd.f32 %v7496_v57, %v14678_v22  ;;  %v7937_v63 = vmul.f32 %v14875_v21, %v7745_v7  ;;  %v7752_v57 = vld [vmem:[#allocation2 + $0x120] sm:$0xff]  ;;  %v15272_v54 = vld [vmem:[#allocation27_spill] sm:$0xff] }
 0x902   : > { %v11079_v15 = vpop.eup %11078  ;;  %11104 = vtanh.f32 %v14777_v23  ;;  %v8006_v12 = vadd.f32 %v7942_v11, %v7614_v50  ;;  %v7943_v17 = vmul.f32 %v11077_v13, %v7751_v10  ;;  %v8000_v19 = vadd.f32 %v14908_v52, %v7495_v38  ;;  %v7504_v34 = vpop.f32.mrf.mxu0  ;;  %v15271_v7 = vld [vmem:[#allocation26_spill] sm:$0xff] }
 0x903   : > { %v11081_v27 = vpop.eup %11080  ;;  %11106 = vtanh.f32 %v14780_v3  ;;  %8186 = vadd.xlane.f32.xlu1 %v8185_v58  ;;  %v7620_v6 = vadd.f32 %v14912_v0, %v14688_v4  ;;  %v8001_v8 = vadd.f32 %v7937_v63, %v7497_v18  ;;  %v7501_v21 = vadd.f32 %v7500_v9, %v14669_v42  ;;  %v7627_v52 = vpop.f32.mrf.mxu1  ;;  %v7758_v0 = vld [vmem:[#allocation2 + $0x150] sm:$0xff]  ;;  %v7757_v18 = vld [vmem:[#allocation2 + $0x148] sm:$0xff] }
 0x904   : > { %v11083_v26 = vpop.eup %11082  ;;  %11108 = vtanh.f32 %v14783_v53  ;;  %8070 = vst [vmem:[#allocation2 + $0x110] sm:$0xff] %v8006_v12  ;;  %v8007_v23 = vadd.f32 %v7943_v17, %v7616_v60  ;;  %v7946_v50 = vmul.f32 %v11081_v27, %v7754_v31  ;;  %8064 = vst [vmem:[#allocation2 + $0xe0] sm:$0xff] %v8000_v19  ;;  %v7940_v44 = vmul.f32 %v11071_v14, %v7748_v46  ;;  %v7506_v39 = vpop.f32.mrf.mxu0  ;;  %v7759_v14 = vld [vmem:[#allocation2 + $0x158] sm:$0xff]  ;;  %v15275_v27 = vld [vmem:[#allocation30_spill] sm:$0xff] }
 0x905   : > { %v11085_v33 = vpop.eup %11084  ;;  %11110 = vtanh.f32 %v14786_v16  ;;  %v7624_v3 = vadd.f32 %v14919_v62, %v14675_v59  ;;  %8065 = vst [vmem:[#allocation2 + $0xe8] sm:$0xff] %v8001_v8  ;;  %v7503_v2 = vadd.f32 %v7502_v36, %v14678_v22  ;;  %v7941_v20 = vmul.f32 %v11075_v35, %v7749_v41  ;;  %v7629_v40 = vpop.f32.mrf.mxu1  ;;  %v7762_v35 = vld [vmem:[#allocation2 + $0x170] sm:$0xff]  ;;  %v7763_v17 = vld [vmem:[#allocation2 + $0x178] sm:$0xff] }
 0x906   : > { %v11087_v53 = vpop.eup %11086  ;;  %11112 = vtanh.f32 %v14790_v47  ;;  %8071 = vst.msk [vmem:[#allocation2 + $0x118] sm:$0xff] %vm5717_vm5, %v8007_v23  ;;  %v8010_v51 = vadd.f32 %v7946_v50, %v7618_v29  ;;  %v7947_v48 = vmul.f32 %v11085_v33, %v7755_v49  ;;  %v8004_v45 = vadd.f32 %v7940_v44, %v7501_v21  ;;  %v7510_v25 = vpop.f32.mrf.mxu0  ;;  %v15273_v36 = vld [vmem:[#allocation28_spill] sm:$0xff] }
 0x907   : > { %v11089_v16 = vpop.eup %11088  ;;  %11114 = vtanh.f32 %v14793_v30  ;;  %v7626_v62 = vadd.f32 %v7625_v32, %v14688_v4  ;;  %v8005_v55 = vadd.f32 %v7941_v20, %v7503_v2  ;;  %v7505_v60 = vadd.f32 %v7504_v34, %v14669_v42  ;;  %v7756_v32 = vld [vmem:[#allocation2 + $0x140] sm:$0xff]  ;;  %v14960_v8 = vpop.f32.mrf.mxu1  ;;  %v7718_v23 = vld [vmem:[#allocation2 + $0x10] sm:$0xff] }
 0x908   : > { %v11091_v28 = vpop.eup %11090  ;;  %11116 = vtanh.f32 %v15271_v7  ;;  %8074 = vst [vmem:[#allocation2 + $0x130] sm:$0xff] %v8010_v51  ;;  %v8011_v47 = vadd.f32 %v7947_v48, %v7620_v6  ;;  %v7950_v9 = vmul.f32 %v11089_v16, %v7758_v0  ;;  %8068 = vst [vmem:[#allocation2 + $0x100] sm:$0xff] %v8004_v45  ;;  %v7944_v1 = vmul.f32 %v11079_v15, %v7752_v57  ;;  %v7512_v10 = vpop.f32.mrf.mxu0  ;;  %v15274_v15 = vld [vmem:[#allocation29_spill] sm:$0xff]  ;;  %v7760_v2 = vld [vmem:[#allocation2 + $0x160] sm:$0xff] }
 0x909   : > { %v11093_v29 = vpop.eup %11092  ;;  %11118 = vtanh.f32 %v15272_v54  ;;  %v7628_v30 = vadd.f32 %v7627_v52, %v14675_v59  ;;  %8069 = vst [vmem:[#allocation2 + $0x108] sm:$0xff] %v8005_v55  ;;  %v7507_v24 = vadd.f32 %v7506_v39, %v14678_v22  ;;  %v7945_v11 = vmul.f32 %v11083_v26, %v7753_v43  ;;  %v15276_v51 = vld [vmem:[#allocation18_spill] sm:$0xff]  ;;  %v7719_v45 = vld [vmem:[#allocation2 + $0x18] sm:$0xff]  ;;  %v14973_v16 = vpop.f32.mrf.mxu1  ;;  %v7761_v7 = vld [vmem:[#allocation2 + $0x168] sm:$0xff] }
 0x90a   : > { %v11095_v38 = vpop.eup %11094  ;;  %11120 = vtanh.f32 %v15273_v36  ;;  %8075 = vst.msk [vmem:[#allocation2 + $0x138] sm:$0xff] %vm5717_vm5, %v8011_v47  ;;  %v8014_v13 = vadd.f32 %v7950_v9, %v7624_v3  ;;  %v7951_v58 = vmul.f32 %v11093_v29, %v7759_v14  ;;  %v8008_v31 = vadd.f32 %v7944_v1, %v7505_v60  ;;  %v7514_v63 = vpop.f32.mrf.mxu0  ;;  %v15277_v1 = vld [vmem:[#allocation19_spill] sm:$0xff] }
 0x90b   : > { %v11097_v46 = vpop.eup %11096  ;;  %11122 = vtanh.f32 %v15274_v15  ;;  %v7630_v12 = vadd.f32 %v7629_v40, %v14688_v4  ;;  %v8009_v19 = vadd.f32 %v7945_v11, %v7507_v24  ;;  %v7511_v41 = vadd.f32 %v7510_v25, %v14669_v42  ;;  %v7722_v24 = vld [vmem:[#allocation2 + $0x30] sm:$0xff] }
 0x90c   : > { %v14957_v34 = vpop.eup %11098  ;;  %11124 = vtanh.f32 %v15275_v27  ;;  %8078 = vst [vmem:[#allocation2 + $0x150] sm:$0xff] %v8014_v13  ;;  %v8015_v6 = vadd.f32 %v7951_v58, %v7626_v62  ;;  %v7954_v49 = vmul.f32 %v11097_v46, %v7762_v35  ;;  %8072 = vst [vmem:[#allocation2 + $0x120] sm:$0xff] %v8008_v31  ;;  %v7948_v21 = vmul.f32 %v11087_v53, %v7756_v32  ;;  %v7516_v26 = vpop.f32.mrf.mxu0  ;;  %v7723_v31 = vld [vmem:[#allocation2 + $0x38] sm:$0xff] }
 0x90d   : > { %v11101_v50 = vpop.eup %11100  ;;  %11126 = vtanh.f32 %v14816_v56  ;;  %8073 = vst [vmem:[#allocation2 + $0x128] sm:$0xff] %v8009_v19  ;;  %v7513_v52 = vadd.f32 %v7512_v10, %v14678_v22  ;;  %v7949_v44 = vmul.f32 %v11091_v28, %v7757_v18  ;;  %v14970_v48 = vmul.f32 %v15276_v51, %v7718_v23  ;;  %v15279_v23 = vld [vmem:[#allocation21_spill] sm:$0xff] }
 0x90e   : > { %v11103_v39 = vpop.eup %11102  ;;  %11128 = vtanh.f32 %v14832_v61  ;;  %8079 = vst.msk [vmem:[#allocation2 + $0x158] sm:$0xff] %vm5717_vm5, %v8015_v6  ;;  %v8018_v33 = vadd.f32 %v7954_v49, %v7628_v30  ;;  %v7955_v3 = vmul.f32 %v11101_v50, %v7763_v17  ;;  %v8012_v0 = vadd.f32 %v7948_v21, %v7511_v41  ;;  %v14966_v20 = vpop.f32.mrf.mxu0  ;;  %v15278_v6 = vld [vmem:[#allocation20_spill] sm:$0xff] }
 0x90f   : > { %v11105_v57 = vpop.eup %11104  ;;  %v7876_v53 = vmul.f32 1.442695, %v11103_v39  ;;  %11130 = vtanh.f32 %v14842_v37  ;;  %v8013_v56 = vadd.f32 %v7949_v44, %v7513_v52  ;;  %v7515_v62 = vadd.f32 %v7514_v63, %v14669_v42  ;;  %v7727_v52 = vld [vmem:[#allocation2 + $0x58] sm:$0xff]  ;;  %v7730_v44 = vld [vmem:[#allocation2 + $0x70] sm:$0xff] }
 0x910   : > { %v11107_v43 = vpop.eup %11106  ;;  %v7880_v25 = vmul.f32 1.442695, %v11105_v57  ;;  %11132 = vtanh.f32 %v14854_v5  ;;  %8082 = vst [vmem:[#allocation2 + $0x170] sm:$0xff] %v8018_v33  ;;  %v8019_v61 = vadd.f32 %v7955_v3, %v7630_v12  ;;  %8076 = vst [vmem:[#allocation2 + $0x140] sm:$0xff] %v8012_v0  ;;  %v14976_v14 = vpop.f32.mrf.mxu0  ;;  %v7952_v28 = vmul.f32 %v11095_v38, %v7760_v2  ;;  %v7726_v12 = vld [vmem:[#allocation2 + $0x50] sm:$0xff] }
 0x911   : > { %v11109_v55 = vpop.eup %11108  ;;  %11134 = vpow2.f32 %v7876_v53  ;;  %v7878_v37 = vmul.f32 1.442695, %v11107_v43  ;;  %v8188_v60 = vadd.f32 %v11107_v43, %v11103_v39  ;;  %8077 = vst [vmem:[#allocation2 + $0x148] sm:$0xff] %v8013_v56  ;;  %v14983_v10 = vmul.f32 %v15277_v1, %v7719_v45  ;;  %v14985_v38 = vpop.f32.mrf.mxu1 }
 0x912   : > { %v11111_v47 = vpop.eup %11110  ;;  %11136 = vpow2.f32 %v7880_v25  ;;  %v7882_v9 = vmul.f32 1.442695, %v11109_v55  ;;  %v8190_v5 = vsel %vm5717_vm5, %v11109_v55, 0.0  ;;  %8083 = vst.msk [vmem:[#allocation2 + $0x178] sm:$0xff] %vm5717_vm5, %v8019_v61  ;;  %v14980_v40 = vpop.f32.mrf.mxu0  ;;  %v8016_v35 = vadd.f32 %v7952_v28, %v7515_v62  ;;  %v15281_v55 = vld [vmem:[#allocation23_spill] sm:$0xff] }
 0x913   : > { %v11113_v29 = vpop.eup %11112  ;;  %11138 = vpow2.f32 %v7878_v37  ;;  %v7884_v54 = vmul.f32 1.442695, %v11111_v47  ;;  %v8189_v30 = vadd.f32 %v11105_v57, %v8188_v60  ;;  %v7517_v36 = vadd.f32 %v7516_v26, %v14678_v22  ;;  %v15000_v0 = vpop.f32.mrf.mxu1  ;;  %v15280_v57 = vld [vmem:[#allocation22_spill] sm:$0xff]  ;;  %v15282_v60 = vld [vmem:[#allocation24_spill] sm:$0xff] }
 0x914   : > { %v11115_v11 = vpop.eup %11114  ;;  %11140 = vpow2.f32 %v7882_v9  ;;  %v7888_v32 = vmul.f32 1.442695, %v11113_v29  ;;  %v7953_v13 = vmul.f32 %v14957_v34, %v7761_v7  ;;  %v14989_v58 = vpop.f32.mrf.mxu0  ;;  %8080 = vst [vmem:[#allocation2 + $0x160] sm:$0xff] %v8016_v35  ;;  %v14994_v49 = vmul.f32 %v15278_v6, %v7722_v24  ;;  %v7764_v24 = vld [vmem:[#allocation2 + $0x180] sm:$0xff] }
 0x915   : > { %v11117_v18 = vpop.eup %11116  ;;  %11142 = vpow2.f32 %v7884_v54  ;;  %v7886_v63 = vmul.f32 1.442695, %v11115_v11  ;;  %v8191_v46 = vadd.f32 %v8190_v5, %v8189_v30  ;;  %v8194_v15 = vadd.f32 %v11115_v11, %v11111_v47  ;;  %v15018_v30 = vpop.f32.mrf.mxu1 }
 0x916   : > { %v11119_v17 = vpop.eup %11118  ;;  %11144 = vpow2.f32 %v7888_v32  ;;  %v7890_v19 = vmul.f32 1.442695, %v11117_v18  ;;  %v8017_v41 = vadd.f32 %v7953_v13, %v7517_v36  ;;  %v14991_v27 = vpop.f32.mrf.mxu0  ;;  %v14997_v50 = vmul.f32 %v15279_v23, %v7723_v31 }
 0x917   : > { %v11121_v34 = vpop.eup %11120  ;;  %11146 = vpow2.f32 %v7886_v63  ;;  %v7892_v21 = vmul.f32 1.442695, %v11119_v17  ;;  %8192 = vadd.xlane.f32.xlu0 %v8191_v46  ;;  %v8195_v26 = vadd.f32 %v11113_v29, %v8194_v15  ;;  %v8196_v3 = vsel %vm5717_vm5, %v11117_v18, 0.0  ;;  %v7766_v18 = vld [vmem:[#allocation2 + $0x190] sm:$0xff] }
 0x918   : > { %v11123_v39 = vpop.eup %11122  ;;  %11148 = vpow2.f32 %v7890_v19  ;;  %v7896_v33 = vmul.f32 1.442695, %v11121_v34  ;;  %8081 = vst [vmem:[#allocation2 + $0x168] sm:$0xff] %v8017_v41  ;;  %v15002_v2 = vpop.f32.mrf.mxu0  ;;  %v15005_v53 = vmul.f32 %v15280_v57, %v7726_v12  ;;  %v15010_v37 = vmul.f32 %v15281_v55, %v7727_v52  ;;  %v7765_v12 = vld [vmem:[#allocation2 + $0x188] sm:$0xff]  ;;  %v7767_v19 = vld [vmem:[#allocation2 + $0x198] sm:$0xff]  ;;  %v7768_v52 = vld [vmem:[#allocation2 + $0x1a0] sm:$0xff] }
 0x919   : > { %v11125_v56 = vpop.eup %11124  ;;  %11150 = vpow2.f32 %v7892_v21  ;;  %v7894_v51 = vmul.f32 1.442695, %v11123_v39  ;;  %v8197_v45 = vadd.f32 %v8196_v3, %v8195_v26  ;;  %v8200_v43 = vadd.f32 %v11123_v39, %v11119_v17 }
 0x91a   : > { %v11127_v25 = vpop.eup %11126  ;;  %11152 = vpow2.f32 %v7896_v33  ;;  %v7898_v61 = vmul.f32 1.442695, %v11125_v56  ;;  %v15007_v62 = vpop.f32.mrf.mxu0  ;;  %v15013_v28 = vmul.f32 %v15282_v60, %v7730_v44  ;;  %v7634_v5 = vadd.f32 %v14960_v8, %v14675_v59  ;;  %v7770_v33 = vld [vmem:[#allocation2 + $0x1b0] sm:$0xff] }
 0x91b   : > { %v11129_v7 = vpop.eup %11128  ;;  %11154 = vpow2.f32 %v7894_v51  ;;  %v7900_v47 = vmul.f32 1.442695, %v11127_v25  ;;  %8198 = vadd.xlane.f32.xlu1 %v8197_v45  ;;  %v8201_v9 = vadd.f32 %v11121_v34, %v8200_v43  ;;  %v8202_v54 = vsel %vm5717_vm5, %v11125_v56, 0.0 }
 0x91c   : > { %v11131_v1 = vpop.eup %11130  ;;  %11156 = vpow2.f32 %v7898_v61  ;;  %v7904_v29 = vmul.f32 1.442695, %v11129_v7  ;;  %v7521_v35 = vadd.f32 %v14966_v20, %v14669_v42  ;;  %v15022_v11 = vpop.f32.mrf.mxu0  ;;  %v7636_v46 = vadd.f32 %v14973_v16, %v14688_v4 }
 0x91d   : > { %v11133_v32 = vpop.eup %11132  ;;  %11158 = vpow2.f32 %v7900_v47  ;;  %v7902_v36 = vmul.f32 1.442695, %v11131_v1  ;;  %v8203_v13 = vadd.f32 %v8202_v54, %v8201_v9  ;;  %v8206_v31 = vadd.f32 %v11131_v1, %v11127_v25  ;;  %v7645_v16 = vpop.f32.mrf.mxu1  ;;  %v7769_v25 = vld [vmem:[#allocation2 + $0x1a8] sm:$0xff]  ;;  %v7771_v47 = vld [vmem:[#allocation2 + $0x1b8] sm:$0xff] }
 0x91e   : > { %v11135_v8 = vpop.eup %11134  ;;  %11160 = vpow2.f32 %v7904_v29  ;;  %v7906_v63 = vmul.f32 1.442695, %v11133_v32  ;;  %v7638_v15 = vadd.f32 %v14985_v38, %v14675_v59  ;;  %v7523_v6 = vadd.f32 %v14976_v14, %v14678_v22 }
 0x91f   : > { %v11137_v20 = vpop.eup %11136  ;;  %11162 = vpow2.f32 %v7902_v36  ;;  %8204 = vadd.xlane.f32.xlu0 %v8203_v13  ;;  %v8207_v17 = vadd.f32 %v11129_v7, %v8206_v31  ;;  %v7956_v41 = vmul.f32 %v11135_v8, %v7764_v24  ;;  %v7573_v34 = vpop.f32.mrf.mxu0  ;;  %v8208_v26 = vsel %vm5717_vm5, %v11133_v32, 0.0  ;;  %v7772_v24 = vld [vmem:[#allocation2 + $0x1c0] sm:$0xff]  ;;  %v7774_v31 = vld [vmem:[#allocation2 + $0x1d0] sm:$0xff] }
 0x920   : > { %v11139_v21 = vpop.eup %11138  ;;  %11164 = vpow2.f32 %v7906_v63  ;;  %v7958_v23 = vmul.f32 %v11137_v20, %v7766_v18  ;;  %v7574_v38 = vadd.f32 %v7573_v34, %v14675_v59  ;;  %v7525_v56 = vadd.f32 %v14980_v40, %v14669_v42 }
 0x921   : > { %v11141_v44 = vpop.eup %11140  ;;  %v8209_v39 = vadd.f32 %v8208_v26, %v8207_v17  ;;  %v8020_v3 = vadd.f32 %v7956_v41, %v7521_v35  ;;  %v7957_v57 = vmul.f32 %v11139_v21, %v7765_v12  ;;  %v7575_v51 = vpop.f32.mrf.mxu0  ;;  %v7640_v7 = vadd.f32 %v15000_v0, %v14688_v4 }
 0x922   : > { %v11143_v14 = vpop.eup %11142  ;;  %v8022_v45 = vadd.f32 %v7958_v23, %v7634_v5  ;;  %v7959_v43 = vmul.f32 %v11141_v44, %v7767_v19  ;;  %v7974_v61 = vadd.f32 %v14970_v48, %v7574_v38  ;;  %v7576_v55 = vadd.f32 %v7575_v51, %v14688_v4  ;;  %v7647_v48 = vpop.f32.mrf.mxu1  ;;  %v7776_v44 = vld [vmem:[#allocation2 + $0x1e0] sm:$0xff] }
 0x923   : > { %v11145_v60 = vpop.eup %11144  ;;  %8210 = vadd.xlane.f32.xlu1 %v8209_v39  ;;  %8084 = vst [vmem:[#allocation2 + $0x180] sm:$0xff] %v8020_v3  ;;  %v8021_v9 = vadd.f32 %v7957_v57, %v7523_v6  ;;  %v7960_v1 = vmul.f32 %v11143_v14, %v7768_v52  ;;  %v7527_v40 = vadd.f32 %v14989_v58, %v14678_v22  ;;  %v7577_v29 = vpop.f32.mrf.mxu0  ;;  %v7775_v6 = vld [vmem:[#allocation2 + $0x1d8] sm:$0xff]  ;;  %v7778_v3 = vld [vmem:[#allocation2 + $0x1f0] sm:$0xff] }
 0x924   : > { %v11147_v5 = vpop.eup %11146  ;;  %8086 = vst [vmem:[#allocation2 + $0x190] sm:$0xff] %v8022_v45  ;;  %v8023_v54 = vadd.f32 %v7959_v43, %v7636_v46  ;;  %v7962_v35 = vmul.f32 %v11145_v60, %v7770_v33  ;;  %8038 = vst [vmem:[#allocation2 + $0x10] sm:$0xff] %v7974_v61  ;;  %v7975_v32 = vadd.f32 %v14983_v10, %v7576_v55  ;;  %v7773_v10 = vld [vmem:[#allocation2 + $0x1c8] sm:$0xff]  ;;  %v7649_v38 = vpop.f32.mrf.mxu1  ;;  %v7731_v55 = vld [vmem:[#allocation2 + $0x78] sm:$0xff] }
 0x925   : > { %v7578_v36 = vadd.f32 %v7577_v29, %v14675_v59  ;;  %v11149_v0 = vpop.eup %11148  ;;  %v7644_v13 = vadd.f32 %v15018_v30, %v14675_v59  ;;  %8085 = vst [vmem:[#allocation2 + $0x188] sm:$0xff] %v8021_v9  ;;  %v8024_v18 = vadd.f32 %v7960_v1, %v7525_v56  ;;  %v7961_v58 = vmul.f32 %v11147_v5, %v7769_v25  ;;  %v7579_v63 = vpop.f32.mrf.mxu0  ;;  %v7777_v25 = vld [vmem:[#allocation2 + $0x1e8] sm:$0xff] }
 0x926   : > { %v7531_v8 = vadd.f32 %v14991_v27, %v14669_v42  ;;  %v11151_v46 = vpop.eup %11150  ;;  %8087 = vst.msk [vmem:[#allocation2 + $0x198] sm:$0xff] %vm5717_vm5, %v8023_v54  ;;  %v8026_v12 = vadd.f32 %v7962_v35, %v7638_v15  ;;  %v7963_v20 = vmul.f32 %v11149_v0, %v7771_v47  ;;  %8039 = vst.msk [vmem:[#allocation2 + $0x18] sm:$0xff] %vm5717_vm5, %v7975_v32  ;;  %v7779_v47 = vld [vmem:[#allocation2 + $0x1f8] sm:$0xff] }
 0x927   : > { %v7978_v17 = vadd.f32 %v14994_v49, %v7578_v36  ;;  %v7580_v30 = vadd.f32 %v7579_v63, %v14688_v4  ;;  %v11153_v19 = vpop.eup %11152  ;;  %v7646_v41 = vadd.f32 %v7645_v16, %v14688_v4  ;;  %8088 = vst [vmem:[#allocation2 + $0x1a0] sm:$0xff] %v8024_v18  ;;  %v8025_v34 = vadd.f32 %v7961_v58, %v7527_v40  ;;  %v7583_v26 = vpop.f32.mrf.mxu0  ;;  %v15283_v36 = vld [vmem:[#allocation25_spill] sm:$0xff]  ;;  %v8100_v58 = vld [vmem:[#allocation3] sm:$0xff] }
 0x928   : > { %v7964_v27 = vmul.f32 %v11151_v46, %v7772_v24  ;;  %v7533_v21 = vadd.f32 %v15002_v2, %v14678_v22  ;;  %v11155_v15 = vpop.eup %11154  ;;  %8090 = vst [vmem:[#allocation2 + $0x1b0] sm:$0xff] %v8026_v12  ;;  %v8027_v23 = vadd.f32 %v7963_v20, %v7640_v7  ;;  %v7966_v52 = vmul.f32 %v11153_v19, %v7774_v31  ;;  %v8101_v46 = vld [vmem:[#allocation3 + $0x8] sm:$0xff]  ;;  %v8102_v12 = vld [vmem:[#allocation3 + $0x10] sm:$0xff] }
 0x929   : > { %8042 = vst [vmem:[#allocation2 + $0x30] sm:$0xff] %v7978_v17  ;;  %v7979_v49 = vadd.f32 %v14997_v50, %v7580_v30  ;;  %v7584_v39 = vadd.f32 %v7583_v26, %v14675_v59  ;;  %v11157_v16 = vpop.eup %11156  ;;  %v7648_v33 = vadd.f32 %v7647_v48, %v14675_v59  ;;  %8089 = vst [vmem:[#allocation2 + $0x1a8] sm:$0xff] %v8025_v34  ;;  %v7585_v51 = vpop.f32.mrf.mxu0  ;;  %v8103_v17 = vld [vmem:[#allocation3 + $0x18] sm:$0xff] }
 0x92a   : > { %v8028_v57 = vadd.f32 %v7964_v27, %v7531_v8  ;;  %v7965_v56 = vmul.f32 %v11155_v15, %v7773_v10  ;;  %v7535_v2 = vadd.f32 %v15007_v62, %v14669_v42  ;;  %v11159_v14 = vpop.eup %11158  ;;  %8091 = vst.msk [vmem:[#allocation2 + $0x1b8] sm:$0xff] %vm5717_vm5, %v8027_v23  ;;  %v8030_v45 = vadd.f32 %v7966_v52, %v7644_v13  ;;  %v8105_v27 = vld [vmem:[#allocation3 + $0x28] sm:$0xff]  ;;  %v8106_v15 = vld [vmem:[#allocation3 + $0x30] sm:$0xff] }
 0x92b   : > { %v7967_v43 = vmul.f32 %v11157_v16, %v7775_v6  ;;  %8043 = vst.msk [vmem:[#allocation2 + $0x38] sm:$0xff] %vm5717_vm5, %v7979_v49  ;;  %v7982_v50 = vadd.f32 %v15005_v53, %v7584_v39  ;;  %v7586_v61 = vadd.f32 %v7585_v51, %v14688_v4  ;;  %v11161_v60 = vpop.eup %11160  ;;  %v7650_v7 = vadd.f32 %v7649_v38, %v14688_v4  ;;  %v7587_v1 = vpop.f32.mrf.mxu0  ;;  %v8107_v38 = vld [vmem:[#allocation3 + $0x38] sm:$0xff]  ;;  %v8108_v39 = vld [vmem:[#allocation3 + $0x40] sm:$0xff] }
 0x92c   : > { %8092 = vst [vmem:[#allocation2 + $0x1c0] sm:$0xff] %v8028_v57  ;;  %v8029_v42 = vadd.f32 %v7965_v56, %v7533_v21  ;;  %v7968_v62 = vmul.f32 %v11159_v14, %v7776_v44  ;;  %v7537_v9 = vadd.f32 %v15022_v11, %v14678_v22  ;;  %v11163_v40 = vpop.eup %11162  ;;  %8094 = vst [vmem:[#allocation2 + $0x1d0] sm:$0xff] %v8030_v45  ;;  %v8111_v45 = vld [vmem:[#allocation3 + $0x58] sm:$0xff] }
 0x92d   : > { %v8031_v29 = vadd.f32 %v7967_v43, %v7646_v41  ;;  %v7970_v5 = vmul.f32 %v11161_v60, %v7778_v3  ;;  %8046 = vst [vmem:[#allocation2 + $0x50] sm:$0xff] %v7982_v50  ;;  %v7983_v53 = vadd.f32 %v15010_v37, %v7586_v61  ;;  %v7588_v54 = vadd.f32 %v7587_v1, %v14675_v59  ;;  %v11165_v35 = vpop.eup %11164  ;;  %v7589_v32 = vpop.f32.mrf.mxu0  ;;  %v8104_v41 = vld [vmem:[#allocation3 + $0x20] sm:$0xff]  ;;  %v8109_v3 = vld [vmem:[#allocation3 + $0x48] sm:$0xff]  ;;  %v8115_v1 = vld [vmem:[#allocation3 + $0x78] sm:$0xff] }
 0x92e   : > { %8093 = vst [vmem:[#allocation2 + $0x1c8] sm:$0xff] %v8029_v42  ;;  %v8032_v48 = vadd.f32 %v7968_v62, %v7535_v2  ;;  %v7969_v24 = vmul.f32 %v11163_v40, %v7777_v25  ;;  %v7923_v0 = vmul.f32 %v15283_v36, %v7731_v55  ;;  %v7971_v11 = vmul.f32 %v11165_v35, %v7779_v47  ;;  %v8110_v2 = vld [vmem:[#allocation3 + $0x50] sm:$0xff]  ;;  %v8112_v50 = vld [vmem:[#allocation3 + $0x60] sm:$0xff]  ;;  %v8113_v60 = vld [vmem:[#allocation3 + $0x68] sm:$0xff] }
 0x92f   : > { %8095 = vst.msk [vmem:[#allocation2 + $0x1d8] sm:$0xff] %vm5717_vm5, %v8031_v29  ;;  %v8034_v22 = vadd.f32 %v7970_v5, %v7648_v33  ;;  %8047 = vst.msk [vmem:[#allocation2 + $0x58] sm:$0xff] %vm5717_vm5, %v7983_v53  ;;  %v7986_v13 = vadd.f32 %v15013_v28, %v7588_v54  ;;  %v7590_v31 = vadd.f32 %v7589_v32, %v14688_v4  ;;  %v8114_v42 = vld [vmem:[#allocation3 + $0x70] sm:$0xff] }
 0x930   : > { %8096 = vst [vmem:[#allocation2 + $0x1e0] sm:$0xff] %v8032_v48  ;;  %v8033_v37 = vadd.f32 %v7969_v24, %v7537_v9  ;;  %v8035_v59 = vadd.f32 %v7971_v11, %v7650_v7 }
 0x931   : > { %8098 = vst [vmem:[#allocation2 + $0x1f0] sm:$0xff] %v8034_v22  ;;  %8050 = vst [vmem:[#allocation2 + $0x70] sm:$0xff] %v7986_v13  ;;  %v7987_v18 = vadd.f32 %v7923_v0, %v7590_v31 }
 0x932   : > { %8097 = vst [vmem:[#allocation2 + $0x1e8] sm:$0xff] %v8033_v37  ;;  %8099 = vst.msk [vmem:[#allocation2 + $0x1f8] sm:$0xff] %vm5717_vm5, %v8035_v59 }
 0x933   : > { %8051 = vst.msk [vmem:[#allocation2 + $0x78] sm:$0xff] %vm5717_vm5, %v7987_v18 }
 0x940   : > { %v8121_v8 = vpop.xlane.xlu0 %8120 }
 0x941   : > { %v8212_v63 = vadd.f32 %v8121_v8, %v8100_v58 }
 0x943   : > { %8229 = vst.msk [vmem:[#allocation3] sm:$0xff] %vm8228_vm7, %v8212_v63 }
 0x944   : > { %v8127_v28 = vpop.xlane.xlu0 %8126 }
 0x945   : > { %v8213_v4 = vadd.f32 %v8127_v28, %v8101_v46 }
 0x947   : > { %8230 = vst.msk [vmem:[#allocation3 + $0x8] sm:$0xff] %vm8228_vm7, %v8213_v4 }
 0x948   : > { %v8133_v20 = vpop.xlane.xlu1 %8132 }
 0x949   : > { %v8214_v10 = vadd.f32 %v8133_v20, %v8102_v12 }
 0x94b   : > { %8231 = vst.msk [vmem:[#allocation3 + $0x10] sm:$0xff] %vm8228_vm7, %v8214_v10 }
 0x94c   : > { %v8139_v30 = vpop.xlane.xlu1 %8138 }
 0x94d   : > { %v8215_v19 = vadd.f32 %v8139_v30, %v8103_v17 }
 0x94f   : > { %8232 = vst.msk [vmem:[#allocation3 + $0x18] sm:$0xff] %vm8228_vm7, %v8215_v19 }
 0x960   : > { %v8145_v6 = vpop.xlane.xlu0 %8144 }
 0x961   : > { %v8216_v34 = vadd.f32 %v8145_v6, %v8104_v41 }
 0x963   : > { %8233 = vst.msk [vmem:[#allocation3 + $0x20] sm:$0xff] %vm8228_vm7, %v8216_v34 }
 0x964   : > { %v8151_v21 = vpop.xlane.xlu1 %8150 }
 0x965   : > { %v8217_v26 = vadd.f32 %v8151_v21, %v8105_v27 }
 0x967   : > { %8234 = vst.msk [vmem:[#allocation3 + $0x28] sm:$0xff] %vm8228_vm7, %v8217_v26 }
 0x968   : > { %v8157_v23 = vpop.xlane.xlu0 %8156 }
 0x969   : > { %v8218_v52 = vadd.f32 %v8157_v23, %v8106_v15 }
 0x96b   : > { %8235 = vst.msk [vmem:[#allocation3 + $0x30] sm:$0xff] %vm8228_vm7, %v8218_v52 }
 0x96c   : > { %v8163_v44 = vpop.xlane.xlu1 %8162 }
 0x96d   : > { %v8219_v49 = vadd.f32 %v8163_v44, %v8107_v38 }
 0x96f   : > { %8236 = vst.msk [vmem:[#allocation3 + $0x38] sm:$0xff] %vm8228_vm7, %v8219_v49 }
 0x980   : > { %v8169_v16 = vpop.xlane.xlu0 %8168 }
 0x981   : > { %v8220_v33 = vadd.f32 %v8169_v16, %v8108_v39 }
 0x983   : > { %8237 = vst.msk [vmem:[#allocation3 + $0x40] sm:$0xff] %vm8228_vm7, %v8220_v33 }
 0x984   : > { %v8175_v57 = vpop.xlane.xlu1 %8174 }
 0x985   : > { %v8221_v56 = vadd.f32 %v8175_v57, %v8109_v3 }
 0x987   : > { %8238 = vst.msk [vmem:[#allocation3 + $0x48] sm:$0xff] %vm8228_vm7, %v8221_v56 }
 0x988   : > { %v8181_v51 = vpop.xlane.xlu0 %8180 }
 0x989   : > { %v8222_v14 = vadd.f32 %v8181_v51, %v8110_v2 }
 0x98b   : > { %8239 = vst.msk [vmem:[#allocation3 + $0x50] sm:$0xff] %vm8228_vm7, %v8222_v14 }
 0x98c   : > { %v8187_v43 = vpop.xlane.xlu1 %8186 }
 0x98d   : > { %v8223_v25 = vadd.f32 %v8187_v43, %v8111_v45 }
 0x98f   : > { %8240 = vst.msk [vmem:[#allocation3 + $0x58] sm:$0xff] %vm8228_vm7, %v8223_v25 }
 0x9a0   : > { %v8193_v61 = vpop.xlane.xlu0 %8192 }
 0x9a1   : > { %v8224_v55 = vadd.f32 %v8193_v61, %v8112_v50 }
 0x9a3   : > { %8241 = vst.msk [vmem:[#allocation3 + $0x60] sm:$0xff] %vm8228_vm7, %v8224_v55 }
 0x9a4   : > { %v8199_v7 = vpop.xlane.xlu1 %8198 }
 0x9a5   : > { %v8225_v47 = vadd.f32 %v8199_v7, %v8113_v60 }
 0x9a7   : > { %8242 = vst.msk [vmem:[#allocation3 + $0x68] sm:$0xff] %vm8228_vm7, %v8225_v47 }
 0x9a8   : > { %v8205_v62 = vpop.xlane.xlu0 %8204 }
 0x9a9   : > { %v8226_v9 = vadd.f32 %v8205_v62, %v8114_v42 }
 0x9ab   : > { %8243 = vst.msk [vmem:[#allocation3 + $0x70] sm:$0xff] %vm8228_vm7, %v8226_v9 }
 0x9ac   : > { %v8211_v40 = vpop.xlane.xlu1 %8210 }
 0x9ad   : > { %v8227_v29 = vadd.f32 %v8211_v40, %v8115_v1 }
 0x9af   : > { %8244 = vst.msk [vmem:[#allocation3 + $0x78] sm:$0xff] %vm8228_vm7, %v8227_v29 }
 0x9b0 PF: > { %p9417_p10 = scmp.ne.s32.totalorder %s11180_s30, 7 }
 0x9b2   : > { %8248 = sbr.rel (%p9417_p10) target bundleno = 2704 (0xa90), region = 72 }
 0x9b7   : > { %v8257_v5 = vld [vmem:[#allocation2 + $0x40] sm:$0xff]  ;;  %v8258_v53 = vld [vmem:[#allocation2 + $0x48] sm:$0xff]  ;;  %v8259_v54 = vld [vmem:[#allocation2 + $0x50] sm:$0xff]  ;;  %vm8379_vm8 = vcmask 64512   ;;  %vm8779_vm9 = vcmask 7168  }
 0x9b8   : > { %v8260_v35 = vld [vmem:[#allocation2 + $0x58] sm:$0xff]  ;;  %v8321_v48 = vmul.f32 %v8257_v5, %v8257_v5  ;;  %v8322_v24 = vmul.f32 %v8258_v53, %v8258_v53  ;;  %v8323_v32 = vmul.f32 %v8259_v54, %v8259_v54  ;;  %v8249_v36 = vld [vmem:[#allocation2] sm:$0xff]  ;;  %v8250_v0 = vld [vmem:[#allocation2 + $0x8] sm:$0xff] }
 0x9b9   : > { %v8324_v22 = vmul.f32 %v8260_v35, %v8260_v35  ;;  %v8251_v11 = vld [vmem:[#allocation2 + $0x10] sm:$0xff]  ;;  %v8252_v13 = vld [vmem:[#allocation2 + $0x18] sm:$0xff]  ;;  %v8313_v31 = vmul.f32 %v8249_v36, %v8249_v36  ;;  %v8314_v37 = vmul.f32 %v8250_v0, %v8250_v0  ;;  %v8261_v59 = vld [vmem:[#allocation2 + $0x60] sm:$0xff] }
 0x9ba   : > { %v8390_v18 = vadd.f32 %v8322_v24, %v8321_v48  ;;  %v8315_v58 = vmul.f32 %v8251_v11, %v8251_v11  ;;  %v8316_v8 = vmul.f32 %v8252_v13, %v8252_v13  ;;  %v8262_v63 = vld [vmem:[#allocation2 + $0x68] sm:$0xff]  ;;  %v8263_v46 = vld [vmem:[#allocation2 + $0x70] sm:$0xff]  ;;  %v8264_v28 = vld [vmem:[#allocation2 + $0x78] sm:$0xff]  ;;  %v8325_v4 = vmul.f32 %v8261_v59, %v8261_v59 }
 0x9bb   : > { %v8392_v12 = vsel %vm8379_vm8, %v8324_v22, 0.0  ;;  %v8377_v20 = vadd.f32 %v8314_v37, %v8313_v31  ;;  %v8326_v10 = vmul.f32 %v8262_v63, %v8262_v63  ;;  %v8327_v17 = vmul.f32 %v8263_v46, %v8263_v46  ;;  %v8253_v30 = vld [vmem:[#allocation2 + $0x20] sm:$0xff]  ;;  %v8254_v19 = vld [vmem:[#allocation2 + $0x28] sm:$0xff]  ;;  %v8255_v41 = vld [vmem:[#allocation2 + $0x30] sm:$0xff] }
 0x9bc   : > { %v8391_v6 = vadd.f32 %v8390_v18, %v8323_v32  ;;  %v8380_v34 = vsel %vm8379_vm8, %v8316_v8, 0.0  ;;  %v8328_v27 = vmul.f32 %v8264_v28, %v8264_v28  ;;  %v8256_v21 = vld [vmem:[#allocation2 + $0x38] sm:$0xff]  ;;  %v8317_v26 = vmul.f32 %v8253_v30, %v8253_v30  ;;  %v8269_v15 = vld [vmem:[#allocation2 + $0xa0] sm:$0xff]  ;;  %v8270_v23 = vld [vmem:[#allocation2 + $0xa8] sm:$0xff] }
 0x9bd   : > { %v8378_v52 = vadd.f32 %v8377_v20, %v8315_v58  ;;  %v8396_v38 = vadd.f32 %v8326_v10, %v8325_v4  ;;  %v8318_v44 = vmul.f32 %v8254_v19, %v8254_v19  ;;  %v8319_v49 = vmul.f32 %v8255_v41, %v8255_v41  ;;  %v8271_v39 = vld [vmem:[#allocation2 + $0xb0] sm:$0xff]  ;;  %v8272_v16 = vld [vmem:[#allocation2 + $0xb8] sm:$0xff]  ;;  %v8265_v33 = vld [vmem:[#allocation2 + $0x80] sm:$0xff] }
 0x9be   : > { %v8393_v3 = vadd.f32 %v8392_v12, %v8391_v6  ;;  %v8398_v57 = vsel %vm8379_vm8, %v8328_v27, 0.0  ;;  %v8320_v56 = vmul.f32 %v8256_v21, %v8256_v21  ;;  %v8333_v2 = vmul.f32 %v8269_v15, %v8269_v15  ;;  %v8266_v51 = vld [vmem:[#allocation2 + $0x88] sm:$0xff]  ;;  %v8267_v50 = vld [vmem:[#allocation2 + $0x90] sm:$0xff]  ;;  %v8268_v61 = vld [vmem:[#allocation2 + $0x98] sm:$0xff] }
 0x9bf   : > { %v8381_v14 = vadd.f32 %v8380_v34, %v8378_v52  ;;  %v8397_v45 = vadd.f32 %v8396_v38, %v8327_v17  ;;  %v8384_v43 = vadd.f32 %v8318_v44, %v8317_v26  ;;  %v8334_v25 = vmul.f32 %v8270_v23, %v8270_v23  ;;  %v8277_v55 = vld [vmem:[#allocation2 + $0xe0] sm:$0xff]  ;;  %v8278_v62 = vld [vmem:[#allocation2 + $0xe8] sm:$0xff]  ;;  %v8279_v5 = vld [vmem:[#allocation2 + $0xf0] sm:$0xff] }
 0x9c0   : > { %8394 = vadd.xlane.f32.xlu1 %v8393_v3  ;;  %v8386_v60 = vsel %vm8379_vm8, %v8320_v56, 0.0  ;;  %v8335_v7 = vmul.f32 %v8271_v39, %v8271_v39  ;;  %v8336_v47 = vmul.f32 %v8272_v16, %v8272_v16  ;;  %v8329_v42 = vmul.f32 %v8265_v33, %v8265_v33  ;;  %v8280_v53 = vld [vmem:[#allocation2 + $0xf8] sm:$0xff]  ;;  %v8273_v54 = vld [vmem:[#allocation2 + $0xc0] sm:$0xff]  ;;  %v8274_v36 = vld [vmem:[#allocation2 + $0xc8] sm:$0xff] }
 0x9c1   : > { %8382 = vadd.xlane.f32.xlu0 %v8381_v14  ;;  %v8399_v9 = vadd.f32 %v8398_v57, %v8397_v45  ;;  %v8385_v1 = vadd.f32 %v8384_v43, %v8319_v49  ;;  %v8408_v40 = vadd.f32 %v8334_v25, %v8333_v2  ;;  %v8330_v29 = vmul.f32 %v8266_v51, %v8266_v51  ;;  %v8275_v31 = vld [vmem:[#allocation2 + $0xd0] sm:$0xff]  ;;  %v8276_v37 = vld [vmem:[#allocation2 + $0xd8] sm:$0xff]  ;;  %v8285_v59 = vld [vmem:[#allocation2 + $0x120] sm:$0xff] }
 0x9c2   : > { %v8410_v35 = vsel %vm8379_vm8, %v8336_v47, 0.0  ;;  %v8331_v48 = vmul.f32 %v8267_v50, %v8267_v50  ;;  %v8332_v24 = vmul.f32 %v8268_v61, %v8268_v61  ;;  %v8341_v32 = vmul.f32 %v8277_v55, %v8277_v55  ;;  %v8286_v46 = vld [vmem:[#allocation2 + $0x128] sm:$0xff]  ;;  %v8287_v10 = vld [vmem:[#allocation2 + $0x130] sm:$0xff]  ;;  %v8288_v17 = vld [vmem:[#allocation2 + $0x138] sm:$0xff] }
 0x9c3   : > { %v8387_v0 = vadd.f32 %v8386_v60, %v8385_v1  ;;  %v8409_v22 = vadd.f32 %v8408_v40, %v8335_v7  ;;  %v8402_v11 = vadd.f32 %v8330_v29, %v8329_v42  ;;  %v8342_v13 = vmul.f32 %v8278_v62, %v8278_v62  ;;  %v8281_v30 = vld [vmem:[#allocation2 + $0x100] sm:$0xff]  ;;  %v8282_v27 = vld [vmem:[#allocation2 + $0x108] sm:$0xff]  ;;  %v8283_v52 = vld [vmem:[#allocation2 + $0x110] sm:$0xff] }
 0x9c4   : > { %8400 = vadd.xlane.f32.xlu1 %v8399_v9  ;;  %v8404_v18 = vsel %vm8379_vm8, %v8332_v24, 0.0  ;;  %v8343_v58 = vmul.f32 %v8279_v5, %v8279_v5  ;;  %v8344_v8 = vmul.f32 %v8280_v53, %v8280_v53  ;;  %v8337_v63 = vmul.f32 %v8273_v54, %v8273_v54  ;;  %v8284_v38 = vld [vmem:[#allocation2 + $0x118] sm:$0xff]  ;;  %v8293_v44 = vld [vmem:[#allocation2 + $0x160] sm:$0xff]  ;;  %v8294_v3 = vld [vmem:[#allocation2 + $0x168] sm:$0xff] }
 0x9c5   : > { %8388 = vadd.xlane.f32.xlu0 %v8387_v0  ;;  %v8411_v28 = vadd.f32 %v8410_v35, %v8409_v22  ;;  %v8403_v4 = vadd.f32 %v8402_v11, %v8331_v48  ;;  %v8420_v12 = vadd.f32 %v8342_v13, %v8341_v32  ;;  %v8338_v20 = vmul.f32 %v8274_v36, %v8274_v36  ;;  %v8295_v14 = vld [vmem:[#allocation2 + $0x170] sm:$0xff]  ;;  %v8296_v45 = vld [vmem:[#allocation2 + $0x178] sm:$0xff]  ;;  %v8289_v43 = vld [vmem:[#allocation2 + $0x140] sm:$0xff] }
 0x9c6   : > { %v8422_v19 = vsel %vm8379_vm8, %v8344_v8, 0.0  ;;  %v8339_v41 = vmul.f32 %v8275_v31, %v8275_v31  ;;  %v8340_v6 = vmul.f32 %v8276_v37, %v8276_v37  ;;  %v8349_v34 = vmul.f32 %v8285_v59, %v8285_v59  ;;  %v8290_v60 = vld [vmem:[#allocation2 + $0x148] sm:$0xff]  ;;  %v8291_v9 = vld [vmem:[#allocation2 + $0x150] sm:$0xff]  ;;  %v8292_v1 = vld [vmem:[#allocation2 + $0x158] sm:$0xff] }
 0x9c7   : > { %v8405_v21 = vadd.f32 %v8404_v18, %v8403_v4  ;;  %v8421_v26 = vadd.f32 %v8420_v12, %v8343_v58  ;;  %v8414_v15 = vadd.f32 %v8338_v20, %v8337_v63  ;;  %v8350_v23 = vmul.f32 %v8286_v46, %v8286_v46  ;;  %v8301_v40 = vld [vmem:[#allocation2 + $0x1a0] sm:$0xff]  ;;  %v8302_v35 = vld [vmem:[#allocation2 + $0x1a8] sm:$0xff]  ;;  %v8303_v0 = vld [vmem:[#allocation2 + $0x1b0] sm:$0xff] }
 0x9c8   : > { %8412 = vadd.xlane.f32.xlu1 %v8411_v28  ;;  %v8416_v49 = vsel %vm8379_vm8, %v8340_v6, 0.0  ;;  %v8351_v39 = vmul.f32 %v8287_v10, %v8287_v10  ;;  %v8352_v16 = vmul.f32 %v8288_v17, %v8288_v17  ;;  %v8345_v33 = vmul.f32 %v8281_v30, %v8281_v30  ;;  %v8304_v22 = vld [vmem:[#allocation2 + $0x1b8] sm:$0xff]  ;;  %v8297_v11 = vld [vmem:[#allocation2 + $0x180] sm:$0xff]  ;;  %v8298_v18 = vld [vmem:[#allocation2 + $0x188] sm:$0xff] }
 0x9c9   : > { %8406 = vadd.xlane.f32.xlu0 %v8405_v21  ;;  %v8423_v57 = vadd.f32 %v8422_v19, %v8421_v26  ;;  %v8415_v56 = vadd.f32 %v8414_v15, %v8339_v41  ;;  %v8432_v2 = vadd.f32 %v8350_v23, %v8349_v34  ;;  %v8346_v51 = vmul.f32 %v8282_v27, %v8282_v27  ;;  %v8299_v28 = vld [vmem:[#allocation2 + $0x190] sm:$0xff]  ;;  %v8300_v4 = vld [vmem:[#allocation2 + $0x198] sm:$0xff]  ;;  %v8309_v12 = vld [vmem:[#allocation2 + $0x1e0] sm:$0xff] }
 0x9ca   : > { %v8434_v25 = vsel %vm8379_vm8, %v8352_v16, 0.0  ;;  %v8347_v50 = vmul.f32 %v8283_v52, %v8283_v52  ;;  %v8348_v61 = vmul.f32 %v8284_v38, %v8284_v38  ;;  %v8357_v55 = vmul.f32 %v8293_v44, %v8293_v44  ;;  %v8310_v19 = vld [vmem:[#allocation2 + $0x1e8] sm:$0xff]  ;;  %v8311_v21 = vld [vmem:[#allocation2 + $0x1f0] sm:$0xff]  ;;  %v8312_v26 = vld [vmem:[#allocation2 + $0x1f8] sm:$0xff] }
 0x9cb   : > { %v8417_v7 = vadd.f32 %v8416_v49, %v8415_v56  ;;  %v8433_v47 = vadd.f32 %v8432_v2, %v8351_v39  ;;  %v8426_v42 = vadd.f32 %v8346_v51, %v8345_v33  ;;  %v8358_v62 = vmul.f32 %v8294_v3, %v8294_v3  ;;  %v8305_v15 = vld [vmem:[#allocation2 + $0x1c0] sm:$0xff]  ;;  %v8306_v49 = vld [vmem:[#allocation2 + $0x1c8] sm:$0xff]  ;;  %v8308_v56 = vld [vmem:[#allocation2 + $0x1d8] sm:$0xff] }
 0x9cc   : > { %8424 = vadd.xlane.f32.xlu1 %v8423_v57  ;;  %v8428_v29 = vsel %vm8379_vm8, %v8348_v61, 0.0  ;;  %v8359_v5 = vmul.f32 %v8295_v14, %v8295_v14  ;;  %v8360_v53 = vmul.f32 %v8296_v45, %v8296_v45  ;;  %v8353_v54 = vmul.f32 %v8289_v43, %v8289_v43  ;;  %v8307_v57 = vld [vmem:[#allocation2 + $0x1d0] sm:$0xff]  ;;  %v8479_v2 = vld [vmem:[#allocation2 + $0x220] sm:$0xff] }
 0x9cd   : > { %8418 = vadd.xlane.f32.xlu0 %v8417_v7  ;;  %v8435_v48 = vadd.f32 %v8434_v25, %v8433_v47  ;;  %v8427_v24 = vadd.f32 %v8426_v42, %v8347_v50  ;;  %v8444_v32 = vadd.f32 %v8358_v62, %v8357_v55  ;;  %v8354_v36 = vmul.f32 %v8290_v60, %v8290_v60  ;;  %v8480_v25 = vld [vmem:[#allocation2 + $0x228] sm:$0xff]  ;;  %v8481_v7 = vld [vmem:[#allocation2 + $0x230] sm:$0xff]  ;;  %v8482_v47 = vld [vmem:[#allocation2 + $0x238] sm:$0xff] }
 0x9ce   : > { %v8446_v13 = vsel %vm8379_vm8, %v8360_v53, 0.0  ;;  %v8355_v31 = vmul.f32 %v8291_v9, %v8291_v9  ;;  %v8356_v37 = vmul.f32 %v8292_v1, %v8292_v1  ;;  %v8365_v59 = vmul.f32 %v8301_v40, %v8301_v40  ;;  %v8475_v42 = vld [vmem:[#allocation2 + $0x200] sm:$0xff] }
 0x9cf   : > { %v8429_v58 = vadd.f32 %v8428_v29, %v8427_v24  ;;  %v8445_v8 = vadd.f32 %v8444_v32, %v8359_v5  ;;  %v8438_v63 = vadd.f32 %v8354_v36, %v8353_v54  ;;  %v8366_v46 = vmul.f32 %v8302_v35, %v8302_v35  ;;  %v8476_v29 = vld [vmem:[#allocation2 + $0x208] sm:$0xff]  ;;  %v8478_v24 = vld [vmem:[#allocation2 + $0x218] sm:$0xff]  ;;  %v8487_v32 = vld [vmem:[#allocation2 + $0x260] sm:$0xff] }
 0x9d0   : > { %8436 = vadd.xlane.f32.xlu1 %v8435_v48  ;;  %v8440_v20 = vsel %vm8379_vm8, %v8356_v37, 0.0  ;;  %v8367_v10 = vmul.f32 %v8303_v0, %v8303_v0  ;;  %v8368_v17 = vmul.f32 %v8304_v22, %v8304_v22  ;;  %v8361_v30 = vmul.f32 %v8297_v11, %v8297_v11  ;;  %v8477_v48 = vld [vmem:[#allocation2 + $0x210] sm:$0xff] }
 0x9d1   : > { %8430 = vadd.xlane.f32.xlu0 %v8429_v58  ;;  %v8447_v41 = vadd.f32 %v8446_v13, %v8445_v8  ;;  %v8439_v6 = vadd.f32 %v8438_v63, %v8355_v31  ;;  %v8456_v34 = vadd.f32 %v8366_v46, %v8365_v59  ;;  %v8362_v27 = vmul.f32 %v8298_v18, %v8298_v18  ;;  %v8488_v13 = vld [vmem:[#allocation2 + $0x268] sm:$0xff]  ;;  %v8489_v58 = vld [vmem:[#allocation2 + $0x270] sm:$0xff]  ;;  %v8490_v8 = vld [vmem:[#allocation2 + $0x278] sm:$0xff] }
 0x9d2   : > { %v8458_v23 = vsel %vm8379_vm8, %v8368_v17, 0.0  ;;  %v8363_v52 = vmul.f32 %v8299_v28, %v8299_v28  ;;  %v8364_v38 = vmul.f32 %v8300_v4, %v8300_v4  ;;  %v8373_v44 = vmul.f32 %v8309_v12, %v8309_v12  ;;  %v8483_v63 = vld [vmem:[#allocation2 + $0x240] sm:$0xff] }
 0x9d3   : > { %v8441_v39 = vadd.f32 %v8440_v20, %v8439_v6  ;;  %v8457_v16 = vadd.f32 %v8456_v34, %v8367_v10  ;;  %v8450_v33 = vadd.f32 %v8362_v27, %v8361_v30  ;;  %v8374_v3 = vmul.f32 %v8310_v19, %v8310_v19  ;;  %v8484_v20 = vld [vmem:[#allocation2 + $0x248] sm:$0xff]  ;;  %v8486_v6 = vld [vmem:[#allocation2 + $0x258] sm:$0xff]  ;;  %v8495_v34 = vld [vmem:[#allocation2 + $0x2a0] sm:$0xff] }
 0x9d4   : > { %8448 = vadd.xlane.f32.xlu1 %v8447_v41  ;;  %v8452_v51 = vsel %vm8379_vm8, %v8364_v38, 0.0  ;;  %v8375_v14 = vmul.f32 %v8311_v21, %v8311_v21  ;;  %v8376_v45 = vmul.f32 %v8312_v26, %v8312_v26  ;;  %v8369_v43 = vmul.f32 %v8305_v15, %v8305_v15  ;;  %v8485_v41 = vld [vmem:[#allocation2 + $0x250] sm:$0xff] }
 0x9d5   : > { %8442 = vadd.xlane.f32.xlu0 %v8441_v39  ;;  %v8459_v50 = vadd.f32 %v8458_v23, %v8457_v16  ;;  %v8451_v61 = vadd.f32 %v8450_v33, %v8363_v52  ;;  %v8468_v55 = vadd.f32 %v8374_v3, %v8373_v44  ;;  %v8370_v60 = vmul.f32 %v8306_v49, %v8306_v49  ;;  %v8496_v23 = vld [vmem:[#allocation2 + $0x2a8] sm:$0xff]  ;;  %v8497_v39 = vld [vmem:[#allocation2 + $0x2b0] sm:$0xff]  ;;  %v8498_v16 = vld [vmem:[#allocation2 + $0x2b8] sm:$0xff] }
 0x9d6   : > { %v8470_v62 = vsel %vm8379_vm8, %v8376_v45, 0.0  ;;  %v8371_v9 = vmul.f32 %v8307_v57, %v8307_v57  ;;  %v8372_v1 = vmul.f32 %v8308_v56, %v8308_v56  ;;  %v8543_v40 = vmul.f32 %v8479_v2, %v8479_v2  ;;  %v8491_v33 = vld [vmem:[#allocation2 + $0x280] sm:$0xff] }
 0x9d7   : > { %v8453_v5 = vadd.f32 %v8452_v51, %v8451_v61  ;;  %v8469_v53 = vadd.f32 %v8468_v55, %v8375_v14  ;;  %v8462_v54 = vadd.f32 %v8370_v60, %v8369_v43  ;;  %v8544_v35 = vmul.f32 %v8480_v25, %v8480_v25  ;;  %v8492_v51 = vld [vmem:[#allocation2 + $0x288] sm:$0xff]  ;;  %v8494_v61 = vld [vmem:[#allocation2 + $0x298] sm:$0xff]  ;;  %v8503_v55 = vld [vmem:[#allocation2 + $0x2e0] sm:$0xff] }
 0x9d8   : > { %8460 = vadd.xlane.f32.xlu1 %v8459_v50  ;;  %v8464_v36 = vsel %vm8379_vm8, %v8372_v1, 0.0  ;;  %v8545_v0 = vmul.f32 %v8481_v7, %v8481_v7  ;;  %v8546_v22 = vmul.f32 %v8482_v47, %v8482_v47  ;;  %v8539_v11 = vmul.f32 %v8475_v42, %v8475_v42  ;;  %v8493_v50 = vld [vmem:[#allocation2 + $0x290] sm:$0xff] }
 0x9d9   : > { %8454 = vadd.xlane.f32.xlu0 %v8453_v5  ;;  %v8471_v31 = vadd.f32 %v8470_v62, %v8469_v53  ;;  %v8463_v37 = vadd.f32 %v8462_v54, %v8371_v9  ;;  %v8609_v59 = vadd.f32 %v8544_v35, %v8543_v40  ;;  %v8540_v18 = vmul.f32 %v8476_v29, %v8476_v29  ;;  %v8504_v62 = vld [vmem:[#allocation2 + $0x2e8] sm:$0xff]  ;;  %v8505_v5 = vld [vmem:[#allocation2 + $0x2f0] sm:$0xff]  ;;  %v8506_v53 = vld [vmem:[#allocation2 + $0x2f8] sm:$0xff] }
 0x9da   : > { %v8611_v46 = vsel %vm8379_vm8, %v8546_v22, 0.0  ;;  %v8541_v28 = vmul.f32 %v8477_v48, %v8477_v48  ;;  %v8542_v4 = vmul.f32 %v8478_v24, %v8478_v24  ;;  %v8551_v12 = vmul.f32 %v8487_v32, %v8487_v32  ;;  %v8499_v54 = vld [vmem:[#allocation2 + $0x2c0] sm:$0xff] }
 0x9db   : > { %v8465_v10 = vadd.f32 %v8464_v36, %v8463_v37  ;;  %v8610_v17 = vadd.f32 %v8609_v59, %v8545_v0  ;;  %v8603_v30 = vadd.f32 %v8540_v18, %v8539_v11  ;;  %v8552_v19 = vmul.f32 %v8488_v13, %v8488_v13  ;;  %v8500_v36 = vld [vmem:[#allocation2 + $0x2c8] sm:$0xff]  ;;  %v8502_v37 = vld [vmem:[#allocation2 + $0x2d8] sm:$0xff]  ;;  %v8511_v59 = vld [vmem:[#allocation2 + $0x320] sm:$0xff] }
 0x9dc   : > { %8472 = vadd.xlane.f32.xlu1 %v8471_v31  ;;  %v8605_v27 = vsel %vm8379_vm8, %v8542_v4, 0.0  ;;  %v8553_v21 = vmul.f32 %v8489_v58, %v8489_v58  ;;  %v8554_v26 = vmul.f32 %v8490_v8, %v8490_v8  ;;  %v8547_v15 = vmul.f32 %v8483_v63, %v8483_v63  ;;  %v8501_v31 = vld [vmem:[#allocation2 + $0x2d0] sm:$0xff] }
 0x9dd   : > { %8466 = vadd.xlane.f32.xlu0 %v8465_v10  ;;  %v8612_v52 = vadd.f32 %v8611_v46, %v8610_v17  ;;  %v8604_v38 = vadd.f32 %v8603_v30, %v8541_v28  ;;  %v8621_v44 = vadd.f32 %v8552_v19, %v8551_v12  ;;  %v8548_v49 = vmul.f32 %v8484_v20, %v8484_v20  ;;  %v8512_v46 = vld [vmem:[#allocation2 + $0x328] sm:$0xff]  ;;  %v8513_v10 = vld [vmem:[#allocation2 + $0x330] sm:$0xff]  ;;  %v8514_v17 = vld [vmem:[#allocation2 + $0x338] sm:$0xff] }
 0x9de   : > { %v8623_v3 = vsel %vm8379_vm8, %v8554_v26, 0.0  ;;  %v8549_v57 = vmul.f32 %v8485_v41, %v8485_v41  ;;  %v8550_v56 = vmul.f32 %v8486_v6, %v8486_v6  ;;  %v8559_v2 = vmul.f32 %v8495_v34, %v8495_v34  ;;  %v8507_v30 = vld [vmem:[#allocation2 + $0x300] sm:$0xff] }
 0x9df   : > { %v8606_v14 = vadd.f32 %v8605_v27, %v8604_v38  ;;  %v8622_v45 = vadd.f32 %v8621_v44, %v8553_v21  ;;  %v8615_v43 = vadd.f32 %v8548_v49, %v8547_v15  ;;  %v8560_v25 = vmul.f32 %v8496_v23, %v8496_v23  ;;  %v8508_v27 = vld [vmem:[#allocation2 + $0x308] sm:$0xff]  ;;  %v8510_v38 = vld [vmem:[#allocation2 + $0x318] sm:$0xff]  ;;  %v8519_v44 = vld [vmem:[#allocation2 + $0x360] sm:$0xff] }
 0x9e0   : > { %8613 = vadd.xlane.f32.xlu1 %v8612_v52  ;;  %v8617_v60 = vsel %vm8379_vm8, %v8550_v56, 0.0  ;;  %v8561_v7 = vmul.f32 %v8497_v39, %v8497_v39  ;;  %v8562_v47 = vmul.f32 %v8498_v16, %v8498_v16  ;;  %v8555_v42 = vmul.f32 %v8491_v33, %v8491_v33  ;;  %v8509_v52 = vld [vmem:[#allocation2 + $0x310] sm:$0xff] }
 0x9e1   : > { %8607 = vadd.xlane.f32.xlu0 %v8606_v14  ;;  %v8624_v9 = vadd.f32 %v8623_v3, %v8622_v45  ;;  %v8616_v1 = vadd.f32 %v8615_v43, %v8549_v57  ;;  %v8633_v40 = vadd.f32 %v8560_v25, %v8559_v2  ;;  %v8556_v29 = vmul.f32 %v8492_v51, %v8492_v51  ;;  %v8520_v3 = vld [vmem:[#allocation2 + $0x368] sm:$0xff]  ;;  %v8521_v14 = vld [vmem:[#allocation2 + $0x370] sm:$0xff]  ;;  %v8522_v45 = vld [vmem:[#allocation2 + $0x378] sm:$0xff] }
 0x9e2   : > { %v8635_v35 = vsel %vm8379_vm8, %v8562_v47, 0.0  ;;  %v8557_v48 = vmul.f32 %v8493_v50, %v8493_v50  ;;  %v8558_v24 = vmul.f32 %v8494_v61, %v8494_v61  ;;  %v8567_v32 = vmul.f32 %v8503_v55, %v8503_v55  ;;  %v8515_v43 = vld [vmem:[#allocation2 + $0x340] sm:$0xff] }
 0x9e3   : > { %v8618_v0 = vadd.f32 %v8617_v60, %v8616_v1  ;;  %v8634_v22 = vadd.f32 %v8633_v40, %v8561_v7  ;;  %v8627_v11 = vadd.f32 %v8556_v29, %v8555_v42  ;;  %v8568_v13 = vmul.f32 %v8504_v62, %v8504_v62  ;;  %v8516_v60 = vld [vmem:[#allocation2 + $0x348] sm:$0xff]  ;;  %v8518_v1 = vld [vmem:[#allocation2 + $0x358] sm:$0xff]  ;;  %v8527_v40 = vld [vmem:[#allocation2 + $0x3a0] sm:$0xff] }
 0x9e4   : > { %8625 = vadd.xlane.f32.xlu1 %v8624_v9  ;;  %v8629_v18 = vsel %vm8379_vm8, %v8558_v24, 0.0  ;;  %v8569_v58 = vmul.f32 %v8505_v5, %v8505_v5  ;;  %v8570_v8 = vmul.f32 %v8506_v53, %v8506_v53  ;;  %v8563_v63 = vmul.f32 %v8499_v54, %v8499_v54  ;;  %v8517_v9 = vld [vmem:[#allocation2 + $0x350] sm:$0xff] }
 0x9e5   : > { %8619 = vadd.xlane.f32.xlu0 %v8618_v0  ;;  %v8636_v28 = vadd.f32 %v8635_v35, %v8634_v22  ;;  %v8628_v4 = vadd.f32 %v8627_v11, %v8557_v48  ;;  %v8645_v12 = vadd.f32 %v8568_v13, %v8567_v32  ;;  %v8564_v20 = vmul.f32 %v8500_v36, %v8500_v36  ;;  %v8528_v35 = vld [vmem:[#allocation2 + $0x3a8] sm:$0xff]  ;;  %v8529_v0 = vld [vmem:[#allocation2 + $0x3b0] sm:$0xff]  ;;  %v8530_v22 = vld [vmem:[#allocation2 + $0x3b8] sm:$0xff] }
 0x9e6   : > { %v8647_v19 = vsel %vm8379_vm8, %v8570_v8, 0.0  ;;  %v8565_v41 = vmul.f32 %v8501_v31, %v8501_v31  ;;  %v8566_v6 = vmul.f32 %v8502_v37, %v8502_v37  ;;  %v8575_v34 = vmul.f32 %v8511_v59, %v8511_v59  ;;  %v8523_v11 = vld [vmem:[#allocation2 + $0x380] sm:$0xff] }
 0x9e7   : > { %v8630_v21 = vadd.f32 %v8629_v18, %v8628_v4  ;;  %v8646_v26 = vadd.f32 %v8645_v12, %v8569_v58  ;;  %v8639_v15 = vadd.f32 %v8564_v20, %v8563_v63  ;;  %v8576_v23 = vmul.f32 %v8512_v46, %v8512_v46  ;;  %v8524_v18 = vld [vmem:[#allocation2 + $0x388] sm:$0xff]  ;;  %v8526_v4 = vld [vmem:[#allocation2 + $0x398] sm:$0xff]  ;;  %v8535_v12 = vld [vmem:[#allocation2 + $0x3e0] sm:$0xff] }
 0x9e8   : > { %8637 = vadd.xlane.f32.xlu1 %v8636_v28  ;;  %v8641_v49 = vsel %vm8379_vm8, %v8566_v6, 0.0  ;;  %v8577_v39 = vmul.f32 %v8513_v10, %v8513_v10  ;;  %v8578_v16 = vmul.f32 %v8514_v17, %v8514_v17  ;;  %v8571_v33 = vmul.f32 %v8507_v30, %v8507_v30  ;;  %v8525_v28 = vld [vmem:[#allocation2 + $0x390] sm:$0xff] }
 0x9e9   : > { %8631 = vadd.xlane.f32.xlu0 %v8630_v21  ;;  %v8648_v57 = vadd.f32 %v8647_v19, %v8646_v26  ;;  %v8640_v56 = vadd.f32 %v8639_v15, %v8565_v41  ;;  %v8657_v2 = vadd.f32 %v8576_v23, %v8575_v34  ;;  %v8572_v51 = vmul.f32 %v8508_v27, %v8508_v27  ;;  %v8536_v19 = vld [vmem:[#allocation2 + $0x3e8] sm:$0xff]  ;;  %v8537_v21 = vld [vmem:[#allocation2 + $0x3f0] sm:$0xff]  ;;  %v8538_v26 = vld [vmem:[#allocation2 + $0x3f8] sm:$0xff] }
 0x9ea   : > { %v8659_v25 = vsel %vm8379_vm8, %v8578_v16, 0.0  ;;  %v8573_v50 = vmul.f32 %v8509_v52, %v8509_v52  ;;  %v8574_v61 = vmul.f32 %v8510_v38, %v8510_v38  ;;  %v8583_v55 = vmul.f32 %v8519_v44, %v8519_v44  ;;  %v8531_v15 = vld [vmem:[#allocation2 + $0x3c0] sm:$0xff] }
 0x9eb   : > { %v8642_v7 = vadd.f32 %v8641_v49, %v8640_v56  ;;  %v8658_v47 = vadd.f32 %v8657_v2, %v8577_v39  ;;  %v8651_v42 = vadd.f32 %v8572_v51, %v8571_v33  ;;  %v8584_v62 = vmul.f32 %v8520_v3, %v8520_v3  ;;  %v8532_v49 = vld [vmem:[#allocation2 + $0x3c8] sm:$0xff]  ;;  %v8534_v56 = vld [vmem:[#allocation2 + $0x3d8] sm:$0xff] }
 0x9ec   : > { %8649 = vadd.xlane.f32.xlu1 %v8648_v57  ;;  %v8653_v29 = vsel %vm8379_vm8, %v8574_v61, 0.0  ;;  %v8585_v5 = vmul.f32 %v8521_v14, %v8521_v14  ;;  %v8586_v53 = vmul.f32 %v8522_v45, %v8522_v45  ;;  %v8579_v54 = vmul.f32 %v8515_v43, %v8515_v43  ;;  %v8533_v57 = vld [vmem:[#allocation2 + $0x3d0] sm:$0xff] }
 0x9ed   : > { %8643 = vadd.xlane.f32.xlu0 %v8642_v7  ;;  %v8660_v48 = vadd.f32 %v8659_v25, %v8658_v47  ;;  %v8652_v24 = vadd.f32 %v8651_v42, %v8573_v50  ;;  %v8669_v32 = vadd.f32 %v8584_v62, %v8583_v55  ;;  %v8580_v36 = vmul.f32 %v8516_v60, %v8516_v60 }
 0x9ee   : > { %v8671_v13 = vsel %vm8379_vm8, %v8586_v53, 0.0  ;;  %v8581_v31 = vmul.f32 %v8517_v9, %v8517_v9  ;;  %v8582_v37 = vmul.f32 %v8518_v1, %v8518_v1  ;;  %v8591_v59 = vmul.f32 %v8527_v40, %v8527_v40 }
 0x9ef   : > { %v8654_v58 = vadd.f32 %v8653_v29, %v8652_v24  ;;  %v8670_v8 = vadd.f32 %v8669_v32, %v8585_v5  ;;  %v8663_v63 = vadd.f32 %v8580_v36, %v8579_v54  ;;  %v8592_v46 = vmul.f32 %v8528_v35, %v8528_v35 }
 0x9f0   : > { %8661 = vadd.xlane.f32.xlu1 %v8660_v48  ;;  %v8665_v20 = vsel %vm8379_vm8, %v8582_v37, 0.0  ;;  %v8593_v10 = vmul.f32 %v8529_v0, %v8529_v0  ;;  %v8594_v17 = vmul.f32 %v8530_v22, %v8530_v22  ;;  %v8587_v30 = vmul.f32 %v8523_v11, %v8523_v11 }
 0x9f1   : > { %8655 = vadd.xlane.f32.xlu0 %v8654_v58  ;;  %v8672_v41 = vadd.f32 %v8671_v13, %v8670_v8  ;;  %v8664_v6 = vadd.f32 %v8663_v63, %v8581_v31  ;;  %v8681_v34 = vadd.f32 %v8592_v46, %v8591_v59  ;;  %v8588_v27 = vmul.f32 %v8524_v18, %v8524_v18 }
 0x9f2   : > { %v8683_v23 = vsel %vm8379_vm8, %v8594_v17, 0.0  ;;  %v8589_v52 = vmul.f32 %v8525_v28, %v8525_v28  ;;  %v8590_v38 = vmul.f32 %v8526_v4, %v8526_v4  ;;  %v8599_v44 = vmul.f32 %v8535_v12, %v8535_v12  ;;  %v8748_v4 = vld [vmem:[#allocation3 + $0x8] sm:$0xff]  ;;  %v8747_v17 = vld [vmem:[#allocation3] sm:$0xff] }
 0x9f3   : > { %v8666_v39 = vadd.f32 %v8665_v20, %v8664_v6  ;;  %v8682_v16 = vadd.f32 %v8681_v34, %v8593_v10  ;;  %v8675_v33 = vadd.f32 %v8588_v27, %v8587_v30  ;;  %v8600_v3 = vmul.f32 %v8536_v19, %v8536_v19 }
 0x9f4   : > { %8673 = vadd.xlane.f32.xlu1 %v8672_v41  ;;  %v8677_v2 = vsel %vm8379_vm8, %v8590_v38, 0.0  ;;  %v8601_v51 = vmul.f32 %v8537_v21, %v8537_v21  ;;  %v8602_v14 = vmul.f32 %v8538_v26, %v8538_v26  ;;  %v8595_v45 = vmul.f32 %v8531_v15, %v8531_v15  ;;  %v8750_v26 = vld [vmem:[#allocation3 + $0x18] sm:$0xff]  ;;  %v8749_v38 = vld [vmem:[#allocation3 + $0x10] sm:$0xff] }
 0x9f5   : > { %8667 = vadd.xlane.f32.xlu0 %v8666_v39  ;;  %v8684_v43 = vadd.f32 %v8683_v23, %v8682_v16  ;;  %v8676_v25 = vadd.f32 %v8675_v33, %v8589_v52  ;;  %v8693_v50 = vadd.f32 %v8600_v3, %v8599_v44  ;;  %v8596_v61 = vmul.f32 %v8532_v49, %v8532_v49 }
 0x9f6   : > { %v8695_v55 = vsel %vm8379_vm8, %v8602_v14, 0.0  ;;  %v8597_v60 = vmul.f32 %v8533_v57, %v8533_v57  ;;  %v8598_v7 = vmul.f32 %v8534_v56, %v8534_v56  ;;  %v8752_v56 = vld [vmem:[#allocation3 + $0x28] sm:$0xff] }
 0x9f7   : > { %v8678_v47 = vadd.f32 %v8677_v2, %v8676_v25  ;;  %v8694_v42 = vadd.f32 %v8693_v50, %v8601_v51  ;;  %v8687_v62 = vadd.f32 %v8596_v61, %v8595_v45  ;;  %v8751_v45 = vld [vmem:[#allocation3 + $0x20] sm:$0xff] }
 0x9f8   : > { %8685 = vadd.xlane.f32.xlu1 %v8684_v43  ;;  %v8689_v9 = vsel %vm8379_vm8, %v8598_v7, 0.0 }
 0x9f9   : > { %8679 = vadd.xlane.f32.xlu0 %v8678_v47  ;;  %v8696_v1 = vadd.f32 %v8695_v55, %v8694_v42  ;;  %v8688_v40 = vadd.f32 %v8687_v62, %v8597_v60  ;;  %v8754_v47 = vld [vmem:[#allocation3 + $0x38] sm:$0xff] }
 0x9fb   : > { %v8690_v29 = vadd.f32 %v8689_v9, %v8688_v40 }
 0x9fc   : > { %8697 = vadd.xlane.f32.xlu1 %v8696_v1  ;;  %v8753_v1 = vld [vmem:[#allocation3 + $0x30] sm:$0xff] }
 0x9fd   : > { %8691 = vadd.xlane.f32.xlu0 %v8690_v29 }
 0xa49   : > { %v8395_v5 = vpop.xlane.xlu1 %8394 }
 0xa4a   : > { %v8383_v53 = vpop.xlane.xlu0 %8382 }
 0xa4d   : > { %v8401_v54 = vpop.xlane.xlu1 %8400 }
 0xa4e   : > { %v8389_v35 = vpop.xlane.xlu0 %8388 }
 0xa51   : > { %v8413_v48 = vpop.xlane.xlu1 %8412 }
 0xa52   : > { %v8407_v24 = vpop.xlane.xlu0 %8406 }
 0xa55   : > { %v8425_v32 = vpop.xlane.xlu1 %8424 }
 0xa56   : > { %v8419_v36 = vpop.xlane.xlu0 %8418 }
 0xa59   : > { %v8437_v0 = vpop.xlane.xlu1 %8436 }
 0xa5a   : > { %v15123_v22 = vpop.xlane.xlu0 %8430 }
 0xa5d   : > { %v15125_v11 = vpop.xlane.xlu1 %8448 }
 0xa5e   : > { %v15127_v13 = vpop.xlane.xlu0 %8442 }
 0xa61   : > { %v15129_v31 = vpop.xlane.xlu1 %8460 }
 0xa62   : > { %v15131_v37 = vpop.xlane.xlu0 %8454 }
 0xa65   : > { %v15133_v59 = vpop.xlane.xlu1 %8472 }
 0xa66   : > { %v15135_v18 = vpop.xlane.xlu0 %8466 }
 0xa69   : > { %v8614_v58 = vpop.xlane.xlu1 %8613 }
 0xa6a   : > { %v8700_v8 = vadd.f32 %v8614_v58, %v8389_v35  ;;  %v8608_v63 = vpop.xlane.xlu0 %8607  ;;  %v8755_v58 = vld [vmem:[#allocation3 + $0x40] sm:$0xff] }
 0xa6b   : > { %v8699_v46 = vadd.f32 %v8608_v63, %v8383_v53 }
 0xa6c   : > { %v8716_v28 = vadd.f32 1440.8956, %v8700_v8 }
 0xa6d   : > { %v8715_v12 = vadd.f32 1440.8956, %v8699_v46  ;;  %v8626_v20 = vpop.xlane.xlu1 %8625 }
 0xa6e   : > { %v8732_v10 = vmul.f32 -0.5, %v8716_v28  ;;  %v8702_v30 = vadd.f32 %v8626_v20, %v8401_v54  ;;  %v8620_v19 = vpop.xlane.xlu0 %8619  ;;  %v8758_v20 = vld [vmem:[#allocation3 + $0x58] sm:$0xff] }
 0xa6f   : > { %v8731_v41 = vmul.f32 -0.5, %v8715_v12  ;;  %v8701_v6 = vadd.f32 %v8620_v19, %v8395_v5 }
 0xa70   : > { %v8764_v34 = vadd.f32 %v8748_v4, %v8732_v10  ;;  %v8718_v27 = vadd.f32 1440.8956, %v8702_v30  ;;  %v8757_v30 = vld [vmem:[#allocation3 + $0x50] sm:$0xff] }
 0xa71   : > { %v8763_v21 = vadd.f32 %v8747_v17, %v8731_v41  ;;  %v8717_v15 = vadd.f32 1440.8956, %v8701_v6  ;;  %v8638_v23 = vpop.xlane.xlu1 %8637 }
 0xa72   : > { %8781 = vst.msk [vmem:[%s15226_s9 + $0x8] sm:$0xff] %vm8779_vm9, %v8764_v34  ;;  %v8734_v52 = vmul.f32 -0.5, %v8718_v27  ;;  %v8704_v44 = vadd.f32 %v8638_v23, %v8413_v48  ;;  %v8632_v49 = vpop.xlane.xlu0 %8631 }
 0xa73   : > { %8780 = vst.msk [vmem:[%s15226_s9] sm:$0xff] %vm8779_vm9, %v8763_v21  ;;  %v8733_v39 = vmul.f32 -0.5, %v8717_v15  ;;  %v8703_v16 = vadd.f32 %v8632_v49, %v8407_v24  ;;  %v8756_v24 = vld [vmem:[#allocation3 + $0x48] sm:$0xff] }
 0xa74   : > { %v8766_v33 = vadd.f32 %v8750_v26, %v8734_v52  ;;  %v8720_v3 = vadd.f32 1440.8956, %v8704_v44  ;;  %v8760_v26 = vld [vmem:[#allocation3 + $0x68] sm:$0xff]  ;;  %v8759_v52 = vld [vmem:[#allocation3 + $0x60] sm:$0xff] }
 0xa75   : > { %v8765_v57 = vadd.f32 %v8749_v38, %v8733_v39  ;;  %v8719_v2 = vadd.f32 1440.8956, %v8703_v16  ;;  %v8650_v51 = vpop.xlane.xlu1 %8649 }
 0xa76   : > { %8783 = vst.msk [vmem:[%s15226_s9 + $0x18] sm:$0xff] %vm8779_vm9, %v8766_v33  ;;  %v8736_v14 = vmul.f32 -0.5, %v8720_v3  ;;  %v8706_v43 = vadd.f32 %v8650_v51, %v8425_v32  ;;  %v8644_v25 = vpop.xlane.xlu0 %8643  ;;  %v8762_v3 = vld [vmem:[#allocation3 + $0x78] sm:$0xff] }
 0xa77   : > { %8782 = vst.msk [vmem:[%s15226_s9 + $0x10] sm:$0xff] %vm8779_vm9, %v8765_v57  ;;  %v8735_v50 = vmul.f32 -0.5, %v8719_v2  ;;  %v8705_v61 = vadd.f32 %v8644_v25, %v8419_v36 }
 0xa78   : > { %v8768_v55 = vadd.f32 %v8752_v56, %v8736_v14  ;;  %v8722_v60 = vadd.f32 1440.8956, %v8706_v43  ;;  %v8761_v56 = vld [vmem:[#allocation3 + $0x70] sm:$0xff] }
 0xa79   : > { %v8767_v7 = vadd.f32 %v8751_v45, %v8735_v50  ;;  %v8721_v42 = vadd.f32 1440.8956, %v8705_v61  ;;  %v8662_v62 = vpop.xlane.xlu1 %8661 }
 0xa7a   : > { %8785 = vst.msk [vmem:[%s15226_s9 + $0x28] sm:$0xff] %vm8779_vm9, %v8768_v55  ;;  %v8738_v9 = vmul.f32 -0.5, %v8722_v60  ;;  %v8708_v40 = vadd.f32 %v8662_v62, %v8437_v0  ;;  %v8656_v29 = vpop.xlane.xlu0 %8655 }
 0xa7b   : > { %8784 = vst.msk [vmem:[%s15226_s9 + $0x20] sm:$0xff] %vm8779_vm9, %v8767_v7  ;;  %v8737_v5 = vmul.f32 -0.5, %v8721_v42  ;;  %v8707_v53 = vadd.f32 %v8656_v29, %v15123_v22 }
 0xa7c   : > { %v8770_v54 = vadd.f32 %v8754_v47, %v8738_v9  ;;  %v8724_v35 = vadd.f32 1440.8956, %v8708_v40 }
 0xa7d   : > { %v8769_v48 = vadd.f32 %v8753_v1, %v8737_v5  ;;  %v8723_v32 = vadd.f32 1440.8956, %v8707_v53  ;;  %v8674_v36 = vpop.xlane.xlu1 %8673 }
 0xa7e   : > { %8787 = vst.msk [vmem:[%s15226_s9 + $0x38] sm:$0xff] %vm8779_vm9, %v8770_v54  ;;  %v8740_v0 = vmul.f32 -0.5, %v8724_v35  ;;  %v8710_v8 = vadd.f32 %v8674_v36, %v15125_v11  ;;  %v8668_v63 = vpop.xlane.xlu0 %8667 }
 0xa7f   : > { %8786 = vst.msk [vmem:[%s15226_s9 + $0x30] sm:$0xff] %vm8779_vm9, %v8769_v48  ;;  %v8739_v22 = vmul.f32 -0.5, %v8723_v32  ;;  %v8709_v46 = vadd.f32 %v8668_v63, %v15127_v13 }
 0xa80   : > { %v8772_v28 = vadd.f32 %v8756_v24, %v8740_v0  ;;  %v8726_v4 = vadd.f32 1440.8956, %v8710_v8 }
 0xa81   : > { %v8771_v12 = vadd.f32 %v8755_v58, %v8739_v22  ;;  %v8725_v10 = vadd.f32 1440.8956, %v8709_v46  ;;  %v8686_v17 = vpop.xlane.xlu1 %8685 }
 0xa82   : > { %8789 = vst.msk [vmem:[%s15226_s9 + $0x48] sm:$0xff] %vm8779_vm9, %v8772_v28  ;;  %v8742_v11 = vmul.f32 -0.5, %v8726_v4  ;;  %v8712_v19 = vadd.f32 %v8686_v17, %v15129_v31  ;;  %v8680_v41 = vpop.xlane.xlu0 %8679 }
 0xa83   : > { %8788 = vst.msk [vmem:[%s15226_s9 + $0x40] sm:$0xff] %vm8779_vm9, %v8771_v12  ;;  %v8741_v13 = vmul.f32 -0.5, %v8725_v10  ;;  %v8711_v6 = vadd.f32 %v8680_v41, %v15131_v37 }
 0xa84   : > { %v8774_v34 = vadd.f32 %v8758_v20, %v8742_v11  ;;  %v8728_v27 = vadd.f32 1440.8956, %v8712_v19 }
 0xa85   : > { %v8773_v21 = vadd.f32 %v8757_v30, %v8741_v13  ;;  %v8727_v15 = vadd.f32 1440.8956, %v8711_v6  ;;  %v8698_v23 = vpop.xlane.xlu1 %8697 }
 0xa86   : > { %8791 = vst.msk [vmem:[%s15226_s9 + $0x58] sm:$0xff] %vm8779_vm9, %v8774_v34  ;;  %v8744_v31 = vmul.f32 -0.5, %v8728_v27  ;;  %v8714_v38 = vadd.f32 %v8698_v23, %v15133_v59  ;;  %v8692_v44 = vpop.xlane.xlu0 %8691 }
 0xa87   : > { %8790 = vst.msk [vmem:[%s15226_s9 + $0x50] sm:$0xff] %vm8779_vm9, %v8773_v21  ;;  %v8743_v37 = vmul.f32 -0.5, %v8727_v15  ;;  %v8713_v49 = vadd.f32 %v8692_v44, %v15135_v18 }
 0xa88   : > { %v8776_v39 = vadd.f32 %v8760_v26, %v8744_v31  ;;  %v8730_v16 = vadd.f32 1440.8956, %v8714_v38 }
 0xa89   : > { %v8775_v33 = vadd.f32 %v8759_v52, %v8743_v37  ;;  %v8729_v57 = vadd.f32 1440.8956, %v8713_v49 }
 0xa8a   : > { %8793 = vst.msk [vmem:[%s15226_s9 + $0x68] sm:$0xff] %vm8779_vm9, %v8776_v39  ;;  %v8746_v59 = vmul.f32 -0.5, %v8730_v16 }
 0xa8b   : > { %8792 = vst.msk [vmem:[%s15226_s9 + $0x60] sm:$0xff] %vm8779_vm9, %v8775_v33  ;;  %v8745_v2 = vmul.f32 -0.5, %v8729_v57 }
 0xa8c   : > { %v8778_v51 = vadd.f32 %v8762_v3, %v8746_v59 }
 0xa8d   : > { %v8777_v18 = vadd.f32 %v8761_v56, %v8745_v2 }
 0xa8e   : > { %8795 = vst.msk [vmem:[%s15226_s9 + $0x78] sm:$0xff] %vm8779_vm9, %v8778_v51 }
 0xa8f   : > { %8794 = vst.msk [vmem:[%s15226_s9 + $0x70] sm:$0xff] %vm8779_vm9, %v8777_v18 }
 0xa90 PF: > { %s19_s11 = sadd.s32 1, %s11188_s11   ;;  %s15284_s15 = sld [smem:[#allocation4_spill]] }
 0xa91   : > { %p16_p11 = scmp.ge.s32.totalorder %s19_s11, 10   ;;  %s15285_s30 = smov %s11184_s10 }
 0xa93   :  { %18 = sbr.rel (!%p16_p11) target bundleno = 3 (0x3), region = 129 }
 0xa96   : > { %s15286_s10 = smov %s15284_s15 }

</bundles_post_ra>
